<compile_context>
chip_gen: v5e
topology: v5e:2x2
jax: 0.10.0
libtpu: 0.0.40
codegen_flags: <defaults>
</compile_context>

<pallas_src>
import functools
import math
from typing import NamedTuple

import jax
import jax.numpy as jnp
from jax.experimental import pallas as pl
from jax.experimental.pallas import tpu as pltpu

_BN_EPS = 1e-5


class _LayerCfg(NamedTuple):
  cin: int
  cout: int
  k: int
  pad: int
  bn: bool
  pool: bool
  act: str


def _layer_configs(channels, bottleneck):
  c = channels
  return (
      _LayerCfg(2,    c[0], 7, 3, True,  False, "relu"),       # conv1
      _LayerCfg(c[0], c[1], 7, 3, False, False, "relu"),       # conv2
      _LayerCfg(c[1], c[2], 5, 2, False, False, "relu"),       # down1.conv1
      _LayerCfg(c[2], c[2], 5, 2, False, True,  "relu"),       # down1.conv2
      _LayerCfg(c[2], c[3], 5, 2, False, False, "relu"),       # down2.conv1
      _LayerCfg(c[3], c[3], 5, 2, False, True,  "relu"),       # down2.conv2
      _LayerCfg(c[3], c[4], 5, 2, False, False, "relu"),       # down3.conv1
      _LayerCfg(c[4], c[4], 5, 2, False, True,  "relu"),       # down3.conv2
      _LayerCfg(c[4], c[5], 3, 1, False, False, "relu"),       # down4.conv1
      _LayerCfg(c[5], c[5], 3, 1, False, True,  "relu"),       # down4.conv2
      _LayerCfg(c[5], c[6], 3, 1, False, False, "relu"),       # down5.conv1
      _LayerCfg(c[6], c[6], 3, 1, False, True,  "relu"),       # down5.conv2
      _LayerCfg(c[6], c[6], 3, 1, True,  False, "relu"),       # conv3
      _LayerCfg(c[6], c[6], 3, 1, False, False, "relu"),       # conv4
      _LayerCfg(c[6], bottleneck, 4, 0, False, False, "tanh"), # bottleneck
  )


def _fused_ecg_kernel(*refs, cfgs, B, L0):
  """Single fused forward pass.

  refs = (x, sel_even, sel_odd, *layer_params, out, buf0, buf1)

  x:         (B, Cin0, L0)  network input, native NCL, in VMEM.
  sel_even:  (Lmax, Lmax//2) constant column-selection matrix, sel[i,j]=(i==2j).
  sel_odd:   same with (i == 2j+1).
  layer params (per layer): w (K, B*cout, B*cin) block-diagonal per-tap weight,
             then either bias (B*cout, 1) or gamma (cout,1), beta (cout,1).
  out:       (B, Cfin, Lfin) final output, native NCL.
  buf0/buf1: (B*Cmax, Lanes) VMEM ping-pong staging buffers, length on lanes.
  """
  n_params = sum(3 if c.bn else 2 for c in cfgs)
  x_ref, sel_e_ref, sel_o_ref = refs[0], refs[1], refs[2]
  param_refs = refs[3:3 + n_params]
  o_ref = refs[3 + n_params]
  bufs = (refs[4 + n_params], refs[5 + n_params])

  # Zero both scratch buffers ONCE. Pads are monotone non-increasing and every
  # later store starts at lane >= its layer's pad, so the leading halo stays
  # zero for the whole network; only trailing halos are re-zeroed per layer.
  bufs[0][...] = jnp.zeros_like(bufs[0])
  bufs[1][...] = jnp.zeros_like(bufs[1])

  # Stage the input: batch stacked along sublanes, length on lanes, at the
  # lane offset of layer 0's halo padding.
  pad0, cin0 = cfgs[0].pad, cfgs[0].cin
  for b in range(B):
    bufs[0][pl.ds(b * cin0, cin0), pl.ds(pad0, L0)] = x_ref[b]

  cur = 0                    # which scratch buffer holds the current input
  Lp = L0 + 2 * pad0         # padded length of the current input
  pidx = 0
  n_layers = len(cfgs)

  for li, c in enumerate(cfgs):
    K, cin, cout = c.k, c.cin, c.cout
    bcin, bcout = B * cin, B * cout
    Lout = Lp - K + 1

    w_ref = param_refs[pidx]; pidx += 1            # (K, B*cout, B*cin)
    if c.bn:
      g_ref = param_refs[pidx]; pidx += 1          # (cout, 1)
      beta_ref = param_refs[pidx]; pidx += 1       # (cout, 1)
    else:
      b_ref = param_refs[pidx]; pidx += 1          # (B*cout, 1)

    buf_in = bufs[cur]

    # Conv: K accumulated matmuls at static lane offsets. The block-diagonal
    # weight handles both batch elements in one MXU push per tap.
    acc = jnp.dot(w_ref[0], buf_in[pl.ds(0, bcin), pl.ds(0, Lout)],
                  preferred_element_type=jnp.float32)
    for k in range(1, K):
      acc = acc + jnp.dot(w_ref[k], buf_in[pl.ds(0, bcin), pl.ds(k, Lout)],
                          preferred_element_type=jnp.float32)

    if c.pool:
      # MaxPool1d(2) with NO strided accesses: select even/odd columns via two
      # constant matmuls and take the elementwise max. Bias add and ReLU are
      # monotone/per-channel, so applying them after the max is exact.
      Lo = Lout // 2
      se = sel_e_ref[pl.ds(0, Lout), pl.ds(0, Lo)]
      so = sel_o_ref[pl.ds(0, Lout), pl.ds(0, Lo)]
      acc = jnp.maximum(
          jnp.dot(acc, se, preferred_element_type=jnp.float32),
          jnp.dot(acc, so, preferred_element_type=jnp.float32))
    else:
      Lo = Lout

    if c.bn:
      # Train-mode BatchNorm over (batch, length); conv bias cancels exactly.
      n = float(B * Lo)
      s1 = jnp.sum(acc, axis=1, keepdims=True)        # (B*cout, 1)
      s2 = jnp.sum(acc * acc, axis=1, keepdims=True)  # (B*cout, 1)
      s1c = s1[0:cout]
      s2c = s2[0:cout]
      for b in range(1, B):
        s1c = s1c + s1[b * cout:(b + 1) * cout]
        s2c = s2c + s2[b * cout:(b + 1) * cout]
      mean = s1c * (1.0 / n)
      var = jnp.maximum(s2c * (1.0 / n) - mean * mean, 0.0)  # clamp cancellation
      scale = g_ref[...] * jax.lax.rsqrt(var + _BN_EPS)      # (cout, 1)
      shift = beta_ref[...] - mean * scale                   # (cout, 1)
      scale_f = jnp.concatenate([scale] * B, axis=0)         # (B*cout, 1)
      shift_f = jnp.concatenate([shift] * B, axis=0)
      acc = acc * scale_f + shift_f
    else:
      acc = acc + b_ref[...]

    if c.act == "relu":
      acc = jnp.maximum(acc, 0.0)
    else:  # "tanh" (bottleneck)
      acc = jnp.tanh(acc)

    if li == n_layers - 1:
      # Write the final output directly in (B, C, L) layout.
      for b in range(B):
        o_ref[b] = acc[b * cout:(b + 1) * cout, :]
    else:
      # Stage for the next layer at its halo offset; re-zero only the trailing
      # halo (leading halo is still zero from the one-time buffer clear).
      npad = cfgs[li + 1].pad
      buf_out = bufs[1 - cur]
      buf_out[pl.ds(0, bcout), pl.ds(npad, Lo)] = acc
      if npad:
        buf_out[pl.ds(0, bcout), pl.ds(npad + Lo, npad)] = jnp.zeros(
            (bcout, npad), jnp.float32)
      cur = 1 - cur
      Lp = Lo + 2 * npad


def init_ecg_encoder_params(key, channels, bottleneck=16):
  """Deterministic parameter init (same shapes / ranges as the PyTorch module)."""
  params = []
  for cfg in _layer_configs(channels, bottleneck):
    key, kw, kb = jax.random.split(key, 3)
    bound = 1.0 / math.sqrt(cfg.cin * cfg.k)   # PyTorch Conv1d default init
    w = jax.random.uniform(kw, (cfg.k, cfg.cin, cfg.cout), jnp.float32, -bound, bound)
    b = jax.random.uniform(kb, (cfg.cout,), jnp.float32, -bound, bound)
    params.append(dict(cfg=cfg, w=w, b=b,
                       gamma=jnp.ones((cfg.cout,), jnp.float32),
                       beta=jnp.zeros((cfg.cout,), jnp.float32)))
  return params


def ecg_encoder_forward(x_ncl, params):
  """x_ncl: (B, 2, L) exactly like the PyTorch module. Returns (B, bottleneck, L_out)."""
  cfgs = tuple(p["cfg"] for p in params)
  x = x_ncl.astype(jnp.float32)                     # native NCL, no transpose
  B, cin0, L0 = x.shape
  assert cin0 == cfgs[0].cin

  # Static shape walk: output size, scratch sizing, max pooled conv length.
  max_ch, max_lanes, max_pool_lout = 0, 0, 0
  Lcur = L0
  for c in cfgs:
    assert not (c.bn and c.pool), "fused BN+pool layer not supported"
    Lp = Lcur + 2 * c.pad
    max_lanes = max(max_lanes, Lp)
    max_ch = max(max_ch, B * max(c.cin, c.cout))
    Lout = Lp - c.k + 1
    if c.pool:
      assert Lout % 2 == 0, "MaxPool1d(2) needs an even length"
      max_pool_lout = max(max_pool_lout, Lout)
      Lcur = Lout // 2
    else:
      Lcur = Lout
  Lfin, Cfin = Lcur, cfgs[-1].cout
  buf_sub = ((max_ch + 7) // 8) * 8
  buf_lanes = ((max_lanes + 127) // 128) * 128

  # Constant even/odd column-selection matrices for the fused maxpool.
  if max_pool_lout > 0:
    rows = jnp.arange(max_pool_lout)[:, None]
    cols = jnp.arange(max_pool_lout // 2)[None, :]
    sel_even = (rows == 2 * cols).astype(jnp.float32)
    sel_odd = (rows == 2 * cols + 1).astype(jnp.float32)
  else:
    sel_even = jnp.zeros((8, 8), jnp.float32)
    sel_odd = jnp.zeros((8, 8), jnp.float32)

  # Flat parameter list in exactly the order the kernel consumes them.
  eye_b = jnp.eye(B, dtype=jnp.float32)
  flat = [x, sel_even, sel_odd]
  for p, c in zip(params, cfgs):
    wkt = jnp.transpose(p["w"], (0, 2, 1)).astype(jnp.float32)     # (K, cout, cin)
    wbd = jnp.einsum("kij,ab->kaibj", wkt, eye_b).reshape(
        c.k, B * c.cout, B * c.cin)                                # block-diag per tap
    flat.append(wbd)
    if c.bn:
      flat.append(p["gamma"].reshape(c.cout, 1).astype(jnp.float32))
      flat.append(p["beta"].reshape(c.cout, 1).astype(jnp.float32))
    else:
      flat.append(jnp.tile(p["b"].reshape(c.cout, 1).astype(jnp.float32), (B, 1)))

  vmem = pl.BlockSpec(memory_space=pltpu.MemorySpace.VMEM)
  out = pl.pallas_call(
      functools.partial(_fused_ecg_kernel, cfgs=cfgs, B=B, L0=L0),
      out_shape=jax.ShapeDtypeStruct((B, Cfin, Lfin), jnp.float32),
      in_specs=[vmem] * len(flat),
      out_specs=vmem,
      scratch_shapes=[pltpu.VMEM((buf_sub, buf_lanes), jnp.float32),
                      pltpu.VMEM((buf_sub, buf_lanes), jnp.float32)],
  )(*flat)
  return out   # already (B, C, L)


if __name__ == "__main__":
  key = jax.random.PRNGKey(0)
  k_params, k_x = jax.random.split(key)

  channels = (8, 8, 16, 16, 32, 32, 32)
  bottleneck = 16
  params = init_ecg_encoder_params(k_params, channels, bottleneck)

  B, L = 2, 256   # 5 maxpools: 256 -> 8; bottleneck conv (k=4, valid): 8 -> 5
  x = jax.random.normal(k_x, (B, 2, L), dtype=jnp.float32)

  out = jax.block_until_ready(ecg_encoder_forward(x, params))

  expected_len = (L // 32) - 3
  assert out.shape == (B, bottleneck, expected_len), out.shape
  assert bool(jnp.all(jnp.isfinite(out)))
  assert bool(jnp.all(jnp.abs(out) <= 1.0 + 1e-6))   # tanh range
  print("KERNEL_OK")
</pallas_src>

<mosaic_0001>
module attributes {stable_mosaic.version = 11 : i64} {
  func.func @_fused_ecg_kernel(%arg0: memref<2x2x256xf32, #tpu.memory_space<vmem>>, %arg1: memref<256x128xf32, #tpu.memory_space<vmem>>, %arg2: memref<256x128xf32, #tpu.memory_space<vmem>>, %arg3: memref<7x16x4xf32, #tpu.memory_space<vmem>>, %arg4: memref<8x1xf32, #tpu.memory_space<vmem>>, %arg5: memref<8x1xf32, #tpu.memory_space<vmem>>, %arg6: memref<7x16x16xf32, #tpu.memory_space<vmem>>, %arg7: memref<16x1xf32, #tpu.memory_space<vmem>>, %arg8: memref<5x32x16xf32, #tpu.memory_space<vmem>>, %arg9: memref<32x1xf32, #tpu.memory_space<vmem>>, %arg10: memref<5x32x32xf32, #tpu.memory_space<vmem>>, %arg11: memref<32x1xf32, #tpu.memory_space<vmem>>, %arg12: memref<5x32x32xf32, #tpu.memory_space<vmem>>, %arg13: memref<32x1xf32, #tpu.memory_space<vmem>>, %arg14: memref<5x32x32xf32, #tpu.memory_space<vmem>>, %arg15: memref<32x1xf32, #tpu.memory_space<vmem>>, %arg16: memref<5x64x32xf32, #tpu.memory_space<vmem>>, %arg17: memref<64x1xf32, #tpu.memory_space<vmem>>, %arg18: memref<5x64x64xf32, #tpu.memory_space<vmem>>, %arg19: memref<64x1xf32, #tpu.memory_space<vmem>>, %arg20: memref<3x64x64xf32, #tpu.memory_space<vmem>>, %arg21: memref<64x1xf32, #tpu.memory_space<vmem>>, %arg22: memref<3x64x64xf32, #tpu.memory_space<vmem>>, %arg23: memref<64x1xf32, #tpu.memory_space<vmem>>, %arg24: memref<3x64x64xf32, #tpu.memory_space<vmem>>, %arg25: memref<64x1xf32, #tpu.memory_space<vmem>>, %arg26: memref<3x64x64xf32, #tpu.memory_space<vmem>>, %arg27: memref<64x1xf32, #tpu.memory_space<vmem>>, %arg28: memref<3x64x64xf32, #tpu.memory_space<vmem>>, %arg29: memref<32x1xf32, #tpu.memory_space<vmem>>, %arg30: memref<32x1xf32, #tpu.memory_space<vmem>>, %arg31: memref<3x64x64xf32, #tpu.memory_space<vmem>>, %arg32: memref<64x1xf32, #tpu.memory_space<vmem>>, %arg33: memref<4x32x64xf32, #tpu.memory_space<vmem>>, %arg34: memref<32x1xf32, #tpu.memory_space<vmem>>, %arg35: memref<2x16x5xf32, #tpu.memory_space<vmem>>, %arg36: memref<64x384xf32, #tpu.memory_space<vmem>>, %arg37: memref<64x384xf32, #tpu.memory_space<vmem>>) attributes {dimension_semantics = [], scalar_prefetch = 0 : i64, scratch_operands = 2 : i64, tpu.core_type = #tpu.core_type<tc>} {
    %cst = arith.constant 0.000000e+00 : f32
    %0 = vector.broadcast %cst : f32 to vector<64x384xf32>
    %c0 = arith.constant 0 : index
    %c0_0 = arith.constant 0 : index
    %1 = vector.load %arg36[%c0, %c0_0] : memref<64x384xf32, #tpu.memory_space<vmem>>, vector<64x384xf32>
    tpu.vector_store %arg36[%c0, %c0_0], %0 {strides = array<i32>} : memref<64x384xf32, #tpu.memory_space<vmem>>, vector<64x384xf32>,
    %cst_1 = arith.constant 0.000000e+00 : f32
    %2 = vector.broadcast %cst_1 : f32 to vector<64x384xf32>
    %c0_2 = arith.constant 0 : index
    %c0_3 = arith.constant 0 : index
    %3 = vector.load %arg37[%c0_2, %c0_3] : memref<64x384xf32, #tpu.memory_space<vmem>>, vector<64x384xf32>
    tpu.vector_store %arg37[%c0_2, %c0_3], %2 {strides = array<i32>} : memref<64x384xf32, #tpu.memory_space<vmem>>, vector<64x384xf32>,
    %c0_4 = arith.constant 0 : index
    %c0_5 = arith.constant 0 : index
    %c0_6 = arith.constant 0 : index
    %4 = vector.load %arg0[%c0_4, %c0_5, %c0_6] : memref<2x2x256xf32, #tpu.memory_space<vmem>>, vector<1x2x256xf32>
    %5 = vector.shape_cast %4 : vector<1x2x256xf32> to vector<2x256xf32>
    %c0_7 = arith.constant 0 : index
    %c3 = arith.constant 3 : index
    %6 = vector.load %arg36[%c0_7, %c3] : memref<64x384xf32, #tpu.memory_space<vmem>>, vector<2x256xf32>
    tpu.vector_store %arg36[%c0_7, %c3], %5 {strides = array<i32>} : memref<64x384xf32, #tpu.memory_space<vmem>>, vector<2x256xf32>,
    %c1 = arith.constant 1 : index
    %c0_8 = arith.constant 0 : index
    %c0_9 = arith.constant 0 : index
    %7 = vector.load %arg0[%c1, %c0_8, %c0_9] : memref<2x2x256xf32, #tpu.memory_space<vmem>>, vector<1x2x256xf32>
    %8 = vector.shape_cast %7 : vector<1x2x256xf32> to vector<2x256xf32>
    %c2 = arith.constant 2 : index
    %c3_10 = arith.constant 3 : index
    %9 = vector.load %arg36[%c2, %c3_10] : memref<64x384xf32, #tpu.memory_space<vmem>>, vector<2x256xf32>
    tpu.vector_store %arg36[%c2, %c3_10], %8 {strides = array<i32>} : memref<64x384xf32, #tpu.memory_space<vmem>>, vector<2x256xf32>,
    %c0_11 = arith.constant 0 : index
    %c0_12 = arith.constant 0 : index
    %c0_13 = arith.constant 0 : index
    %10 = vector.load %arg3[%c0_11, %c0_12, %c0_13] : memref<7x16x4xf32, #tpu.memory_space<vmem>>, vector<1x16x4xf32>
    %11 = vector.shape_cast %10 : vector<1x16x4xf32> to vector<16x4xf32>
    %c0_14 = arith.constant 0 : index
    %c0_15 = arith.constant 0 : index
    %12 = vector.load %arg36[%c0_14, %c0_15] : memref<64x384xf32, #tpu.memory_space<vmem>>, vector<4x256xf32>
    %cst_16 = arith.constant dense<0.000000e+00> : vector<16x256xf32>
    %13 = tpu.matmul %11, %12, %cst_16 {dimension_numbers = #tpu.dot_dimension_numbers<[1], [0], [0], [1], [0, 0, 1, 1], [], []>} : vector<16x4xf32>, vector<4x256xf32>, vector<16x256xf32> -> vector<16x256xf32>
    %c1_17 = arith.constant 1 : index
    %c0_18 = arith.constant 0 : index
    %c0_19 = arith.constant 0 : index
    %14 = vector.load %arg3[%c1_17, %c0_18, %c0_19] : memref<7x16x4xf32, #tpu.memory_space<vmem>>, vector<1x16x4xf32>
    %15 = vector.shape_cast %14 : vector<1x16x4xf32> to vector<16x4xf32>
    %c0_20 = arith.constant 0 : index
    %c1_21 = arith.constant 1 : index
    %16 = vector.load %arg36[%c0_20, %c1_21] : memref<64x384xf32, #tpu.memory_space<vmem>>, vector<4x256xf32>
    %cst_22 = arith.constant dense<0.000000e+00> : vector<16x256xf32>
    %17 = tpu.matmul %15, %16, %cst_22 {dimension_numbers = #tpu.dot_dimension_numbers<[1], [0], [0], [1], [0, 0, 1, 1], [], []>} : vector<16x4xf32>, vector<4x256xf32>, vector<16x256xf32> -> vector<16x256xf32>
    %18 = arith.addf %13, %17 : vector<16x256xf32>
    %c2_23 = arith.constant 2 : index
    %c0_24 = arith.constant 0 : index
    %c0_25 = arith.constant 0 : index
    %19 = vector.load %arg3[%c2_23, %c0_24, %c0_25] : memref<7x16x4xf32, #tpu.memory_space<vmem>>, vector<1x16x4xf32>
    %20 = vector.shape_cast %19 : vector<1x16x4xf32> to vector<16x4xf32>
    %c0_26 = arith.constant 0 : index
    %c2_27 = arith.constant 2 : index
    %21 = vector.load %arg36[%c0_26, %c2_27] : memref<64x384xf32, #tpu.memory_space<vmem>>, vector<4x256xf32>
    %cst_28 = arith.constant dense<0.000000e+00> : vector<16x256xf32>
    %22 = tpu.matmul %20, %21, %cst_28 {dimension_numbers = #tpu.dot_dimension_numbers<[1], [0], [0], [1], [0, 0, 1, 1], [], []>} : vector<16x4xf32>, vector<4x256xf32>, vector<16x256xf32> -> vector<16x256xf32>
    %23 = arith.addf %18, %22 : vector<16x256xf32>
    %c3_29 = arith.constant 3 : index
    %c0_30 = arith.constant 0 : index
    %c0_31 = arith.constant 0 : index
    %24 = vector.load %arg3[%c3_29, %c0_30, %c0_31] : memref<7x16x4xf32, #tpu.memory_space<vmem>>, vector<1x16x4xf32>
    %25 = vector.shape_cast %24 : vector<1x16x4xf32> to vector<16x4xf32>
    %c0_32 = arith.constant 0 : index
    %c3_33 = arith.constant 3 : index
    %26 = vector.load %arg36[%c0_32, %c3_33] : memref<64x384xf32, #tpu.memory_space<vmem>>, vector<4x256xf32>
    %cst_34 = arith.constant dense<0.000000e+00> : vector<16x256xf32>
    %27 = tpu.matmul %25, %26, %cst_34 {dimension_numbers = #tpu.dot_dimension_numbers<[1], [0], [0], [1], [0, 0, 1, 1], [], []>} : vector<16x4xf32>, vector<4x256xf32>, vector<16x256xf32> -> vector<16x256xf32>
    %28 = arith.addf %23, %27 : vector<16x256xf32>
    %c4 = arith.constant 4 : index
    %c0_35 = arith.constant 0 : index
    %c0_36 = arith.constant 0 : index
    %29 = vector.load %arg3[%c4, %c0_35, %c0_36] : memref<7x16x4xf32, #tpu.memory_space<vmem>>, vector<1x16x4xf32>
    %30 = vector.shape_cast %29 : vector<1x16x4xf32> to vector<16x4xf32>
    %c0_37 = arith.constant 0 : index
    %c4_38 = arith.constant 4 : index
    %31 = vector.load %arg36[%c0_37, %c4_38] : memref<64x384xf32, #tpu.memory_space<vmem>>, vector<4x256xf32>
    %cst_39 = arith.constant dense<0.000000e+00> : vector<16x256xf32>
    %32 = tpu.matmul %30, %31, %cst_39 {dimension_numbers = #tpu.dot_dimension_numbers<[1], [0], [0], [1], [0, 0, 1, 1], [], []>} : vector<16x4xf32>, vector<4x256xf32>, vector<16x256xf32> -> vector<16x256xf32>
    %33 = arith.addf %28, %32 : vector<16x256xf32>
    %c5 = arith.constant 5 : index
    %c0_40 = arith.constant 0 : index
    %c0_41 = arith.constant 0 : index
    %34 = vector.load %arg3[%c5, %c0_40, %c0_41] : memref<7x16x4xf32, #tpu.memory_space<vmem>>, vector<1x16x4xf32>
    %35 = vector.shape_cast %34 : vector<1x16x4xf32> to vector<16x4xf32>
    %c0_42 = arith.constant 0 : index
    %c5_43 = arith.constant 5 : index
    %36 = vector.load %arg36[%c0_42, %c5_43] : memref<64x384xf32, #tpu.memory_space<vmem>>, vector<4x256xf32>
    %cst_44 = arith.constant dense<0.000000e+00> : vector<16x256xf32>
    %37 = tpu.matmul %35, %36, %cst_44 {dimension_numbers = #tpu.dot_dimension_numbers<[1], [0], [0], [1], [0, 0, 1, 1], [], []>} : vector<16x4xf32>, vector<4x256xf32>, vector<16x256xf32> -> vector<16x256xf32>
    %38 = arith.addf %33, %37 : vector<16x256xf32>
    %c6 = arith.constant 6 : index
    %c0_45 = arith.constant 0 : index
    %c0_46 = arith.constant 0 : index
    %39 = vector.load %arg3[%c6, %c0_45, %c0_46] : memref<7x16x4xf32, #tpu.memory_space<vmem>>, vector<1x16x4xf32>
    %40 = vector.shape_cast %39 : vector<1x16x4xf32> to vector<16x4xf32>
    %c0_47 = arith.constant 0 : index
    %c6_48 = arith.constant 6 : index
    %41 = vector.load %arg36[%c0_47, %c6_48] : memref<64x384xf32, #tpu.memory_space<vmem>>, vector<4x256xf32>
    %cst_49 = arith.constant dense<0.000000e+00> : vector<16x256xf32>
    %42 = tpu.matmul %40, %41, %cst_49 {dimension_numbers = #tpu.dot_dimension_numbers<[1], [0], [0], [1], [0, 0, 1, 1], [], []>} : vector<16x4xf32>, vector<4x256xf32>, vector<16x256xf32> -> vector<16x256xf32>
    %43 = arith.addf %38, %42 : vector<16x256xf32>
    %cst_50 = arith.constant dense<0.000000e+00> : vector<16xf32>
    %44 = vector.multi_reduction <add>, %43, %cst_50 [1] : vector<16x256xf32> to vector<16xf32>
    %45 = vector.shape_cast %44 : vector<16xf32> to vector<16x1xf32>
    %46 = arith.mulf %43, %43 : vector<16x256xf32>
    %cst_51 = arith.constant dense<0.000000e+00> : vector<16xf32>
    %47 = vector.multi_reduction <add>, %46, %cst_51 [1] : vector<16x256xf32> to vector<16xf32>
    %48 = vector.shape_cast %47 : vector<16xf32> to vector<16x1xf32>
    %49 = vector.extract_strided_slice %45 {offsets = [0, 0], sizes = [8, 1], strides = [1, 1]} : vector<16x1xf32> to vector<8x1xf32>
    %50 = vector.extract_strided_slice %48 {offsets = [0, 0], sizes = [8, 1], strides = [1, 1]} : vector<16x1xf32> to vector<8x1xf32>
    %51 = vector.extract_strided_slice %45 {offsets = [8, 0], sizes = [8, 1], strides = [1, 1]} : vector<16x1xf32> to vector<8x1xf32>
    %52 = arith.addf %49, %51 : vector<8x1xf32>
    %53 = vector.extract_strided_slice %48 {offsets = [8, 0], sizes = [8, 1], strides = [1, 1]} : vector<16x1xf32> to vector<8x1xf32>
    %54 = arith.addf %50, %53 : vector<8x1xf32>
    %cst_52 = arith.constant 0.001953125 : f32
    %55 = vector.broadcast %cst_52 : f32 to vector<8x1xf32>
    %56 = arith.mulf %52, %55 : vector<8x1xf32>
    %cst_53 = arith.constant 0.001953125 : f32
    %57 = vector.broadcast %cst_53 : f32 to vector<8x1xf32>
    %58 = arith.mulf %54, %57 : vector<8x1xf32>
    %59 = arith.mulf %56, %56 : vector<8x1xf32>
    %60 = arith.subf %58, %59 : vector<8x1xf32>
    %cst_54 = arith.constant 0.000000e+00 : f32
    %61 = vector.broadcast %cst_54 : f32 to vector<8x1xf32>
    %62 = arith.maximumf %60, %61 : vector<8x1xf32>
    %c0_55 = arith.constant 0 : index
    %c0_56 = arith.constant 0 : index
    %63 = vector.load %arg4[%c0_55, %c0_56] : memref<8x1xf32, #tpu.memory_space<vmem>>, vector<8x1xf32>
    %cst_57 = arith.constant 9.99999974E-6 : f32
    %64 = vector.broadcast %cst_57 : f32 to vector<8x1xf32>
    %65 = arith.addf %62, %64 : vector<8x1xf32>
    %66 = math.rsqrt %65 : vector<8x1xf32>
    %67 = arith.mulf %63, %66 : vector<8x1xf32>
    %c0_58 = arith.constant 0 : index
    %c0_59 = arith.constant 0 : index
    %68 = vector.load %arg5[%c0_58, %c0_59] : memref<8x1xf32, #tpu.memory_space<vmem>>, vector<8x1xf32>
    %69 = arith.mulf %56, %67 : vector<8x1xf32>
    %70 = arith.subf %68, %69 : vector<8x1xf32>
    %71 = tpu.concatenate %67, %67 in 0 : vector<8x1xf32>, vector<8x1xf32> -> vector<16x1xf32>
    %72 = tpu.concatenate %70, %70 in 0 : vector<8x1xf32>, vector<8x1xf32> -> vector<16x1xf32>
    %73 = vector.broadcast %71 : vector<16x1xf32> to vector<16x256xf32>
    %74 = arith.mulf %43, %73 : vector<16x256xf32>
    %75 = vector.broadcast %72 : vector<16x1xf32> to vector<16x256xf32>
    %76 = arith.addf %74, %75 : vector<16x256xf32>
    %cst_60 = arith.constant 0.000000e+00 : f32
    %77 = vector.broadcast %cst_60 : f32 to vector<16x256xf32>
    %78 = arith.maximumf %76, %77 : vector<16x256xf32>
    %c0_61 = arith.constant 0 : index
    %c3_62 = arith.constant 3 : index
    %79 = vector.load %arg37[%c0_61, %c3_62] : memref<64x384xf32, #tpu.memory_space<vmem>>, vector<16x256xf32>
    tpu.vector_store %arg37[%c0_61, %c3_62], %78 {strides = array<i32>} : memref<64x384xf32, #tpu.memory_space<vmem>>, vector<16x256xf32>,
    %cst_63 = arith.constant 0.000000e+00 : f32
    %80 = vector.broadcast %cst_63 : f32 to vector<16x3xf32>
    %c0_64 = arith.constant 0 : index
    %c259 = arith.constant 259 : index
    %81 = vector.load %arg37[%c0_64, %c259] : memref<64x384xf32, #tpu.memory_space<vmem>>, vector<16x3xf32>
    tpu.vector_store %arg37[%c0_64, %c259], %80 {strides = array<i32>} : memref<64x384xf32, #tpu.memory_space<vmem>>, vector<16x3xf32>,
    %c0_65 = arith.constant 0 : index
    %c0_66 = arith.constant 0 : index
    %c0_67 = arith.constant 0 : index
    %82 = vector.load %arg6[%c0_65, %c0_66, %c0_67] : memref<7x16x16xf32, #tpu.memory_space<vmem>>, vector<1x16x16xf32>
    %83 = vector.shape_cast %82 : vector<1x16x16xf32> to vector<16x16xf32>
    %c0_68 = arith.constant 0 : index
    %c0_69 = arith.constant 0 : index
    %84 = vector.load %arg37[%c0_68, %c0_69] : memref<64x384xf32, #tpu.memory_space<vmem>>, vector<16x256xf32>
    %cst_70 = arith.constant dense<0.000000e+00> : vector<16x256xf32>
    %85 = tpu.matmul %83, %84, %cst_70 {dimension_numbers = #tpu.dot_dimension_numbers<[1], [0], [0], [1], [0, 0, 1, 1], [], []>} : vector<16x16xf32>, vector<16x256xf32>, vector<16x256xf32> -> vector<16x256xf32>
    %c1_71 = arith.constant 1 : index
    %c0_72 = arith.constant 0 : index
    %c0_73 = arith.constant 0 : index
    %86 = vector.load %arg6[%c1_71, %c0_72, %c0_73] : memref<7x16x16xf32, #tpu.memory_space<vmem>>, vector<1x16x16xf32>
    %87 = vector.shape_cast %86 : vector<1x16x16xf32> to vector<16x16xf32>
    %c0_74 = arith.constant 0 : index
    %c1_75 = arith.constant 1 : index
    %88 = vector.load %arg37[%c0_74, %c1_75] : memref<64x384xf32, #tpu.memory_space<vmem>>, vector<16x256xf32>
    %cst_76 = arith.constant dense<0.000000e+00> : vector<16x256xf32>
    %89 = tpu.matmul %87, %88, %cst_76 {dimension_numbers = #tpu.dot_dimension_numbers<[1], [0], [0], [1], [0, 0, 1, 1], [], []>} : vector<16x16xf32>, vector<16x256xf32>, vector<16x256xf32> -> vector<16x256xf32>
    %90 = arith.addf %85, %89 : vector<16x256xf32>
    %c2_77 = arith.constant 2 : index
    %c0_78 = arith.constant 0 : index
    %c0_79 = arith.constant 0 : index
    %91 = vector.load %arg6[%c2_77, %c0_78, %c0_79] : memref<7x16x16xf32, #tpu.memory_space<vmem>>, vector<1x16x16xf32>
    %92 = vector.shape_cast %91 : vector<1x16x16xf32> to vector<16x16xf32>
    %c0_80 = arith.constant 0 : index
    %c2_81 = arith.constant 2 : index
    %93 = vector.load %arg37[%c0_80, %c2_81] : memref<64x384xf32, #tpu.memory_space<vmem>>, vector<16x256xf32>
    %cst_82 = arith.constant dense<0.000000e+00> : vector<16x256xf32>
    %94 = tpu.matmul %92, %93, %cst_82 {dimension_numbers = #tpu.dot_dimension_numbers<[1], [0], [0], [1], [0, 0, 1, 1], [], []>} : vector<16x16xf32>, vector<16x256xf32>, vector<16x256xf32> -> vector<16x256xf32>
    %95 = arith.addf %90, %94 : vector<16x256xf32>
    %c3_83 = arith.constant 3 : index
    %c0_84 = arith.constant 0 : index
    %c0_85 = arith.constant 0 : index
    %96 = vector.load %arg6[%c3_83, %c0_84, %c0_85] : memref<7x16x16xf32, #tpu.memory_space<vmem>>, vector<1x16x16xf32>
    %97 = vector.shape_cast %96 : vector<1x16x16xf32> to vector<16x16xf32>
    %c0_86 = arith.constant 0 : index
    %c3_87 = arith.constant 3 : index
    %98 = vector.load %arg37[%c0_86, %c3_87] : memref<64x384xf32, #tpu.memory_space<vmem>>, vector<16x256xf32>
    %cst_88 = arith.constant dense<0.000000e+00> : vector<16x256xf32>
    %99 = tpu.matmul %97, %98, %cst_88 {dimension_numbers = #tpu.dot_dimension_numbers<[1], [0], [0], [1], [0, 0, 1, 1], [], []>} : vector<16x16xf32>, vector<16x256xf32>, vector<16x256xf32> -> vector<16x256xf32>
    %100 = arith.addf %95, %99 : vector<16x256xf32>
    %c4_89 = arith.constant 4 : index
    %c0_90 = arith.constant 0 : index
    %c0_91 = arith.constant 0 : index
    %101 = vector.load %arg6[%c4_89, %c0_90, %c0_91] : memref<7x16x16xf32, #tpu.memory_space<vmem>>, vector<1x16x16xf32>
    %102 = vector.shape_cast %101 : vector<1x16x16xf32> to vector<16x16xf32>
    %c0_92 = arith.constant 0 : index
    %c4_93 = arith.constant 4 : index
    %103 = vector.load %arg37[%c0_92, %c4_93] : memref<64x384xf32, #tpu.memory_space<vmem>>, vector<16x256xf32>
    %cst_94 = arith.constant dense<0.000000e+00> : vector<16x256xf32>
    %104 = tpu.matmul %102, %103, %cst_94 {dimension_numbers = #tpu.dot_dimension_numbers<[1], [0], [0], [1], [0, 0, 1, 1], [], []>} : vector<16x16xf32>, vector<16x256xf32>, vector<16x256xf32> -> vector<16x256xf32>
    %105 = arith.addf %100, %104 : vector<16x256xf32>
    %c5_95 = arith.constant 5 : index
    %c0_96 = arith.constant 0 : index
    %c0_97 = arith.constant 0 : index
    %106 = vector.load %arg6[%c5_95, %c0_96, %c0_97] : memref<7x16x16xf32, #tpu.memory_space<vmem>>, vector<1x16x16xf32>
    %107 = vector.shape_cast %106 : vector<1x16x16xf32> to vector<16x16xf32>
    %c0_98 = arith.constant 0 : index
    %c5_99 = arith.constant 5 : index
    %108 = vector.load %arg37[%c0_98, %c5_99] : memref<64x384xf32, #tpu.memory_space<vmem>>, vector<16x256xf32>
    %cst_100 = arith.constant dense<0.000000e+00> : vector<16x256xf32>
    %109 = tpu.matmul %107, %108, %cst_100 {dimension_numbers = #tpu.dot_dimension_numbers<[1], [0], [0], [1], [0, 0, 1, 1], [], []>} : vector<16x16xf32>, vector<16x256xf32>, vector<16x256xf32> -> vector<16x256xf32>
    %110 = arith.addf %105, %109 : vector<16x256xf32>
    %c6_101 = arith.constant 6 : index
    %c0_102 = arith.constant 0 : index
    %c0_103 = arith.constant 0 : index
    %111 = vector.load %arg6[%c6_101, %c0_102, %c0_103] : memref<7x16x16xf32, #tpu.memory_space<vmem>>, vector<1x16x16xf32>
    %112 = vector.shape_cast %111 : vector<1x16x16xf32> to vector<16x16xf32>
    %c0_104 = arith.constant 0 : index
    %c6_105 = arith.constant 6 : index
    %113 = vector.load %arg37[%c0_104, %c6_105] : memref<64x384xf32, #tpu.memory_space<vmem>>, vector<16x256xf32>
    %cst_106 = arith.constant dense<0.000000e+00> : vector<16x256xf32>
    %114 = tpu.matmul %112, %113, %cst_106 {dimension_numbers = #tpu.dot_dimension_numbers<[1], [0], [0], [1], [0, 0, 1, 1], [], []>} : vector<16x16xf32>, vector<16x256xf32>, vector<16x256xf32> -> vector<16x256xf32>
    %115 = arith.addf %110, %114 : vector<16x256xf32>
    %c0_107 = arith.constant 0 : index
    %c0_108 = arith.constant 0 : index
    %116 = vector.load %arg7[%c0_107, %c0_108] : memref<16x1xf32, #tpu.memory_space<vmem>>, vector<16x1xf32>
    %117 = vector.broadcast %116 : vector<16x1xf32> to vector<16x256xf32>
    %118 = arith.addf %115, %117 : vector<16x256xf32>
    %cst_109 = arith.constant 0.000000e+00 : f32
    %119 = vector.broadcast %cst_109 : f32 to vector<16x256xf32>
    %120 = arith.maximumf %118, %119 : vector<16x256xf32>
    %c0_110 = arith.constant 0 : index
    %c2_111 = arith.constant 2 : index
    %121 = vector.load %arg36[%c0_110, %c2_111] : memref<64x384xf32, #tpu.memory_space<vmem>>, vector<16x256xf32>
    tpu.vector_store %arg36[%c0_110, %c2_111], %120 {strides = array<i32>} : memref<64x384xf32, #tpu.memory_space<vmem>>, vector<16x256xf32>,
    %cst_112 = arith.constant 0.000000e+00 : f32
    %122 = vector.broadcast %cst_112 : f32 to vector<16x2xf32>
    %c0_113 = arith.constant 0 : index
    %c258 = arith.constant 258 : index
    %123 = vector.load %arg36[%c0_113, %c258] : memref<64x384xf32, #tpu.memory_space<vmem>>, vector<16x2xf32>
    tpu.vector_store %arg36[%c0_113, %c258], %122 {strides = array<i32>} : memref<64x384xf32, #tpu.memory_space<vmem>>, vector<16x2xf32>,
    %c0_114 = arith.constant 0 : index
    %c0_115 = arith.constant 0 : index
    %c0_116 = arith.constant 0 : index
    %124 = vector.load %arg8[%c0_114, %c0_115, %c0_116] : memref<5x32x16xf32, #tpu.memory_space<vmem>>, vector<1x32x16xf32>
    %125 = vector.shape_cast %124 : vector<1x32x16xf32> to vector<32x16xf32>
    %c0_117 = arith.constant 0 : index
    %c0_118 = arith.constant 0 : index
    %126 = vector.load %arg36[%c0_117, %c0_118] : memref<64x384xf32, #tpu.memory_space<vmem>>, vector<16x256xf32>
    %cst_119 = arith.constant dense<0.000000e+00> : vector<32x256xf32>
    %127 = tpu.matmul %125, %126, %cst_119 {dimension_numbers = #tpu.dot_dimension_numbers<[1], [0], [0], [1], [0, 0, 1, 1], [], []>} : vector<32x16xf32>, vector<16x256xf32>, vector<32x256xf32> -> vector<32x256xf32>
    %c1_120 = arith.constant 1 : index
    %c0_121 = arith.constant 0 : index
    %c0_122 = arith.constant 0 : index
    %128 = vector.load %arg8[%c1_120, %c0_121, %c0_122] : memref<5x32x16xf32, #tpu.memory_space<vmem>>, vector<1x32x16xf32>
    %129 = vector.shape_cast %128 : vector<1x32x16xf32> to vector<32x16xf32>
    %c0_123 = arith.constant 0 : index
    %c1_124 = arith.constant 1 : index
    %130 = vector.load %arg36[%c0_123, %c1_124] : memref<64x384xf32, #tpu.memory_space<vmem>>, vector<16x256xf32>
    %cst_125 = arith.constant dense<0.000000e+00> : vector<32x256xf32>
    %131 = tpu.matmul %129, %130, %cst_125 {dimension_numbers = #tpu.dot_dimension_numbers<[1], [0], [0], [1], [0, 0, 1, 1], [], []>} : vector<32x16xf32>, vector<16x256xf32>, vector<32x256xf32> -> vector<32x256xf32>
    %132 = arith.addf %127, %131 : vector<32x256xf32>
    %c2_126 = arith.constant 2 : index
    %c0_127 = arith.constant 0 : index
    %c0_128 = arith.constant 0 : index
    %133 = vector.load %arg8[%c2_126, %c0_127, %c0_128] : memref<5x32x16xf32, #tpu.memory_space<vmem>>, vector<1x32x16xf32>
    %134 = vector.shape_cast %133 : vector<1x32x16xf32> to vector<32x16xf32>
    %c0_129 = arith.constant 0 : index
    %c2_130 = arith.constant 2 : index
    %135 = vector.load %arg36[%c0_129, %c2_130] : memref<64x384xf32, #tpu.memory_space<vmem>>, vector<16x256xf32>
    %cst_131 = arith.constant dense<0.000000e+00> : vector<32x256xf32>
    %136 = tpu.matmul %134, %135, %cst_131 {dimension_numbers = #tpu.dot_dimension_numbers<[1], [0], [0], [1], [0, 0, 1, 1], [], []>} : vector<32x16xf32>, vector<16x256xf32>, vector<32x256xf32> -> vector<32x256xf32>
    %137 = arith.addf %132, %136 : vector<32x256xf32>
    %c3_132 = arith.constant 3 : index
    %c0_133 = arith.constant 0 : index
    %c0_134 = arith.constant 0 : index
    %138 = vector.load %arg8[%c3_132, %c0_133, %c0_134] : memref<5x32x16xf32, #tpu.memory_space<vmem>>, vector<1x32x16xf32>
    %139 = vector.shape_cast %138 : vector<1x32x16xf32> to vector<32x16xf32>
    %c0_135 = arith.constant 0 : index
    %c3_136 = arith.constant 3 : index
    %140 = vector.load %arg36[%c0_135, %c3_136] : memref<64x384xf32, #tpu.memory_space<vmem>>, vector<16x256xf32>
    %cst_137 = arith.constant dense<0.000000e+00> : vector<32x256xf32>
    %141 = tpu.matmul %139, %140, %cst_137 {dimension_numbers = #tpu.dot_dimension_numbers<[1], [0], [0], [1], [0, 0, 1, 1], [], []>} : vector<32x16xf32>, vector<16x256xf32>, vector<32x256xf32> -> vector<32x256xf32>
    %142 = arith.addf %137, %141 : vector<32x256xf32>
    %c4_138 = arith.constant 4 : index
    %c0_139 = arith.constant 0 : index
    %c0_140 = arith.constant 0 : index
    %143 = vector.load %arg8[%c4_138, %c0_139, %c0_140] : memref<5x32x16xf32, #tpu.memory_space<vmem>>, vector<1x32x16xf32>
    %144 = vector.shape_cast %143 : vector<1x32x16xf32> to vector<32x16xf32>
    %c0_141 = arith.constant 0 : index
    %c4_142 = arith.constant 4 : index
    %145 = vector.load %arg36[%c0_141, %c4_142] : memref<64x384xf32, #tpu.memory_space<vmem>>, vector<16x256xf32>
    %cst_143 = arith.constant dense<0.000000e+00> : vector<32x256xf32>
    %146 = tpu.matmul %144, %145, %cst_143 {dimension_numbers = #tpu.dot_dimension_numbers<[1], [0], [0], [1], [0, 0, 1, 1], [], []>} : vector<32x16xf32>, vector<16x256xf32>, vector<32x256xf32> -> vector<32x256xf32>
    %147 = arith.addf %142, %146 : vector<32x256xf32>
    %c0_144 = arith.constant 0 : index
    %c0_145 = arith.constant 0 : index
    %148 = vector.load %arg9[%c0_144, %c0_145] : memref<32x1xf32, #tpu.memory_space<vmem>>, vector<32x1xf32>
    %149 = vector.broadcast %148 : vector<32x1xf32> to vector<32x256xf32>
    %150 = arith.addf %147, %149 : vector<32x256xf32>
    %cst_146 = arith.constant 0.000000e+00 : f32
    %151 = vector.broadcast %cst_146 : f32 to vector<32x256xf32>
    %152 = arith.maximumf %150, %151 : vector<32x256xf32>
    %c0_147 = arith.constant 0 : index
    %c2_148 = arith.constant 2 : index
    %153 = vector.load %arg37[%c0_147, %c2_148] : memref<64x384xf32, #tpu.memory_space<vmem>>, vector<32x256xf32>
    tpu.vector_store %arg37[%c0_147, %c2_148], %152 {strides = array<i32>} : memref<64x384xf32, #tpu.memory_space<vmem>>, vector<32x256xf32>,
    %cst_149 = arith.constant 0.000000e+00 : f32
    %154 = vector.broadcast %cst_149 : f32 to vector<32x2xf32>
    %c0_150 = arith.constant 0 : index
    %c258_151 = arith.constant 258 : index
    %155 = vector.load %arg37[%c0_150, %c258_151] : memref<64x384xf32, #tpu.memory_space<vmem>>, vector<32x2xf32>
    tpu.vector_store %arg37[%c0_150, %c258_151], %154 {strides = array<i32>} : memref<64x384xf32, #tpu.memory_space<vmem>>, vector<32x2xf32>,
    %c0_152 = arith.constant 0 : index
    %c0_153 = arith.constant 0 : index
    %c0_154 = arith.constant 0 : index
    %156 = vector.load %arg10[%c0_152, %c0_153, %c0_154] : memref<5x32x32xf32, #tpu.memory_space<vmem>>, vector<1x32x32xf32>
    %157 = vector.shape_cast %156 : vector<1x32x32xf32> to vector<32x32xf32>
    %c0_155 = arith.constant 0 : index
    %c0_156 = arith.constant 0 : index
    %158 = vector.load %arg37[%c0_155, %c0_156] : memref<64x384xf32, #tpu.memory_space<vmem>>, vector<32x256xf32>
    %cst_157 = arith.constant dense<0.000000e+00> : vector<32x256xf32>
    %159 = tpu.matmul %157, %158, %cst_157 {dimension_numbers = #tpu.dot_dimension_numbers<[1], [0], [0], [1], [0, 0, 1, 1], [], []>} : vector<32x32xf32>, vector<32x256xf32>, vector<32x256xf32> -> vector<32x256xf32>
    %c1_158 = arith.constant 1 : index
    %c0_159 = arith.constant 0 : index
    %c0_160 = arith.constant 0 : index
    %160 = vector.load %arg10[%c1_158, %c0_159, %c0_160] : memref<5x32x32xf32, #tpu.memory_space<vmem>>, vector<1x32x32xf32>
    %161 = vector.shape_cast %160 : vector<1x32x32xf32> to vector<32x32xf32>
    %c0_161 = arith.constant 0 : index
    %c1_162 = arith.constant 1 : index
    %162 = vector.load %arg37[%c0_161, %c1_162] : memref<64x384xf32, #tpu.memory_space<vmem>>, vector<32x256xf32>
    %cst_163 = arith.constant dense<0.000000e+00> : vector<32x256xf32>
    %163 = tpu.matmul %161, %162, %cst_163 {dimension_numbers = #tpu.dot_dimension_numbers<[1], [0], [0], [1], [0, 0, 1, 1], [], []>} : vector<32x32xf32>, vector<32x256xf32>, vector<32x256xf32> -> vector<32x256xf32>
    %164 = arith.addf %159, %163 : vector<32x256xf32>
    %c2_164 = arith.constant 2 : index
    %c0_165 = arith.constant 0 : index
    %c0_166 = arith.constant 0 : index
    %165 = vector.load %arg10[%c2_164, %c0_165, %c0_166] : memref<5x32x32xf32, #tpu.memory_space<vmem>>, vector<1x32x32xf32>
    %166 = vector.shape_cast %165 : vector<1x32x32xf32> to vector<32x32xf32>
    %c0_167 = arith.constant 0 : index
    %c2_168 = arith.constant 2 : index
    %167 = vector.load %arg37[%c0_167, %c2_168] : memref<64x384xf32, #tpu.memory_space<vmem>>, vector<32x256xf32>
    %cst_169 = arith.constant dense<0.000000e+00> : vector<32x256xf32>
    %168 = tpu.matmul %166, %167, %cst_169 {dimension_numbers = #tpu.dot_dimension_numbers<[1], [0], [0], [1], [0, 0, 1, 1], [], []>} : vector<32x32xf32>, vector<32x256xf32>, vector<32x256xf32> -> vector<32x256xf32>
    %169 = arith.addf %164, %168 : vector<32x256xf32>
    %c3_170 = arith.constant 3 : index
    %c0_171 = arith.constant 0 : index
    %c0_172 = arith.constant 0 : index
    %170 = vector.load %arg10[%c3_170, %c0_171, %c0_172] : memref<5x32x32xf32, #tpu.memory_space<vmem>>, vector<1x32x32xf32>
    %171 = vector.shape_cast %170 : vector<1x32x32xf32> to vector<32x32xf32>
    %c0_173 = arith.constant 0 : index
    %c3_174 = arith.constant 3 : index
    %172 = vector.load %arg37[%c0_173, %c3_174] : memref<64x384xf32, #tpu.memory_space<vmem>>, vector<32x256xf32>
    %cst_175 = arith.constant dense<0.000000e+00> : vector<32x256xf32>
    %173 = tpu.matmul %171, %172, %cst_175 {dimension_numbers = #tpu.dot_dimension_numbers<[1], [0], [0], [1], [0, 0, 1, 1], [], []>} : vector<32x32xf32>, vector<32x256xf32>, vector<32x256xf32> -> vector<32x256xf32>
    %174 = arith.addf %169, %173 : vector<32x256xf32>
    %c4_176 = arith.constant 4 : index
    %c0_177 = arith.constant 0 : index
    %c0_178 = arith.constant 0 : index
    %175 = vector.load %arg10[%c4_176, %c0_177, %c0_178] : memref<5x32x32xf32, #tpu.memory_space<vmem>>, vector<1x32x32xf32>
    %176 = vector.shape_cast %175 : vector<1x32x32xf32> to vector<32x32xf32>
    %c0_179 = arith.constant 0 : index
    %c4_180 = arith.constant 4 : index
    %177 = vector.load %arg37[%c0_179, %c4_180] : memref<64x384xf32, #tpu.memory_space<vmem>>, vector<32x256xf32>
    %cst_181 = arith.constant dense<0.000000e+00> : vector<32x256xf32>
    %178 = tpu.matmul %176, %177, %cst_181 {dimension_numbers = #tpu.dot_dimension_numbers<[1], [0], [0], [1], [0, 0, 1, 1], [], []>} : vector<32x32xf32>, vector<32x256xf32>, vector<32x256xf32> -> vector<32x256xf32>
    %179 = arith.addf %174, %178 : vector<32x256xf32>
    %c0_182 = arith.constant 0 : index
    %c0_183 = arith.constant 0 : index
    %180 = vector.load %arg1[%c0_182, %c0_183] : memref<256x128xf32, #tpu.memory_space<vmem>>, vector<256x128xf32>
    %c0_184 = arith.constant 0 : index
    %c0_185 = arith.constant 0 : index
    %181 = vector.load %arg2[%c0_184, %c0_185] : memref<256x128xf32, #tpu.memory_space<vmem>>, vector<256x128xf32>
    %cst_186 = arith.constant dense<0.000000e+00> : vector<32x128xf32>
    %182 = tpu.matmul %179, %180, %cst_186 {dimension_numbers = #tpu.dot_dimension_numbers<[1], [0], [0], [1], [0, 0, 1, 1], [], []>} : vector<32x256xf32>, vector<256x128xf32>, vector<32x128xf32> -> vector<32x128xf32>
    %cst_187 = arith.constant dense<0.000000e+00> : vector<32x128xf32>
    %183 = tpu.matmul %179, %181, %cst_187 {dimension_numbers = #tpu.dot_dimension_numbers<[1], [0], [0], [1], [0, 0, 1, 1], [], []>} : vector<32x256xf32>, vector<256x128xf32>, vector<32x128xf32> -> vector<32x128xf32>
    %184 = arith.maximumf %182, %183 : vector<32x128xf32>
    %c0_188 = arith.constant 0 : index
    %c0_189 = arith.constant 0 : index
    %185 = vector.load %arg11[%c0_188, %c0_189] : memref<32x1xf32, #tpu.memory_space<vmem>>, vector<32x1xf32>
    %186 = vector.broadcast %185 : vector<32x1xf32> to vector<32x128xf32>
    %187 = arith.addf %184, %186 : vector<32x128xf32>
    %cst_190 = arith.constant 0.000000e+00 : f32
    %188 = vector.broadcast %cst_190 : f32 to vector<32x128xf32>
    %189 = arith.maximumf %187, %188 : vector<32x128xf32>
    %c0_191 = arith.constant 0 : index
    %c2_192 = arith.constant 2 : index
    %190 = vector.load %arg36[%c0_191, %c2_192] : memref<64x384xf32, #tpu.memory_space<vmem>>, vector<32x128xf32>
    tpu.vector_store %arg36[%c0_191, %c2_192], %189 {strides = array<i32>} : memref<64x384xf32, #tpu.memory_space<vmem>>, vector<32x128xf32>,
    %cst_193 = arith.constant 0.000000e+00 : f32
    %191 = vector.broadcast %cst_193 : f32 to vector<32x2xf32>
    %c0_194 = arith.constant 0 : index
    %c130 = arith.constant 130 : index
    %192 = vector.load %arg36[%c0_194, %c130] : memref<64x384xf32, #tpu.memory_space<vmem>>, vector<32x2xf32>
    tpu.vector_store %arg36[%c0_194, %c130], %191 {strides = array<i32>} : memref<64x384xf32, #tpu.memory_space<vmem>>, vector<32x2xf32>,
    %c0_195 = arith.constant 0 : index
    %c0_196 = arith.constant 0 : index
    %c0_197 = arith.constant 0 : index
    %193 = vector.load %arg12[%c0_195, %c0_196, %c0_197] : memref<5x32x32xf32, #tpu.memory_space<vmem>>, vector<1x32x32xf32>
    %194 = vector.shape_cast %193 : vector<1x32x32xf32> to vector<32x32xf32>
    %c0_198 = arith.constant 0 : index
    %c0_199 = arith.constant 0 : index
    %195 = vector.load %arg36[%c0_198, %c0_199] : memref<64x384xf32, #tpu.memory_space<vmem>>, vector<32x128xf32>
    %cst_200 = arith.constant dense<0.000000e+00> : vector<32x128xf32>
    %196 = tpu.matmul %194, %195, %cst_200 {dimension_numbers = #tpu.dot_dimension_numbers<[1], [0], [0], [1], [0, 0, 1, 1], [], []>} : vector<32x32xf32>, vector<32x128xf32>, vector<32x128xf32> -> vector<32x128xf32>
    %c1_201 = arith.constant 1 : index
    %c0_202 = arith.constant 0 : index
    %c0_203 = arith.constant 0 : index
    %197 = vector.load %arg12[%c1_201, %c0_202, %c0_203] : memref<5x32x32xf32, #tpu.memory_space<vmem>>, vector<1x32x32xf32>
    %198 = vector.shape_cast %197 : vector<1x32x32xf32> to vector<32x32xf32>
    %c0_204 = arith.constant 0 : index
    %c1_205 = arith.constant 1 : index
    %199 = vector.load %arg36[%c0_204, %c1_205] : memref<64x384xf32, #tpu.memory_space<vmem>>, vector<32x128xf32>
    %cst_206 = arith.constant dense<0.000000e+00> : vector<32x128xf32>
    %200 = tpu.matmul %198, %199, %cst_206 {dimension_numbers = #tpu.dot_dimension_numbers<[1], [0], [0], [1], [0, 0, 1, 1], [], []>} : vector<32x32xf32>, vector<32x128xf32>, vector<32x128xf32> -> vector<32x128xf32>
    %201 = arith.addf %196, %200 : vector<32x128xf32>
    %c2_207 = arith.constant 2 : index
    %c0_208 = arith.constant 0 : index
    %c0_209 = arith.constant 0 : index
    %202 = vector.load %arg12[%c2_207, %c0_208, %c0_209] : memref<5x32x32xf32, #tpu.memory_space<vmem>>, vector<1x32x32xf32>
    %203 = vector.shape_cast %202 : vector<1x32x32xf32> to vector<32x32xf32>
    %c0_210 = arith.constant 0 : index
    %c2_211 = arith.constant 2 : index
    %204 = vector.load %arg36[%c0_210, %c2_211] : memref<64x384xf32, #tpu.memory_space<vmem>>, vector<32x128xf32>
    %cst_212 = arith.constant dense<0.000000e+00> : vector<32x128xf32>
    %205 = tpu.matmul %203, %204, %cst_212 {dimension_numbers = #tpu.dot_dimension_numbers<[1], [0], [0], [1], [0, 0, 1, 1], [], []>} : vector<32x32xf32>, vector<32x128xf32>, vector<32x128xf32> -> vector<32x128xf32>
    %206 = arith.addf %201, %205 : vector<32x128xf32>
    %c3_213 = arith.constant 3 : index
    %c0_214 = arith.constant 0 : index
    %c0_215 = arith.constant 0 : index
    %207 = vector.load %arg12[%c3_213, %c0_214, %c0_215] : memref<5x32x32xf32, #tpu.memory_space<vmem>>, vector<1x32x32xf32>
    %208 = vector.shape_cast %207 : vector<1x32x32xf32> to vector<32x32xf32>
    %c0_216 = arith.constant 0 : index
    %c3_217 = arith.constant 3 : index
    %209 = vector.load %arg36[%c0_216, %c3_217] : memref<64x384xf32, #tpu.memory_space<vmem>>, vector<32x128xf32>
    %cst_218 = arith.constant dense<0.000000e+00> : vector<32x128xf32>
    %210 = tpu.matmul %208, %209, %cst_218 {dimension_numbers = #tpu.dot_dimension_numbers<[1], [0], [0], [1], [0, 0, 1, 1], [], []>} : vector<32x32xf32>, vector<32x128xf32>, vector<32x128xf32> -> vector<32x128xf32>
    %211 = arith.addf %206, %210 : vector<32x128xf32>
    %c4_219 = arith.constant 4 : index
    %c0_220 = arith.constant 0 : index
    %c0_221 = arith.constant 0 : index
    %212 = vector.load %arg12[%c4_219, %c0_220, %c0_221] : memref<5x32x32xf32, #tpu.memory_space<vmem>>, vector<1x32x32xf32>
    %213 = vector.shape_cast %212 : vector<1x32x32xf32> to vector<32x32xf32>
    %c0_222 = arith.constant 0 : index
    %c4_223 = arith.constant 4 : index
    %214 = vector.load %arg36[%c0_222, %c4_223] : memref<64x384xf32, #tpu.memory_space<vmem>>, vector<32x128xf32>
    %cst_224 = arith.constant dense<0.000000e+00> : vector<32x128xf32>
    %215 = tpu.matmul %213, %214, %cst_224 {dimension_numbers = #tpu.dot_dimension_numbers<[1], [0], [0], [1], [0, 0, 1, 1], [], []>} : vector<32x32xf32>, vector<32x128xf32>, vector<32x128xf32> -> vector<32x128xf32>
    %216 = arith.addf %211, %215 : vector<32x128xf32>
    %c0_225 = arith.constant 0 : index
    %c0_226 = arith.constant 0 : index
    %217 = vector.load %arg13[%c0_225, %c0_226] : memref<32x1xf32, #tpu.memory_space<vmem>>, vector<32x1xf32>
    %218 = vector.broadcast %217 : vector<32x1xf32> to vector<32x128xf32>
    %219 = arith.addf %216, %218 : vector<32x128xf32>
    %cst_227 = arith.constant 0.000000e+00 : f32
    %220 = vector.broadcast %cst_227 : f32 to vector<32x128xf32>
    %221 = arith.maximumf %219, %220 : vector<32x128xf32>
    %c0_228 = arith.constant 0 : index
    %c2_229 = arith.constant 2 : index
    %222 = vector.load %arg37[%c0_228, %c2_229] : memref<64x384xf32, #tpu.memory_space<vmem>>, vector<32x128xf32>
    tpu.vector_store %arg37[%c0_228, %c2_229], %221 {strides = array<i32>} : memref<64x384xf32, #tpu.memory_space<vmem>>, vector<32x128xf32>,
    %cst_230 = arith.constant 0.000000e+00 : f32
    %223 = vector.broadcast %cst_230 : f32 to vector<32x2xf32>
    %c0_231 = arith.constant 0 : index
    %c130_232 = arith.constant 130 : index
    %224 = vector.load %arg37[%c0_231, %c130_232] : memref<64x384xf32, #tpu.memory_space<vmem>>, vector<32x2xf32>
    tpu.vector_store %arg37[%c0_231, %c130_232], %223 {strides = array<i32>} : memref<64x384xf32, #tpu.memory_space<vmem>>, vector<32x2xf32>,
    %c0_233 = arith.constant 0 : index
    %c0_234 = arith.constant 0 : index
    %c0_235 = arith.constant 0 : index
    %225 = vector.load %arg14[%c0_233, %c0_234, %c0_235] : memref<5x32x32xf32, #tpu.memory_space<vmem>>, vector<1x32x32xf32>
    %226 = vector.shape_cast %225 : vector<1x32x32xf32> to vector<32x32xf32>
    %c0_236 = arith.constant 0 : index
    %c0_237 = arith.constant 0 : index
    %227 = vector.load %arg37[%c0_236, %c0_237] : memref<64x384xf32, #tpu.memory_space<vmem>>, vector<32x128xf32>
    %cst_238 = arith.constant dense<0.000000e+00> : vector<32x128xf32>
    %228 = tpu.matmul %226, %227, %cst_238 {dimension_numbers = #tpu.dot_dimension_numbers<[1], [0], [0], [1], [0, 0, 1, 1], [], []>} : vector<32x32xf32>, vector<32x128xf32>, vector<32x128xf32> -> vector<32x128xf32>
    %c1_239 = arith.constant 1 : index
    %c0_240 = arith.constant 0 : index
    %c0_241 = arith.constant 0 : index
    %229 = vector.load %arg14[%c1_239, %c0_240, %c0_241] : memref<5x32x32xf32, #tpu.memory_space<vmem>>, vector<1x32x32xf32>
    %230 = vector.shape_cast %229 : vector<1x32x32xf32> to vector<32x32xf32>
    %c0_242 = arith.constant 0 : index
    %c1_243 = arith.constant 1 : index
    %231 = vector.load %arg37[%c0_242, %c1_243] : memref<64x384xf32, #tpu.memory_space<vmem>>, vector<32x128xf32>
    %cst_244 = arith.constant dense<0.000000e+00> : vector<32x128xf32>
    %232 = tpu.matmul %230, %231, %cst_244 {dimension_numbers = #tpu.dot_dimension_numbers<[1], [0], [0], [1], [0, 0, 1, 1], [], []>} : vector<32x32xf32>, vector<32x128xf32>, vector<32x128xf32> -> vector<32x128xf32>
    %233 = arith.addf %228, %232 : vector<32x128xf32>
    %c2_245 = arith.constant 2 : index
    %c0_246 = arith.constant 0 : index
    %c0_247 = arith.constant 0 : index
    %234 = vector.load %arg14[%c2_245, %c0_246, %c0_247] : memref<5x32x32xf32, #tpu.memory_space<vmem>>, vector<1x32x32xf32>
    %235 = vector.shape_cast %234 : vector<1x32x32xf32> to vector<32x32xf32>
    %c0_248 = arith.constant 0 : index
    %c2_249 = arith.constant 2 : index
    %236 = vector.load %arg37[%c0_248, %c2_249] : memref<64x384xf32, #tpu.memory_space<vmem>>, vector<32x128xf32>
    %cst_250 = arith.constant dense<0.000000e+00> : vector<32x128xf32>
    %237 = tpu.matmul %235, %236, %cst_250 {dimension_numbers = #tpu.dot_dimension_numbers<[1], [0], [0], [1], [0, 0, 1, 1], [], []>} : vector<32x32xf32>, vector<32x128xf32>, vector<32x128xf32> -> vector<32x128xf32>
    %238 = arith.addf %233, %237 : vector<32x128xf32>
    %c3_251 = arith.constant 3 : index
    %c0_252 = arith.constant 0 : index
    %c0_253 = arith.constant 0 : index
    %239 = vector.load %arg14[%c3_251, %c0_252, %c0_253] : memref<5x32x32xf32, #tpu.memory_space<vmem>>, vector<1x32x32xf32>
    %240 = vector.shape_cast %239 : vector<1x32x32xf32> to vector<32x32xf32>
    %c0_254 = arith.constant 0 : index
    %c3_255 = arith.constant 3 : index
    %241 = vector.load %arg37[%c0_254, %c3_255] : memref<64x384xf32, #tpu.memory_space<vmem>>, vector<32x128xf32>
    %cst_256 = arith.constant dense<0.000000e+00> : vector<32x128xf32>
    %242 = tpu.matmul %240, %241, %cst_256 {dimension_numbers = #tpu.dot_dimension_numbers<[1], [0], [0], [1], [0, 0, 1, 1], [], []>} : vector<32x32xf32>, vector<32x128xf32>, vector<32x128xf32> -> vector<32x128xf32>
    %243 = arith.addf %238, %242 : vector<32x128xf32>
    %c4_257 = arith.constant 4 : index
    %c0_258 = arith.constant 0 : index
    %c0_259 = arith.constant 0 : index
    %244 = vector.load %arg14[%c4_257, %c0_258, %c0_259] : memref<5x32x32xf32, #tpu.memory_space<vmem>>, vector<1x32x32xf32>
    %245 = vector.shape_cast %244 : vector<1x32x32xf32> to vector<32x32xf32>
    %c0_260 = arith.constant 0 : index
    %c4_261 = arith.constant 4 : index
    %246 = vector.load %arg37[%c0_260, %c4_261] : memref<64x384xf32, #tpu.memory_space<vmem>>, vector<32x128xf32>
    %cst_262 = arith.constant dense<0.000000e+00> : vector<32x128xf32>
    %247 = tpu.matmul %245, %246, %cst_262 {dimension_numbers = #tpu.dot_dimension_numbers<[1], [0], [0], [1], [0, 0, 1, 1], [], []>} : vector<32x32xf32>, vector<32x128xf32>, vector<32x128xf32> -> vector<32x128xf32>
    %248 = arith.addf %243, %247 : vector<32x128xf32>
    %c0_263 = arith.constant 0 : index
    %c0_264 = arith.constant 0 : index
    %249 = vector.load %arg1[%c0_263, %c0_264] : memref<256x128xf32, #tpu.memory_space<vmem>>, vector<128x64xf32>
    %c0_265 = arith.constant 0 : index
    %c0_266 = arith.constant 0 : index
    %250 = vector.load %arg2[%c0_265, %c0_266] : memref<256x128xf32, #tpu.memory_space<vmem>>, vector<128x64xf32>
    %cst_267 = arith.constant dense<0.000000e+00> : vector<32x64xf32>
    %251 = tpu.matmul %248, %249, %cst_267 {dimension_numbers = #tpu.dot_dimension_numbers<[1], [0], [0], [1], [0, 0, 1, 1], [], []>} : vector<32x128xf32>, vector<128x64xf32>, vector<32x64xf32> -> vector<32x64xf32>
    %cst_268 = arith.constant dense<0.000000e+00> : vector<32x64xf32>
    %252 = tpu.matmul %248, %250, %cst_268 {dimension_numbers = #tpu.dot_dimension_numbers<[1], [0], [0], [1], [0, 0, 1, 1], [], []>} : vector<32x128xf32>, vector<128x64xf32>, vector<32x64xf32> -> vector<32x64xf32>
    %253 = arith.maximumf %251, %252 : vector<32x64xf32>
    %c0_269 = arith.constant 0 : index
    %c0_270 = arith.constant 0 : index
    %254 = vector.load %arg15[%c0_269, %c0_270] : memref<32x1xf32, #tpu.memory_space<vmem>>, vector<32x1xf32>
    %255 = vector.broadcast %254 : vector<32x1xf32> to vector<32x64xf32>
    %256 = arith.addf %253, %255 : vector<32x64xf32>
    %cst_271 = arith.constant 0.000000e+00 : f32
    %257 = vector.broadcast %cst_271 : f32 to vector<32x64xf32>
    %258 = arith.maximumf %256, %257 : vector<32x64xf32>
    %c0_272 = arith.constant 0 : index
    %c2_273 = arith.constant 2 : index
    %259 = vector.load %arg36[%c0_272, %c2_273] : memref<64x384xf32, #tpu.memory_space<vmem>>, vector<32x64xf32>
    tpu.vector_store %arg36[%c0_272, %c2_273], %258 {strides = array<i32>} : memref<64x384xf32, #tpu.memory_space<vmem>>, vector<32x64xf32>,
    %cst_274 = arith.constant 0.000000e+00 : f32
    %260 = vector.broadcast %cst_274 : f32 to vector<32x2xf32>
    %c0_275 = arith.constant 0 : index
    %c66 = arith.constant 66 : index
    %261 = vector.load %arg36[%c0_275, %c66] : memref<64x384xf32, #tpu.memory_space<vmem>>, vector<32x2xf32>
    tpu.vector_store %arg36[%c0_275, %c66], %260 {strides = array<i32>} : memref<64x384xf32, #tpu.memory_space<vmem>>, vector<32x2xf32>,
    %c0_276 = arith.constant 0 : index
    %c0_277 = arith.constant 0 : index
    %c0_278 = arith.constant 0 : index
    %262 = vector.load %arg16[%c0_276, %c0_277, %c0_278] : memref<5x64x32xf32, #tpu.memory_space<vmem>>, vector<1x64x32xf32>
    %263 = vector.shape_cast %262 : vector<1x64x32xf32> to vector<64x32xf32>
    %c0_279 = arith.constant 0 : index
    %c0_280 = arith.constant 0 : index
    %264 = vector.load %arg36[%c0_279, %c0_280] : memref<64x384xf32, #tpu.memory_space<vmem>>, vector<32x64xf32>
    %cst_281 = arith.constant dense<0.000000e+00> : vector<64x64xf32>
    %265 = tpu.matmul %263, %264, %cst_281 {dimension_numbers = #tpu.dot_dimension_numbers<[1], [0], [0], [1], [0, 0, 1, 1], [], []>} : vector<64x32xf32>, vector<32x64xf32>, vector<64x64xf32> -> vector<64x64xf32>
    %c1_282 = arith.constant 1 : index
    %c0_283 = arith.constant 0 : index
    %c0_284 = arith.constant 0 : index
    %266 = vector.load %arg16[%c1_282, %c0_283, %c0_284] : memref<5x64x32xf32, #tpu.memory_space<vmem>>, vector<1x64x32xf32>
    %267 = vector.shape_cast %266 : vector<1x64x32xf32> to vector<64x32xf32>
    %c0_285 = arith.constant 0 : index
    %c1_286 = arith.constant 1 : index
    %268 = vector.load %arg36[%c0_285, %c1_286] : memref<64x384xf32, #tpu.memory_space<vmem>>, vector<32x64xf32>
    %cst_287 = arith.constant dense<0.000000e+00> : vector<64x64xf32>
    %269 = tpu.matmul %267, %268, %cst_287 {dimension_numbers = #tpu.dot_dimension_numbers<[1], [0], [0], [1], [0, 0, 1, 1], [], []>} : vector<64x32xf32>, vector<32x64xf32>, vector<64x64xf32> -> vector<64x64xf32>
    %270 = arith.addf %265, %269 : vector<64x64xf32>
    %c2_288 = arith.constant 2 : index
    %c0_289 = arith.constant 0 : index
    %c0_290 = arith.constant 0 : index
    %271 = vector.load %arg16[%c2_288, %c0_289, %c0_290] : memref<5x64x32xf32, #tpu.memory_space<vmem>>, vector<1x64x32xf32>
    %272 = vector.shape_cast %271 : vector<1x64x32xf32> to vector<64x32xf32>
    %c0_291 = arith.constant 0 : index
    %c2_292 = arith.constant 2 : index
    %273 = vector.load %arg36[%c0_291, %c2_292] : memref<64x384xf32, #tpu.memory_space<vmem>>, vector<32x64xf32>
    %cst_293 = arith.constant dense<0.000000e+00> : vector<64x64xf32>
    %274 = tpu.matmul %272, %273, %cst_293 {dimension_numbers = #tpu.dot_dimension_numbers<[1], [0], [0], [1], [0, 0, 1, 1], [], []>} : vector<64x32xf32>, vector<32x64xf32>, vector<64x64xf32> -> vector<64x64xf32>
    %275 = arith.addf %270, %274 : vector<64x64xf32>
    %c3_294 = arith.constant 3 : index
    %c0_295 = arith.constant 0 : index
    %c0_296 = arith.constant 0 : index
    %276 = vector.load %arg16[%c3_294, %c0_295, %c0_296] : memref<5x64x32xf32, #tpu.memory_space<vmem>>, vector<1x64x32xf32>
    %277 = vector.shape_cast %276 : vector<1x64x32xf32> to vector<64x32xf32>
    %c0_297 = arith.constant 0 : index
    %c3_298 = arith.constant 3 : index
    %278 = vector.load %arg36[%c0_297, %c3_298] : memref<64x384xf32, #tpu.memory_space<vmem>>, vector<32x64xf32>
    %cst_299 = arith.constant dense<0.000000e+00> : vector<64x64xf32>
    %279 = tpu.matmul %277, %278, %cst_299 {dimension_numbers = #tpu.dot_dimension_numbers<[1], [0], [0], [1], [0, 0, 1, 1], [], []>} : vector<64x32xf32>, vector<32x64xf32>, vector<64x64xf32> -> vector<64x64xf32>
    %280 = arith.addf %275, %279 : vector<64x64xf32>
    %c4_300 = arith.constant 4 : index
    %c0_301 = arith.constant 0 : index
    %c0_302 = arith.constant 0 : index
    %281 = vector.load %arg16[%c4_300, %c0_301, %c0_302] : memref<5x64x32xf32, #tpu.memory_space<vmem>>, vector<1x64x32xf32>
    %282 = vector.shape_cast %281 : vector<1x64x32xf32> to vector<64x32xf32>
    %c0_303 = arith.constant 0 : index
    %c4_304 = arith.constant 4 : index
    %283 = vector.load %arg36[%c0_303, %c4_304] : memref<64x384xf32, #tpu.memory_space<vmem>>, vector<32x64xf32>
    %cst_305 = arith.constant dense<0.000000e+00> : vector<64x64xf32>
    %284 = tpu.matmul %282, %283, %cst_305 {dimension_numbers = #tpu.dot_dimension_numbers<[1], [0], [0], [1], [0, 0, 1, 1], [], []>} : vector<64x32xf32>, vector<32x64xf32>, vector<64x64xf32> -> vector<64x64xf32>
    %285 = arith.addf %280, %284 : vector<64x64xf32>
    %c0_306 = arith.constant 0 : index
    %c0_307 = arith.constant 0 : index
    %286 = vector.load %arg17[%c0_306, %c0_307] : memref<64x1xf32, #tpu.memory_space<vmem>>, vector<64x1xf32>
    %287 = vector.broadcast %286 : vector<64x1xf32> to vector<64x64xf32>
    %288 = arith.addf %285, %287 : vector<64x64xf32>
    %cst_308 = arith.constant 0.000000e+00 : f32
    %289 = vector.broadcast %cst_308 : f32 to vector<64x64xf32>
    %290 = arith.maximumf %288, %289 : vector<64x64xf32>
    %c0_309 = arith.constant 0 : index
    %c2_310 = arith.constant 2 : index
    %291 = vector.load %arg37[%c0_309, %c2_310] : memref<64x384xf32, #tpu.memory_space<vmem>>, vector<64x64xf32>
    tpu.vector_store %arg37[%c0_309, %c2_310], %290 {strides = array<i32>} : memref<64x384xf32, #tpu.memory_space<vmem>>, vector<64x64xf32>,
    %cst_311 = arith.constant 0.000000e+00 : f32
    %292 = vector.broadcast %cst_311 : f32 to vector<64x2xf32>
    %c0_312 = arith.constant 0 : index
    %c66_313 = arith.constant 66 : index
    %293 = vector.load %arg37[%c0_312, %c66_313] : memref<64x384xf32, #tpu.memory_space<vmem>>, vector<64x2xf32>
    tpu.vector_store %arg37[%c0_312, %c66_313], %292 {strides = array<i32>} : memref<64x384xf32, #tpu.memory_space<vmem>>, vector<64x2xf32>,
    %c0_314 = arith.constant 0 : index
    %c0_315 = arith.constant 0 : index
    %c0_316 = arith.constant 0 : index
    %294 = vector.load %arg18[%c0_314, %c0_315, %c0_316] : memref<5x64x64xf32, #tpu.memory_space<vmem>>, vector<1x64x64xf32>
    %295 = vector.shape_cast %294 : vector<1x64x64xf32> to vector<64x64xf32>
    %c0_317 = arith.constant 0 : index
    %c0_318 = arith.constant 0 : index
    %296 = vector.load %arg37[%c0_317, %c0_318] : memref<64x384xf32, #tpu.memory_space<vmem>>, vector<64x64xf32>
    %cst_319 = arith.constant dense<0.000000e+00> : vector<64x64xf32>
    %297 = tpu.matmul %295, %296, %cst_319 {dimension_numbers = #tpu.dot_dimension_numbers<[1], [0], [0], [1], [0, 0, 1, 1], [], []>} : vector<64x64xf32>, vector<64x64xf32>, vector<64x64xf32> -> vector<64x64xf32>
    %c1_320 = arith.constant 1 : index
    %c0_321 = arith.constant 0 : index
    %c0_322 = arith.constant 0 : index
    %298 = vector.load %arg18[%c1_320, %c0_321, %c0_322] : memref<5x64x64xf32, #tpu.memory_space<vmem>>, vector<1x64x64xf32>
    %299 = vector.shape_cast %298 : vector<1x64x64xf32> to vector<64x64xf32>
    %c0_323 = arith.constant 0 : index
    %c1_324 = arith.constant 1 : index
    %300 = vector.load %arg37[%c0_323, %c1_324] : memref<64x384xf32, #tpu.memory_space<vmem>>, vector<64x64xf32>
    %cst_325 = arith.constant dense<0.000000e+00> : vector<64x64xf32>
    %301 = tpu.matmul %299, %300, %cst_325 {dimension_numbers = #tpu.dot_dimension_numbers<[1], [0], [0], [1], [0, 0, 1, 1], [], []>} : vector<64x64xf32>, vector<64x64xf32>, vector<64x64xf32> -> vector<64x64xf32>
    %302 = arith.addf %297, %301 : vector<64x64xf32>
    %c2_326 = arith.constant 2 : index
    %c0_327 = arith.constant 0 : index
    %c0_328 = arith.constant 0 : index
    %303 = vector.load %arg18[%c2_326, %c0_327, %c0_328] : memref<5x64x64xf32, #tpu.memory_space<vmem>>, vector<1x64x64xf32>
    %304 = vector.shape_cast %303 : vector<1x64x64xf32> to vector<64x64xf32>
    %c0_329 = arith.constant 0 : index
    %c2_330 = arith.constant 2 : index
    %305 = vector.load %arg37[%c0_329, %c2_330] : memref<64x384xf32, #tpu.memory_space<vmem>>, vector<64x64xf32>
    %cst_331 = arith.constant dense<0.000000e+00> : vector<64x64xf32>
    %306 = tpu.matmul %304, %305, %cst_331 {dimension_numbers = #tpu.dot_dimension_numbers<[1], [0], [0], [1], [0, 0, 1, 1], [], []>} : vector<64x64xf32>, vector<64x64xf32>, vector<64x64xf32> -> vector<64x64xf32>
    %307 = arith.addf %302, %306 : vector<64x64xf32>
    %c3_332 = arith.constant 3 : index
    %c0_333 = arith.constant 0 : index
    %c0_334 = arith.constant 0 : index
    %308 = vector.load %arg18[%c3_332, %c0_333, %c0_334] : memref<5x64x64xf32, #tpu.memory_space<vmem>>, vector<1x64x64xf32>
    %309 = vector.shape_cast %308 : vector<1x64x64xf32> to vector<64x64xf32>
    %c0_335 = arith.constant 0 : index
    %c3_336 = arith.constant 3 : index
    %310 = vector.load %arg37[%c0_335, %c3_336] : memref<64x384xf32, #tpu.memory_space<vmem>>, vector<64x64xf32>
    %cst_337 = arith.constant dense<0.000000e+00> : vector<64x64xf32>
    %311 = tpu.matmul %309, %310, %cst_337 {dimension_numbers = #tpu.dot_dimension_numbers<[1], [0], [0], [1], [0, 0, 1, 1], [], []>} : vector<64x64xf32>, vector<64x64xf32>, vector<64x64xf32> -> vector<64x64xf32>
    %312 = arith.addf %307, %311 : vector<64x64xf32>
    %c4_338 = arith.constant 4 : index
    %c0_339 = arith.constant 0 : index
    %c0_340 = arith.constant 0 : index
    %313 = vector.load %arg18[%c4_338, %c0_339, %c0_340] : memref<5x64x64xf32, #tpu.memory_space<vmem>>, vector<1x64x64xf32>
    %314 = vector.shape_cast %313 : vector<1x64x64xf32> to vector<64x64xf32>
    %c0_341 = arith.constant 0 : index
    %c4_342 = arith.constant 4 : index
    %315 = vector.load %arg37[%c0_341, %c4_342] : memref<64x384xf32, #tpu.memory_space<vmem>>, vector<64x64xf32>
    %cst_343 = arith.constant dense<0.000000e+00> : vector<64x64xf32>
    %316 = tpu.matmul %314, %315, %cst_343 {dimension_numbers = #tpu.dot_dimension_numbers<[1], [0], [0], [1], [0, 0, 1, 1], [], []>} : vector<64x64xf32>, vector<64x64xf32>, vector<64x64xf32> -> vector<64x64xf32>
    %317 = arith.addf %312, %316 : vector<64x64xf32>
    %c0_344 = arith.constant 0 : index
    %c0_345 = arith.constant 0 : index
    %318 = vector.load %arg1[%c0_344, %c0_345] : memref<256x128xf32, #tpu.memory_space<vmem>>, vector<64x32xf32>
    %c0_346 = arith.constant 0 : index
    %c0_347 = arith.constant 0 : index
    %319 = vector.load %arg2[%c0_346, %c0_347] : memref<256x128xf32, #tpu.memory_space<vmem>>, vector<64x32xf32>
    %cst_348 = arith.constant dense<0.000000e+00> : vector<64x32xf32>
    %320 = tpu.matmul %317, %318, %cst_348 {dimension_numbers = #tpu.dot_dimension_numbers<[1], [0], [0], [1], [0, 0, 1, 1], [], []>} : vector<64x64xf32>, vector<64x32xf32>, vector<64x32xf32> -> vector<64x32xf32>
    %cst_349 = arith.constant dense<0.000000e+00> : vector<64x32xf32>
    %321 = tpu.matmul %317, %319, %cst_349 {dimension_numbers = #tpu.dot_dimension_numbers<[1], [0], [0], [1], [0, 0, 1, 1], [], []>} : vector<64x64xf32>, vector<64x32xf32>, vector<64x32xf32> -> vector<64x32xf32>
    %322 = arith.maximumf %320, %321 : vector<64x32xf32>
    %c0_350 = arith.constant 0 : index
    %c0_351 = arith.constant 0 : index
    %323 = vector.load %arg19[%c0_350, %c0_351] : memref<64x1xf32, #tpu.memory_space<vmem>>, vector<64x1xf32>
    %324 = vector.broadcast %323 : vector<64x1xf32> to vector<64x32xf32>
    %325 = arith.addf %322, %324 : vector<64x32xf32>
    %cst_352 = arith.constant 0.000000e+00 : f32
    %326 = vector.broadcast %cst_352 : f32 to vector<64x32xf32>
    %327 = arith.maximumf %325, %326 : vector<64x32xf32>
    %c0_353 = arith.constant 0 : index
    %c1_354 = arith.constant 1 : index
    %328 = vector.load %arg36[%c0_353, %c1_354] : memref<64x384xf32, #tpu.memory_space<vmem>>, vector<64x32xf32>
    tpu.vector_store %arg36[%c0_353, %c1_354], %327 {strides = array<i32>} : memref<64x384xf32, #tpu.memory_space<vmem>>, vector<64x32xf32>,
    %cst_355 = arith.constant 0.000000e+00 : f32
    %329 = vector.broadcast %cst_355 : f32 to vector<64x1xf32>
    %c0_356 = arith.constant 0 : index
    %c33 = arith.constant 33 : index
    %330 = vector.load %arg36[%c0_356, %c33] : memref<64x384xf32, #tpu.memory_space<vmem>>, vector<64x1xf32>
    tpu.vector_store %arg36[%c0_356, %c33], %329 {strides = array<i32>} : memref<64x384xf32, #tpu.memory_space<vmem>>, vector<64x1xf32>,
    %c0_357 = arith.constant 0 : index
    %c0_358 = arith.constant 0 : index
    %c0_359 = arith.constant 0 : index
    %331 = vector.load %arg20[%c0_357, %c0_358, %c0_359] : memref<3x64x64xf32, #tpu.memory_space<vmem>>, vector<1x64x64xf32>
    %332 = vector.shape_cast %331 : vector<1x64x64xf32> to vector<64x64xf32>
    %c0_360 = arith.constant 0 : index
    %c0_361 = arith.constant 0 : index
    %333 = vector.load %arg36[%c0_360, %c0_361] : memref<64x384xf32, #tpu.memory_space<vmem>>, vector<64x32xf32>
    %cst_362 = arith.constant dense<0.000000e+00> : vector<64x32xf32>
    %334 = tpu.matmul %332, %333, %cst_362 {dimension_numbers = #tpu.dot_dimension_numbers<[1], [0], [0], [1], [0, 0, 1, 1], [], []>} : vector<64x64xf32>, vector<64x32xf32>, vector<64x32xf32> -> vector<64x32xf32>
    %c1_363 = arith.constant 1 : index
    %c0_364 = arith.constant 0 : index
    %c0_365 = arith.constant 0 : index
    %335 = vector.load %arg20[%c1_363, %c0_364, %c0_365] : memref<3x64x64xf32, #tpu.memory_space<vmem>>, vector<1x64x64xf32>
    %336 = vector.shape_cast %335 : vector<1x64x64xf32> to vector<64x64xf32>
    %c0_366 = arith.constant 0 : index
    %c1_367 = arith.constant 1 : index
    %337 = vector.load %arg36[%c0_366, %c1_367] : memref<64x384xf32, #tpu.memory_space<vmem>>, vector<64x32xf32>
    %cst_368 = arith.constant dense<0.000000e+00> : vector<64x32xf32>
    %338 = tpu.matmul %336, %337, %cst_368 {dimension_numbers = #tpu.dot_dimension_numbers<[1], [0], [0], [1], [0, 0, 1, 1], [], []>} : vector<64x64xf32>, vector<64x32xf32>, vector<64x32xf32> -> vector<64x32xf32>
    %339 = arith.addf %334, %338 : vector<64x32xf32>
    %c2_369 = arith.constant 2 : index
    %c0_370 = arith.constant 0 : index
    %c0_371 = arith.constant 0 : index
    %340 = vector.load %arg20[%c2_369, %c0_370, %c0_371] : memref<3x64x64xf32, #tpu.memory_space<vmem>>, vector<1x64x64xf32>
    %341 = vector.shape_cast %340 : vector<1x64x64xf32> to vector<64x64xf32>
    %c0_372 = arith.constant 0 : index
    %c2_373 = arith.constant 2 : index
    %342 = vector.load %arg36[%c0_372, %c2_373] : memref<64x384xf32, #tpu.memory_space<vmem>>, vector<64x32xf32>
    %cst_374 = arith.constant dense<0.000000e+00> : vector<64x32xf32>
    %343 = tpu.matmul %341, %342, %cst_374 {dimension_numbers = #tpu.dot_dimension_numbers<[1], [0], [0], [1], [0, 0, 1, 1], [], []>} : vector<64x64xf32>, vector<64x32xf32>, vector<64x32xf32> -> vector<64x32xf32>
    %344 = arith.addf %339, %343 : vector<64x32xf32>
    %c0_375 = arith.constant 0 : index
    %c0_376 = arith.constant 0 : index
    %345 = vector.load %arg21[%c0_375, %c0_376] : memref<64x1xf32, #tpu.memory_space<vmem>>, vector<64x1xf32>
    %346 = vector.broadcast %345 : vector<64x1xf32> to vector<64x32xf32>
    %347 = arith.addf %344, %346 : vector<64x32xf32>
    %cst_377 = arith.constant 0.000000e+00 : f32
    %348 = vector.broadcast %cst_377 : f32 to vector<64x32xf32>
    %349 = arith.maximumf %347, %348 : vector<64x32xf32>
    %c0_378 = arith.constant 0 : index
    %c1_379 = arith.constant 1 : index
    %350 = vector.load %arg37[%c0_378, %c1_379] : memref<64x384xf32, #tpu.memory_space<vmem>>, vector<64x32xf32>
    tpu.vector_store %arg37[%c0_378, %c1_379], %349 {strides = array<i32>} : memref<64x384xf32, #tpu.memory_space<vmem>>, vector<64x32xf32>,
    %cst_380 = arith.constant 0.000000e+00 : f32
    %351 = vector.broadcast %cst_380 : f32 to vector<64x1xf32>
    %c0_381 = arith.constant 0 : index
    %c33_382 = arith.constant 33 : index
    %352 = vector.load %arg37[%c0_381, %c33_382] : memref<64x384xf32, #tpu.memory_space<vmem>>, vector<64x1xf32>
    tpu.vector_store %arg37[%c0_381, %c33_382], %351 {strides = array<i32>} : memref<64x384xf32, #tpu.memory_space<vmem>>, vector<64x1xf32>,
    %c0_383 = arith.constant 0 : index
    %c0_384 = arith.constant 0 : index
    %c0_385 = arith.constant 0 : index
    %353 = vector.load %arg22[%c0_383, %c0_384, %c0_385] : memref<3x64x64xf32, #tpu.memory_space<vmem>>, vector<1x64x64xf32>
    %354 = vector.shape_cast %353 : vector<1x64x64xf32> to vector<64x64xf32>
    %c0_386 = arith.constant 0 : index
    %c0_387 = arith.constant 0 : index
    %355 = vector.load %arg37[%c0_386, %c0_387] : memref<64x384xf32, #tpu.memory_space<vmem>>, vector<64x32xf32>
    %cst_388 = arith.constant dense<0.000000e+00> : vector<64x32xf32>
    %356 = tpu.matmul %354, %355, %cst_388 {dimension_numbers = #tpu.dot_dimension_numbers<[1], [0], [0], [1], [0, 0, 1, 1], [], []>} : vector<64x64xf32>, vector<64x32xf32>, vector<64x32xf32> -> vector<64x32xf32>
    %c1_389 = arith.constant 1 : index
    %c0_390 = arith.constant 0 : index
    %c0_391 = arith.constant 0 : index
    %357 = vector.load %arg22[%c1_389, %c0_390, %c0_391] : memref<3x64x64xf32, #tpu.memory_space<vmem>>, vector<1x64x64xf32>
    %358 = vector.shape_cast %357 : vector<1x64x64xf32> to vector<64x64xf32>
    %c0_392 = arith.constant 0 : index
    %c1_393 = arith.constant 1 : index
    %359 = vector.load %arg37[%c0_392, %c1_393] : memref<64x384xf32, #tpu.memory_space<vmem>>, vector<64x32xf32>
    %cst_394 = arith.constant dense<0.000000e+00> : vector<64x32xf32>
    %360 = tpu.matmul %358, %359, %cst_394 {dimension_numbers = #tpu.dot_dimension_numbers<[1], [0], [0], [1], [0, 0, 1, 1], [], []>} : vector<64x64xf32>, vector<64x32xf32>, vector<64x32xf32> -> vector<64x32xf32>
    %361 = arith.addf %356, %360 : vector<64x32xf32>
    %c2_395 = arith.constant 2 : index
    %c0_396 = arith.constant 0 : index
    %c0_397 = arith.constant 0 : index
    %362 = vector.load %arg22[%c2_395, %c0_396, %c0_397] : memref<3x64x64xf32, #tpu.memory_space<vmem>>, vector<1x64x64xf32>
    %363 = vector.shape_cast %362 : vector<1x64x64xf32> to vector<64x64xf32>
    %c0_398 = arith.constant 0 : index
    %c2_399 = arith.constant 2 : index
    %364 = vector.load %arg37[%c0_398, %c2_399] : memref<64x384xf32, #tpu.memory_space<vmem>>, vector<64x32xf32>
    %cst_400 = arith.constant dense<0.000000e+00> : vector<64x32xf32>
    %365 = tpu.matmul %363, %364, %cst_400 {dimension_numbers = #tpu.dot_dimension_numbers<[1], [0], [0], [1], [0, 0, 1, 1], [], []>} : vector<64x64xf32>, vector<64x32xf32>, vector<64x32xf32> -> vector<64x32xf32>
    %366 = arith.addf %361, %365 : vector<64x32xf32>
    %c0_401 = arith.constant 0 : index
    %c0_402 = arith.constant 0 : index
    %367 = vector.load %arg1[%c0_401, %c0_402] : memref<256x128xf32, #tpu.memory_space<vmem>>, vector<32x16xf32>
    %c0_403 = arith.constant 0 : index
    %c0_404 = arith.constant 0 : index
    %368 = vector.load %arg2[%c0_403, %c0_404] : memref<256x128xf32, #tpu.memory_space<vmem>>, vector<32x16xf32>
    %cst_405 = arith.constant dense<0.000000e+00> : vector<64x16xf32>
    %369 = tpu.matmul %366, %367, %cst_405 {dimension_numbers = #tpu.dot_dimension_numbers<[1], [0], [0], [1], [0, 0, 1, 1], [], []>} : vector<64x32xf32>, vector<32x16xf32>, vector<64x16xf32> -> vector<64x16xf32>
    %cst_406 = arith.constant dense<0.000000e+00> : vector<64x16xf32>
    %370 = tpu.matmul %366, %368, %cst_406 {dimension_numbers = #tpu.dot_dimension_numbers<[1], [0], [0], [1], [0, 0, 1, 1], [], []>} : vector<64x32xf32>, vector<32x16xf32>, vector<64x16xf32> -> vector<64x16xf32>
    %371 = arith.maximumf %369, %370 : vector<64x16xf32>
    %c0_407 = arith.constant 0 : index
    %c0_408 = arith.constant 0 : index
    %372 = vector.load %arg23[%c0_407, %c0_408] : memref<64x1xf32, #tpu.memory_space<vmem>>, vector<64x1xf32>
    %373 = vector.broadcast %372 : vector<64x1xf32> to vector<64x16xf32>
    %374 = arith.addf %371, %373 : vector<64x16xf32>
    %cst_409 = arith.constant 0.000000e+00 : f32
    %375 = vector.broadcast %cst_409 : f32 to vector<64x16xf32>
    %376 = arith.maximumf %374, %375 : vector<64x16xf32>
    %c0_410 = arith.constant 0 : index
    %c1_411 = arith.constant 1 : index
    %377 = vector.load %arg36[%c0_410, %c1_411] : memref<64x384xf32, #tpu.memory_space<vmem>>, vector<64x16xf32>
    tpu.vector_store %arg36[%c0_410, %c1_411], %376 {strides = array<i32>} : memref<64x384xf32, #tpu.memory_space<vmem>>, vector<64x16xf32>,
    %cst_412 = arith.constant 0.000000e+00 : f32
    %378 = vector.broadcast %cst_412 : f32 to vector<64x1xf32>
    %c0_413 = arith.constant 0 : index
    %c17 = arith.constant 17 : index
    %379 = vector.load %arg36[%c0_413, %c17] : memref<64x384xf32, #tpu.memory_space<vmem>>, vector<64x1xf32>
    tpu.vector_store %arg36[%c0_413, %c17], %378 {strides = array<i32>} : memref<64x384xf32, #tpu.memory_space<vmem>>, vector<64x1xf32>,
    %c0_414 = arith.constant 0 : index
    %c0_415 = arith.constant 0 : index
    %c0_416 = arith.constant 0 : index
    %380 = vector.load %arg24[%c0_414, %c0_415, %c0_416] : memref<3x64x64xf32, #tpu.memory_space<vmem>>, vector<1x64x64xf32>
    %381 = vector.shape_cast %380 : vector<1x64x64xf32> to vector<64x64xf32>
    %c0_417 = arith.constant 0 : index
    %c0_418 = arith.constant 0 : index
    %382 = vector.load %arg36[%c0_417, %c0_418] : memref<64x384xf32, #tpu.memory_space<vmem>>, vector<64x16xf32>
    %cst_419 = arith.constant dense<0.000000e+00> : vector<64x16xf32>
    %383 = tpu.matmul %381, %382, %cst_419 {dimension_numbers = #tpu.dot_dimension_numbers<[1], [0], [0], [1], [0, 0, 1, 1], [], []>} : vector<64x64xf32>, vector<64x16xf32>, vector<64x16xf32> -> vector<64x16xf32>
    %c1_420 = arith.constant 1 : index
    %c0_421 = arith.constant 0 : index
    %c0_422 = arith.constant 0 : index
    %384 = vector.load %arg24[%c1_420, %c0_421, %c0_422] : memref<3x64x64xf32, #tpu.memory_space<vmem>>, vector<1x64x64xf32>
    %385 = vector.shape_cast %384 : vector<1x64x64xf32> to vector<64x64xf32>
    %c0_423 = arith.constant 0 : index
    %c1_424 = arith.constant 1 : index
    %386 = vector.load %arg36[%c0_423, %c1_424] : memref<64x384xf32, #tpu.memory_space<vmem>>, vector<64x16xf32>
    %cst_425 = arith.constant dense<0.000000e+00> : vector<64x16xf32>
    %387 = tpu.matmul %385, %386, %cst_425 {dimension_numbers = #tpu.dot_dimension_numbers<[1], [0], [0], [1], [0, 0, 1, 1], [], []>} : vector<64x64xf32>, vector<64x16xf32>, vector<64x16xf32> -> vector<64x16xf32>
    %388 = arith.addf %383, %387 : vector<64x16xf32>
    %c2_426 = arith.constant 2 : index
    %c0_427 = arith.constant 0 : index
    %c0_428 = arith.constant 0 : index
    %389 = vector.load %arg24[%c2_426, %c0_427, %c0_428] : memref<3x64x64xf32, #tpu.memory_space<vmem>>, vector<1x64x64xf32>
    %390 = vector.shape_cast %389 : vector<1x64x64xf32> to vector<64x64xf32>
    %c0_429 = arith.constant 0 : index
    %c2_430 = arith.constant 2 : index
    %391 = vector.load %arg36[%c0_429, %c2_430] : memref<64x384xf32, #tpu.memory_space<vmem>>, vector<64x16xf32>
    %cst_431 = arith.constant dense<0.000000e+00> : vector<64x16xf32>
    %392 = tpu.matmul %390, %391, %cst_431 {dimension_numbers = #tpu.dot_dimension_numbers<[1], [0], [0], [1], [0, 0, 1, 1], [], []>} : vector<64x64xf32>, vector<64x16xf32>, vector<64x16xf32> -> vector<64x16xf32>
    %393 = arith.addf %388, %392 : vector<64x16xf32>
    %c0_432 = arith.constant 0 : index
    %c0_433 = arith.constant 0 : index
    %394 = vector.load %arg25[%c0_432, %c0_433] : memref<64x1xf32, #tpu.memory_space<vmem>>, vector<64x1xf32>
    %395 = vector.broadcast %394 : vector<64x1xf32> to vector<64x16xf32>
    %396 = arith.addf %393, %395 : vector<64x16xf32>
    %cst_434 = arith.constant 0.000000e+00 : f32
    %397 = vector.broadcast %cst_434 : f32 to vector<64x16xf32>
    %398 = arith.maximumf %396, %397 : vector<64x16xf32>
    %c0_435 = arith.constant 0 : index
    %c1_436 = arith.constant 1 : index
    %399 = vector.load %arg37[%c0_435, %c1_436] : memref<64x384xf32, #tpu.memory_space<vmem>>, vector<64x16xf32>
    tpu.vector_store %arg37[%c0_435, %c1_436], %398 {strides = array<i32>} : memref<64x384xf32, #tpu.memory_space<vmem>>, vector<64x16xf32>,
    %cst_437 = arith.constant 0.000000e+00 : f32
    %400 = vector.broadcast %cst_437 : f32 to vector<64x1xf32>
    %c0_438 = arith.constant 0 : index
    %c17_439 = arith.constant 17 : index
    %401 = vector.load %arg37[%c0_438, %c17_439] : memref<64x384xf32, #tpu.memory_space<vmem>>, vector<64x1xf32>
    tpu.vector_store %arg37[%c0_438, %c17_439], %400 {strides = array<i32>} : memref<64x384xf32, #tpu.memory_space<vmem>>, vector<64x1xf32>,
    %c0_440 = arith.constant 0 : index
    %c0_441 = arith.constant 0 : index
    %c0_442 = arith.constant 0 : index
    %402 = vector.load %arg26[%c0_440, %c0_441, %c0_442] : memref<3x64x64xf32, #tpu.memory_space<vmem>>, vector<1x64x64xf32>
    %403 = vector.shape_cast %402 : vector<1x64x64xf32> to vector<64x64xf32>
    %c0_443 = arith.constant 0 : index
    %c0_444 = arith.constant 0 : index
    %404 = vector.load %arg37[%c0_443, %c0_444] : memref<64x384xf32, #tpu.memory_space<vmem>>, vector<64x16xf32>
    %cst_445 = arith.constant dense<0.000000e+00> : vector<64x16xf32>
    %405 = tpu.matmul %403, %404, %cst_445 {dimension_numbers = #tpu.dot_dimension_numbers<[1], [0], [0], [1], [0, 0, 1, 1], [], []>} : vector<64x64xf32>, vector<64x16xf32>, vector<64x16xf32> -> vector<64x16xf32>
    %c1_446 = arith.constant 1 : index
    %c0_447 = arith.constant 0 : index
    %c0_448 = arith.constant 0 : index
    %406 = vector.load %arg26[%c1_446, %c0_447, %c0_448] : memref<3x64x64xf32, #tpu.memory_space<vmem>>, vector<1x64x64xf32>
    %407 = vector.shape_cast %406 : vector<1x64x64xf32> to vector<64x64xf32>
    %c0_449 = arith.constant 0 : index
    %c1_450 = arith.constant 1 : index
    %408 = vector.load %arg37[%c0_449, %c1_450] : memref<64x384xf32, #tpu.memory_space<vmem>>, vector<64x16xf32>
    %cst_451 = arith.constant dense<0.000000e+00> : vector<64x16xf32>
    %409 = tpu.matmul %407, %408, %cst_451 {dimension_numbers = #tpu.dot_dimension_numbers<[1], [0], [0], [1], [0, 0, 1, 1], [], []>} : vector<64x64xf32>, vector<64x16xf32>, vector<64x16xf32> -> vector<64x16xf32>
    %410 = arith.addf %405, %409 : vector<64x16xf32>
    %c2_452 = arith.constant 2 : index
    %c0_453 = arith.constant 0 : index
    %c0_454 = arith.constant 0 : index
    %411 = vector.load %arg26[%c2_452, %c0_453, %c0_454] : memref<3x64x64xf32, #tpu.memory_space<vmem>>, vector<1x64x64xf32>
    %412 = vector.shape_cast %411 : vector<1x64x64xf32> to vector<64x64xf32>
    %c0_455 = arith.constant 0 : index
    %c2_456 = arith.constant 2 : index
    %413 = vector.load %arg37[%c0_455, %c2_456] : memref<64x384xf32, #tpu.memory_space<vmem>>, vector<64x16xf32>
    %cst_457 = arith.constant dense<0.000000e+00> : vector<64x16xf32>
    %414 = tpu.matmul %412, %413, %cst_457 {dimension_numbers = #tpu.dot_dimension_numbers<[1], [0], [0], [1], [0, 0, 1, 1], [], []>} : vector<64x64xf32>, vector<64x16xf32>, vector<64x16xf32> -> vector<64x16xf32>
    %415 = arith.addf %410, %414 : vector<64x16xf32>
    %c0_458 = arith.constant 0 : index
    %c0_459 = arith.constant 0 : index
    %416 = vector.load %arg1[%c0_458, %c0_459] : memref<256x128xf32, #tpu.memory_space<vmem>>, vector<16x8xf32>
    %c0_460 = arith.constant 0 : index
    %c0_461 = arith.constant 0 : index
    %417 = vector.load %arg2[%c0_460, %c0_461] : memref<256x128xf32, #tpu.memory_space<vmem>>, vector<16x8xf32>
    %cst_462 = arith.constant dense<0.000000e+00> : vector<64x8xf32>
    %418 = tpu.matmul %415, %416, %cst_462 {dimension_numbers = #tpu.dot_dimension_numbers<[1], [0], [0], [1], [0, 0, 1, 1], [], []>} : vector<64x16xf32>, vector<16x8xf32>, vector<64x8xf32> -> vector<64x8xf32>
    %cst_463 = arith.constant dense<0.000000e+00> : vector<64x8xf32>
    %419 = tpu.matmul %415, %417, %cst_463 {dimension_numbers = #tpu.dot_dimension_numbers<[1], [0], [0], [1], [0, 0, 1, 1], [], []>} : vector<64x16xf32>, vector<16x8xf32>, vector<64x8xf32> -> vector<64x8xf32>
    %420 = arith.maximumf %418, %419 : vector<64x8xf32>
    %c0_464 = arith.constant 0 : index
    %c0_465 = arith.constant 0 : index
    %421 = vector.load %arg27[%c0_464, %c0_465] : memref<64x1xf32, #tpu.memory_space<vmem>>, vector<64x1xf32>
    %422 = vector.broadcast %421 : vector<64x1xf32> to vector<64x8xf32>
    %423 = arith.addf %420, %422 : vector<64x8xf32>
    %cst_466 = arith.constant 0.000000e+00 : f32
    %424 = vector.broadcast %cst_466 : f32 to vector<64x8xf32>
    %425 = arith.maximumf %423, %424 : vector<64x8xf32>
    %c0_467 = arith.constant 0 : index
    %c1_468 = arith.constant 1 : index
    %426 = vector.load %arg36[%c0_467, %c1_468] : memref<64x384xf32, #tpu.memory_space<vmem>>, vector<64x8xf32>
    tpu.vector_store %arg36[%c0_467, %c1_468], %425 {strides = array<i32>} : memref<64x384xf32, #tpu.memory_space<vmem>>, vector<64x8xf32>,
    %cst_469 = arith.constant 0.000000e+00 : f32
    %427 = vector.broadcast %cst_469 : f32 to vector<64x1xf32>
    %c0_470 = arith.constant 0 : index
    %c9 = arith.constant 9 : index
    %428 = vector.load %arg36[%c0_470, %c9] : memref<64x384xf32, #tpu.memory_space<vmem>>, vector<64x1xf32>
    tpu.vector_store %arg36[%c0_470, %c9], %427 {strides = array<i32>} : memref<64x384xf32, #tpu.memory_space<vmem>>, vector<64x1xf32>,
    %c0_471 = arith.constant 0 : index
    %c0_472 = arith.constant 0 : index
    %c0_473 = arith.constant 0 : index
    %429 = vector.load %arg28[%c0_471, %c0_472, %c0_473] : memref<3x64x64xf32, #tpu.memory_space<vmem>>, vector<1x64x64xf32>
    %430 = vector.shape_cast %429 : vector<1x64x64xf32> to vector<64x64xf32>
    %c0_474 = arith.constant 0 : index
    %c0_475 = arith.constant 0 : index
    %431 = vector.load %arg36[%c0_474, %c0_475] : memref<64x384xf32, #tpu.memory_space<vmem>>, vector<64x8xf32>
    %cst_476 = arith.constant dense<0.000000e+00> : vector<64x8xf32>
    %432 = tpu.matmul %430, %431, %cst_476 {dimension_numbers = #tpu.dot_dimension_numbers<[1], [0], [0], [1], [0, 0, 1, 1], [], []>} : vector<64x64xf32>, vector<64x8xf32>, vector<64x8xf32> -> vector<64x8xf32>
    %c1_477 = arith.constant 1 : index
    %c0_478 = arith.constant 0 : index
    %c0_479 = arith.constant 0 : index
    %433 = vector.load %arg28[%c1_477, %c0_478, %c0_479] : memref<3x64x64xf32, #tpu.memory_space<vmem>>, vector<1x64x64xf32>
    %434 = vector.shape_cast %433 : vector<1x64x64xf32> to vector<64x64xf32>
    %c0_480 = arith.constant 0 : index
    %c1_481 = arith.constant 1 : index
    %435 = vector.load %arg36[%c0_480, %c1_481] : memref<64x384xf32, #tpu.memory_space<vmem>>, vector<64x8xf32>
    %cst_482 = arith.constant dense<0.000000e+00> : vector<64x8xf32>
    %436 = tpu.matmul %434, %435, %cst_482 {dimension_numbers = #tpu.dot_dimension_numbers<[1], [0], [0], [1], [0, 0, 1, 1], [], []>} : vector<64x64xf32>, vector<64x8xf32>, vector<64x8xf32> -> vector<64x8xf32>
    %437 = arith.addf %432, %436 : vector<64x8xf32>
    %c2_483 = arith.constant 2 : index
    %c0_484 = arith.constant 0 : index
    %c0_485 = arith.constant 0 : index
    %438 = vector.load %arg28[%c2_483, %c0_484, %c0_485] : memref<3x64x64xf32, #tpu.memory_space<vmem>>, vector<1x64x64xf32>
    %439 = vector.shape_cast %438 : vector<1x64x64xf32> to vector<64x64xf32>
    %c0_486 = arith.constant 0 : index
    %c2_487 = arith.constant 2 : index
    %440 = vector.load %arg36[%c0_486, %c2_487] : memref<64x384xf32, #tpu.memory_space<vmem>>, vector<64x8xf32>
    %cst_488 = arith.constant dense<0.000000e+00> : vector<64x8xf32>
    %441 = tpu.matmul %439, %440, %cst_488 {dimension_numbers = #tpu.dot_dimension_numbers<[1], [0], [0], [1], [0, 0, 1, 1], [], []>} : vector<64x64xf32>, vector<64x8xf32>, vector<64x8xf32> -> vector<64x8xf32>
    %442 = arith.addf %437, %441 : vector<64x8xf32>
    %cst_489 = arith.constant dense<0.000000e+00> : vector<64xf32>
    %443 = vector.multi_reduction <add>, %442, %cst_489 [1] : vector<64x8xf32> to vector<64xf32>
    %444 = vector.shape_cast %443 : vector<64xf32> to vector<64x1xf32>
    %445 = arith.mulf %442, %442 : vector<64x8xf32>
    %cst_490 = arith.constant dense<0.000000e+00> : vector<64xf32>
    %446 = vector.multi_reduction <add>, %445, %cst_490 [1] : vector<64x8xf32> to vector<64xf32>
    %447 = vector.shape_cast %446 : vector<64xf32> to vector<64x1xf32>
    %448 = vector.extract_strided_slice %444 {offsets = [0, 0], sizes = [32, 1], strides = [1, 1]} : vector<64x1xf32> to vector<32x1xf32>
    %449 = vector.extract_strided_slice %447 {offsets = [0, 0], sizes = [32, 1], strides = [1, 1]} : vector<64x1xf32> to vector<32x1xf32>
    %450 = vector.extract_strided_slice %444 {offsets = [32, 0], sizes = [32, 1], strides = [1, 1]} : vector<64x1xf32> to vector<32x1xf32>
    %451 = arith.addf %448, %450 : vector<32x1xf32>
    %452 = vector.extract_strided_slice %447 {offsets = [32, 0], sizes = [32, 1], strides = [1, 1]} : vector<64x1xf32> to vector<32x1xf32>
    %453 = arith.addf %449, %452 : vector<32x1xf32>
    %cst_491 = arith.constant 6.250000e-02 : f32
    %454 = vector.broadcast %cst_491 : f32 to vector<32x1xf32>
    %455 = arith.mulf %451, %454 : vector<32x1xf32>
    %cst_492 = arith.constant 6.250000e-02 : f32
    %456 = vector.broadcast %cst_492 : f32 to vector<32x1xf32>
    %457 = arith.mulf %453, %456 : vector<32x1xf32>
    %458 = arith.mulf %455, %455 : vector<32x1xf32>
    %459 = arith.subf %457, %458 : vector<32x1xf32>
    %cst_493 = arith.constant 0.000000e+00 : f32
    %460 = vector.broadcast %cst_493 : f32 to vector<32x1xf32>
    %461 = arith.maximumf %459, %460 : vector<32x1xf32>
    %c0_494 = arith.constant 0 : index
    %c0_495 = arith.constant 0 : index
    %462 = vector.load %arg29[%c0_494, %c0_495] : memref<32x1xf32, #tpu.memory_space<vmem>>, vector<32x1xf32>
    %cst_496 = arith.constant 9.99999974E-6 : f32
    %463 = vector.broadcast %cst_496 : f32 to vector<32x1xf32>
    %464 = arith.addf %461, %463 : vector<32x1xf32>
    %465 = math.rsqrt %464 : vector<32x1xf32>
    %466 = arith.mulf %462, %465 : vector<32x1xf32>
    %c0_497 = arith.constant 0 : index
    %c0_498 = arith.constant 0 : index
    %467 = vector.load %arg30[%c0_497, %c0_498] : memref<32x1xf32, #tpu.memory_space<vmem>>, vector<32x1xf32>
    %468 = arith.mulf %455, %466 : vector<32x1xf32>
    %469 = arith.subf %467, %468 : vector<32x1xf32>
    %470 = tpu.concatenate %466, %466 in 0 : vector<32x1xf32>, vector<32x1xf32> -> vector<64x1xf32>
    %471 = tpu.concatenate %469, %469 in 0 : vector<32x1xf32>, vector<32x1xf32> -> vector<64x1xf32>
    %472 = vector.broadcast %470 : vector<64x1xf32> to vector<64x8xf32>
    %473 = arith.mulf %442, %472 : vector<64x8xf32>
    %474 = vector.broadcast %471 : vector<64x1xf32> to vector<64x8xf32>
    %475 = arith.addf %473, %474 : vector<64x8xf32>
    %cst_499 = arith.constant 0.000000e+00 : f32
    %476 = vector.broadcast %cst_499 : f32 to vector<64x8xf32>
    %477 = arith.maximumf %475, %476 : vector<64x8xf32>
    %c0_500 = arith.constant 0 : index
    %c1_501 = arith.constant 1 : index
    %478 = vector.load %arg37[%c0_500, %c1_501] : memref<64x384xf32, #tpu.memory_space<vmem>>, vector<64x8xf32>
    tpu.vector_store %arg37[%c0_500, %c1_501], %477 {strides = array<i32>} : memref<64x384xf32, #tpu.memory_space<vmem>>, vector<64x8xf32>,
    %cst_502 = arith.constant 0.000000e+00 : f32
    %479 = vector.broadcast %cst_502 : f32 to vector<64x1xf32>
    %c0_503 = arith.constant 0 : index
    %c9_504 = arith.constant 9 : index
    %480 = vector.load %arg37[%c0_503, %c9_504] : memref<64x384xf32, #tpu.memory_space<vmem>>, vector<64x1xf32>
    tpu.vector_store %arg37[%c0_503, %c9_504], %479 {strides = array<i32>} : memref<64x384xf32, #tpu.memory_space<vmem>>, vector<64x1xf32>,
    %c0_505 = arith.constant 0 : index
    %c0_506 = arith.constant 0 : index
    %c0_507 = arith.constant 0 : index
    %481 = vector.load %arg31[%c0_505, %c0_506, %c0_507] : memref<3x64x64xf32, #tpu.memory_space<vmem>>, vector<1x64x64xf32>
    %482 = vector.shape_cast %481 : vector<1x64x64xf32> to vector<64x64xf32>
    %c0_508 = arith.constant 0 : index
    %c0_509 = arith.constant 0 : index
    %483 = vector.load %arg37[%c0_508, %c0_509] : memref<64x384xf32, #tpu.memory_space<vmem>>, vector<64x8xf32>
    %cst_510 = arith.constant dense<0.000000e+00> : vector<64x8xf32>
    %484 = tpu.matmul %482, %483, %cst_510 {dimension_numbers = #tpu.dot_dimension_numbers<[1], [0], [0], [1], [0, 0, 1, 1], [], []>} : vector<64x64xf32>, vector<64x8xf32>, vector<64x8xf32> -> vector<64x8xf32>
    %c1_511 = arith.constant 1 : index
    %c0_512 = arith.constant 0 : index
    %c0_513 = arith.constant 0 : index
    %485 = vector.load %arg31[%c1_511, %c0_512, %c0_513] : memref<3x64x64xf32, #tpu.memory_space<vmem>>, vector<1x64x64xf32>
    %486 = vector.shape_cast %485 : vector<1x64x64xf32> to vector<64x64xf32>
    %c0_514 = arith.constant 0 : index
    %c1_515 = arith.constant 1 : index
    %487 = vector.load %arg37[%c0_514, %c1_515] : memref<64x384xf32, #tpu.memory_space<vmem>>, vector<64x8xf32>
    %cst_516 = arith.constant dense<0.000000e+00> : vector<64x8xf32>
    %488 = tpu.matmul %486, %487, %cst_516 {dimension_numbers = #tpu.dot_dimension_numbers<[1], [0], [0], [1], [0, 0, 1, 1], [], []>} : vector<64x64xf32>, vector<64x8xf32>, vector<64x8xf32> -> vector<64x8xf32>
    %489 = arith.addf %484, %488 : vector<64x8xf32>
    %c2_517 = arith.constant 2 : index
    %c0_518 = arith.constant 0 : index
    %c0_519 = arith.constant 0 : index
    %490 = vector.load %arg31[%c2_517, %c0_518, %c0_519] : memref<3x64x64xf32, #tpu.memory_space<vmem>>, vector<1x64x64xf32>
    %491 = vector.shape_cast %490 : vector<1x64x64xf32> to vector<64x64xf32>
    %c0_520 = arith.constant 0 : index
    %c2_521 = arith.constant 2 : index
    %492 = vector.load %arg37[%c0_520, %c2_521] : memref<64x384xf32, #tpu.memory_space<vmem>>, vector<64x8xf32>
    %cst_522 = arith.constant dense<0.000000e+00> : vector<64x8xf32>
    %493 = tpu.matmul %491, %492, %cst_522 {dimension_numbers = #tpu.dot_dimension_numbers<[1], [0], [0], [1], [0, 0, 1, 1], [], []>} : vector<64x64xf32>, vector<64x8xf32>, vector<64x8xf32> -> vector<64x8xf32>
    %494 = arith.addf %489, %493 : vector<64x8xf32>
    %c0_523 = arith.constant 0 : index
    %c0_524 = arith.constant 0 : index
    %495 = vector.load %arg32[%c0_523, %c0_524] : memref<64x1xf32, #tpu.memory_space<vmem>>, vector<64x1xf32>
    %496 = vector.broadcast %495 : vector<64x1xf32> to vector<64x8xf32>
    %497 = arith.addf %494, %496 : vector<64x8xf32>
    %cst_525 = arith.constant 0.000000e+00 : f32
    %498 = vector.broadcast %cst_525 : f32 to vector<64x8xf32>
    %499 = arith.maximumf %497, %498 : vector<64x8xf32>
    %c0_526 = arith.constant 0 : index
    %c0_527 = arith.constant 0 : index
    %500 = vector.load %arg36[%c0_526, %c0_527] : memref<64x384xf32, #tpu.memory_space<vmem>>, vector<64x8xf32>
    tpu.vector_store %arg36[%c0_526, %c0_527], %499 {strides = array<i32>} : memref<64x384xf32, #tpu.memory_space<vmem>>, vector<64x8xf32>,
    %c0_528 = arith.constant 0 : index
    %c0_529 = arith.constant 0 : index
    %c0_530 = arith.constant 0 : index
    %501 = vector.load %arg33[%c0_528, %c0_529, %c0_530] : memref<4x32x64xf32, #tpu.memory_space<vmem>>, vector<1x32x64xf32>
    %502 = vector.shape_cast %501 : vector<1x32x64xf32> to vector<32x64xf32>
    %c0_531 = arith.constant 0 : index
    %c0_532 = arith.constant 0 : index
    %503 = vector.load %arg36[%c0_531, %c0_532] : memref<64x384xf32, #tpu.memory_space<vmem>>, vector<64x5xf32>
    %cst_533 = arith.constant dense<0.000000e+00> : vector<32x5xf32>
    %504 = tpu.matmul %502, %503, %cst_533 {dimension_numbers = #tpu.dot_dimension_numbers<[1], [0], [0], [1], [0, 0, 1, 1], [], []>} : vector<32x64xf32>, vector<64x5xf32>, vector<32x5xf32> -> vector<32x5xf32>
    %c1_534 = arith.constant 1 : index
    %c0_535 = arith.constant 0 : index
    %c0_536 = arith.constant 0 : index
    %505 = vector.load %arg33[%c1_534, %c0_535, %c0_536] : memref<4x32x64xf32, #tpu.memory_space<vmem>>, vector<1x32x64xf32>
    %506 = vector.shape_cast %505 : vector<1x32x64xf32> to vector<32x64xf32>
    %c0_537 = arith.constant 0 : index
    %c1_538 = arith.constant 1 : index
    %507 = vector.load %arg36[%c0_537, %c1_538] : memref<64x384xf32, #tpu.memory_space<vmem>>, vector<64x5xf32>
    %cst_539 = arith.constant dense<0.000000e+00> : vector<32x5xf32>
    %508 = tpu.matmul %506, %507, %cst_539 {dimension_numbers = #tpu.dot_dimension_numbers<[1], [0], [0], [1], [0, 0, 1, 1], [], []>} : vector<32x64xf32>, vector<64x5xf32>, vector<32x5xf32> -> vector<32x5xf32>
    %509 = arith.addf %504, %508 : vector<32x5xf32>
    %c2_540 = arith.constant 2 : index
    %c0_541 = arith.constant 0 : index
    %c0_542 = arith.constant 0 : index
    %510 = vector.load %arg33[%c2_540, %c0_541, %c0_542] : memref<4x32x64xf32, #tpu.memory_space<vmem>>, vector<1x32x64xf32>
    %511 = vector.shape_cast %510 : vector<1x32x64xf32> to vector<32x64xf32>
    %c0_543 = arith.constant 0 : index
    %c2_544 = arith.constant 2 : index
    %512 = vector.load %arg36[%c0_543, %c2_544] : memref<64x384xf32, #tpu.memory_space<vmem>>, vector<64x5xf32>
    %cst_545 = arith.constant dense<0.000000e+00> : vector<32x5xf32>
    %513 = tpu.matmul %511, %512, %cst_545 {dimension_numbers = #tpu.dot_dimension_numbers<[1], [0], [0], [1], [0, 0, 1, 1], [], []>} : vector<32x64xf32>, vector<64x5xf32>, vector<32x5xf32> -> vector<32x5xf32>
    %514 = arith.addf %509, %513 : vector<32x5xf32>
    %c3_546 = arith.constant 3 : index
    %c0_547 = arith.constant 0 : index
    %c0_548 = arith.constant 0 : index
    %515 = vector.load %arg33[%c3_546, %c0_547, %c0_548] : memref<4x32x64xf32, #tpu.memory_space<vmem>>, vector<1x32x64xf32>
    %516 = vector.shape_cast %515 : vector<1x32x64xf32> to vector<32x64xf32>
    %c0_549 = arith.constant 0 : index
    %c3_550 = arith.constant 3 : index
    %517 = vector.load %arg36[%c0_549, %c3_550] : memref<64x384xf32, #tpu.memory_space<vmem>>, vector<64x5xf32>
    %cst_551 = arith.constant dense<0.000000e+00> : vector<32x5xf32>
    %518 = tpu.matmul %516, %517, %cst_551 {dimension_numbers = #tpu.dot_dimension_numbers<[1], [0], [0], [1], [0, 0, 1, 1], [], []>} : vector<32x64xf32>, vector<64x5xf32>, vector<32x5xf32> -> vector<32x5xf32>
    %519 = arith.addf %514, %518 : vector<32x5xf32>
    %c0_552 = arith.constant 0 : index
    %c0_553 = arith.constant 0 : index
    %520 = vector.load %arg34[%c0_552, %c0_553] : memref<32x1xf32, #tpu.memory_space<vmem>>, vector<32x1xf32>
    %521 = vector.broadcast %520 : vector<32x1xf32> to vector<32x5xf32>
    %522 = arith.addf %519, %521 : vector<32x5xf32>
    %523 = math.tanh %522 : vector<32x5xf32>
    %524 = vector.extract_strided_slice %523 {offsets = [0, 0], sizes = [16, 5], strides = [1, 1]} : vector<32x5xf32> to vector<16x5xf32>
    %c0_554 = arith.constant 0 : index
    %c0_555 = arith.constant 0 : index
    %c0_556 = arith.constant 0 : index
    %525 = vector.load %arg35[%c0_554, %c0_555, %c0_556] : memref<2x16x5xf32, #tpu.memory_space<vmem>>, vector<1x16x5xf32>
    %526 = vector.shape_cast %525 : vector<1x16x5xf32> to vector<16x5xf32>
    %527 = vector.shape_cast %524 : vector<16x5xf32> to vector<1x16x5xf32>
    tpu.vector_store %arg35[%c0_554, %c0_555, %c0_556], %527 {strides = array<i32>} : memref<2x16x5xf32, #tpu.memory_space<vmem>>, vector<1x16x5xf32>,
    %528 = vector.extract_strided_slice %523 {offsets = [16, 0], sizes = [16, 5], strides = [1, 1]} : vector<32x5xf32> to vector<16x5xf32>
    %c1_557 = arith.constant 1 : index
    %c0_558 = arith.constant 0 : index
    %c0_559 = arith.constant 0 : index
    %529 = vector.load %arg35[%c1_557, %c0_558, %c0_559] : memref<2x16x5xf32, #tpu.memory_space<vmem>>, vector<1x16x5xf32>
    %530 = vector.shape_cast %529 : vector<1x16x5xf32> to vector<16x5xf32>
    %531 = vector.shape_cast %528 : vector<16x5xf32> to vector<1x16x5xf32>
    tpu.vector_store %arg35[%c1_557, %c0_558, %c0_559], %531 {strides = array<i32>} : memref<2x16x5xf32, #tpu.memory_space<vmem>>, vector<1x16x5xf32>,
    return
  }
}

</mosaic_0001>

<bundles_post_ra>
// kernel: tpu_custom_call.1
= control target key start
LH: loop header
LB: loop body
LE: loop exit
PB: predicated region body
PF: predicated region fallthrough
CT: control target
= control target key end

     0   :  { %s10133_s6 = smov 1   ;;  %s10134_s10 = smov 2   ;;  %s12142_s0 = inlined_call_operand.smem [shape: u32[36], index: -1, kind: input, shape index: {}] }
   0x1   :  { %s10199_s5 = sld [smem:[%s12142_s0]]   ;;  %s10135_s14 = smov 3  }
   0x2   :  { %s10204_s9 = sld [smem:[%s12142_s0 + %s10133_s6]]   ;;  %s10136_s18 = smov 4  }
   0x3   :  { %s10209_s13 = sld [smem:[%s12142_s0 + %s10134_s10]]   ;;  %s10137_s22 = smov 5  }
   0x4   :  { %s10214_s17 = sld [smem:[%s12142_s0 + %s10135_s14]]   ;;  %s10138_s26 = smov 6  }
   0x5   :  { %s10219_s21 = sld [smem:[%s12142_s0 + %s10136_s18]]   ;;  %s10139_s30 = smov 7  }
   0x6   :  { %s10224_s25 = sld [smem:[%s12142_s0 + %s10137_s22]]   ;;  %s10140_s4 = smov 8  }
   0x7   :  { %s10229_s29 = sld [smem:[%s12142_s0 + %s10138_s26]]   ;;  %s10141_s10 = smov 9  }
   0x8   :  { %12161 = sst [smem:[#allocation26_spill]] %s10204_s9  ;;  %s10142_s15 = smov 10  }
   0x9   :  { %s10234_s3 = sld [smem:[%s12142_s0 + %s10139_s30]]   ;;  %s10143_s20 = smov 11  }
   0xa   :  { %s10239_s8 = sld [smem:[%s12142_s0 + %s10140_s4]]   ;;  %s10144_s26 = smov 12  }
   0xb   :  { %s10244_s14 = sld [smem:[%s12142_s0 + %s10141_s10]]   ;;  %s10145_s1 = smov 13  }
   0xc   :  { %s10249_s19 = sld [smem:[%s12142_s0 + %s10142_s15]]   ;;  %s10146_s7 = smov 14  }
   0xd   :  { %12162 = sst [smem:[#allocation27_spill]] %s10229_s29  ;;  %s10147_s15 = smov 15  }
   0xe   :  { %s10254_s24 = sld [smem:[%s12142_s0 + %s10143_s20]]   ;;  %s10148_s22 = smov 16  }
   0xf   :  { %12163 = sst [smem:[#allocation28_spill]] %s10234_s3  ;;  %s10149_s28 = smov 17  }
  0x10   :  { %12164 = sst [smem:[#allocation29_spill]] %s10239_s8 }
  0x11   :  { %12165 = sst [smem:[#allocation30_spill]] %s10244_s14 }
  0x12   :  { %s10259_s30 = sld [smem:[%s12142_s0 + %s10144_s26]]  }
  0x13   :  { %s10264_s6 = sld [smem:[%s12142_s0 + %s10145_s1]]  }
  0x14   :  { %12166 = sst [smem:[#allocation31_spill]] %s10254_s24 }
  0x15   :  { %s10269_s12 = sld [smem:[%s12142_s0 + %s10146_s7]]   ;;  %s10150_s7 = smov 18  }
  0x16   :  { %s10274_s20 = sld [smem:[%s12142_s0 + %s10147_s15]]   ;;  %s10151_s15 = smov 19  }
  0x17   :  { %s10279_s27 = sld [smem:[%s12142_s0 + %s10148_s22]]   ;;  %s10152_s22 = smov 20  }
  0x18   :  { %s10284_s4 = sld [smem:[%s12142_s0 + %s10149_s28]]   ;;  %s10153_s28 = smov 21  }
  0x19   :  { %12167 = sst [smem:[#allocation32_spill]] %s10264_s6 }
  0x1a   :  { %s10289_s6 = sld [smem:[%s12142_s0 + %s10150_s7]]   ;;  %s10154_s7 = smov 22  }
  0x1c   :  { %12168 = sst [smem:[#allocation33_spill]] %s10274_s20 }
  0x1d   :  { %12169 = sst [smem:[#allocation34_spill]] %s10279_s27 }
  0x1e   :  { %12170 = sst [smem:[#allocation35_spill]] %s10284_s4 }
  0x1f   :  { %s10294_s20 = sld [smem:[%s12142_s0 + %s10151_s15]]   ;;  %s10155_s15 = smov 23  }
  0x20   :  { %12171 = sst [smem:[#allocation36_spill]] %s10289_s6 }
  0x21   :  { %s10299_s27 = sld [smem:[%s12142_s0 + %s10152_s22]]   ;;  %s10156_s22 = smov 24  }
  0x22   :  { %s10304_s4 = sld [smem:[%s12142_s0 + %s10153_s28]]   ;;  %s10157_s28 = smov 25  }
  0x23   :  { %s10309_s6 = sld [smem:[%s12142_s0 + %s10154_s7]]   ;;  %s10158_s7 = smov 26  }
  0x24   :  { %s10319_s9 = sld [smem:[%s12142_s0 + %s10156_s22]]   ;;  %s10160_s22 = smov 28  }
  0x25   :  { %12172 = sst [smem:[#allocation37_spill]] %s10294_s20 }
  0x26   :  { %s10314_s20 = sld [smem:[%s12142_s0 + %s10155_s15]]   ;;  %s10159_s15 = smov 27  }
  0x27   :  { %s10329_s24 = sld [smem:[%s12142_s0 + %s10158_s7]]   ;;  %s10162_s7 = smov 30  }
  0x28   :  { %12173 = sst [smem:[#allocation38_spill]] %s10304_s4 }
  0x29   :  { %s10324_s4 = sld [smem:[%s12142_s0 + %s10157_s28]]   ;;  %s10161_s28 = smov 29  }
  0x2a   :  { %s10339_s8 = sld [smem:[%s12142_s0 + %s10160_s22]]   ;;  %s10164_s22 = smov 32  }
  0x2b   :  { %s10349_s14 = sld [smem:[%s12142_s0 + %s10162_s7]]   ;;  %s10166_s7 = smov 34  }
  0x2c   :  { %12174 = sst [smem:[#allocation39_spill]] %s10314_s20 }
  0x2d   :  { %s10334_s20 = sld [smem:[%s12142_s0 + %s10159_s15]]   ;;  %s10163_s15 = smov 31  }
  0x2e   :  { %s10359_s29 = sld [smem:[%s12142_s0 + %s10164_s22]]  }
  0x2f   :  { %12175 = sst [smem:[#allocation40_spill]] %s10324_s4 }
  0x30   :  { %s10344_s4 = sld [smem:[%s12142_s0 + %s10161_s28]]   ;;  %s10165_s28 = smov 33  }
  0x31   :  { %12178 = sst [smem:[#allocation43_spill]] %s10349_s14 }
  0x32   :  { %s10369_s14 = sld [smem:[%s12142_s0 + %s10166_s7]]  }
  0x33   :  { %12176 = sst [smem:[#allocation41_spill]] %s10334_s20 }
  0x34   :  { %s10354_s20 = sld [smem:[%s12142_s0 + %s10163_s15]]   ;;  %s10167_s15 = smov 35  }
  0x35   :  { %s10374_s3 = sld [smem:[%s12142_s0 + %s10167_s15]]  }
  0x36   :  { %12177 = sst [smem:[#allocation42_spill]] %s10344_s4 }
  0x37   :  { %s10364_s4 = sld [smem:[%s12142_s0 + %s10165_s28]]  }
  0x38   :  { %76 = vsyncpa [#allocation5], 0 }
  0x39   :  { %77 = vsyncpa [#allocation7], 0 }
  0x3a   :  { %78 = vsyncpa [#allocation10], 0 }
  0x3b   :  { %79 = vsyncpa [#allocation13], 0 }
  0x3c   :  { %80 = vsyncpa [#allocation16], 0 }
  0x3d   :  { %81 = vsyncpa [#allocation19], 0  ;;  %s117_s22 = sshll.u32 %s10249_s19, 4  ;;  %s10168_s23 = smov [#allocation6]   ;;  %s118_s22 = int_to_ptr.hbm [resolvable:$true] %s117_s22 }
  0x3e   :  { %s119_s26 = sshll.u32 %s10168_s23, 4  ;;  %s147_s28 = sshll.u32 %s10269_s12, 4  ;;  %s120_s26 = int_to_ptr.vmem [resolvable:$true] %s119_s26  ;;  %s148_s28 = int_to_ptr.hbm [resolvable:$true] %s147_s28 }
  0x3f   :  { %s9881_s1 = sshra.s32 %s118_s22, 4  ;;  %s9885_s2 = scalar_lea.hbm %s10249_s19, 160  ;;  %s9882_s1 = int_to_ptr.hbm [resolvable:$true] %s9881_s1 }
  0x40   :  { %s9883_s0 = scalar_lea.hbm %s9882_s1, 160  ;;  %p9886_p1 = scmp.lt.s32.totalorder %s9882_s1, %s10249_s19 }
  0x41   :  { %p9884_p0 = scmp.ne.s32.totalorder %s9882_s1, %s9883_s0  ;;  %p9887_p2 = scmp.lt.s32.totalorder %s9885_s2, %s9883_s0 }
  0x43   :  { %p9888_p3 = por %p9887_p2, %p9886_p1 }
  0x45   :  { %p9889_p4 = pnand %p9888_p3, %p9884_p0 }
  0x47   :  { %9892 = shalt.err (!%p9889_p4)
}
  0x48   :  { %s10169_s7 = smov 128   ;;  %s10170_s10 = smov 8  }
  0x49   :  { %125 = dma.hbm_to_vmem [thread:$0]  %s118_s22, 2560, %s120_s26, [#allocation7], %s10169_s7, %s10169_s7, %s10170_s10  }
  0x4a   :  { %s10171_s11 = smov [#allocation9]   ;;  %s185_s16 = sshll.u32 %s10309_s6, 4  ;;  %s10384_s16 = int_to_ptr.hbm [resolvable:$true] %s185_s16 }
  0x4b   :  { %s149_s15 = sshll.u32 %s10171_s11, 4  ;;  %s9905_s19 = sshra.s32 %s148_s28, 4  ;;  %s150_s15 = int_to_ptr.vmem [resolvable:$true] %s149_s15  ;;  %s9906_s19 = int_to_ptr.hbm [resolvable:$true] %s9905_s19 }
  0x4c   :  { %s9907_s18 = scalar_lea.hbm %s9906_s19, 160  ;;  %s9909_s23 = scalar_lea.hbm %s10269_s12, 160 }
  0x4d   :  { %p9908_p5 = scmp.ne.s32.totalorder %s9906_s19, %s9907_s18  ;;  %p9910_p6 = scmp.lt.s32.totalorder %s9906_s19, %s10269_s12 }
  0x4e   :  { %p9911_p7 = scmp.lt.s32.totalorder %s9909_s23, %s9907_s18 }
  0x50   :  { %p9912_p8 = por %p9911_p7, %p9910_p6 }
  0x52   :  { %p9913_p9 = pnand %p9912_p8, %p9908_p5 }
  0x54   :  { %9916 = shalt.err (!%p9913_p9)
}
  0x55   :  { %155 = dma.hbm_to_vmem [thread:$0]  %s148_s28, 2560, %s150_s15, [#allocation10], %s10169_s7, %s10169_s7, %s10170_s10  }
  0x56   :  { %s215_s22 = sshll.u32 %s10329_s24, 4  ;;  %s10172_s26 = smov [#allocation12]   ;;  %s10392_s22 = int_to_ptr.hbm [resolvable:$true] %s215_s22 }
  0x57   :  { %s187_s1 = sshll.u32 %s10172_s26, 4  ;;  %s9929_s0 = sshra.s32 %s10384_s16, 4  ;;  %s188_s1 = int_to_ptr.vmem [resolvable:$true] %s187_s1  ;;  %s9930_s0 = int_to_ptr.hbm [resolvable:$true] %s9929_s0 }
  0x58   :  { %s9931_s12 = scalar_lea.hbm %s9930_s0, 192  ;;  %s9933_s2 = scalar_lea.hbm %s10309_s6, 192 }
  0x59   :  { %p9932_p10 = scmp.ne.s32.totalorder %s9930_s0, %s9931_s12  ;;  %p9934_p11 = scmp.lt.s32.totalorder %s9930_s0, %s10309_s6 }
  0x5a   :  { %p9935_p12 = scmp.lt.s32.totalorder %s9933_s2, %s9931_s12 }
  0x5c   :  { %p9936_p13 = por %p9935_p12, %p9934_p11 }
  0x5e   :  { %p9937_p0 = pnand %p9936_p13, %p9932_p10 }
  0x60   :  { %9940 = shalt.err (!%p9937_p0)
}
  0x61   :  { %193 = dma.hbm_to_vmem [thread:$0]  %s10384_s16, 3072, %s188_s1, [#allocation13], %s10169_s7, %s10169_s7, %s10170_s10  }
  0x62   :  { %s10173_s28 = smov [#allocation15]   ;;  %s90_s15 = sshll.u32 %s10209_s13, 4  ;;  %s10402_s15 = int_to_ptr.hbm [resolvable:$true] %s90_s15 }
  0x63   :  { %s217_s11 = sshll.u32 %s10173_s28, 4  ;;  %s9953_s6 = sshra.s32 %s10392_s22, 4  ;;  %s218_s11 = int_to_ptr.vmem [resolvable:$true] %s217_s11  ;;  %s9954_s6 = int_to_ptr.hbm [resolvable:$true] %s9953_s6 }
  0x64   :  { %s9955_s19 = scalar_lea.hbm %s9954_s6, 192  ;;  %s9957_s18 = scalar_lea.hbm %s10329_s24, 192 }
  0x65   :  { %p9956_p1 = scmp.ne.s32.totalorder %s9954_s6, %s9955_s19  ;;  %p9958_p2 = scmp.lt.s32.totalorder %s9954_s6, %s10329_s24 }
  0x66   :  { %p9959_p3 = scmp.lt.s32.totalorder %s9957_s18, %s9955_s19 }
  0x68   :  { %p9960_p4 = por %p9959_p3, %p9958_p2 }
  0x6a   :  { %p9961_p5 = pnand %p9960_p4, %p9956_p1 }
  0x6c   :  { %9964 = shalt.err (!%p9961_p5)
}
  0x6d   :  { %223 = dma.hbm_to_vmem [thread:$0]  %s10392_s22, 3072, %s218_s11, [#allocation16], %s10169_s7, %s10169_s7, %s10170_s10  }
  0x6e   :  { %s132_s16 = sshll.u32 %s10259_s30, 4  ;;  %s10174_s23 = smov [#allocation4]   ;;  %s10412_s16 = int_to_ptr.hbm [resolvable:$true] %s132_s16 }
  0x6f   :  { %s92_s26 = sshll.u32 %s10174_s23, 4  ;;  %s9977_s24 = sshra.s32 %s10402_s15, 4  ;;  %s93_s26 = int_to_ptr.vmem [resolvable:$true] %s92_s26  ;;  %s9978_s24 = int_to_ptr.hbm [resolvable:$true] %s9977_s24 }
  0x70   :  { %s9979_s1 = scalar_lea.hbm %s9978_s24, 256  ;;  %s9981_s0 = scalar_lea.hbm %s10209_s13, 256 }
  0x71   :  { %p9980_p6 = scmp.ne.s32.totalorder %s9978_s24, %s9979_s1  ;;  %p9982_p7 = scmp.lt.s32.totalorder %s9978_s24, %s10209_s13 }
  0x72   :  { %p9983_p8 = scmp.lt.s32.totalorder %s9981_s0, %s9979_s1 }
  0x74   :  { %p9984_p9 = por %p9983_p8, %p9982_p7 }
  0x76   :  { %p9985_p10 = pnand %p9984_p9, %p9980_p6 }
  0x78   :  { %9988 = shalt.err (!%p9985_p10)
}
  0x79   :  { %98 = dma.hbm_to_vmem [thread:$0]  %s10402_s15, 4096, %s93_s26, [#allocation5], %s10169_s7, %s10169_s7, %s10170_s10  }
  0x7a   :  { %s10175_s22 = smov [#allocation8]   ;;  %s170_s2 = sshll.u32 %s10299_s27, 4  ;;  %s10422_s2 = int_to_ptr.hbm [resolvable:$true] %s170_s2 }
  0x7b   :  { %s134_s12 = sshll.u32 %s10175_s22, 4  ;;  %s10001_s13 = sshra.s32 %s10412_s16, 4  ;;  %s135_s12 = int_to_ptr.vmem [resolvable:$true] %s134_s12  ;;  %s10002_s13 = int_to_ptr.hbm [resolvable:$true] %s10001_s13 }
  0x7c   :  { %s10003_s28 = scalar_lea.hbm %s10002_s13, 160  ;;  %s10005_s11 = scalar_lea.hbm %s10259_s30, 160 }
  0x7d   :  { %p10004_p11 = scmp.ne.s32.totalorder %s10002_s13, %s10003_s28  ;;  %p10006_p12 = scmp.lt.s32.totalorder %s10002_s13, %s10259_s30 }
  0x7e   :  { %p10007_p13 = scmp.lt.s32.totalorder %s10005_s11, %s10003_s28 }
  0x80   :  { %p10008_p0 = por %p10007_p13, %p10006_p12 }
  0x82   :  { %p10009_p1 = pnand %p10008_p0, %p10004_p11 }
  0x84   :  { %10012 = shalt.err (!%p10009_p1)
}
  0x85   :  { %140 = dma.hbm_to_vmem [thread:$0]  %s10412_s16, 2560, %s135_s12, [#allocation7], %s10169_s7, %s10169_s7, %s10170_s10  }
  0x86   :  { %s200_s15 = sshll.u32 %s10319_s9, 4  ;;  %s10176_s6 = smov [#allocation11]   ;;  %s10432_s15 = int_to_ptr.hbm [resolvable:$true] %s200_s15 }
  0x87   :  { %s172_s19 = sshll.u32 %s10176_s6, 4  ;;  %s10025_s30 = sshra.s32 %s10422_s2, 4  ;;  %s173_s19 = int_to_ptr.vmem [resolvable:$true] %s172_s19  ;;  %s10026_s30 = int_to_ptr.hbm [resolvable:$true] %s10025_s30 }
  0x88   :  { %s10027_s18 = scalar_lea.hbm %s10026_s30, 192  ;;  %s10029_s23 = scalar_lea.hbm %s10299_s27, 192 }
  0x89   :  { %p10028_p2 = scmp.ne.s32.totalorder %s10026_s30, %s10027_s18  ;;  %p10030_p3 = scmp.lt.s32.totalorder %s10026_s30, %s10299_s27 }
  0x8a   :  { %p10031_p4 = scmp.lt.s32.totalorder %s10029_s23, %s10027_s18 }
  0x8c   :  { %p10032_p5 = por %p10031_p4, %p10030_p3 }
  0x8e   :  { %p10033_p6 = pnand %p10032_p5, %p10028_p2 }
  0x90   :  { %10036 = shalt.err (!%p10033_p6)
}
  0x91   :  { %178 = dma.hbm_to_vmem [thread:$0]  %s10422_s2, 3072, %s173_s19, [#allocation10], %s10169_s7, %s10169_s7, %s10170_s10  }
  0x92   :  { %s10177_s16 = smov [#allocation14]   ;;  %s230_s24 = sshll.u32 %s10339_s8, 4  ;;  %s10442_s24 = int_to_ptr.hbm [resolvable:$true] %s230_s24 }
  0x93   :  { %s202_s26 = sshll.u32 %s10177_s16, 4  ;;  %s10049_s27 = sshra.s32 %s10432_s15, 4  ;;  %s203_s26 = int_to_ptr.vmem [resolvable:$true] %s202_s26  ;;  %s10050_s27 = int_to_ptr.hbm [resolvable:$true] %s10049_s27 }
  0x94   :  { %s10051_s1 = scalar_lea.hbm %s10050_s27, 192  ;;  %s10053_s0 = scalar_lea.hbm %s10319_s9, 192 }
  0x95   :  { %p10052_p7 = scmp.ne.s32.totalorder %s10050_s27, %s10051_s1  ;;  %p10054_p8 = scmp.lt.s32.totalorder %s10050_s27, %s10319_s9 }
  0x96   :  { %p10055_p9 = scmp.lt.s32.totalorder %s10053_s0, %s10051_s1 }
  0x98   :  { %p10056_p10 = por %p10055_p9, %p10054_p8 }
  0x9a   :  { %p10057_p11 = pnand %p10056_p10, %p10052_p7 }
  0x9c   :  { %10060 = shalt.err (!%p10057_p11)
}
  0x9d   :  { %208 = dma.hbm_to_vmem [thread:$0]  %s10432_s15, 3072, %s203_s26, [#allocation13], %s10169_s7, %s10169_s7, %s10170_s10  }
  0x9e   :  { %s247_s22 = sshll.u32 %s10354_s20, 4  ;;  %s10178_s12 = smov [#allocation17]   ;;  %s10452_s22 = int_to_ptr.hbm [resolvable:$true] %s247_s22 }
  0x9f   :  { %s232_s2 = sshll.u32 %s10178_s12, 4  ;;  %s10073_s9 = sshra.s32 %s10442_s24, 4  ;;  %s233_s2 = int_to_ptr.vmem [resolvable:$true] %s232_s2  ;;  %s10074_s9 = int_to_ptr.hbm [resolvable:$true] %s10073_s9 }
  0xa0   :  { %s10075_s13 = scalar_lea.hbm %s10074_s9, 192  ;;  %s10077_s28 = scalar_lea.hbm %s10339_s8, 192 }
  0xa1   :  { %p10076_p12 = scmp.ne.s32.totalorder %s10074_s9, %s10075_s13  ;;  %p10078_p13 = scmp.lt.s32.totalorder %s10074_s9, %s10339_s8 }
  0xa2   :  { %p10079_p0 = scmp.lt.s32.totalorder %s10077_s28, %s10075_s13 }
  0xa4   :  { %p10080_p1 = por %p10079_p0, %p10078_p13 }
  0xa6   :  { %p10081_p2 = pnand %p10080_p1, %p10076_p12 }
  0xa8   :  { %10084 = shalt.err (!%p10081_p2)
}
  0xa9   :  { %238 = dma.hbm_to_vmem [thread:$0]  %s10442_s24, 3072, %s233_s2, [#allocation16], %s10169_s7, %s10169_s7, %s10170_s10  }
  0xaa   :  { %s10179_s11 = smov [#allocation18]   ;;  %s10097_s6 = sshra.s32 %s10452_s22, 4  ;;  %s10098_s6 = int_to_ptr.hbm [resolvable:$true] %s10097_s6 }
  0xab   :  { %s249_s15 = sshll.u32 %s10179_s11, 4  ;;  %s10099_s19 = scalar_lea.hbm %s10098_s6, 192  ;;  %s250_s15 = int_to_ptr.vmem [resolvable:$true] %s249_s15 }
  0xac   :  { %p10100_p3 = scmp.ne.s32.totalorder %s10098_s6, %s10099_s19  ;;  %s10101_s8 = scalar_lea.hbm %s10354_s20, 192 }
  0xad   :  { %p10102_p4 = scmp.lt.s32.totalorder %s10098_s6, %s10354_s20  ;;  %p10103_p5 = scmp.lt.s32.totalorder %s10101_s8, %s10099_s19 }
  0xaf   :  { %p10104_p6 = por %p10103_p5, %p10102_p4 }
  0xb1   :  { %p10105_p7 = pnand %p10104_p6, %p10100_p3 }
  0xb3   :  { %10108 = shalt.err (!%p10105_p7)
}
  0xb4   :  { %255 = dma.hbm_to_vmem [thread:$0]  %s10452_s22, 3072, %s250_s15, [#allocation19], %s10169_s7, %s10169_s7, %s10170_s10  }
  0xb5   :  { %10121 = dma.done.wait [#allocation5], 4096  }
  0xb6   :  { %10122 = vsyncadd [#allocation5], 4294963200 }
  0xb7   :  { %10123 = dma.done.wait [#allocation7], 5120  }
  0xb8   :  { %10124 = vsyncadd [#allocation7], 4294962176 }
  0xb9   :  { %10125 = dma.done.wait [#allocation10], 5632  }
  0xba   :  { %10126 = vsyncadd [#allocation10], 4294961664 }
  0xbb   :  { %10127 = dma.done.wait [#allocation13], 6144  }
  0xbc   :  { %10128 = vsyncadd [#allocation13], 4294961152 }
  0xbd   :  { %10129 = dma.done.wait [#allocation16], 6144  }
  0xbe   :  { %10130 = vsyncadd [#allocation16], 4294961152 }
  0xbf   :  { %10131 = dma.done.wait [#allocation19], 3072  }
  0xc0   :  { %10132 = vsyncadd [#allocation19], 4294964224  ;;  %v10180_v0 = vmov 0.0   ;;  %v350_v1 = vld [vmem:[%s10199_s5] sm:$0xf]  ;;  %s10181_s20 = smov 3  }
  0xc1   :  { %310 = vst [vmem:[#allocation2 + $0x40] sm:$0xff] %v10180_v0  ;;  %v8349_v2 = vld [vmem:[%s10199_s5 + $0x4] sm:$0xf]  ;;  %vm364_vm0 = vcmask 1041432   ;;  %vm359_vm1 = vcmask 23552   ;;  %vm367_vm2 = vcmask 17408  }
  0xc2   :  { %302 = vst [vmem:[#allocation2] sm:$0xff] %v10180_v0  ;;  %vm384_vm3 = vcmask 1043482   ;;  %vm387_vm4 = vcmask 19458   ;;  %vm416_vm5 = vcmask 1043456   ;;  %s10182_s5 = smov 126   ;;  %s10183_s7 = smov 127  }
  0xc3   :  { %303 = vst [vmem:[#allocation2 + $0x8] sm:$0xff] %v10180_v0  ;;  %s10184_s10 = smov 125   ;;  %s10185_s30 = smov 124   ;;  %vm409_vm6 = vcmask 31744   ;;  %v389_v16 = vld [vmem:[%s10214_s17] sm:$0xff]  ;;  %v390_v17 = vld [vmem:[%s10214_s17 + $0x8] sm:$0xff] }
  0xc4   :  { %304 = vst [vmem:[#allocation2 + $0x10] sm:$0xff] %v10180_v0  ;;  %s10186_s18 = smov 123   ;;  %s10187_s23 = smov 122   ;;  %vm406_vm7 = vcmask 1039360   ;;  %v8350_v20 = vld [vmem:[%s10214_s17 + $0x10] sm:$0xff]  ;;  %v8351_v23 = vld [vmem:[%s10214_s17 + $0x18] sm:$0xff] }
  0xc5   :  { %305 = vst [vmem:[#allocation2 + $0x18] sm:$0xff] %v10180_v0  ;;  %vm532_vm8 = vcmask 1031168   ;;  %v8364_v25 = vld [vmem:[%s10214_s17 + $0x20] sm:$0xff]  ;;  %vm604_vm9 = vcmask 1022976   ;;  %v8372_v31 = vld [vmem:[%s10214_s17 + $0x30] sm:$0xff]  ;;  %v8365_v32 = vld [vmem:[%s10214_s17 + $0x28] sm:$0xff] }
  0xc6   :  { %307 = vst [vmem:[#allocation2 + $0x28] sm:$0xff] %v10180_v0  ;;  %vm676_vm10 = vcmask 1014784   ;;  %v8373_v38 = vld [vmem:[%s10214_s17 + $0x38] sm:$0xff]  ;;  %v8380_v39 = vld [vmem:[%s10214_s17 + $0x40] sm:$0xff]  ;;  %vm748_vm11 = vcmask 1006592   ;;  %v8388_v45 = vld [vmem:[%s10214_s17 + $0x50] sm:$0xff] }
  0xc7   :  { %308 = vst [vmem:[#allocation2 + $0x30] sm:$0xff] %v10180_v0  ;;  %v8381_v46 = vld [vmem:[%s10214_s17 + $0x48] sm:$0xff]  ;;  %vm820_vm12 = vcmask 998400   ;;  %v8389_v52 = vld [vmem:[%s10214_s17 + $0x58] sm:$0xff]  ;;  %v8396_v53 = vld [vmem:[%s10214_s17 + $0x60] sm:$0xff]  ;;  %s12181_s16 = sld [smem:[#allocation30_spill]] }
  0xc8   :  { %309 = vst [vmem:[#allocation2 + $0x38] sm:$0xff] %v10180_v0  ;;  %v8397_v57 = vld [vmem:[%s10214_s17 + $0x68] sm:$0xff]  ;;  %s12179_s17 = sld [smem:[#allocation28_spill]]  ;;  %s10190_s13 = smov 1  }
  0xc9   :  { %311 = vst [vmem:[#allocation2 + $0x48] sm:$0xff] %v10180_v0  ;;  %s12182_s26 = sld [smem:[#allocation29_spill]] }
  0xca   :  { %312 = vst [vmem:[#allocation2 + $0x50] sm:$0xff] %v10180_v0  ;;  %s12183_s24 = sld [smem:[#allocation31_spill]] }
  0xcb   :  { %314 = vst [vmem:[#allocation2 + $0x60] sm:$0xff] %v10180_v0  ;;  %s12184_s27 = sld [smem:[#allocation26_spill]] }
  0xcc   :  { %317 = vst [vmem:[#allocation2 + $0x78] sm:$0xff] %v10180_v0  ;;  %s12185_s1 = sld [smem:[#allocation32_spill]] }
  0xcd   :  { %320 = vst [vmem:[#allocation2 + $0x90] sm:$0xff] %v10180_v0  ;;  %s12186_s0 = sld [smem:[#allocation33_spill]] }
  0xce   :  { %323 = vst [vmem:[#allocation2 + $0xa8] sm:$0xff] %v10180_v0  ;;  %s12187_s22 = sld [smem:[#allocation35_spill]] }
  0xcf   :  { %326 = vst [vmem:[#allocation3] sm:$0xff] %v10180_v0  ;;  %s12188_s12 = sld [smem:[#allocation34_spill]] }
  0xd0   :  { %328 = vst [vmem:[#allocation3 + $0x10] sm:$0xff] %v10180_v0  ;;  %s12189_s2 = sld [smem:[#allocation37_spill]] }
  0xd1   :  { %329 = vst [vmem:[#allocation3 + $0x18] sm:$0xff] %v10180_v0  ;;  %s12190_s9 = sld [smem:[#allocation36_spill]] }
  0xd2   :  { %331 = vst [vmem:[#allocation3 + $0x28] sm:$0xff] %v10180_v0  ;;  %s12191_s28 = sld [smem:[#allocation38_spill]] }
  0xd3   :  { %332 = vst [vmem:[#allocation3 + $0x30] sm:$0xff] %v10180_v0  ;;  %s12192_s11 = sld [smem:[#allocation39_spill]] }
  0xd4   :  { %334 = vst [vmem:[#allocation3 + $0x40] sm:$0xff] %v10180_v0  ;;  %s12193_s15 = sld [smem:[#allocation40_spill]] }
  0xd5   :  { %335 = vst [vmem:[#allocation3 + $0x48] sm:$0xff] %v10180_v0  ;;  %s12194_s6 = sld [smem:[#allocation41_spill]] }
  0xd6   :  { %337 = vst [vmem:[#allocation3 + $0x58] sm:$0xff] %v10180_v0  ;;  %s12195_s19 = sld [smem:[#allocation42_spill]] }
  0xd7   :  { %338 = vst [vmem:[#allocation3 + $0x60] sm:$0xff] %v10180_v0  ;;  %s12196_s8 = sld [smem:[#allocation43_spill]] }
  0xd8   :  { %341 = vst [vmem:[#allocation3 + $0x78] sm:$0xff] %v10180_v0 }
  0xd9   :  { %344 = vst [vmem:[#allocation3 + $0x90] sm:$0xff] %v10180_v0 }
  0xda   :  { %347 = vst [vmem:[#allocation3 + $0xa8] sm:$0xff] %v10180_v0 }
  0xdb   :  { %352 = vst [vmem:[#allocation1] ss:$4 sm:$0xff] %v350_v1 }
  0xe2   :  { %v353_v3 = vld.sshfl [vmem:[#allocation1] sm:$0xff pattern:$0x73625140]  ;;  %v354_v4 = vld.sshfl [vmem:[#allocation1 + $0x8] sm:$0xff pattern:$0x73625140] }
  0xe3   :  { %355 = vrot.lane.b32.xlu0 %v353_v3, %s10181_s20  ;;  %373 = vst [vmem:[#allocation1 + $0x1] ss:$4 sm:$0xff] %v8349_v2 }
  0xea   :  { %v374_v5 = vld.sshfl [vmem:[#allocation1] sm:$0xff pattern:$0x73625140]  ;;  %v375_v6 = vld.sshfl [vmem:[#allocation1 + $0x8] sm:$0xff pattern:$0x73625140] }
  0xeb   :  { %357 = vrot.lane.b32.xlu0 %v354_v4, %s10181_s20  ;;  %376 = vrot.lane.b32.xlu1 %v374_v5, %s10181_s20 }
  0xf3   :  { %378 = vrot.lane.b32.xlu1 %v375_v6, %s10181_s20 }
 0x155   :  { %v356_v7 = vpop.permute.xlu0 %355 }
 0x156   :  { %365 = vst.msk [vmem:[#allocation2] sm:$0x3] %vm364_vm0, %v356_v7  ;;  %vm971_vm0 = vcmask 48152  }
 0x15d   :  { %v358_v8 = vpop.permute.xlu0 %357  ;;  %v377_v9 = vpop.permute.xlu1 %376 }
 0x15e   :  { %v360_v10 = vsel %vm359_vm1, %v356_v7, %v358_v8  ;;  %368 = vst.msk [vmem:[#allocation2 + $0x10] sm:$0x3] %vm367_vm2, %v358_v8  ;;  %vm964_vm2 = vcmask 1047576  }
 0x15f   :  { %366 = vst [vmem:[#allocation2 + $0x8] sm:$0x3] %v360_v10 }
 0x160   :  { %385 = vst.msk [vmem:[#allocation2] sm:$0xc] %vm384_vm3, %v377_v9  ;;  %vm1552_vm3 = vcmask 1047568  }
 0x165   :  { %v379_v11 = vpop.permute.xlu1 %378 }
 0x166   :  { %v380_v12 = vsel %vm359_vm1, %v377_v9, %v379_v11  ;;  %388 = vst.msk [vmem:[#allocation2 + $0x10] sm:$0xc] %vm387_vm4, %v379_v11  ;;  %vm1543_vm4 = vcmask 15360  }
 0x167   :  { %386 = vst [vmem:[#allocation2 + $0x8] sm:$0xc] %v380_v12  ;;  %v391_v13 = vld [vmem:[#allocation2] sm:$0xf] }
 0x168   :  { %526 = vrot.lane.b32.xlu1 %v391_v13, %s10182_s5  ;;  %400 = vrot.lane.b32.xlu2 %v391_v13, %s10183_s7 }
 0x169   :  { %8358 = vmatpush.msk.msra.mxu2 %vm416_vm5, %v391_v13 }
 0x16a   :  { %8359 = vmatmul.msk.f32.vlgmr.msra.gmra.mxu2 %vm409_vm6, %v389_v16 }
 0x16d   :  { %v396_v14 = vld [vmem:[#allocation2 + $0x10] sm:$0xf] }
 0x16e   :  { %404 = vrot.lane.b32.xlu0 %v396_v14, %s10183_s7  ;;  %v392_v15 = vld [vmem:[#allocation2 + $0x8] sm:$0xf] }
 0x16f   :  { %8361 = vmatpush.msk.msra.mxu3 %vm416_vm5, %v392_v15 }
 0x170   :  { %598 = vrot.lane.b32.xlu1 %v391_v13, %s10184_s10  ;;  %402 = vrot.lane.b32.xlu2 %v392_v15, %s10183_s7 }
 0x171   :  { %8362 = vmatmul.msk.f32.vlgmr.msra.gmra.mxu3 %vm409_vm6, %v389_v16 }
 0x172   :  { %8360 = vmatmul.msk.f32.gmra.mxu2 %vm409_vm6, %v390_v17 }
 0x176   :  { %530 = vrot.lane.b32.xlu0 %v396_v14, %s10182_s5 }
 0x178   :  { %670 = vrot.lane.b32.xlu1 %v391_v13, %s10185_s30  ;;  %528 = vrot.lane.b32.xlu2 %v392_v15, %s10182_s5 }
 0x179   :  { %8363 = vmatmul.msk.f32.gmra.mxu3 %vm409_vm6, %v390_v17 }
 0x17e   :  { %602 = vrot.lane.b32.xlu0 %v396_v14, %s10184_s10 }
 0x180   :  { %742 = vrot.lane.b32.xlu1 %v391_v13, %s10186_s18  ;;  %600 = vrot.lane.b32.xlu2 %v392_v15, %s10184_s10 }
 0x186   :  { %674 = vrot.lane.b32.xlu0 %v396_v14, %s10185_s30 }
 0x188   :  { %814 = vrot.lane.b32.xlu1 %v391_v13, %s10187_s23  ;;  %672 = vrot.lane.b32.xlu2 %v392_v15, %s10185_s30 }
 0x18e   :  { %746 = vrot.lane.b32.xlu0 %v396_v14, %s10186_s18 }
 0x190   :  { %744 = vrot.lane.b32.xlu2 %v392_v15, %s10186_s18 }
 0x196   :  { %818 = vrot.lane.b32.xlu0 %v396_v14, %s10187_s23 }
 0x198   :  { %816 = vrot.lane.b32.xlu2 %v392_v15, %s10187_s23 }
 0x1c2   :  { %v401_v18 = vpop.permute.xlu2 %400 }
 0x1ca   :  { %v403_v19 = vpop.permute.xlu2 %402 }
 0x1cb   :  { %v407_v21 = vsel %vm406_vm7, %v401_v18, %v403_v19 }
 0x1cc   :  { %8352 = vmatpush.msk.msra.mxu0 %vm416_vm5, %v407_v21 }
 0x1cd   :  { %8353 = vmatmul.msk.f32.vlgmr.msra.gmra.mxu0 %vm409_vm6, %v8350_v20 }
 0x1d2   :  { %v529_v22 = vpop.permute.xlu2 %528 }
 0x1d5   :  { %8354 = vmatmul.msk.f32.gmra.mxu0 %vm409_vm6, %v8351_v23 }
 0x1da   :  { %v527_v24 = vpop.permute.xlu1 %526  ;;  %v601_v27 = vpop.permute.xlu2 %600 }
 0x1db   :  { %v533_v26 = vsel %vm532_vm8, %v527_v24, %v529_v22 }
 0x1dc   :  { %8366 = vmatpush.msk.msrb.mxu0 %vm416_vm5, %v533_v26 }
 0x1dd   :  { %8367 = vmatmul.msk.f32.vlgmr.msrb.gmra.mxu0 %vm409_vm6, %v8364_v25 }
 0x1e0   :  { %v405_v28 = vpop.permute.xlu0 %404 }
 0x1e1   :  { %v408_v29 = vsel %vm406_vm7, %v403_v19, %v405_v28 }
 0x1e2   :  { %v599_v30 = vpop.permute.xlu1 %598  ;;  %8355 = vmatpush.msk.msra.mxu1 %vm416_vm5, %v408_v29  ;;  %v673_v34 = vpop.permute.xlu2 %672 }
 0x1e3   :  { %v605_v33 = vsel %vm604_vm9, %v599_v30, %v601_v27  ;;  %8356 = vmatmul.msk.f32.vlgmr.msra.gmra.mxu1 %vm409_vm6, %v8350_v20 }
 0x1e4   :  { %8374 = vmatpush.msk.msrb.mxu2 %vm416_vm5, %v605_v33 }
 0x1e5   :  { %8375 = vmatmul.msk.f32.vlgmr.msrb.gmra.mxu2 %vm409_vm6, %v8372_v31  ;;  %8368 = vmatmul.msk.f32.gmra.mxu0 %vm409_vm6, %v8365_v32 }
 0x1e8   :  { %v531_v35 = vpop.permute.xlu0 %530 }
 0x1e9   :  { %v534_v36 = vsel %vm532_vm8, %v529_v22, %v531_v35 }
 0x1ea   :  { %v671_v37 = vpop.permute.xlu1 %670  ;;  %8369 = vmatpush.msk.msrb.mxu1 %vm416_vm5, %v534_v36  ;;  %v745_v41 = vpop.permute.xlu2 %744 }
 0x1eb   :  { %v677_v40 = vsel %vm676_vm10, %v671_v37, %v673_v34  ;;  %8357 = vmatmul.msk.f32.gmra.mxu1 %vm409_vm6, %v8351_v23 }
 0x1ec   :  { %8382 = vmatpush.msk.msra.mxu0 %vm416_vm5, %v677_v40 }
 0x1ed   :  { %8376 = vmatmul.msk.f32.gmra.mxu2 %vm409_vm6, %v8373_v38  ;;  %8383 = vmatmul.msk.f32.vlgmr.msra.gmra.mxu0 %vm409_vm6, %v8380_v39  ;;  %v494_v62 = vpop.f32.mrf.mxu2 }
 0x1f0   :  { %v603_v42 = vpop.permute.xlu0 %602 }
 0x1f1   :  { %v606_v43 = vsel %vm604_vm9, %v601_v27, %v603_v42 }
 0x1f2   :  { %v743_v44 = vpop.permute.xlu1 %742  ;;  %8377 = vmatpush.msk.msrb.mxu3 %vm416_vm5, %v606_v43  ;;  %v817_v50 = vpop.permute.xlu2 %816 }
 0x1f3   :  { %v749_v47 = vsel %vm748_vm11, %v743_v44, %v745_v41  ;;  %8370 = vmatmul.msk.f32.vlgmr.msrb.gmra.mxu1 %vm409_vm6, %v8364_v25  ;;  %8378 = vmatmul.msk.f32.vlgmr.msrb.gmra.mxu3 %vm409_vm6, %v8372_v31 }
 0x1f4   :  { %8390 = vmatpush.msk.msra.mxu2 %vm416_vm5, %v749_v47  ;;  %v517_v2 = vpop.f32.mrf.mxu3 }
 0x1f5   :  { %8391 = vmatmul.msk.f32.vlgmr.msra.gmra.mxu2 %vm409_vm6, %v8388_v45  ;;  %8384 = vmatmul.msk.f32.gmra.mxu0 %vm409_vm6, %v8381_v46  ;;  %v497_v4 = vpop.f32.mrf.mxu2 }
 0x1f8   :  { %v675_v48 = vpop.permute.xlu0 %674 }
 0x1f9   :  { %v678_v49 = vsel %vm676_vm10, %v673_v34, %v675_v48 }
 0x1fa   :  { %v815_v51 = vpop.permute.xlu1 %814  ;;  %8385 = vmatpush.msk.msra.mxu1 %vm416_vm5, %v678_v49 }
 0x1fb   :  { %v821_v54 = vsel %vm820_vm12, %v815_v51, %v817_v50  ;;  %8371 = vmatmul.msk.f32.gmra.mxu1 %vm409_vm6, %v8365_v32  ;;  %8379 = vmatmul.msk.f32.gmra.mxu3 %vm409_vm6, %v8373_v38 }
 0x1fc   :  { %8398 = vmatpush.msk.msrb.mxu0 %vm416_vm5, %v821_v54  ;;  %v520_v6 = vpop.f32.mrf.mxu3 }
 0x1fd   :  { %8392 = vmatmul.msk.f32.gmra.mxu2 %vm409_vm6, %v8389_v52  ;;  %8399 = vmatmul.msk.f32.vlgmr.msrb.gmra.mxu0 %vm409_vm6, %v8396_v53 }
 0x200   :  { %v747_v55 = vpop.permute.xlu0 %746 }
 0x201   :  { %v750_v56 = vsel %vm748_vm11, %v745_v41, %v747_v55 }
 0x202   :  { %8393 = vmatpush.msk.msra.mxu3 %vm416_vm5, %v750_v56 }
 0x203   :  { %8386 = vmatmul.msk.f32.vlgmr.msra.gmra.mxu1 %vm409_vm6, %v8380_v39  ;;  %8394 = vmatmul.msk.f32.vlgmr.msra.gmra.mxu3 %vm409_vm6, %v8388_v45 }
 0x205   :  { %8400 = vmatmul.msk.f32.gmra.mxu0 %vm409_vm6, %v8397_v57 }
 0x208   :  { %v819_v58 = vpop.permute.xlu0 %818 }
 0x209   :  { %v822_v59 = vsel %vm820_vm12, %v817_v50, %v819_v58 }
 0x20a   :  { %8401 = vmatpush.msk.msrb.mxu1 %vm416_vm5, %v822_v59  ;;  %vm1559_vm5 = vcmask 31760  }
 0x20b   :  { %8387 = vmatmul.msk.f32.gmra.mxu1 %vm409_vm6, %v8381_v46  ;;  %8395 = vmatmul.msk.f32.gmra.mxu3 %vm409_vm6, %v8389_v52 }
 0x213   :  { %8402 = vmatmul.msk.f32.vlgmr.msrb.gmra.mxu1 %vm409_vm6, %v8396_v53 }
 0x21b   :  { %8403 = vmatmul.msk.f32.gmra.mxu1 %vm409_vm6, %v8397_v57  ;;  %v10188_v57 = vmov 0   ;;  %vm2221_vm6 = vcmask 261120  }
 0x21c   :  { %9004 = vset.pattern.permute.xlu1 %v10188_v57  ;;  %9005 = vset.pattern.permute.xlu2 %v10188_v57 }
 0x21d   :  { %9096 = vset.pattern.permute.xlu0 %v10188_v57 }
 0x24a   :  { %v438_v60 = vpop.f32.mrf.mxu0 }
 0x24b   :  { %v495_v13 = vadd.f32 %v494_v62, %v438_v60 }
 0x252   :  { %v441_v61 = vpop.f32.mrf.mxu0 }
 0x253   :  { %v498_v20 = vadd.f32 %v497_v4, %v441_v61 }
 0x25a   :  { %v562_v1 = vpop.f32.mrf.mxu0 }
 0x25b   :  { %v591_v17 = vadd.f32 %v562_v1, %v495_v13 }
 0x260   :  { %v461_v63 = vpop.f32.mrf.mxu1 }
 0x261   :  { %v518_v19 = vadd.f32 %v517_v2, %v461_v63 }
 0x262   :  { %v565_v5 = vpop.f32.mrf.mxu0 }
 0x263   :  { %v593_v28 = vadd.f32 %v565_v5, %v498_v20 }
 0x268   :  { %v464_v3 = vpop.f32.mrf.mxu1  ;;  %v634_v8 = vpop.f32.mrf.mxu2 }
 0x269   :  { %v663_v18 = vadd.f32 %v634_v8, %v591_v17  ;;  %v521_v32 = vadd.f32 %v520_v6, %v464_v3 }
 0x26a   :  { %v706_v10 = vpop.f32.mrf.mxu0 }
 0x26b   :  { %v735_v23 = vadd.f32 %v706_v10, %v663_v18 }
 0x270   :  { %v585_v7 = vpop.f32.mrf.mxu1  ;;  %v637_v12 = vpop.f32.mrf.mxu2 }
 0x271   :  { %v592_v24 = vadd.f32 %v585_v7, %v518_v19  ;;  %v665_v31 = vadd.f32 %v637_v12, %v593_v28  ;;  %v906_v12 = vld [vmem:[%s10219_s21] sm:$0xff]  ;;  %s12180_s21 = sld [smem:[#allocation27_spill]] }
 0x272   :  { %v709_v16 = vpop.f32.mrf.mxu0 }
 0x273   :  { %v737_v38 = vadd.f32 %v709_v16, %v665_v31  ;;  %v919_v16 = vld [vmem:[%s10224_s25] sm:$0xff]  ;;  %s10189_s25 = smov 2  }
 0x276   :  { %v657_v9 = vpop.f32.mrf.mxu3 }
 0x277   :  { %v664_v26 = vadd.f32 %v657_v9, %v592_v24 }
 0x278   :  { %v588_v11 = vpop.f32.mrf.mxu1  ;;  %v778_v21 = vpop.f32.mrf.mxu2 }
 0x279   :  { %v807_v27 = vadd.f32 %v778_v21, %v735_v23  ;;  %v594_v36 = vadd.f32 %v588_v11, %v521_v32 }
 0x27a   :  { %v850_v29 = vpop.f32.mrf.mxu0 }
 0x27b   :  { %v10588_v33 = vadd.f32 %v850_v29, %v807_v27 }
 0x27d   :  { %v889_v42 = vmul.f32 %v10588_v33, %v10588_v33 }
 0x27e   :  { %v660_v14 = vpop.f32.mrf.mxu3 }
 0x27f   :  { %v666_v40 = vadd.f32 %v660_v14, %v594_v36 }
 0x280   :  { %v729_v15 = vpop.f32.mrf.mxu1  ;;  %v781_v39 = vpop.f32.mrf.mxu2 }
 0x281   :  { %v736_v30 = vadd.f32 %v729_v15, %v664_v26  ;;  %v809_v45 = vadd.f32 %v781_v39, %v737_v38 }
 0x282   :  { %v853_v48 = vpop.f32.mrf.mxu0 }
 0x283   :  { %v881_v51 = vadd.f32 %v853_v48, %v809_v45  ;;  %v1512_v45 = vld [vmem:[%s12179_s17 + $0x8] sm:$0xff] }
 0x284   :  { %v975_v48 = vld [vmem:[%s12180_s21 + $0x8] sm:$0xff] }
 0x285   :  { %v891_v55 = vmul.f32 %v881_v51, %v881_v51 }
 0x286   :  { %v801_v25 = vpop.f32.mrf.mxu3 }
 0x287   :  { %v808_v34 = vadd.f32 %v801_v25, %v736_v30 }
 0x288   :  { %v732_v22 = vpop.f32.mrf.mxu1 }
 0x289   :  { %v738_v46 = vadd.f32 %v732_v22, %v666_v40 }
 0x28e   :  { %v804_v44 = vpop.f32.mrf.mxu3 }
 0x28f   :  { %v810_v49 = vadd.f32 %v804_v44, %v738_v46  ;;  %v974_v46 = vld [vmem:[%s12180_s21] sm:$0xff] }
 0x290   :  { %v873_v35 = vpop.f32.mrf.mxu1 }
 0x291   :  { %v880_v37 = vadd.f32 %v873_v35, %v808_v34 }
 0x293   :  { %v883_v41 = vadd.f32 %v880_v37, %v10588_v33  ;;  %v890_v43 = vmul.f32 %v880_v37, %v880_v37 }
 0x295   :  { %884 = vadd.xlane.f32.xlu1 %v883_v41  ;;  %v893_v47 = vadd.f32 %v890_v43, %v889_v42 }
 0x297   :  { %894 = vadd.xlane.f32.xlu0 %v893_v47 }
 0x298   :  { %v876_v50 = vpop.f32.mrf.mxu1 }
 0x299   :  { %v882_v52 = vadd.f32 %v876_v50, %v810_v49 }
 0x29b   :  { %v886_v53 = vadd.f32 %v882_v52, %v881_v51  ;;  %v892_v54 = vmul.f32 %v882_v52, %v882_v52 }
 0x29d   :  { %887 = vadd.xlane.f32.xlu2 %v886_v53  ;;  %v896_v56 = vadd.f32 %v892_v54, %v891_v55 }
 0x2a5   :  { %897 = vadd.xlane.f32.xlu2 %v896_v56 }
 0x308   :  { %v885_v59 = vpop.xlane.xlu1 %884 }
 0x30a   :  { %v895_v62 = vpop.xlane.xlu0 %894 }
 0x310   :  { %v888_v58 = vpop.xlane.xlu2 %887 }
 0x311   :  { %v899_v60 = vadd.f32 %v888_v58, %v885_v59 }
 0x313   :  { %v901_v61 = vmul.f32 0.001953125, %v899_v60  ;;  %v8404_v60 = vld [vmem:[%s12180_s21 + $0x10] sm:$0xff] }
 0x315   :  { %v903_v2 = vmul.f32 %v901_v61, %v901_v61 }
 0x318   :  { %v898_v63 = vpop.xlane.xlu2 %897 }
 0x319   :  { %v900_v1 = vadd.f32 %v898_v63, %v895_v62 }
 0x31b   :  { %v902_v3 = vmul.f32 0.001953125, %v900_v1 }
 0x31d   :  { %v904_v4 = vsub.f32 %v902_v3, %v903_v2 }
 0x31f   :  { %v905_v5 = vmax.f32 %v904_v4, 0.0 }
 0x321   :  { %v907_v6 = vadd.f32 1e-05, %v905_v5 }
 0x323   :  { %9857 = vrsqrt.f32 %v907_v6  ;;  %vm914_vm14 = vweird.f32 %v907_v6 }
 0x329   :  { %v9858_v7 = vpop.eup %9857 }
 0x32a   :  { %v909_v8 = vmul.f32 %v9858_v7, %v907_v6  ;;  %vm915_vm13 = vweird.f32 %v9858_v7 }
 0x32b   :  { %vm916_vm15 = vmor %vm914_vm14, %vm915_vm13  ;;  %vm6129_vm13 = vcmask 146568   ;;  %vm7050_vm14 = vcmask 72712  }
 0x32c   :  { %v910_v9 = vmul.f32 %v9858_v7, %v909_v8 }
 0x32e   :  { %v911_v10 = vmul.f32 0.5, %v910_v9 }
 0x330   :  { %v912_v11 = vsub.f32 1.5, %v911_v10 }
 0x332   :  { %v913_v13 = vmul.f32 %v9858_v7, %v912_v11  ;;  %v8405_v11 = vld [vmem:[%s12180_s21 + $0x18] sm:$0xff] }
 0x334   :  { %v917_v14 = vsel %vm916_vm15, %v9858_v7, %v913_v13  ;;  %vm7059_vm15 = vcmask 80968  }
 0x335   :  { %v918_v15 = vmul.f32 %v917_v14, %v906_v12 }
 0x337   :  { %924 = vperm.xlu1 %9004, %v918_v15   ;;  %v920_v17 = vmul.f32 %v918_v15, %v901_v61 }
 0x339   :  { %v921_v18 = vsub.f32 %v919_v16, %v920_v17 }
 0x33b   :  { %933 = vperm.xlu2 %9005, %v921_v18  }
 0x395   :  { %v934_v23 = vpop.permute.xlu2 %933 }
 0x3a9   :  { %v925_v19 = vpop.permute.xlu1 %924 }
 0x3aa   :  { %v930_v20 = vmul.f32 %v925_v19, %v882_v52  ;;  %v929_v21 = vmul.f32 %v925_v19, %v881_v51  ;;  %v928_v22 = vmul.f32 %v925_v19, %v880_v37  ;;  %v927_v30 = vmul.f32 %v925_v19, %v10588_v33 }
 0x3ac   :  { %v939_v24 = vadd.f32 %v934_v23, %v930_v20  ;;  %v938_v25 = vadd.f32 %v934_v23, %v929_v21  ;;  %v937_v26 = vadd.f32 %v934_v23, %v928_v22  ;;  %v936_v31 = vadd.f32 %v934_v23, %v927_v30 }
 0x3ae   :  { %v943_v27 = vmax.f32 %v939_v24, 0.0  ;;  %v942_v28 = vmax.f32 %v938_v25, 0.0  ;;  %v941_v29 = vmax.f32 %v937_v26, 0.0  ;;  %v940_v32 = vmax.f32 %v936_v31, 0.0  ;;  %v8414_v25 = vld [vmem:[%s12180_s21 + $0x20] sm:$0xff] }
 0x3b0   :  { %954 = vrot.lane.b32.xlu1 %v943_v27, %s10181_s20  ;;  %952 = vrot.lane.b32.xlu0 %v942_v28, %s10181_s20 }
 0x3b1   :  { %950 = vrot.lane.b32.xlu2 %v941_v29, %s10181_s20 }
 0x3b8   :  { %948 = vrot.lane.b32.xlu0 %v940_v32, %s10181_s20 }
 0x40b   :  { %v951_v34 = vpop.permute.xlu2 %950 }
 0x40c   :  { %967 = vst.msk [vmem:[#allocation3 + $0x10] sm:$0xff] %vm359_vm1, %v951_v34 }
 0x40d   :  { %972 = vst.msk [vmem:[#allocation3 + $0x10] sm:$0xff] %vm971_vm0, %v10180_v0 }
 0x414   :  { %v983_v37 = vld [vmem:[#allocation3 + $0x10] sm:$0xff] }
 0x422   :  { %v955_v35 = vpop.permute.xlu1 %954  ;;  %v953_v36 = vpop.permute.xlu0 %952 }
 0x423   :  { %970 = vst.msk [vmem:[#allocation3 + $0x28] sm:$0xff] %vm359_vm1, %v955_v35  ;;  %v957_v33 = vsel %vm359_vm1, %v953_v36, %v955_v35 }
 0x424   :  { %973 = vst.msk [vmem:[#allocation3 + $0x28] sm:$0xff] %vm971_vm0, %v10180_v0  ;;  %1107 = vmatpush.msra.mxu1 %v957_v33  ;;  %vm7361_vm0 = vcmask 64512  }
 0x425   :  { %968 = vst.msk [vmem:[#allocation3 + $0x18] sm:$0xff] %vm964_vm2, %v953_v36 }
 0x42a   :  { %v949_v38 = vpop.permute.xlu0 %948 }
 0x42b   :  { %v956_v39 = vsel %vm359_vm1, %v949_v38, %v951_v34  ;;  %965 = vst.msk [vmem:[#allocation3] sm:$0xff] %vm964_vm2, %v949_v38  ;;  %v984_v43 = vld [vmem:[#allocation3 + $0x28] sm:$0xff]  ;;  %vm1011_vm1 = vcmask 130048   ;;  %v8415_v38 = vld [vmem:[%s12180_s21 + $0x28] sm:$0xff] }
 0x42c   :  { %v978_v40 = vld [vmem:[#allocation3 + $0x18] sm:$0xff]  ;;  %1108 = vmatpush.msra.mxu1 %v956_v39  ;;  %v9016_v41 = vpack.i.bf16 %v983_v37, %v956_v39 }
 0x42d   :  { %1084 = vmatpush.msra.mxu0 %v978_v40  ;;  %v9006_v42 = vpack.i.bf16 %v957_v33, %v978_v40  ;;  %8412 = vmatmul.msk.f32.vlgmr.msra.gmra.mxu1 %vm1011_vm1, %v974_v46 }
 0x42e   :  { %9017 = vrot.lane.b32.xlu2 %v9016_v41, %s10183_s7 }
 0x42f   :  { %9007 = vrot.lane.b32.xlu1 %v9006_v42, %s10183_s7 }
 0x432   :  { %v976_v44 = vld [vmem:[#allocation3] sm:$0xff] }
 0x433   :  { %1085 = vmatpush.msra.mxu0 %v976_v44  ;;  %v9011_v0 = vpack.i.bf16 %v976_v44, %v984_v43  ;;  %v8420_v44 = vld [vmem:[%s12180_s21 + $0x30] sm:$0xff] }
 0x434   :  { %8410 = vmatmul.msk.f32.vlgmr.msra.gmra.mxu0 %vm1011_vm1, %v974_v46  ;;  %v1511_v46 = vld [vmem:[%s12179_s17] sm:$0xff] }
 0x435   :  { %9012 = vrot.lane.b32.xlu0 %v9011_v0, %s10183_s7  ;;  %8413 = vmatmul.msk.f32.gmra.mxu1 %vm1011_vm1, %v975_v48 }
 0x436   :  { %9032 = vrot.lane.b32.xlu2 %v9016_v41, %s10182_s5 }
 0x437   :  { %9022 = vrot.lane.b32.xlu1 %v9006_v42, %s10182_s5 }
 0x43c   :  { %8411 = vmatmul.msk.f32.gmra.mxu0 %vm1011_vm1, %v975_v48 }
 0x43d   :  { %9027 = vrot.lane.b32.xlu0 %v9011_v0, %s10182_s5 }
 0x43e   :  { %9047 = vrot.lane.b32.xlu2 %v9016_v41, %s10185_s30 }
 0x43f   :  { %9037 = vrot.lane.b32.xlu1 %v9006_v42, %s10185_s30 }
 0x445   :  { %9042 = vrot.lane.b32.xlu0 %v9011_v0, %s10185_s30 }
 0x446   :  { %9062 = vrot.lane.b32.xlu2 %v9016_v41, %s10184_s10 }
 0x447   :  { %9052 = vrot.lane.b32.xlu1 %v9006_v42, %s10184_s10 }
 0x44d   :  { %9057 = vrot.lane.b32.xlu0 %v9011_v0, %s10184_s10 }
 0x44e   :  { %9077 = vrot.lane.b32.xlu2 %v9016_v41, %s10187_s23 }
 0x44f   :  { %9067 = vrot.lane.b32.xlu1 %v9006_v42, %s10187_s23 }
 0x455   :  { %9072 = vrot.lane.b32.xlu0 %v9011_v0, %s10187_s23 }
 0x456   :  { %9092 = vrot.lane.b32.xlu2 %v9016_v41, %s10186_s18 }
 0x457   :  { %9082 = vrot.lane.b32.xlu1 %v9006_v42, %s10186_s18 }
 0x45d   :  { %9087 = vrot.lane.b32.xlu0 %v9011_v0, %s10186_s18 }
 0x45f   :  { %1520 = vperm.xlu1 %9004, %v1512_v45  }
 0x465   :  { %1515 = vperm.xlu0 %9096, %v1511_v46  }
 0x488   :  { %v9018_v47 = vpop.permute.xlu2 %9017 }
 0x489   :  { %v9020_v55 = vunpack.i.h.bf16 %v9018_v47  ;;  %v9019_v56 = vunpack.i.l.bf16 %v9018_v47 }
 0x48b   :  { %v1004_v3 = vsel %vm406_vm7, %v9019_v56, %v9020_v55 }
 0x490   :  { %v9033_v53 = vpop.permute.xlu2 %9032 }
 0x491   :  { %v9035_v6 = vunpack.i.h.bf16 %v9033_v53  ;;  %v9034_v7 = vunpack.i.l.bf16 %v9033_v53  ;;  %v8426_v53 = vld [vmem:[%s12180_s21 + $0x40] sm:$0xff] }
 0x493   :  { %v1132_v17 = vsel %vm532_vm8, %v9034_v7, %v9035_v6 }
 0x498   :  { %v9048_v4 = vpop.permute.xlu2 %9047 }
 0x499   :  { %v9050_v19 = vunpack.i.h.bf16 %v9048_v4  ;;  %v9049_v20 = vunpack.i.l.bf16 %v9048_v4  ;;  %v8427_v4 = vld [vmem:[%s12180_s21 + $0x48] sm:$0xff] }
 0x49b   :  { %v1290_v31 = vsel %vm676_vm10, %v9049_v20, %v9050_v19 }
 0x4a0   :  { %v9063_v23 = vpop.permute.xlu2 %9062 }
 0x4a1   :  { %v9008_v49 = vpop.permute.xlu1 %9007  ;;  %v9065_v34 = vunpack.i.h.bf16 %v9063_v23  ;;  %v9064_v35 = vunpack.i.l.bf16 %v9063_v23 }
 0x4a2   :  { %v9010_v50 = vunpack.i.h.bf16 %v9008_v49  ;;  %v9009_v51 = vunpack.i.l.bf16 %v9008_v49 }
 0x4a3   :  { %v1211_v45 = vsel %vm604_vm9, %v9064_v35, %v9065_v34 }
 0x4a4   :  { %v1005_v52 = vsel %vm406_vm7, %v9009_v51, %v9010_v50 }
 0x4a5   :  { %1032 = vmatpush.msrb.mxu2 %v1005_v52 }
 0x4a7   :  { %v9013_v54 = vpop.permute.xlu0 %9012 }
 0x4a8   :  { %v9015_v57 = vunpack.i.h.bf16 %v9013_v54  ;;  %v9014_v58 = vunpack.i.l.bf16 %v9013_v54  ;;  %v9078_v43 = vpop.permute.xlu2 %9077 }
 0x4a9   :  { %v9023_v59 = vpop.permute.xlu1 %9022  ;;  %v9080_v48 = vunpack.i.h.bf16 %v9078_v43  ;;  %v9079_v49 = vunpack.i.l.bf16 %v9078_v43 }
 0x4aa   :  { %v9025_v61 = vunpack.i.h.bf16 %v9023_v59  ;;  %v9024_v62 = vunpack.i.l.bf16 %v9023_v59  ;;  %v1003_v63 = vsel %vm406_vm7, %v9015_v57, %v9019_v56  ;;  %v1006_v1 = vsel %vm406_vm7, %v9010_v50, %v9014_v58  ;;  %v8421_v58 = vld [vmem:[%s12180_s21 + $0x38] sm:$0xff] }
 0x4ab   :  { %1033 = vmatpush.msrb.mxu2 %v1003_v63  ;;  %1055 = vmatpush.msrb.mxu3 %v1006_v1 }
 0x4ac   :  { %8406 = vmatmul.msk.f32.vlgmr.msrb.gmra.mxu2 %vm1011_vm1, %v8404_v60  ;;  %v1133_v2 = vsel %vm532_vm8, %v9024_v62, %v9025_v61 }
 0x4ad   :  { %1159 = vmatpush.msra.mxu2 %v1133_v2  ;;  %1056 = vmatpush.msrb.mxu3 %v1004_v3 }
 0x4ae   :  { %8408 = vmatmul.msk.f32.vlgmr.msrb.gmra.mxu3 %vm1011_vm1, %v8404_v60  ;;  %v1448_v60 = vsel %vm820_vm12, %v9079_v49, %v9080_v48 }
 0x4af   :  { %v9028_v5 = vpop.permute.xlu0 %9027 }
 0x4b0   :  { %v9030_v8 = vunpack.i.h.bf16 %v9028_v5  ;;  %v9029_v9 = vunpack.i.l.bf16 %v9028_v5 }
 0x4b1   :  { %v9038_v10 = vpop.permute.xlu1 %9037 }
 0x4b2   :  { %v9040_v12 = vunpack.i.h.bf16 %v9038_v10  ;;  %v9039_v13 = vunpack.i.l.bf16 %v9038_v10  ;;  %v1131_v14 = vsel %vm532_vm8, %v9030_v8, %v9034_v7  ;;  %v1134_v15 = vsel %vm532_vm8, %v9025_v61, %v9029_v9  ;;  %v9093_v61 = vpop.permute.xlu2 %9092  ;;  %v8432_v7 = vld [vmem:[%s12180_s21 + $0x50] sm:$0xff]  ;;  %v8438_v9 = vld [vmem:[%s12180_s21 + $0x60] sm:$0xff]  ;;  %v8433_v10 = vld [vmem:[%s12180_s21 + $0x58] sm:$0xff] }
 0x4b3   :  { %1160 = vmatpush.msra.mxu2 %v1131_v14  ;;  %1182 = vmatpush.msra.mxu3 %v1134_v15  ;;  %v9095_v63 = vunpack.i.h.bf16 %v9093_v61  ;;  %v9094_v1 = vunpack.i.l.bf16 %v9093_v61  ;;  %v1087_v14 = vpop.f32.mrf.mxu0  ;;  %v1110_v15 = vpop.f32.mrf.mxu1 }
 0x4b4   :  { %8407 = vmatmul.msk.f32.gmra.mxu2 %vm1011_vm1, %v8405_v11  ;;  %v1291_v16 = vsel %vm676_vm10, %v9039_v13, %v9040_v12 }
 0x4b5   :  { %1317 = vmatpush.msrb.mxu2 %v1291_v16  ;;  %1183 = vmatpush.msra.mxu3 %v1132_v17  ;;  %v1369_v8 = vsel %vm748_vm11, %v9094_v1, %v9095_v63 }
 0x4b6   :  { %8409 = vmatmul.msk.f32.gmra.mxu3 %vm1011_vm1, %v8405_v11  ;;  %v8439_v11 = vld [vmem:[%s12180_s21 + $0x68] sm:$0xff] }
 0x4b7   :  { %v9043_v18 = vpop.permute.xlu0 %9042 }
 0x4b8   :  { %v9045_v21 = vunpack.i.h.bf16 %v9043_v18  ;;  %v9044_v22 = vunpack.i.l.bf16 %v9043_v18 }
 0x4b9   :  { %v9053_v24 = vpop.permute.xlu1 %9052 }
 0x4ba   :  { %v9055_v26 = vunpack.i.h.bf16 %v9053_v24  ;;  %v9054_v27 = vunpack.i.l.bf16 %v9053_v24  ;;  %v1289_v28 = vsel %vm676_vm10, %v9045_v21, %v9049_v20  ;;  %v1292_v29 = vsel %vm676_vm10, %v9040_v12, %v9044_v22 }
 0x4bb   :  { %1318 = vmatpush.msrb.mxu2 %v1289_v28  ;;  %1340 = vmatpush.msrb.mxu3 %v1292_v29  ;;  %v1090_v18 = vpop.f32.mrf.mxu0  ;;  %v1113_v19 = vpop.f32.mrf.mxu1 }
 0x4bc   :  { %8416 = vmatmul.msk.f32.vlgmr.msra.gmra.mxu2 %vm1011_vm1, %v8414_v25  ;;  %v1212_v30 = vsel %vm604_vm9, %v9054_v27, %v9055_v26 }
 0x4bd   :  { %1238 = vmatpush.msrb.mxu0 %v1212_v30  ;;  %1341 = vmatpush.msrb.mxu3 %v1290_v31 }
 0x4be   :  { %8418 = vmatmul.msk.f32.vlgmr.msra.gmra.mxu3 %vm1011_vm1, %v8414_v25 }
 0x4bf   :  { %v9058_v32 = vpop.permute.xlu0 %9057 }
 0x4c0   :  { %v9060_v36 = vunpack.i.h.bf16 %v9058_v32  ;;  %v9059_v33 = vunpack.i.l.bf16 %v9058_v32 }
 0x4c1   :  { %v9068_v37 = vpop.permute.xlu1 %9067 }
 0x4c2   :  { %v9070_v39 = vunpack.i.h.bf16 %v9068_v37  ;;  %v9069_v40 = vunpack.i.l.bf16 %v9068_v37  ;;  %v1210_v41 = vsel %vm604_vm9, %v9060_v36, %v9064_v35  ;;  %v1213_v42 = vsel %vm604_vm9, %v9055_v26, %v9059_v33 }
 0x4c3   :  { %1239 = vmatpush.msrb.mxu0 %v1210_v41  ;;  %1261 = vmatpush.msrb.mxu1 %v1213_v42 }
 0x4c4   :  { %8417 = vmatmul.msk.f32.gmra.mxu2 %vm1011_vm1, %v8415_v38  ;;  %8422 = vmatmul.msk.f32.vlgmr.msrb.gmra.mxu0 %vm1011_vm1, %v8420_v44  ;;  %v1449_v0 = vsel %vm820_vm12, %v9069_v40, %v9070_v39 }
 0x4c5   :  { %1475 = vmatpush.msra.mxu2 %v1449_v0  ;;  %1262 = vmatpush.msrb.mxu1 %v1211_v45 }
 0x4c6   :  { %8419 = vmatmul.msk.f32.gmra.mxu3 %vm1011_vm1, %v8415_v38  ;;  %8424 = vmatmul.msk.f32.vlgmr.msrb.gmra.mxu1 %vm1011_vm1, %v8420_v44 }
 0x4c7   :  { %v9073_v47 = vpop.permute.xlu0 %9072 }
 0x4c8   :  { %v9075_v50 = vunpack.i.h.bf16 %v9073_v47  ;;  %v9074_v51 = vunpack.i.l.bf16 %v9073_v47 }
 0x4c9   :  { %v9083_v52 = vpop.permute.xlu1 %9082 }
 0x4ca   :  { %v9085_v54 = vunpack.i.h.bf16 %v9083_v52  ;;  %v9084_v55 = vunpack.i.l.bf16 %v9083_v52  ;;  %v1447_v56 = vsel %vm820_vm12, %v9075_v50, %v9079_v49  ;;  %v1450_v57 = vsel %vm820_vm12, %v9070_v39, %v9074_v51 }
 0x4cb   :  { %1476 = vmatpush.msra.mxu2 %v1447_v56  ;;  %1498 = vmatpush.msra.mxu3 %v1450_v57  ;;  %vm6120_vm12 = vcmask 138248  }
 0x4cc   :  { %8423 = vmatmul.msk.f32.gmra.mxu0 %vm1011_vm1, %v8421_v58  ;;  %8428 = vmatmul.msk.f32.vlgmr.msrb.gmra.mxu2 %vm1011_vm1, %v8426_v53  ;;  %v1370_v59 = vsel %vm748_vm11, %v9084_v55, %v9085_v54 }
 0x4cd   :  { %1396 = vmatpush.msra.mxu0 %v1370_v59  ;;  %1499 = vmatpush.msra.mxu3 %v1448_v60 }
 0x4ce   :  { %8425 = vmatmul.msk.f32.gmra.mxu1 %vm1011_vm1, %v8421_v58  ;;  %8430 = vmatmul.msk.f32.vlgmr.msrb.gmra.mxu3 %vm1011_vm1, %v8426_v53 }
 0x4cf   :  { %v9088_v62 = vpop.permute.xlu0 %9087 }
 0x4d0   :  { %v9090_v2 = vunpack.i.h.bf16 %v9088_v62  ;;  %v9089_v3 = vunpack.i.l.bf16 %v9088_v62 }
 0x4d1   :  { %v1521_v57 = vpop.permute.xlu1 %1520 }
 0x4d2   :  { %v1368_v5 = vsel %vm748_vm11, %v9090_v2, %v9094_v1  ;;  %v1371_v6 = vsel %vm748_vm11, %v9085_v54, %v9089_v3  ;;  %vm5195_vm11 = vcmask 277768  }
 0x4d3   :  { %1397 = vmatpush.msra.mxu0 %v1368_v5  ;;  %1419 = vmatpush.msra.mxu1 %v1371_v6 }
 0x4d4   :  { %8429 = vmatmul.msk.f32.gmra.mxu2 %vm1011_vm1, %v8427_v4  ;;  %8434 = vmatmul.msk.f32.vlgmr.msra.gmra.mxu0 %vm1011_vm1, %v8432_v7 }
 0x4d5   :  { %1420 = vmatpush.msra.mxu1 %v1369_v8 }
 0x4d6   :  { %8431 = vmatmul.msk.f32.gmra.mxu3 %vm1011_vm1, %v8427_v4  ;;  %8436 = vmatmul.msk.f32.vlgmr.msra.gmra.mxu1 %vm1011_vm1, %v8432_v7 }
 0x4d7   :  { %v1516_v3 = vpop.permute.xlu0 %1515 }
 0x4dc   :  { %8435 = vmatmul.msk.f32.gmra.mxu0 %vm1011_vm1, %v8433_v10  ;;  %8440 = vmatmul.msk.f32.vlgmr.msra.gmra.mxu2 %vm1011_vm1, %v8438_v9 }
 0x4de   :  { %8437 = vmatmul.msk.f32.gmra.mxu1 %vm1011_vm1, %v8433_v10  ;;  %8442 = vmatmul.msk.f32.vlgmr.msra.gmra.mxu3 %vm1011_vm1, %v8438_v9 }
 0x4e4   :  { %8441 = vmatmul.msk.f32.gmra.mxu2 %vm1011_vm1, %v8439_v11 }
 0x4e6   :  { %8443 = vmatmul.msk.f32.gmra.mxu3 %vm1011_vm1, %v8439_v11 }
 0x52f   :  { %v1035_v12 = vpop.f32.mrf.mxu2 }
 0x530   :  { %v1088_v35 = vadd.f32 %v1087_v14, %v1035_v12 }
 0x531   :  { %v1058_v13 = vpop.f32.mrf.mxu3 }
 0x532   :  { %v1111_v42 = vadd.f32 %v1110_v15, %v1058_v13 }
 0x537   :  { %v1038_v16 = vpop.f32.mrf.mxu2 }
 0x538   :  { %v1091_v30 = vadd.f32 %v1090_v18, %v1038_v16 }
 0x539   :  { %v1061_v17 = vpop.f32.mrf.mxu3 }
 0x53a   :  { %v1114_v37 = vadd.f32 %v1113_v19, %v1061_v17  ;;  %v10700_v17 = vld [vmem:[#allocation2 + $0x40] sm:$0xff] }
 0x53f   :  { %v1162_v20 = vpop.f32.mrf.mxu2 }
 0x540   :  { %v1191_v38 = vadd.f32 %v1162_v20, %v1088_v35 }
 0x541   :  { %v1185_v21 = vpop.f32.mrf.mxu3  ;;  %v1241_v22 = vpop.f32.mrf.mxu0 }
 0x542   :  { %v1192_v44 = vadd.f32 %v1185_v21, %v1111_v42  ;;  %v1270_v0 = vadd.f32 %v1241_v22, %v1191_v38 }
 0x543   :  { %v1264_v23 = vpop.f32.mrf.mxu1 }
 0x544   :  { %v1271_v50 = vadd.f32 %v1264_v23, %v1192_v44 }
 0x547   :  { %v1165_v24 = vpop.f32.mrf.mxu2 }
 0x548   :  { %v1193_v36 = vadd.f32 %v1165_v24, %v1091_v30  ;;  %v2055_v24 = vld [vmem:[%s12181_s16 + $0x18] sm:$0xff] }
 0x549   :  { %v1188_v25 = vpop.f32.mrf.mxu3  ;;  %v1244_v26 = vpop.f32.mrf.mxu0 }
 0x54a   :  { %v1194_v39 = vadd.f32 %v1188_v25, %v1114_v37  ;;  %v1272_v40 = vadd.f32 %v1244_v26, %v1193_v36  ;;  %v2052_v25 = vld [vmem:[%s12181_s16] sm:$0xff]  ;;  %v2054_v26 = vld [vmem:[%s12181_s16 + $0x10] sm:$0xff] }
 0x54b   :  { %v1267_v28 = vpop.f32.mrf.mxu1 }
 0x54c   :  { %v1273_v45 = vadd.f32 %v1267_v28, %v1194_v39  ;;  %v1562_v28 = vld [vmem:[%s12182_s26] sm:$0xff]  ;;  %v1565_v39 = vld [vmem:[%s12182_s26 + $0x18] sm:$0xff] }
 0x54f   :  { %v1320_v27 = vpop.f32.mrf.mxu2 }
 0x550   :  { %v1349_v51 = vadd.f32 %v1320_v27, %v1270_v0  ;;  %v2053_v27 = vld [vmem:[%s12181_s16 + $0x8] sm:$0xff] }
 0x551   :  { %v1343_v29 = vpop.f32.mrf.mxu3  ;;  %v1399_v32 = vpop.f32.mrf.mxu0 }
 0x552   :  { %v1350_v54 = vadd.f32 %v1343_v29, %v1271_v50  ;;  %v1428_v59 = vadd.f32 %v1399_v32, %v1349_v51  ;;  %v1563_v29 = vld [vmem:[%s12182_s26 + $0x8] sm:$0xff]  ;;  %v8444_v51 = vld [vmem:[%s12182_s26 + $0x20] sm:$0xff] }
 0x553   :  { %v1422_v33 = vpop.f32.mrf.mxu1 }
 0x554   :  { %v1429_v62 = vadd.f32 %v1422_v33, %v1350_v54 }
 0x557   :  { %v1323_v31 = vpop.f32.mrf.mxu2 }
 0x558   :  { %v1351_v46 = vadd.f32 %v1323_v31, %v1272_v40  ;;  %v1564_v31 = vld [vmem:[%s12182_s26 + $0x10] sm:$0xff] }
 0x559   :  { %v1346_v34 = vpop.f32.mrf.mxu3  ;;  %v1402_v47 = vpop.f32.mrf.mxu0 }
 0x55a   :  { %v1352_v48 = vadd.f32 %v1346_v34, %v1273_v45  ;;  %v1430_v52 = vadd.f32 %v1402_v47, %v1351_v46 }
 0x55b   :  { %v1425_v49 = vpop.f32.mrf.mxu1 }
 0x55c   :  { %v1431_v55 = vadd.f32 %v1425_v49, %v1352_v48 }
 0x55f   :  { %v1478_v41 = vpop.f32.mrf.mxu2 }
 0x560   :  { %v1507_v63 = vadd.f32 %v1478_v41, %v1428_v59 }
 0x561   :  { %v1501_v43 = vpop.f32.mrf.mxu3 }
 0x562   :  { %v1508_v4 = vadd.f32 %v1501_v43, %v1429_v62  ;;  %v1523_v6 = vadd.f32 %v1516_v3, %v1507_v63 }
 0x564   :  { %v1524_v7 = vadd.f32 %v1516_v3, %v1508_v4  ;;  %v1527_v8 = vmax.f32 %v1523_v6, 0.0 }
 0x566   :  { %v1528_v9 = vmax.f32 %v1524_v7, 0.0 }
 0x567   :  { %v1481_v53 = vpop.f32.mrf.mxu2 }
 0x568   :  { %v1509_v56 = vadd.f32 %v1481_v53, %v1430_v52 }
 0x569   :  { %v1504_v58 = vpop.f32.mrf.mxu3 }
 0x56a   :  { %v1525_v60 = vadd.f32 %v1521_v57, %v1509_v56  ;;  %v1510_v61 = vadd.f32 %v1504_v58, %v1431_v55 }
 0x56c   :  { %v1526_v1 = vadd.f32 %v1521_v57, %v1510_v61  ;;  %v1529_v2 = vmax.f32 %v1525_v60, 0.0 }
 0x56e   :  { %1539 = vrot.lane.b32.xlu2 %v1529_v2, %s10189_s25  ;;  %v1530_v5 = vmax.f32 %v1526_v1, 0.0 }
 0x570   :  { %1541 = vrot.lane.b32.xlu1 %v1530_v5, %s10189_s25  ;;  %v8445_v5 = vld [vmem:[%s12182_s26 + $0x28] sm:$0xff] }
 0x576   :  { %1535 = vrot.lane.b32.xlu2 %v1527_v8, %s10189_s25 }
 0x578   :  { %1537 = vrot.lane.b32.xlu1 %v1528_v9, %s10189_s25 }
 0x5c8   :  { %v1540_v10 = vpop.permute.xlu2 %1539 }
 0x5c9   :  { %1556 = vst.msk [vmem:[#allocation2 + $0x18] sm:$0xff] %vm1552_vm3, %v1540_v10 }
 0x5d0   :  { %v1536_v11 = vpop.permute.xlu2 %1535  ;;  %v1568_v12 = vld [vmem:[#allocation2 + $0x18] sm:$0xff] }
 0x5d1   :  { %1553 = vst.msk [vmem:[#allocation2] sm:$0xff] %vm1552_vm3, %v1536_v11  ;;  %1699 = vmatpush.msrb.mxu2 %v1568_v12 }
 0x5d8   :  { %v1566_v13 = vld [vmem:[#allocation2] sm:$0xff] }
 0x5d9   :  { %1700 = vmatpush.msrb.mxu2 %v1566_v13 }
 0x5da   :  { %8456 = vmatmul.msk.f32.vlgmr.msrb.gmra.mxu2 %vm1011_vm1, %v1562_v28 }
 0x5e2   :  { %v1542_v14 = vpop.permute.xlu1 %1541  ;;  %8457 = vmatmul.msk.f32.gmra.mxu2 %vm1011_vm1, %v1563_v29 }
 0x5e3   :  { %v1545_v15 = vsel %vm1543_vm4, %v1540_v10, %v1542_v14  ;;  %1558 = vst.msk [vmem:[#allocation2 + $0x28] sm:$0xff] %vm1543_vm4, %v1542_v14  ;;  %v8446_v14 = vld [vmem:[%s12182_s26 + $0x30] sm:$0xff] }
 0x5e4   :  { %1557 = vst [vmem:[#allocation2 + $0x20] sm:$0xff] %v1545_v15  ;;  %1728 = vmatpush.msrb.mxu3 %v1545_v15  ;;  %v9097_v16 = vpack.i.bf16 %v1545_v15, %v1568_v12 }
 0x5e5   :  { %1561 = vst.msk [vmem:[#allocation2 + $0x28] sm:$0xff] %vm1559_vm5, %v10700_v17 }
 0x5e6   :  { %9098 = vrot.lane.b32.xlu0 %v9097_v16, %s10183_s7 }
 0x5ea   :  { %v1538_v18 = vpop.permute.xlu1 %1537  ;;  %8458 = vmatmul.msk.f32.gmra.mxu2 %vm1011_vm1, %v1564_v31 }
 0x5eb   :  { %v1544_v19 = vsel %vm1543_vm4, %v1536_v11, %v1538_v18  ;;  %1555 = vst.msk [vmem:[#allocation2 + $0x10] sm:$0xff] %vm1543_vm4, %v1538_v18  ;;  %v8476_v18 = vld [vmem:[%s12182_s26 + $0x60] sm:$0xff] }
 0x5ec   :  { %1554 = vst [vmem:[#allocation2 + $0x8] sm:$0xff] %v1544_v19  ;;  %v1576_v20 = vld [vmem:[#allocation2 + $0x28] sm:$0xff]  ;;  %1729 = vmatpush.msrb.mxu3 %v1544_v19 }
 0x5ed   :  { %1560 = vst.msk [vmem:[#allocation2 + $0x10] sm:$0xff] %vm1559_vm5, %v10700_v17  ;;  %v9102_v21 = vpack.i.bf16 %v1566_v13, %v1576_v20  ;;  %8460 = vmatmul.msk.f32.vlgmr.msrb.gmra.mxu3 %vm1011_vm1, %v1562_v28  ;;  %v8478_v28 = vld [vmem:[%s12182_s26 + $0x70] sm:$0xff] }
 0x5ee   :  { %9113 = vrot.lane.b32.xlu0 %v9097_v16, %s10182_s5 }
 0x5ef   :  { %9103 = vrot.lane.b32.xlu2 %v9102_v21, %s10183_s7 }
 0x5f2   :  { %8459 = vmatmul.msk.f32.gmra.mxu2 %vm1011_vm1, %v1565_v39 }
 0x5f4   :  { %v1575_v22 = vld [vmem:[#allocation2 + $0x10] sm:$0xff] }
 0x5f5   :  { %v9107_v23 = vpack.i.bf16 %v1575_v22, %v1544_v19  ;;  %8461 = vmatmul.msk.f32.gmra.mxu3 %vm1011_vm1, %v1563_v29  ;;  %v8465_v29 = vld [vmem:[%s12182_s26 + $0x48] sm:$0xff] }
 0x5f6   :  { %9133 = vrot.lane.b32.xlu0 %v9097_v16, %s10184_s10 }
 0x5f7   :  { %9118 = vrot.lane.b32.xlu2 %v9102_v21, %s10182_s5  ;;  %9108 = vrot.lane.b32.xlu1 %v9107_v23, %s10183_s7 }
 0x5fd   :  { %8462 = vmatmul.msk.f32.gmra.mxu3 %vm1011_vm1, %v1564_v31  ;;  %v8466_v31 = vld [vmem:[%s12182_s26 + $0x50] sm:$0xff] }
 0x5fe   :  { %9143 = vrot.lane.b32.xlu0 %v9097_v16, %s10185_s30 }
 0x5ff   :  { %9138 = vrot.lane.b32.xlu2 %v9102_v21, %s10184_s10  ;;  %9123 = vrot.lane.b32.xlu1 %v9107_v23, %s10182_s5 }
 0x605   :  { %8463 = vmatmul.msk.f32.gmra.mxu3 %vm1011_vm1, %v1565_v39 }
 0x606   :  { %2073 = vperm.xlu0 %9096, %v2055_v24  }
 0x607   :  { %9148 = vrot.lane.b32.xlu2 %v9102_v21, %s10185_s30  ;;  %9128 = vrot.lane.b32.xlu1 %v9107_v23, %s10184_s10 }
 0x60e   :  { %2058 = vperm.xlu0 %9096, %v2052_v25  }
 0x60f   :  { %2068 = vperm.xlu2 %9005, %v2054_v26   ;;  %9153 = vrot.lane.b32.xlu1 %v9107_v23, %s10185_s30  ;;  %v8447_v23 = vld [vmem:[%s12182_s26 + $0x38] sm:$0xff]  ;;  %v8477_v26 = vld [vmem:[%s12182_s26 + $0x68] sm:$0xff] }
 0x617   :  { %2063 = vperm.xlu1 %9004, %v2053_v27   ;;  %v8464_v27 = vld [vmem:[%s12182_s26 + $0x40] sm:$0xff] }
 0x649   :  { %v9104_v30 = vpop.permute.xlu2 %9103 }
 0x64a   :  { %v9105_v34 = vunpack.i.l.bf16 %v9104_v30  ;;  %v9106_v43 = vunpack.i.h.bf16 %v9104_v30  ;;  %v8479_v30 = vld [vmem:[%s12182_s26 + $0x78] sm:$0xff] }
 0x651   :  { %v9119_v33 = vpop.permute.xlu2 %9118 }
 0x652   :  { %v9120_v54 = vunpack.i.l.bf16 %v9119_v33  ;;  %v9121_v1 = vunpack.i.h.bf16 %v9119_v33  ;;  %v8491_v33 = vld [vmem:[%s12182_s26 + $0x98] sm:$0xff] }
 0x658   :  { %v9099_v32 = vpop.permute.xlu0 %9098 }
 0x659   :  { %v9101_v35 = vunpack.i.h.bf16 %v9099_v32  ;;  %v9100_v36 = vunpack.i.l.bf16 %v9099_v32  ;;  %v9139_v41 = vpop.permute.xlu2 %9138  ;;  %v8467_v32 = vld [vmem:[%s12182_s26 + $0x58] sm:$0xff] }
 0x65a   :  { %v9140_v44 = vunpack.i.l.bf16 %v9139_v41  ;;  %v9141_v11 = vunpack.i.h.bf16 %v9139_v41 }
 0x65b   :  { %v1597_v37 = vsel %vm406_vm7, %v9100_v36, %v9101_v35  ;;  %v1598_v38 = vsel %vm406_vm7, %v9101_v35, %v9105_v34  ;;  %v8488_v34 = vld [vmem:[%s12182_s26 + $0x80] sm:$0xff]  ;;  %v8489_v35 = vld [vmem:[%s12182_s26 + $0x88] sm:$0xff]  ;;  %v8490_v36 = vld [vmem:[%s12182_s26 + $0x90] sm:$0xff] }
 0x65c   :  { %1629 = vmatpush.msrb.mxu0 %v1597_v37  ;;  %1658 = vmatpush.msrb.mxu1 %v1598_v38 }
 0x65d   :  { %v1702_v41 = vpop.f32.mrf.mxu2 }
 0x660   :  { %v9114_v40 = vpop.permute.xlu0 %9113 }
 0x661   :  { %v9116_v47 = vunpack.i.h.bf16 %v9114_v40  ;;  %v9115_v48 = vunpack.i.l.bf16 %v9114_v40  ;;  %v9149_v59 = vpop.permute.xlu2 %9148 }
 0x662   :  { %v9150_v2 = vunpack.i.l.bf16 %v9149_v59  ;;  %v9151_v20 = vunpack.i.h.bf16 %v9149_v59 }
 0x663   :  { %v1762_v57 = vsel %vm532_vm8, %v9115_v48, %v9116_v47  ;;  %v1763_v58 = vsel %vm532_vm8, %v9116_v47, %v9120_v54 }
 0x668   :  { %v9134_v42 = vpop.permute.xlu0 %9133 }
 0x669   :  { %v9109_v0 = vpop.permute.xlu1 %9108  ;;  %v9136_v45 = vunpack.i.h.bf16 %v9134_v42  ;;  %v9135_v46 = vunpack.i.l.bf16 %v9134_v42 }
 0x66a   :  { %v9111_v49 = vunpack.i.h.bf16 %v9109_v0  ;;  %v9110_v50 = vunpack.i.l.bf16 %v9109_v0  ;;  %v1705_v0 = vpop.f32.mrf.mxu2 }
 0x66b   :  { %v1865_v52 = vsel %vm604_vm9, %v9135_v46, %v9136_v45  ;;  %v1866_v53 = vsel %vm604_vm9, %v9136_v45, %v9140_v44 }
 0x66c   :  { %v1595_v55 = vsel %vm406_vm7, %v9106_v43, %v9110_v50  ;;  %v1596_v56 = vsel %vm406_vm7, %v9110_v50, %v9111_v49  ;;  %1897 = vmatpush.msra.mxu2 %v1865_v52  ;;  %1926 = vmatpush.msra.mxu3 %v1866_v53 }
 0x66d   :  { %1630 = vmatpush.msrb.mxu0 %v1595_v55  ;;  %1659 = vmatpush.msrb.mxu1 %v1596_v56 }
 0x66e   :  { %8448 = vmatmul.msk.f32.vlgmr.msrb.gmra.mxu0 %vm1011_vm1, %v8444_v51  ;;  %8452 = vmatmul.msk.f32.vlgmr.msrb.gmra.mxu1 %vm1011_vm1, %v8444_v51 }
 0x66f   :  { %1794 = vmatpush.msra.mxu0 %v1762_v57  ;;  %1823 = vmatpush.msra.mxu1 %v1763_v58 }
 0x670   :  { %v9144_v60 = vpop.permute.xlu0 %9143  ;;  %v1731_v42 = vpop.f32.mrf.mxu3 }
 0x671   :  { %v9124_v61 = vpop.permute.xlu1 %9123  ;;  %v9146_v62 = vunpack.i.h.bf16 %v9144_v60  ;;  %v9145_v63 = vunpack.i.l.bf16 %v9144_v60 }
 0x672   :  { %v9126_v3 = vunpack.i.h.bf16 %v9124_v61  ;;  %v9125_v4 = vunpack.i.l.bf16 %v9124_v61  ;;  %v1708_v50 = vpop.f32.mrf.mxu2 }
 0x673   :  { %v1968_v8 = vsel %vm676_vm10, %v9145_v63, %v9146_v62  ;;  %v1969_v9 = vsel %vm676_vm10, %v9146_v62, %v9150_v2 }
 0x674   :  { %v1760_v6 = vsel %vm532_vm8, %v9121_v1, %v9125_v4  ;;  %v1761_v7 = vsel %vm532_vm8, %v9125_v4, %v9126_v3 }
 0x675   :  { %1795 = vmatpush.msra.mxu0 %v1760_v6  ;;  %1824 = vmatpush.msra.mxu1 %v1761_v7 }
 0x676   :  { %8449 = vmatmul.msk.f32.gmra.mxu0 %vm1011_vm1, %v8445_v5  ;;  %8453 = vmatmul.msk.f32.gmra.mxu1 %vm1011_vm1, %v8445_v5 }
 0x677   :  { %2000 = vmatpush.msrb.mxu0 %v1968_v8  ;;  %2029 = vmatpush.msrb.mxu1 %v1969_v9 }
 0x678   :  { %v1734_v47 = vpop.f32.mrf.mxu3 }
 0x679   :  { %v9129_v10 = vpop.permute.xlu1 %9128 }
 0x67a   :  { %v9131_v12 = vunpack.i.h.bf16 %v9129_v10  ;;  %v9130_v13 = vunpack.i.l.bf16 %v9129_v10  ;;  %v1711_v54 = vpop.f32.mrf.mxu2 }
 0x67c   :  { %v1863_v15 = vsel %vm604_vm9, %v9141_v11, %v9130_v13  ;;  %v1864_v16 = vsel %vm604_vm9, %v9130_v13, %v9131_v12 }
 0x67d   :  { %1898 = vmatpush.msra.mxu2 %v1863_v15  ;;  %1927 = vmatpush.msra.mxu3 %v1864_v16 }
 0x67e   :  { %8450 = vmatmul.msk.f32.gmra.mxu0 %vm1011_vm1, %v8446_v14  ;;  %8454 = vmatmul.msk.f32.gmra.mxu1 %vm1011_vm1, %v8446_v14 }
 0x67f   :  { %8480 = vmatmul.msk.f32.vlgmr.msra.gmra.mxu2 %vm1011_vm1, %v8476_v18  ;;  %8484 = vmatmul.msk.f32.vlgmr.msra.gmra.mxu3 %vm1011_vm1, %v8476_v18 }
 0x680   :  { %v1737_v51 = vpop.f32.mrf.mxu3 }
 0x681   :  { %v9154_v19 = vpop.permute.xlu1 %9153 }
 0x682   :  { %v9156_v21 = vunpack.i.h.bf16 %v9154_v19  ;;  %v9155_v22 = vunpack.i.l.bf16 %v9154_v19 }
 0x684   :  { %v1966_v24 = vsel %vm676_vm10, %v9151_v20, %v9155_v22  ;;  %v1967_v25 = vsel %vm676_vm10, %v9155_v22, %v9156_v21 }
 0x685   :  { %2001 = vmatpush.msrb.mxu0 %v1966_v24  ;;  %2030 = vmatpush.msrb.mxu1 %v1967_v25 }
 0x686   :  { %8451 = vmatmul.msk.f32.gmra.mxu0 %vm1011_vm1, %v8447_v23  ;;  %8455 = vmatmul.msk.f32.gmra.mxu1 %vm1011_vm1, %v8447_v23 }
 0x687   :  { %8481 = vmatmul.msk.f32.gmra.mxu2 %vm1011_vm1, %v8477_v26  ;;  %8485 = vmatmul.msk.f32.gmra.mxu3 %vm1011_vm1, %v8477_v26 }
 0x688   :  { %v1740_v55 = vpop.f32.mrf.mxu3 }
 0x689   :  { %v2064_v8 = vpop.permute.xlu1 %2063 }
 0x68e   :  { %8468 = vmatmul.msk.f32.vlgmr.msra.gmra.mxu0 %vm1011_vm1, %v8464_v27  ;;  %8472 = vmatmul.msk.f32.vlgmr.msra.gmra.mxu1 %vm1011_vm1, %v8464_v27 }
 0x68f   :  { %8482 = vmatmul.msk.f32.gmra.mxu2 %vm1011_vm1, %v8478_v28  ;;  %8486 = vmatmul.msk.f32.gmra.mxu3 %vm1011_vm1, %v8478_v28 }
 0x696   :  { %8469 = vmatmul.msk.f32.gmra.mxu0 %vm1011_vm1, %v8465_v29  ;;  %8473 = vmatmul.msk.f32.gmra.mxu1 %vm1011_vm1, %v8465_v29  ;;  %v2069_v29 = vpop.permute.xlu2 %2068 }
 0x697   :  { %8483 = vmatmul.msk.f32.gmra.mxu2 %vm1011_vm1, %v8479_v30  ;;  %8487 = vmatmul.msk.f32.gmra.mxu3 %vm1011_vm1, %v8479_v30 }
 0x69e   :  { %8470 = vmatmul.msk.f32.gmra.mxu0 %vm1011_vm1, %v8466_v31  ;;  %8474 = vmatmul.msk.f32.gmra.mxu1 %vm1011_vm1, %v8466_v31 }
 0x6a6   :  { %8471 = vmatmul.msk.f32.gmra.mxu0 %vm1011_vm1, %v8467_v32  ;;  %8475 = vmatmul.msk.f32.gmra.mxu1 %vm1011_vm1, %v8467_v32 }
 0x6ae   :  { %8492 = vmatmul.msk.f32.vlgmr.msrb.gmra.mxu0 %vm1011_vm1, %v8488_v34  ;;  %8496 = vmatmul.msk.f32.vlgmr.msrb.gmra.mxu1 %vm1011_vm1, %v8488_v34 }
 0x6b6   :  { %8493 = vmatmul.msk.f32.gmra.mxu0 %vm1011_vm1, %v8489_v35  ;;  %8497 = vmatmul.msk.f32.gmra.mxu1 %vm1011_vm1, %v8489_v35 }
 0x6be   :  { %8494 = vmatmul.msk.f32.gmra.mxu0 %vm1011_vm1, %v8490_v36  ;;  %8498 = vmatmul.msk.f32.gmra.mxu1 %vm1011_vm1, %v8490_v36 }
 0x6c6   :  { %8495 = vmatmul.msk.f32.gmra.mxu0 %vm1011_vm1, %v8491_v33  ;;  %8499 = vmatmul.msk.f32.gmra.mxu1 %vm1011_vm1, %v8491_v33 }
 0x6eb   :  { %v1632_v37 = vpop.f32.mrf.mxu0  ;;  %v10800_v38 = vpop.f32.mrf.mxu1 }
 0x6ec   :  { %v1703_v35 = vadd.f32 %v1702_v41, %v1632_v37 }
 0x6f3   :  { %v1635_v39 = vpop.f32.mrf.mxu0  ;;  %v1664_v40 = vpop.f32.mrf.mxu1 }
 0x6f4   :  { %v1706_v3 = vadd.f32 %v1705_v0, %v1635_v39  ;;  %v1735_v19 = vadd.f32 %v1734_v47, %v1664_v40  ;;  %v1732_v40 = vadd.f32 %v1731_v42, %v10800_v38  ;;  %v2074_v0 = vpop.permute.xlu0 %2073 }
 0x6fb   :  { %v1638_v43 = vpop.f32.mrf.mxu0  ;;  %v1667_v44 = vpop.f32.mrf.mxu1 }
 0x6fc   :  { %v1738_v9 = vadd.f32 %v1737_v51, %v1667_v44  ;;  %v1709_v10 = vadd.f32 %v1708_v50, %v1638_v43 }
 0x702   :  { %v1900_v58 = vpop.f32.mrf.mxu2  ;;  %v1929_v59 = vpop.f32.mrf.mxu3 }
 0x703   :  { %v1641_v45 = vpop.f32.mrf.mxu0  ;;  %v1670_v46 = vpop.f32.mrf.mxu1 }
 0x704   :  { %v1741_v25 = vadd.f32 %v1740_v55, %v1670_v46  ;;  %v1712_v26 = vadd.f32 %v1711_v54, %v1641_v45 }
 0x70a   :  { %v1903_v62 = vpop.f32.mrf.mxu2  ;;  %v1932_v63 = vpop.f32.mrf.mxu3 }
 0x70b   :  { %v1797_v48 = vpop.f32.mrf.mxu0  ;;  %v1826_v49 = vpop.f32.mrf.mxu1 }
 0x70c   :  { %v1838_v47 = vadd.f32 %v1797_v48, %v1703_v35  ;;  %v1839_v46 = vadd.f32 %v1826_v49, %v1732_v40  ;;  %v2148_v35 = vld [vmem:[#allocation6] sm:$0xff] }
 0x70e   :  { %v1941_v55 = vadd.f32 %v1900_v58, %v1838_v47  ;;  %v2149_v47 = vld [vmem:[#allocation6 + $0x8] sm:$0xff] }
 0x712   :  { %v1906_v12 = vpop.f32.mrf.mxu2  ;;  %v1935_v13 = vpop.f32.mrf.mxu3 }
 0x713   :  { %v1800_v52 = vpop.f32.mrf.mxu0  ;;  %v1829_v53 = vpop.f32.mrf.mxu1 }
 0x714   :  { %v1840_v4 = vadd.f32 %v1800_v52, %v1706_v3  ;;  %v1841_v22 = vadd.f32 %v1829_v53, %v1735_v19 }
 0x716   :  { %v1943_v5 = vadd.f32 %v1903_v62, %v1840_v4  ;;  %v1944_v36 = vadd.f32 %v1932_v63, %v1841_v22  ;;  %v2059_v62 = vpop.permute.xlu0 %2058 }
 0x71a   :  { %v1909_v33 = vpop.f32.mrf.mxu2  ;;  %v1938_v39 = vpop.f32.mrf.mxu3 }
 0x71b   :  { %v1803_v56 = vpop.f32.mrf.mxu0  ;;  %v1832_v57 = vpop.f32.mrf.mxu1 }
 0x71c   :  { %v1842_v14 = vadd.f32 %v1803_v56, %v1709_v10  ;;  %v1843_v15 = vadd.f32 %v1832_v57, %v1738_v9  ;;  %v1942_v56 = vadd.f32 %v1929_v59, %v1839_v46 }
 0x71e   :  { %v1945_v20 = vadd.f32 %v1906_v12, %v1842_v14  ;;  %v1946_v21 = vadd.f32 %v1935_v13, %v1843_v15 }
 0x723   :  { %v1806_v60 = vpop.f32.mrf.mxu0  ;;  %v1835_v61 = vpop.f32.mrf.mxu1 }
 0x724   :  { %v1844_v30 = vadd.f32 %v1806_v60, %v1712_v26  ;;  %v1845_v31 = vadd.f32 %v1835_v61, %v1741_v25 }
 0x726   :  { %v1947_v45 = vadd.f32 %v1909_v33, %v1844_v30  ;;  %v1948_v51 = vadd.f32 %v1938_v39, %v1845_v31  ;;  %v2917_v30 = vld [vmem:[%s12183_s24 + $0x10] sm:$0xff]  ;;  %v2916_v31 = vld [vmem:[%s12183_s24 + $0x8] sm:$0xff] }
 0x72b   :  { %v2003_v1 = vpop.f32.mrf.mxu0  ;;  %v2032_v2 = vpop.f32.mrf.mxu1 }
 0x72c   :  { %v2044_v57 = vadd.f32 %v2003_v1, %v1941_v55  ;;  %v2045_v60 = vadd.f32 %v2032_v2, %v1942_v56  ;;  %v2150_v56 = vld [vmem:[#allocation6 + $0x10] sm:$0xff] }
 0x72e   :  { %v2076_v63 = vadd.f32 %v2059_v62, %v2044_v57  ;;  %v2077_v3 = vadd.f32 %v2059_v62, %v2045_v60 }
 0x730   :  { %v2084_v4 = vmax.f32 %v2076_v63, 0.0 }
 0x733   :  { %v2006_v6 = vpop.f32.mrf.mxu0  ;;  %v2035_v7 = vpop.f32.mrf.mxu1 }
 0x734   :  { %v2046_v11 = vadd.f32 %v2006_v6, %v1943_v5  ;;  %v2047_v50 = vadd.f32 %v2035_v7, %v1944_v36  ;;  %v2085_v5 = vmax.f32 %v2077_v3, 0.0 }
 0x736   :  { %v2078_v16 = vadd.f32 %v2064_v8, %v2046_v11  ;;  %v2079_v54 = vadd.f32 %v2064_v8, %v2047_v50 }
 0x738   :  { %v2086_v18 = vmax.f32 %v2078_v16, 0.0  ;;  %v2087_v49 = vmax.f32 %v2079_v54, 0.0 }
 0x73a   :  { %2104 = vrot.lane.b32.xlu1 %v2086_v18, %s10189_s25 }
 0x73b   :  { %v2009_v23 = vpop.f32.mrf.mxu0  ;;  %v2038_v24 = vpop.f32.mrf.mxu1 }
 0x73c   :  { %v2048_v27 = vadd.f32 %v2009_v23, %v1945_v20  ;;  %v2049_v28 = vadd.f32 %v2038_v24, %v1946_v21 }
 0x73e   :  { %v2080_v32 = vadd.f32 %v2069_v29, %v2048_v27  ;;  %v2081_v34 = vadd.f32 %v2069_v29, %v2049_v28  ;;  %v2915_v29 = vld [vmem:[%s12183_s24] sm:$0xff] }
 0x740   :  { %v2088_v43 = vmax.f32 %v2080_v32, 0.0  ;;  %v2089_v44 = vmax.f32 %v2081_v34, 0.0 }
 0x742   :  { %2108 = vrot.lane.b32.xlu0 %v2088_v43, %s10189_s25  ;;  %2110 = vrot.lane.b32.xlu2 %v2089_v44, %s10189_s25 }
 0x743   :  { %v2012_v52 = vpop.f32.mrf.mxu0  ;;  %v2041_v53 = vpop.f32.mrf.mxu1 }
 0x744   :  { %v2050_v37 = vadd.f32 %v2012_v52, %v1947_v45  ;;  %v2051_v41 = vadd.f32 %v2041_v53, %v1948_v51 }
 0x746   :  { %v2082_v38 = vadd.f32 %v2074_v0, %v2050_v37  ;;  %v2083_v42 = vadd.f32 %v2074_v0, %v2051_v41 }
 0x748   :  { %v2091_v48 = vmax.f32 %v2083_v42, 0.0  ;;  %v2090_v61 = vmax.f32 %v2082_v38, 0.0 }
 0x74a   :  { %2114 = vrot.lane.b32.xlu1 %v2091_v48, %s10189_s25  ;;  %2112 = vrot.lane.b32.xlu2 %v2090_v61, %s10189_s25 }
 0x74b   :  { %2106 = vrot.lane.b32.xlu0 %v2087_v49, %s10189_s25 }
 0x752   :  { %2100 = vrot.lane.b32.xlu2 %v2084_v4, %s10189_s25  ;;  %2102 = vrot.lane.b32.xlu1 %v2085_v5, %s10189_s25  ;;  %v2151_v5 = vld [vmem:[#allocation6 + $0x18] sm:$0xff] }
 0x79c   :  { %v2111_v58 = vpop.permute.xlu2 %2110 }
 0x79d   :  { %2140 = vst.msk [vmem:[#allocation3 + $0x40] sm:$0xff] %vm1543_vm4, %v2111_v58 }
 0x79e   :  { %2146 = vst.msk [vmem:[#allocation3 + $0x40] sm:$0xff] %vm1559_vm5, %v10700_v17 }
 0x7a4   :  { %v2113_v59 = vpop.permute.xlu2 %2112 }
 0x7a5   :  { %2141 = vst.msk [vmem:[#allocation3 + $0x48] sm:$0xff] %vm1552_vm3, %v2113_v59  ;;  %v2167_v7 = vld [vmem:[#allocation3 + $0x40] sm:$0xff] }
 0x7ac   :  { %v2105_v1 = vpop.permute.xlu1 %2104  ;;  %v2101_v2 = vpop.permute.xlu2 %2100  ;;  %v2158_v6 = vld [vmem:[#allocation3 + $0x48] sm:$0xff] }
 0x7ad   :  { %2135 = vst.msk [vmem:[#allocation3 + $0x18] sm:$0xff] %vm1552_vm3, %v2105_v1  ;;  %2316 = vmatpush.msra.mxu0 %v2158_v6 }
 0x7ae   :  { %2132 = vst.msk [vmem:[#allocation3] sm:$0xff] %vm1552_vm3, %v2101_v2 }
 0x7b4   :  { %v2109_v8 = vpop.permute.xlu0 %2108  ;;  %v2154_v16 = vld [vmem:[#allocation3 + $0x18] sm:$0xff] }
 0x7b5   :  { %v2118_v9 = vsel %vm1543_vm4, %v2109_v8, %v2111_v58  ;;  %2138 = vst.msk [vmem:[#allocation3 + $0x30] sm:$0xff] %vm1552_vm3, %v2109_v8  ;;  %v2152_v19 = vld [vmem:[#allocation3] sm:$0xff] }
 0x7b6   :  { %2139 = vst [vmem:[#allocation3 + $0x38] sm:$0xff] %v2118_v9  ;;  %v9157_v10 = vpack.i.bf16 %v2167_v7, %v2118_v9  ;;  %v2161_v58 = vld [vmem:[#allocation6 + $0x20] sm:$0xff] }
 0x7b8   :  { %9158 = vrot.lane.b32.xlu1 %v9157_v10, %s10183_s7 }
 0x7bc   :  { %v2115_v11 = vpop.permute.xlu1 %2114  ;;  %v2156_v12 = vld [vmem:[#allocation3 + $0x30] sm:$0xff] }
 0x7bd   :  { %v2119_v13 = vsel %vm1543_vm4, %v2113_v59, %v2115_v11  ;;  %2143 = vst.msk [vmem:[#allocation3 + $0x58] sm:$0xff] %vm1543_vm4, %v2115_v11  ;;  %v2107_v14 = vpop.permute.xlu0 %2106  ;;  %2317 = vmatpush.msra.mxu0 %v2156_v12 }
 0x7be   :  { %2142 = vst [vmem:[#allocation3 + $0x50] sm:$0xff] %v2119_v13  ;;  %v2117_v15 = vsel %vm1543_vm4, %v2105_v1, %v2107_v14  ;;  %2345 = vmatpush.msra.mxu1 %v2119_v13  ;;  %v9162_v18 = vpack.i.bf16 %v2119_v13, %v2158_v6 }
 0x7bf   :  { %2147 = vst.msk [vmem:[#allocation3 + $0x58] sm:$0xff] %vm1559_vm5, %v10700_v17  ;;  %2318 = vmatpush.msra.mxu0 %v2154_v16  ;;  %v9167_v23 = vpack.i.bf16 %v2117_v15, %v2154_v16 }
 0x7c0   :  { %2136 = vst [vmem:[#allocation3 + $0x20] sm:$0xff] %v2117_v15  ;;  %2346 = vmatpush.msra.mxu1 %v2118_v9  ;;  %9163 = vrot.lane.b32.xlu0 %v9162_v18, %s10183_s7 }
 0x7c1   :  { %2137 = vst.msk [vmem:[#allocation3 + $0x28] sm:$0xff] %vm1543_vm4, %v2107_v14  ;;  %2319 = vmatpush.msra.mxu0 %v2152_v19 }
 0x7c2   :  { %2145 = vst.msk [vmem:[#allocation3 + $0x28] sm:$0xff] %vm1559_vm5, %v10700_v17  ;;  %2347 = vmatpush.msra.mxu1 %v2117_v15  ;;  %8508 = vmatmul.msk.f32.vlgmr.msra.gmra.mxu0 %vm2221_vm6, %v2148_v35  ;;  %v2162_v15 = vld [vmem:[#allocation6 + $0x28] sm:$0xff] }
 0x7c4   :  { %v2103_v20 = vpop.permute.xlu1 %2102 }
 0x7c5   :  { %v2116_v21 = vsel %vm1543_vm4, %v2101_v2, %v2103_v20  ;;  %2134 = vst.msk [vmem:[#allocation3 + $0x10] sm:$0xff] %vm1543_vm4, %v2103_v20 }
 0x7c6   :  { %2133 = vst [vmem:[#allocation3 + $0x8] sm:$0xff] %v2116_v21  ;;  %v2168_v22 = vld [vmem:[#allocation3 + $0x58] sm:$0xff]  ;;  %2348 = vmatpush.msra.mxu1 %v2116_v21 }
 0x7c7   :  { %2144 = vst.msk [vmem:[#allocation3 + $0x10] sm:$0xff] %vm1559_vm5, %v10700_v17  ;;  %v9172_v24 = vpack.i.bf16 %v2156_v12, %v2168_v22  ;;  %v2918_v17 = vld [vmem:[%s12183_s24 + $0x18] sm:$0xff]  ;;  %8512 = vmatmul.msk.f32.vlgmr.msra.gmra.mxu1 %vm2221_vm6, %v2148_v35 }
 0x7c8   :  { %9168 = vrot.lane.b32.xlu0 %v9167_v23, %s10183_s7 }
 0x7c9   :  { %9173 = vrot.lane.b32.xlu2 %v9172_v24, %s10183_s7  ;;  %v2166_v25 = vld [vmem:[#allocation3 + $0x28] sm:$0xff] }
 0x7ca   :  { %v9177_v27 = vpack.i.bf16 %v2152_v19, %v2166_v25  ;;  %8509 = vmatmul.msk.f32.gmra.mxu0 %vm2221_vm6, %v2149_v47 }
 0x7ce   :  { %v2165_v26 = vld [vmem:[#allocation3 + $0x10] sm:$0xff] }
 0x7cf   :  { %v9182_v28 = vpack.i.bf16 %v2165_v26, %v2116_v21  ;;  %8513 = vmatmul.msk.f32.gmra.mxu1 %vm2221_vm6, %v2149_v47 }
 0x7d0   :  { %9193 = vrot.lane.b32.xlu0 %v9162_v18, %s10182_s5 }
 0x7d1   :  { %9178 = vrot.lane.b32.xlu2 %v9177_v27, %s10183_s7  ;;  %9183 = vrot.lane.b32.xlu1 %v9182_v28, %s10183_s7 }
 0x7d2   :  { %8510 = vmatmul.msk.f32.gmra.mxu0 %vm2221_vm6, %v2150_v56 }
 0x7d7   :  { %8514 = vmatmul.msk.f32.gmra.mxu1 %vm2221_vm6, %v2150_v56 }
 0x7d8   :  { %9198 = vrot.lane.b32.xlu0 %v9167_v23, %s10182_s5 }
 0x7d9   :  { %9203 = vrot.lane.b32.xlu2 %v9172_v24, %s10182_s5  ;;  %9188 = vrot.lane.b32.xlu1 %v9157_v10, %s10182_s5 }
 0x7da   :  { %8511 = vmatmul.msk.f32.gmra.mxu0 %vm2221_vm6, %v2151_v5 }
 0x7df   :  { %8515 = vmatmul.msk.f32.gmra.mxu1 %vm2221_vm6, %v2151_v5 }
 0x7e0   :  { %9228 = vrot.lane.b32.xlu0 %v9177_v27, %s10185_s30 }
 0x7e1   :  { %9208 = vrot.lane.b32.xlu2 %v9177_v27, %s10182_s5  ;;  %9213 = vrot.lane.b32.xlu1 %v9182_v28, %s10182_s5 }
 0x7e8   :  { %9243 = vrot.lane.b32.xlu0 %v9162_v18, %s10185_s30 }
 0x7e9   :  { %9233 = vrot.lane.b32.xlu2 %v9157_v10, %s10184_s10  ;;  %9218 = vrot.lane.b32.xlu1 %v9157_v10, %s10185_s30 }
 0x7f0   :  { %9253 = vrot.lane.b32.xlu0 %v9162_v18, %s10184_s10 }
 0x7f1   :  { %9248 = vrot.lane.b32.xlu2 %v9172_v24, %s10185_s30  ;;  %9223 = vrot.lane.b32.xlu1 %v9167_v23, %s10185_s30 }
 0x7f8   :  { %9258 = vrot.lane.b32.xlu0 %v9167_v23, %s10184_s10 }
 0x7f9   :  { %9263 = vrot.lane.b32.xlu2 %v9172_v24, %s10184_s10  ;;  %9238 = vrot.lane.b32.xlu1 %v9182_v28, %s10185_s30 }
 0x800   :  { %2936 = vperm.xlu0 %9096, %v2918_v17  }
 0x801   :  { %9268 = vrot.lane.b32.xlu2 %v9177_v27, %s10184_s10  ;;  %9273 = vrot.lane.b32.xlu1 %v9182_v28, %s10184_s10  ;;  %v2163_v28 = vld [vmem:[#allocation6 + $0x30] sm:$0xff] }
 0x808   :  { %2921 = vperm.xlu0 %9096, %v2915_v29  }
 0x809   :  { %2931 = vperm.xlu2 %9005, %v2917_v30   ;;  %2926 = vperm.xlu1 %9004, %v2916_v31  }
 0x823   :  { %v9174_v32 = vpop.permute.xlu2 %9173 }
 0x824   :  { %v9175_v33 = vunpack.i.l.bf16 %v9174_v32  ;;  %v9176_v50 = vunpack.i.h.bf16 %v9174_v32 }
 0x82a   :  { %v9159_v36 = vpop.permute.xlu1 %9158 }
 0x82b   :  { %v9179_v34 = vpop.permute.xlu2 %9178  ;;  %v9161_v40 = vunpack.i.h.bf16 %v9159_v36  ;;  %v9160_v43 = vunpack.i.l.bf16 %v9159_v36 }
 0x82c   :  { %v9180_v41 = vunpack.i.l.bf16 %v9179_v34  ;;  %v9181_v62 = vunpack.i.h.bf16 %v9179_v34 }
 0x82d   :  { %v2209_v52 = vsel %vm406_vm7, %v9176_v50, %v9160_v43  ;;  %v2210_v53 = vsel %vm406_vm7, %v9160_v43, %v9161_v40 }
 0x832   :  { %v9164_v39 = vpop.permute.xlu0 %9163 }
 0x833   :  { %v9166_v44 = vunpack.i.h.bf16 %v9164_v39  ;;  %v9165_v0 = vunpack.i.l.bf16 %v9164_v39  ;;  %v9204_v51 = vpop.permute.xlu2 %9203  ;;  %v2164_v39 = vld [vmem:[#allocation6 + $0x38] sm:$0xff] }
 0x834   :  { %v9205_v63 = vunpack.i.l.bf16 %v9204_v51  ;;  %v9206_v9 = vunpack.i.h.bf16 %v9204_v51 }
 0x835   :  { %v2211_v46 = vsel %vm406_vm7, %v9165_v0, %v9166_v44  ;;  %v2212_v45 = vsel %vm406_vm7, %v9166_v44, %v9175_v33 }
 0x836   :  { %2246 = vmatpush.msrb.mxu2 %v2211_v46  ;;  %2275 = vmatpush.msrb.mxu3 %v2212_v45 }
 0x838   :  { %2247 = vmatpush.msrb.mxu2 %v2209_v52  ;;  %2276 = vmatpush.msrb.mxu3 %v2210_v53 }
 0x83a   :  { %v9169_v37 = vpop.permute.xlu0 %9168 }
 0x83b   :  { %v9171_v54 = vunpack.i.h.bf16 %v9169_v37  ;;  %v9170_v55 = vunpack.i.l.bf16 %v9169_v37  ;;  %v9209_v57 = vpop.permute.xlu2 %9208 }
 0x83c   :  { %v9210_v16 = vunpack.i.l.bf16 %v9209_v57  ;;  %v9211_v24 = vunpack.i.h.bf16 %v9209_v57 }
 0x83d   :  { %v2207_v38 = vsel %vm406_vm7, %v9170_v55, %v9171_v54  ;;  %v2208_v42 = vsel %vm406_vm7, %v9171_v54, %v9180_v41 }
 0x83e   :  { %2248 = vmatpush.msrb.mxu2 %v2207_v38  ;;  %2277 = vmatpush.msrb.mxu3 %v2208_v42  ;;  %v2363_v42 = vld [vmem:[#allocation6 + $0x40] sm:$0xff] }
 0x842   :  { %v9194_v60 = vpop.permute.xlu0 %9193 }
 0x843   :  { %v9184_v48 = vpop.permute.xlu1 %9183  ;;  %v9196_v61 = vunpack.i.h.bf16 %v9194_v60  ;;  %v9195_v49 = vunpack.i.l.bf16 %v9194_v60  ;;  %v10879_v7 = vpop.permute.xlu2 %9233 }
 0x844   :  { %v9186_v3 = vunpack.i.h.bf16 %v9184_v48  ;;  %v9185_v4 = vunpack.i.l.bf16 %v9184_v48  ;;  %v9236_v46 = vunpack.i.h.bf16 %v10879_v7  ;;  %v9235_v51 = vunpack.i.l.bf16 %v10879_v7  ;;  %v2364_v7 = vld [vmem:[#allocation6 + $0x48] sm:$0xff] }
 0x845   :  { %v2397_v2 = vsel %vm532_vm8, %v9195_v49, %v9196_v61  ;;  %v2398_v6 = vsel %vm532_vm8, %v9196_v61, %v9205_v63 }
 0x846   :  { %v2205_v59 = vsel %vm406_vm7, %v9181_v62, %v9185_v4  ;;  %v2206_v1 = vsel %vm406_vm7, %v9185_v4, %v9186_v3  ;;  %v2519_v63 = vsel %vm604_vm9, %v9235_v51, %v9236_v46  ;;  %v2743_v46 = vld [vmem:[%s12184_s27 + $0x60] sm:$0xff] }
 0x847   :  { %2249 = vmatpush.msrb.mxu2 %v2205_v59  ;;  %2278 = vmatpush.msrb.mxu3 %v2206_v1 }
 0x848   :  { %8500 = vmatmul.msk.f32.vlgmr.msrb.gmra.mxu2 %vm2221_vm6, %v2161_v58  ;;  %8504 = vmatmul.msk.f32.vlgmr.msrb.gmra.mxu3 %vm2221_vm6, %v2161_v58 }
 0x849   :  { %2431 = vmatpush.msra.mxu2 %v2397_v2  ;;  %2460 = vmatpush.msra.mxu3 %v2398_v6 }
 0x84a   :  { %v9199_v8 = vpop.permute.xlu0 %9198 }
 0x84b   :  { %v9189_v10 = vpop.permute.xlu1 %9188  ;;  %v9201_v13 = vunpack.i.h.bf16 %v9199_v8  ;;  %v9200_v14 = vunpack.i.l.bf16 %v9199_v8  ;;  %v9249_v25 = vpop.permute.xlu2 %9248 }
 0x84c   :  { %v9191_v11 = vunpack.i.h.bf16 %v9189_v10  ;;  %v9190_v12 = vunpack.i.l.bf16 %v9189_v10  ;;  %v9250_v31 = vunpack.i.l.bf16 %v9249_v25  ;;  %v9251_v44 = vunpack.i.h.bf16 %v9249_v25  ;;  %v2610_v25 = vld [vmem:[#allocation6 + $0x88] sm:$0xff] }
 0x84d   :  { %v2393_v20 = vsel %vm532_vm8, %v9200_v14, %v9201_v13  ;;  %v2394_v21 = vsel %vm532_vm8, %v9201_v13, %v9210_v16  ;;  %v2365_v16 = vld [vmem:[#allocation6 + $0x50] sm:$0xff] }
 0x84e   :  { %v2395_v18 = vsel %vm532_vm8, %v9206_v9, %v9190_v12  ;;  %v2396_v19 = vsel %vm532_vm8, %v9190_v12, %v9191_v11 }
 0x84f   :  { %2432 = vmatpush.msra.mxu2 %v2395_v18  ;;  %2461 = vmatpush.msra.mxu3 %v2396_v19 }
 0x850   :  { %8501 = vmatmul.msk.f32.gmra.mxu2 %vm2221_vm6, %v2162_v15  ;;  %8505 = vmatmul.msk.f32.gmra.mxu3 %vm2221_vm6, %v2162_v15 }
 0x851   :  { %2433 = vmatpush.msra.mxu2 %v2393_v20  ;;  %2462 = vmatpush.msra.mxu3 %v2394_v21  ;;  %v2486_v20 = vld [vmem:[#allocation6 + $0x60] sm:$0xff]  ;;  %v2366_v21 = vld [vmem:[#allocation6 + $0x58] sm:$0xff] }
 0x852   :  { %v10887_v22 = vpop.permute.xlu0 %9228 }
 0x853   :  { %v9214_v23 = vpop.permute.xlu1 %9213  ;;  %v9264_v0 = vpop.permute.xlu2 %9263  ;;  %v9230_v55 = vunpack.i.l.bf16 %v10887_v22  ;;  %v9231_v1 = vunpack.i.h.bf16 %v10887_v22  ;;  %v2487_v22 = vld [vmem:[#allocation6 + $0x68] sm:$0xff] }
 0x854   :  { %v9216_v26 = vunpack.i.h.bf16 %v9214_v23  ;;  %v9215_v27 = vunpack.i.l.bf16 %v9214_v23  ;;  %v9265_v52 = vunpack.i.l.bf16 %v9264_v0  ;;  %v9266_v54 = vunpack.i.h.bf16 %v9264_v0  ;;  %v2609_v23 = vld [vmem:[#allocation6 + $0x80] sm:$0xff] }
 0x855   :  { %v2760_v0 = vld [vmem:[%s12184_s27 + $0xe8] sm:$0xff] }
 0x856   :  { %v2391_v17 = vsel %vm532_vm8, %v9211_v24, %v9215_v27  ;;  %v2392_v29 = vsel %vm532_vm8, %v9215_v27, %v9216_v26  ;;  %v2518_v62 = vsel %vm604_vm9, %v9266_v54, %v9235_v51  ;;  %v2488_v24 = vld [vmem:[#allocation6 + $0x70] sm:$0xff]  ;;  %v2489_v26 = vld [vmem:[#allocation6 + $0x78] sm:$0xff]  ;;  %v2775_v51 = vld [vmem:[#allocation4 + $0x60] sm:$0xff] }
 0x857   :  { %2434 = vmatpush.msra.mxu2 %v2391_v17  ;;  %2463 = vmatpush.msra.mxu3 %v2392_v29  ;;  %v2611_v27 = vld [vmem:[#allocation6 + $0x90] sm:$0xff]  ;;  %v2790_v54 = vld [vmem:[#allocation4 + $0xd8] sm:$0xff] }
 0x858   :  { %8502 = vmatmul.msk.f32.gmra.mxu2 %vm2221_vm6, %v2163_v28  ;;  %8506 = vmatmul.msk.f32.gmra.mxu3 %vm2221_vm6, %v2163_v28  ;;  %v2612_v28 = vld [vmem:[#allocation6 + $0x98] sm:$0xff] }
 0x85a   :  { %v9244_v30 = vpop.permute.xlu0 %9243 }
 0x85b   :  { %v9219_v32 = vpop.permute.xlu1 %9218  ;;  %v9246_v34 = vunpack.i.h.bf16 %v9244_v30  ;;  %v9245_v35 = vunpack.i.l.bf16 %v9244_v30  ;;  %v9269_v49 = vpop.permute.xlu2 %9268  ;;  %v2746_v30 = vld [vmem:[%s12184_s27 + $0x78] sm:$0xff] }
 0x85c   :  { %v9221_v36 = vunpack.i.h.bf16 %v9219_v32  ;;  %v9220_v33 = vunpack.i.l.bf16 %v9219_v32  ;;  %v9270_v4 = vunpack.i.l.bf16 %v9269_v49  ;;  %v9271_v13 = vunpack.i.h.bf16 %v9269_v49  ;;  %v2778_v32 = vld [vmem:[#allocation4 + $0x78] sm:$0xff]  ;;  %v2740_v49 = vld [vmem:[%s12184_s27 + $0x48] sm:$0xff] }
 0x85d   :  { %v2643_v40 = vsel %vm676_vm10, %v9245_v35, %v9246_v34  ;;  %v2644_v43 = vsel %vm676_vm10, %v9246_v34, %v9250_v31  ;;  %v2762_v31 = vld [vmem:[%s12184_s27 + $0xf8] sm:$0xff]  ;;  %v2794_v34 = vld [vmem:[#allocation4 + $0xf8] sm:$0xff]  ;;  %v2745_v35 = vld [vmem:[%s12184_s27 + $0x70] sm:$0xff] }
 0x85e   :  { %2677 = vmatpush.msrb.mxu2 %v2643_v40  ;;  %2706 = vmatpush.msrb.mxu3 %v2644_v43  ;;  %v2641_v47 = vsel %vm676_vm10, %v9251_v44, %v9220_v33  ;;  %v2642_v50 = vsel %vm676_vm10, %v9220_v33, %v9221_v36  ;;  %v2761_v36 = vld [vmem:[%s12184_s27 + $0xf0] sm:$0xff]  ;;  %v2777_v33 = vld [vmem:[#allocation4 + $0x70] sm:$0xff]  ;;  %v2744_v44 = vld [vmem:[%s12184_s27 + $0x68] sm:$0xff] }
 0x860   :  { %8503 = vmatmul.msk.f32.gmra.mxu2 %vm2221_vm6, %v2164_v39  ;;  %8507 = vmatmul.msk.f32.gmra.mxu3 %vm2221_vm6, %v2164_v39  ;;  %v2793_v39 = vld [vmem:[#allocation4 + $0xf0] sm:$0xff] }
 0x861   :  { %2678 = vmatpush.msrb.mxu2 %v2641_v47  ;;  %2707 = vmatpush.msrb.mxu3 %v2642_v50  ;;  %v2776_v47 = vld [vmem:[#allocation4 + $0x68] sm:$0xff] }
 0x862   :  { %v9254_v45 = vpop.permute.xlu0 %9253  ;;  %v2792_v50 = vld [vmem:[#allocation4 + $0xe8] sm:$0xff] }
 0x863   :  { %v9224_v53 = vpop.permute.xlu1 %9223  ;;  %v9256_v37 = vunpack.i.h.bf16 %v9254_v45  ;;  %v9255_v41 = vunpack.i.l.bf16 %v9254_v45  ;;  %v2759_v45 = vld [vmem:[%s12184_s27 + $0xe0] sm:$0xff] }
 0x864   :  { %v9226_v56 = vunpack.i.h.bf16 %v9224_v53  ;;  %v9225_v38 = vunpack.i.l.bf16 %v9224_v53  ;;  %v2742_v53 = vld [vmem:[%s12184_s27 + $0x58] sm:$0xff] }
 0x865   :  { %v2520_v57 = vsel %vm604_vm9, %v9255_v41, %v9256_v37  ;;  %v2521_v60 = vsel %vm604_vm9, %v9256_v37, %v9265_v52  ;;  %v2791_v52 = vld [vmem:[#allocation4 + $0xe0] sm:$0xff]  ;;  %v2758_v37 = vld [vmem:[%s12184_s27 + $0xd8] sm:$0xff]  ;;  %v2774_v41 = vld [vmem:[#allocation4 + $0x58] sm:$0xff] }
 0x866   :  { %v2639_v48 = vsel %vm676_vm10, %v9225_v38, %v9226_v56  ;;  %v2640_v61 = vsel %vm676_vm10, %v9226_v56, %v9230_v55  ;;  %2554 = vmatpush.msrb.mxu0 %v2520_v57  ;;  %2583 = vmatpush.msrb.mxu1 %v2521_v60  ;;  %v2741_v55 = vld [vmem:[%s12184_s27 + $0x50] sm:$0xff]  ;;  %v10958_v56 = vpop.f32.mrf.mxu0  ;;  %v10960_v38 = vpop.f32.mrf.mxu1  ;;  %v2773_v57 = vld [vmem:[#allocation4 + $0x50] sm:$0xff] }
 0x867   :  { %2679 = vmatpush.msrb.mxu2 %v2639_v48  ;;  %2708 = vmatpush.msrb.mxu3 %v2640_v61  ;;  %v2789_v60 = vld [vmem:[#allocation4 + $0xd0] sm:$0xff] }
 0x868   :  { %8516 = vmatmul.msk.f32.vlgmr.msra.gmra.mxu2 %vm2221_vm6, %v2363_v42  ;;  %8520 = vmatmul.msk.f32.vlgmr.msra.gmra.mxu3 %vm2221_vm6, %v2363_v42  ;;  %v2757_v42 = vld [vmem:[%s12184_s27 + $0xd0] sm:$0xff] }
 0x869   :  { %2555 = vmatpush.msrb.mxu0 %v2518_v62  ;;  %2584 = vmatpush.msrb.mxu1 %v2519_v63  ;;  %v2756_v62 = vld [vmem:[%s12184_s27 + $0xc8] sm:$0xff]  ;;  %v2772_v63 = vld [vmem:[#allocation4 + $0x48] sm:$0xff] }
 0x86a   :  { %v9259_v3 = vpop.permute.xlu0 %9258 }
 0x86b   :  { %v9239_v5 = vpop.permute.xlu1 %9238  ;;  %v9261_v58 = vunpack.i.h.bf16 %v9259_v3  ;;  %v9260_v59 = vunpack.i.l.bf16 %v9259_v3  ;;  %v2788_v3 = vld [vmem:[#allocation4 + $0xc8] sm:$0xff] }
 0x86c   :  { %v9241_v2 = vunpack.i.h.bf16 %v9239_v5  ;;  %v9240_v6 = vunpack.i.l.bf16 %v9239_v5  ;;  %v2755_v5 = vld [vmem:[%s12184_s27 + $0xc0] sm:$0xff] }
 0x86d   :  { %v2516_v8 = vsel %vm604_vm9, %v9260_v59, %v9261_v58  ;;  %v2517_v9 = vsel %vm604_vm9, %v9261_v58, %v9270_v4  ;;  %v2739_v4 = vld [vmem:[%s12184_s27 + $0x40] sm:$0xff]  ;;  %v2771_v58 = vld [vmem:[#allocation4 + $0x40] sm:$0xff] }
 0x86e   :  { %v2637_v10 = vsel %vm676_vm10, %v9231_v1, %v9240_v6  ;;  %v2638_v11 = vsel %vm676_vm10, %v9240_v6, %v9241_v2  ;;  %2556 = vmatpush.msrb.mxu0 %v2516_v8  ;;  %2585 = vmatpush.msrb.mxu1 %v2517_v9  ;;  %v2787_v59 = vld [vmem:[#allocation4 + $0xc0] sm:$0xff]  ;;  %v2738_v1 = vld [vmem:[%s12184_s27 + $0x38] sm:$0xff]  ;;  %v2770_v6 = vld [vmem:[#allocation4 + $0x38] sm:$0xff] }
 0x86f   :  { %2680 = vmatpush.msrb.mxu2 %v2637_v10  ;;  %2709 = vmatpush.msrb.mxu3 %v2638_v11  ;;  %v2754_v2 = vld [vmem:[%s12184_s27 + $0xb8] sm:$0xff]  ;;  %v2737_v8 = vld [vmem:[%s12184_s27 + $0x30] sm:$0xff] }
 0x870   :  { %8517 = vmatmul.msk.f32.gmra.mxu2 %vm2221_vm6, %v2364_v7  ;;  %8521 = vmatmul.msk.f32.gmra.mxu3 %vm2221_vm6, %v2364_v7  ;;  %v2786_v7 = vld [vmem:[#allocation4 + $0xb8] sm:$0xff]  ;;  %v2753_v9 = vld [vmem:[%s12184_s27 + $0xb0] sm:$0xff]  ;;  %v2769_v10 = vld [vmem:[#allocation4 + $0x30] sm:$0xff] }
 0x871   :  { %2853 = vmatpush.msra.mxu2 %v2778_v32  ;;  %2882 = vmatpush.msra.mxu3 %v2794_v34  ;;  %v2785_v11 = vld [vmem:[#allocation4 + $0xb0] sm:$0xff] }
 0x872   :  { %v2765_v32 = vld [vmem:[#allocation4 + $0x10] sm:$0xff] }
 0x873   :  { %v9274_v12 = vpop.permute.xlu1 %9273  ;;  %2854 = vmatpush.msra.mxu2 %v2777_v33  ;;  %2883 = vmatpush.msra.mxu3 %v2793_v39  ;;  %v2781_v34 = vld [vmem:[#allocation4 + $0x90] sm:$0xff]  ;;  %v2732_v33 = vld [vmem:[%s12184_s27 + $0x8] sm:$0xff] }
 0x874   :  { %v9276_v14 = vunpack.i.h.bf16 %v9274_v12  ;;  %v9275_v15 = vunpack.i.l.bf16 %v9274_v12  ;;  %v2748_v39 = vld [vmem:[%s12184_s27 + $0x88] sm:$0xff] }
 0x875   :  { %2855 = vmatpush.msra.mxu2 %v2776_v47  ;;  %2884 = vmatpush.msra.mxu3 %v2792_v50 }
 0x876   :  { %v2514_v18 = vsel %vm604_vm9, %v9271_v13, %v9275_v15  ;;  %v2515_v19 = vsel %vm604_vm9, %v9275_v15, %v9276_v14  ;;  %v10979_v14 = vpop.f32.mrf.mxu0  ;;  %v10981_v15 = vpop.f32.mrf.mxu1 }
 0x877   :  { %2557 = vmatpush.msrb.mxu0 %v2514_v18  ;;  %2586 = vmatpush.msrb.mxu1 %v2515_v19  ;;  %v2752_v18 = vld [vmem:[%s12184_s27 + $0xa8] sm:$0xff]  ;;  %v2768_v19 = vld [vmem:[#allocation4 + $0x28] sm:$0xff] }
 0x878   :  { %8518 = vmatmul.msk.f32.gmra.mxu2 %vm2221_vm6, %v2365_v16  ;;  %8522 = vmatmul.msk.f32.gmra.mxu3 %vm2221_vm6, %v2365_v16  ;;  %v2736_v16 = vld [vmem:[%s12184_s27 + $0x28] sm:$0xff] }
 0x879   :  { %8524 = vmatmul.msk.f32.vlgmr.msrb.gmra.mxu0 %vm2221_vm6, %v2486_v20  ;;  %8528 = vmatmul.msk.f32.vlgmr.msrb.gmra.mxu1 %vm2221_vm6, %v2486_v20  ;;  %v2784_v20 = vld [vmem:[#allocation4 + $0xa8] sm:$0xff] }
 0x87a   :  { %2795 = vmatpush.msra.mxu0 %v2746_v30  ;;  %2824 = vmatpush.msra.mxu1 %v2762_v31  ;;  %v2733_v30 = vld [vmem:[%s12184_s27 + $0x10] sm:$0xff] }
 0x87b   :  { %2856 = vmatpush.msra.mxu2 %v2775_v51  ;;  %2885 = vmatpush.msra.mxu3 %v2791_v52  ;;  %v2749_v31 = vld [vmem:[%s12184_s27 + $0x90] sm:$0xff]  ;;  %v2763_v51 = vld [vmem:[#allocation4] sm:$0xff] }
 0x87c   :  { %2796 = vmatpush.msra.mxu0 %v2745_v35  ;;  %2825 = vmatpush.msra.mxu1 %v2761_v36  ;;  %v2779_v52 = vld [vmem:[#allocation4 + $0x80] sm:$0xff] }
 0x87d   :  { %2857 = vmatpush.msra.mxu2 %v2774_v41  ;;  %2886 = vmatpush.msra.mxu3 %v2790_v54 }
 0x87e   :  { %2797 = vmatpush.msra.mxu0 %v2744_v44  ;;  %2826 = vmatpush.msra.mxu1 %v2760_v0  ;;  %v2764_v44 = vld [vmem:[#allocation4 + $0x8] sm:$0xff]  ;;  %v2327_v47 = vpop.f32.mrf.mxu0  ;;  %v2356_v50 = vpop.f32.mrf.mxu1 }
 0x87f   :  { %2858 = vmatpush.msra.mxu2 %v2773_v57  ;;  %2887 = vmatpush.msra.mxu3 %v2789_v60  ;;  %v2780_v0 = vld [vmem:[#allocation4 + $0x88] sm:$0xff] }
 0x880   :  { %8519 = vmatmul.msk.f32.gmra.mxu2 %vm2221_vm6, %v2366_v21  ;;  %8523 = vmatmul.msk.f32.gmra.mxu3 %vm2221_vm6, %v2366_v21  ;;  %v2735_v21 = vld [vmem:[%s12184_s27 + $0x20] sm:$0xff] }
 0x881   :  { %8525 = vmatmul.msk.f32.gmra.mxu0 %vm2221_vm6, %v2487_v22  ;;  %8529 = vmatmul.msk.f32.gmra.mxu1 %vm2221_vm6, %v2487_v22  ;;  %v2751_v22 = vld [vmem:[%s12184_s27 + $0xa0] sm:$0xff] }
 0x882   :  { %2798 = vmatpush.msra.mxu0 %v2743_v46  ;;  %2827 = vmatpush.msra.mxu1 %v2759_v45  ;;  %v2731_v46 = vld [vmem:[%s12184_s27] sm:$0xff] }
 0x883   :  { %2859 = vmatpush.msra.mxu2 %v2772_v63  ;;  %2888 = vmatpush.msra.mxu3 %v2788_v3  ;;  %v2747_v45 = vld [vmem:[%s12184_s27 + $0x80] sm:$0xff] }
 0x884   :  { %2799 = vmatpush.msra.mxu0 %v2742_v53  ;;  %2828 = vmatpush.msra.mxu1 %v2758_v37 }
 0x885   :  { %2860 = vmatpush.msra.mxu2 %v2771_v58  ;;  %2889 = vmatpush.msra.mxu3 %v2787_v59 }
 0x886   :  { %2800 = vmatpush.msra.mxu0 %v2741_v55  ;;  %2829 = vmatpush.msra.mxu1 %v2757_v42  ;;  %v2330_v41 = vpop.f32.mrf.mxu0  ;;  %v2359_v54 = vpop.f32.mrf.mxu1 }
 0x887   :  { %2861 = vmatpush.msra.mxu2 %v2770_v6  ;;  %2890 = vmatpush.msra.mxu3 %v2786_v7 }
 0x888   :  { %8532 = vmatmul.msk.f32.vlgmr.msrb.gmra.mxu2 %vm2221_vm6, %v2609_v23  ;;  %8536 = vmatmul.msk.f32.vlgmr.msrb.gmra.mxu3 %vm2221_vm6, %v2609_v23  ;;  %v2767_v23 = vld [vmem:[#allocation4 + $0x20] sm:$0xff] }
 0x889   :  { %8526 = vmatmul.msk.f32.gmra.mxu0 %vm2221_vm6, %v2488_v24  ;;  %8530 = vmatmul.msk.f32.gmra.mxu1 %vm2221_vm6, %v2488_v24  ;;  %v2783_v24 = vld [vmem:[#allocation4 + $0xa0] sm:$0xff] }
 0x88a   :  { %2801 = vmatpush.msra.mxu0 %v2740_v49  ;;  %2830 = vmatpush.msra.mxu1 %v2756_v62 }
 0x88b   :  { %2862 = vmatpush.msra.mxu2 %v2769_v10  ;;  %2891 = vmatpush.msra.mxu3 %v2785_v11 }
 0x88c   :  { %2802 = vmatpush.msra.mxu0 %v2739_v4  ;;  %2831 = vmatpush.msra.mxu1 %v2755_v5 }
 0x88d   :  { %2863 = vmatpush.msra.mxu2 %v2768_v19  ;;  %2892 = vmatpush.msra.mxu3 %v2784_v20 }
 0x88e   :  { %2803 = vmatpush.msra.mxu0 %v2738_v1  ;;  %2832 = vmatpush.msra.mxu1 %v2754_v2 }
 0x88f   :  { %2864 = vmatpush.msra.mxu2 %v2767_v23  ;;  %2893 = vmatpush.msra.mxu3 %v2783_v24 }
 0x890   :  { %8533 = vmatmul.msk.f32.gmra.mxu2 %vm2221_vm6, %v2610_v25  ;;  %8537 = vmatmul.msk.f32.gmra.mxu3 %vm2221_vm6, %v2610_v25  ;;  %v2734_v25 = vld [vmem:[%s12184_s27 + $0x18] sm:$0xff] }
 0x891   :  { %8527 = vmatmul.msk.f32.gmra.mxu0 %vm2221_vm6, %v2489_v26  ;;  %8531 = vmatmul.msk.f32.gmra.mxu1 %vm2221_vm6, %v2489_v26  ;;  %v2750_v26 = vld [vmem:[%s12184_s27 + $0x98] sm:$0xff] }
 0x892   :  { %2804 = vmatpush.msra.mxu0 %v2737_v8  ;;  %2833 = vmatpush.msra.mxu1 %v2753_v9 }
 0x894   :  { %2805 = vmatpush.msra.mxu0 %v2736_v16  ;;  %2834 = vmatpush.msra.mxu1 %v2752_v18 }
 0x896   :  { %2806 = vmatpush.msra.mxu0 %v2735_v21  ;;  %2835 = vmatpush.msra.mxu1 %v2751_v22 }
 0x898   :  { %8534 = vmatmul.msk.f32.gmra.mxu2 %vm2221_vm6, %v2611_v27  ;;  %8538 = vmatmul.msk.f32.gmra.mxu3 %vm2221_vm6, %v2611_v27  ;;  %v2766_v27 = vld [vmem:[#allocation4 + $0x18] sm:$0xff] }
 0x899   :  { %2807 = vmatpush.msra.mxu0 %v2734_v25  ;;  %2836 = vmatpush.msra.mxu1 %v2750_v26 }
 0x89a   :  { %2865 = vmatpush.msra.mxu2 %v2766_v27 }
 0x89b   :  { %2808 = vmatpush.msra.mxu0 %v2733_v30  ;;  %2837 = vmatpush.msra.mxu1 %v2749_v31 }
 0x89c   :  { %2866 = vmatpush.msra.mxu2 %v2765_v32 }
 0x89d   :  { %2809 = vmatpush.msra.mxu0 %v2732_v33  ;;  %2838 = vmatpush.msra.mxu1 %v2748_v39 }
 0x89e   :  { %2867 = vmatpush.msra.mxu2 %v2764_v44 }
 0x89f   :  { %2810 = vmatpush.msra.mxu0 %v2731_v46  ;;  %2839 = vmatpush.msra.mxu1 %v2747_v45 }
 0x8a0   :  { %8535 = vmatmul.msk.f32.gmra.mxu2 %vm2221_vm6, %v2612_v28  ;;  %8539 = vmatmul.msk.f32.gmra.mxu3 %vm2221_vm6, %v2612_v28  ;;  %v2782_v28 = vld [vmem:[#allocation4 + $0x98] sm:$0xff] }
 0x8a1   :  { %2894 = vmatpush.msra.mxu3 %v2782_v28  ;;  %2868 = vmatpush.msra.mxu2 %v2763_v51 }
 0x8a3   :  { %2895 = vmatpush.msra.mxu3 %v2781_v34 }
 0x8a5   :  { %2896 = vmatpush.msra.mxu3 %v2780_v0 }
 0x8a7   :  { %2897 = vmatpush.msra.mxu3 %v2779_v52 }
 0x8cb   :  { %v10939_v17 = vpop.f32.mrf.mxu2  ;;  %v10941_v29 = vpop.f32.mrf.mxu3 }
 0x8cc   :  { %v2322_v63 = vadd.f32 %v10958_v56, %v10939_v17  ;;  %v2351_v3 = vadd.f32 %v10960_v38, %v10941_v29 }
 0x8d3   :  { %v10947_v40 = vpop.f32.mrf.mxu2  ;;  %v10949_v43 = vpop.f32.mrf.mxu3 }
 0x8d4   :  { %v2325_v10 = vadd.f32 %v10979_v14, %v10947_v40  ;;  %v2354_v11 = vadd.f32 %v10981_v15, %v10949_v43 }
 0x8db   :  { %v10963_v48 = vpop.f32.mrf.mxu2  ;;  %v10965_v61 = vpop.f32.mrf.mxu3 }
 0x8dc   :  { %v2328_v23 = vadd.f32 %v2327_v47, %v10963_v48  ;;  %v2357_v40 = vadd.f32 %v2356_v50, %v10965_v61 }
 0x8e3   :  { %v10975_v12 = vpop.f32.mrf.mxu2  ;;  %v10977_v13 = vpop.f32.mrf.mxu3 }
 0x8e4   :  { %v2331_v30 = vadd.f32 %v2330_v41, %v10975_v12  ;;  %v2360_v31 = vadd.f32 %v2359_v54, %v10977_v13  ;;  %v2927_v41 = vpop.permute.xlu1 %2926 }
 0x8eb   :  { %v2436_v35 = vpop.f32.mrf.mxu2  ;;  %v2465_v36 = vpop.f32.mrf.mxu3 }
 0x8ec   :  { %v2477_v4 = vadd.f32 %v2436_v35, %v2322_v63  ;;  %v2478_v5 = vadd.f32 %v2465_v36, %v2351_v3 }
 0x8f3   :  { %v2439_v53 = vpop.f32.mrf.mxu2  ;;  %v2468_v37 = vpop.f32.mrf.mxu3 }
 0x8f4   :  { %v2479_v17 = vadd.f32 %v2439_v53, %v2325_v10  ;;  %v2480_v29 = vadd.f32 %v2468_v37, %v2354_v11 }
 0x8f6   :  { %v2559_v57 = vpop.f32.mrf.mxu0  ;;  %v2588_v60 = vpop.f32.mrf.mxu1 }
 0x8f7   :  { %v2600_v58 = vadd.f32 %v2559_v57, %v2477_v4  ;;  %v2601_v59 = vadd.f32 %v2588_v60, %v2478_v5  ;;  %v2932_v5 = vpop.permute.xlu2 %2931 }
 0x8fb   :  { %v2442_v55 = vpop.f32.mrf.mxu2  ;;  %v2471_v42 = vpop.f32.mrf.mxu3 }
 0x8fc   :  { %v2481_v43 = vadd.f32 %v2442_v55, %v2328_v23  ;;  %v2482_v14 = vadd.f32 %v2471_v42, %v2357_v40 }
 0x8fe   :  { %v2562_v1 = vpop.f32.mrf.mxu0  ;;  %v2591_v2 = vpop.f32.mrf.mxu1 }
 0x8ff   :  { %v2602_v56 = vadd.f32 %v2562_v1, %v2479_v17  ;;  %v2603_v38 = vadd.f32 %v2591_v2, %v2480_v29  ;;  %v2937_v2 = vpop.permute.xlu0 %2936 }
 0x903   :  { %v2445_v49 = vpop.f32.mrf.mxu2  ;;  %v2474_v62 = vpop.f32.mrf.mxu3 }
 0x904   :  { %v2483_v32 = vadd.f32 %v2445_v49, %v2331_v30  ;;  %v2484_v34 = vadd.f32 %v2474_v62, %v2360_v31 }
 0x906   :  { %v2565_v21 = vpop.f32.mrf.mxu0  ;;  %v2594_v22 = vpop.f32.mrf.mxu1 }
 0x907   :  { %v2604_v15 = vadd.f32 %v2565_v21, %v2481_v43  ;;  %v2605_v24 = vadd.f32 %v2594_v22, %v2482_v14  ;;  %v11013_v22 = vld [vmem:[#allocation2 + $0x40] sm:$0xff] }
 0x90b   :  { %v2682_v6 = vpop.f32.mrf.mxu2  ;;  %v2711_v7 = vpop.f32.mrf.mxu3 }
 0x90c   :  { %v2723_v8 = vadd.f32 %v2682_v6, %v2600_v58  ;;  %v2724_v9 = vadd.f32 %v2711_v7, %v2601_v59 }
 0x90e   :  { %2811 = vmatmul.f32.vlgmr.msra.gmra.mxu0 %v2723_v8  ;;  %2840 = vmatmul.f32.vlgmr.msra.gmra.mxu1 %v2724_v9  ;;  %v2568_v48 = vpop.f32.mrf.mxu0  ;;  %v2597_v61 = vpop.f32.mrf.mxu1 }
 0x90f   :  { %2869 = vmatmul.f32.vlgmr.msra.gmra.mxu2 %v2723_v8  ;;  %2898 = vmatmul.f32.vlgmr.msra.gmra.mxu3 %v2724_v9  ;;  %v2606_v35 = vadd.f32 %v2568_v48, %v2483_v32  ;;  %v2607_v36 = vadd.f32 %v2597_v61, %v2484_v34  ;;  %v3330_v34 = vld [vmem:[%s12185_s1 + $0x10] sm:$0xff] }
 0x913   :  { %v2685_v16 = vpop.f32.mrf.mxu2  ;;  %v2714_v18 = vpop.f32.mrf.mxu3 }
 0x914   :  { %v2725_v19 = vadd.f32 %v2685_v16, %v2602_v56  ;;  %v2726_v20 = vadd.f32 %v2714_v18, %v2603_v38  ;;  %v2922_v18 = vpop.permute.xlu0 %2921 }
 0x916   :  { %2814 = vmatmul.f32.gmra.mxu0 %v2725_v19  ;;  %2843 = vmatmul.f32.gmra.mxu1 %v2726_v20 }
 0x917   :  { %2872 = vmatmul.f32.gmra.mxu2 %v2725_v19  ;;  %2901 = vmatmul.f32.gmra.mxu3 %v2726_v20 }
 0x91b   :  { %v2688_v25 = vpop.f32.mrf.mxu2  ;;  %v2717_v26 = vpop.f32.mrf.mxu3 }
 0x91c   :  { %v2727_v27 = vadd.f32 %v2688_v25, %v2604_v15  ;;  %v2728_v28 = vadd.f32 %v2717_v26, %v2605_v24 }
 0x91e   :  { %2817 = vmatmul.f32.gmra.mxu0 %v2727_v27  ;;  %2846 = vmatmul.f32.gmra.mxu1 %v2728_v28 }
 0x91f   :  { %2875 = vmatmul.f32.gmra.mxu2 %v2727_v27  ;;  %2904 = vmatmul.f32.gmra.mxu3 %v2728_v28 }
 0x923   :  { %v2691_v33 = vpop.f32.mrf.mxu2  ;;  %v2720_v39 = vpop.f32.mrf.mxu3 }
 0x924   :  { %v2729_v44 = vadd.f32 %v2691_v33, %v2606_v35  ;;  %v2730_v0 = vadd.f32 %v2720_v39, %v2607_v36  ;;  %v3329_v35 = vld [vmem:[%s12185_s1 + $0x8] sm:$0xff]  ;;  %v3331_v36 = vld [vmem:[%s12185_s1 + $0x18] sm:$0xff]  ;;  %v3328_v33 = vld [vmem:[%s12185_s1] sm:$0xff] }
 0x925   :  { %v2975_v39 = vld [vmem:[#allocation8] sm:$0xff] }
 0x926   :  { %2820 = vmatmul.f32.gmra.mxu0 %v2729_v44  ;;  %2849 = vmatmul.f32.gmra.mxu1 %v2730_v0 }
 0x927   :  { %2878 = vmatmul.f32.gmra.mxu2 %v2729_v44  ;;  %2907 = vmatmul.f32.gmra.mxu3 %v2730_v0 }
 0x98b   :  { %v2812_v12 = vpop.f32.mrf.mxu0  ;;  %v2841_v13 = vpop.f32.mrf.mxu1 }
 0x98c   :  { %v2842_v29 = vadd.f32 %v2841_v13, %v2812_v12 }
 0x992   :  { %v2870_v47 = vpop.f32.mrf.mxu2  ;;  %v2899_v50 = vpop.f32.mrf.mxu3 }
 0x993   :  { %v2815_v46 = vpop.f32.mrf.mxu0  ;;  %v2844_v45 = vpop.f32.mrf.mxu1  ;;  %v2900_v11 = vadd.f32 %v2899_v50, %v2870_v47  ;;  %v2976_v47 = vld [vmem:[#allocation8 + $0x8] sm:$0xff] }
 0x994   :  { %v2845_v53 = vadd.f32 %v2844_v45, %v2815_v46  ;;  %v2977_v45 = vld [vmem:[#allocation8 + $0x10] sm:$0xff] }
 0x995   :  { %v2911_v38 = vmax.f32 %v2842_v29, %v2900_v11 }
 0x997   :  { %v2939_v19 = vadd.f32 %v2922_v18, %v2911_v38 }
 0x999   :  { %v2943_v20 = vmax.f32 %v2939_v19, 0.0 }
 0x99a   :  { %v2873_v51 = vpop.f32.mrf.mxu2  ;;  %v2902_v52 = vpop.f32.mrf.mxu3 }
 0x99b   :  { %v2903_v37 = vadd.f32 %v2902_v52, %v2873_v51  ;;  %v2818_v55 = vpop.f32.mrf.mxu0  ;;  %v2847_v42 = vpop.f32.mrf.mxu1 }
 0x99c   :  { %v2848_v63 = vadd.f32 %v2847_v42, %v2818_v55 }
 0x99d   :  { %v2912_v54 = vmax.f32 %v2845_v53, %v2903_v37 }
 0x99f   :  { %v2940_v57 = vadd.f32 %v2927_v41, %v2912_v54 }
 0x9a1   :  { %v2944_v60 = vmax.f32 %v2940_v57, 0.0 }
 0x9a2   :  { %v2876_v49 = vpop.f32.mrf.mxu2  ;;  %v2905_v62 = vpop.f32.mrf.mxu3 }
 0x9a3   :  { %v2906_v3 = vadd.f32 %v2905_v62, %v2876_v49  ;;  %2953 = vrot.lane.b32.xlu0 %v2944_v60, %s10189_s25  ;;  %v2821_v59 = vpop.f32.mrf.mxu0  ;;  %v2850_v1 = vpop.f32.mrf.mxu1  ;;  %v2978_v49 = vld [vmem:[#allocation8 + $0x18] sm:$0xff] }
 0x9a4   :  { %v2851_v9 = vadd.f32 %v2850_v1, %v2821_v59 }
 0x9a5   :  { %v2913_v4 = vmax.f32 %v2848_v63, %v2906_v3  ;;  %v2984_v63 = vld [vmem:[#allocation8 + $0x20] sm:$0xff] }
 0x9a7   :  { %v2941_v58 = vadd.f32 %v2932_v5, %v2913_v4 }
 0x9a9   :  { %v2945_v6 = vmax.f32 %v2941_v58, 0.0 }
 0x9aa   :  { %v2879_v7 = vpop.f32.mrf.mxu2  ;;  %v2908_v8 = vpop.f32.mrf.mxu3 }
 0x9ab   :  { %v2909_v10 = vadd.f32 %v2908_v8, %v2879_v7  ;;  %2955 = vrot.lane.b32.xlu1 %v2945_v6, %s10189_s25  ;;  %v2985_v8 = vld [vmem:[#allocation8 + $0x28] sm:$0xff] }
 0x9ad   :  { %v2914_v17 = vmax.f32 %v2851_v9, %v2909_v10 }
 0x9af   :  { %v2942_v56 = vadd.f32 %v2937_v2, %v2914_v17 }
 0x9b1   :  { %v2946_v16 = vmax.f32 %v2942_v56, 0.0 }
 0x9b3   :  { %2957 = vrot.lane.b32.xlu2 %v2946_v16, %s10189_s25 }
 0x9bb   :  { %2951 = vrot.lane.b32.xlu2 %v2943_v20, %s10189_s25 }
 0xa0d   :  { %v2958_v21 = vpop.permute.xlu2 %2957 }
 0xa0e   :  { %2969 = vst.msk [vmem:[#allocation2 + $0x48] sm:$0xff] %vm1552_vm3, %v2958_v21 }
 0xa0f   :  { %2970 = vst.msk [vmem:[#allocation2 + $0x50] sm:$0xff] %vm1543_vm4, %v2958_v21 }
 0xa10   :  { %2974 = vst.msk [vmem:[#allocation2 + $0x50] sm:$0xff] %vm1559_vm5, %v11013_v22 }
 0xa15   :  { %v2954_v23 = vpop.permute.xlu0 %2953  ;;  %v2982_v40 = vld [vmem:[#allocation2 + $0x48] sm:$0xff]  ;;  %v2952_v43 = vpop.permute.xlu2 %2951 }
 0xa16   :  { %2965 = vst.msk [vmem:[#allocation2 + $0x18] sm:$0xff] %vm1552_vm3, %v2954_v23  ;;  %3089 = vmatpush.msrb.mxu1 %v2982_v40 }
 0xa17   :  { %2966 = vst.msk [vmem:[#allocation2 + $0x20] sm:$0xff] %vm1543_vm4, %v2954_v23  ;;  %v2991_v14 = vld [vmem:[#allocation2 + $0x50] sm:$0xff] }
 0xa18   :  { %2972 = vst.msk [vmem:[#allocation2 + $0x20] sm:$0xff] %vm1559_vm5, %v11013_v22  ;;  %v9287_v15 = vpack.i.bf16 %v2991_v14, %v2982_v40 }
 0xa19   :  { %2963 = vst.msk [vmem:[#allocation2] sm:$0xff] %vm1552_vm3, %v2952_v43 }
 0xa1a   :  { %2964 = vst.msk [vmem:[#allocation2 + $0x8] sm:$0xff] %vm1543_vm4, %v2952_v43  ;;  %9288 = vrot.lane.b32.xlu1 %v9287_v15, %s10183_s7 }
 0xa1b   :  { %2971 = vst.msk [vmem:[#allocation2 + $0x8] sm:$0xff] %vm1559_vm5, %v11013_v22 }
 0xa1d   :  { %v2956_v24 = vpop.permute.xlu1 %2955  ;;  %v2980_v25 = vld [vmem:[#allocation2 + $0x18] sm:$0xff] }
 0xa1e   :  { %2967 = vst.msk [vmem:[#allocation2 + $0x30] sm:$0xff] %vm1552_vm3, %v2956_v24 }
 0xa1f   :  { %2968 = vst.msk [vmem:[#allocation2 + $0x38] sm:$0xff] %vm1543_vm4, %v2956_v24  ;;  %v2989_v26 = vld [vmem:[#allocation2 + $0x20] sm:$0xff]  ;;  %v2986_v24 = vld [vmem:[#allocation8 + $0x30] sm:$0xff] }
 0xa20   :  { %2973 = vst.msk [vmem:[#allocation2 + $0x38] sm:$0xff] %vm1559_vm5, %v11013_v22  ;;  %v9277_v27 = vpack.i.bf16 %v2989_v26, %v2980_v25  ;;  %v2979_v28 = vld [vmem:[#allocation2] sm:$0xff] }
 0xa22   :  { %9278 = vrot.lane.b32.xlu2 %v9277_v27, %s10183_s7  ;;  %v2988_v30 = vld [vmem:[#allocation2 + $0x8] sm:$0xff] }
 0xa23   :  { %v9292_v31 = vpack.i.bf16 %v2988_v30, %v2979_v28 }
 0xa25   :  { %9293 = vrot.lane.b32.xlu1 %v9292_v31, %s10183_s7  ;;  %v2981_v48 = vld [vmem:[#allocation2 + $0x30] sm:$0xff] }
 0xa26   :  { %3090 = vmatpush.msrb.mxu1 %v2981_v48 }
 0xa27   :  { %v2990_v61 = vld [vmem:[#allocation2 + $0x38] sm:$0xff] }
 0xa28   :  { %3091 = vmatpush.msrb.mxu1 %v2980_v25  ;;  %v9282_v32 = vpack.i.bf16 %v2990_v61, %v2981_v48 }
 0xa2a   :  { %9283 = vrot.lane.b32.xlu0 %v9282_v32, %s10183_s7  ;;  %9298 = vrot.lane.b32.xlu2 %v9282_v32, %s10182_s5 }
 0xa2b   :  { %3092 = vmatpush.msrb.mxu1 %v2979_v28  ;;  %v3107_v28 = vld [vmem:[#allocation8 + $0x40] sm:$0xff] }
 0xa2c   :  { %8544 = vmatmul.msk.f32.vlgmr.msrb.gmra.mxu1 %vm2221_vm6, %v2975_v39 }
 0xa2d   :  { %9313 = vrot.lane.b32.xlu1 %v9292_v31, %s10182_s5 }
 0xa32   :  { %9303 = vrot.lane.b32.xlu0 %v9277_v27, %s10182_s5  ;;  %9308 = vrot.lane.b32.xlu2 %v9282_v32, %s10184_s10 }
 0xa34   :  { %8545 = vmatmul.msk.f32.gmra.mxu1 %vm2221_vm6, %v2976_v47 }
 0xa35   :  { %9343 = vrot.lane.b32.xlu1 %v9287_v15, %s10184_s10 }
 0xa3a   :  { %9318 = vrot.lane.b32.xlu0 %v9287_v15, %s10182_s5  ;;  %9328 = vrot.lane.b32.xlu2 %v9292_v31, %s10184_s10 }
 0xa3c   :  { %8546 = vmatmul.msk.f32.gmra.mxu1 %vm2221_vm6, %v2977_v45 }
 0xa3d   :  { %9348 = vrot.lane.b32.xlu1 %v9287_v15, %s10185_s30 }
 0xa42   :  { %9323 = vrot.lane.b32.xlu0 %v9277_v27, %s10184_s10  ;;  %9338 = vrot.lane.b32.xlu2 %v9277_v27, %s10185_s30 }
 0xa44   :  { %8547 = vmatmul.msk.f32.gmra.mxu1 %vm2221_vm6, %v2978_v49  ;;  %v3257_v49 = vld [vmem:[#allocation8 + $0x90] sm:$0xff] }
 0xa45   :  { %9353 = vrot.lane.b32.xlu1 %v9292_v31, %s10185_s30 }
 0xa4a   :  { %9333 = vrot.lane.b32.xlu0 %v9282_v32, %s10185_s30  ;;  %3344 = vperm.xlu2 %9005, %v3330_v34   ;;  %v3181_v34 = vld [vmem:[#allocation8 + $0x60] sm:$0xff] }
 0xa4d   :  { %3339 = vperm.xlu1 %9004, %v3329_v35  }
 0xa52   :  { %3349 = vperm.xlu0 %9096, %v3331_v36  }
 0xa5a   :  { %3334 = vperm.xlu0 %9096, %v3328_v33   ;;  %v2987_v33 = vld [vmem:[#allocation8 + $0x38] sm:$0xff] }
 0xa7c   :  { %v9279_v50 = vpop.permute.xlu2 %9278 }
 0xa7d   :  { %v9281_v53 = vunpack.i.h.bf16 %v9279_v50  ;;  %v9280_v37 = vunpack.i.l.bf16 %v9279_v50 }
 0xa7f   :  { %v3017_v62 = vsel %vm406_vm7, %v9280_v37, %v9281_v53  ;;  %v3255_v37 = vld [vmem:[#allocation8 + $0x80] sm:$0xff] }
 0xa84   :  { %v9299_v51 = vpop.permute.xlu2 %9298 }
 0xa85   :  { %v9301_v11 = vunpack.i.h.bf16 %v9299_v51  ;;  %v9300_v17 = vunpack.i.l.bf16 %v9299_v51 }
 0xa87   :  { %v3129_v14 = vsel %vm532_vm8, %v9300_v17, %v9301_v11 }
 0xa8c   :  { %v9289_v44 = vpop.permute.xlu1 %9288  ;;  %v9309_v5 = vpop.permute.xlu2 %9308 }
 0xa8d   :  { %v9291_v0 = vunpack.i.h.bf16 %v9289_v44  ;;  %v9290_v12 = vunpack.i.l.bf16 %v9289_v44  ;;  %v9311_v59 = vunpack.i.h.bf16 %v9309_v5  ;;  %v9310_v1 = vunpack.i.l.bf16 %v9309_v5 }
 0xa8f   :  { %v3019_v13 = vsel %vm406_vm7, %v9290_v12, %v9291_v0  ;;  %v3203_v9 = vsel %vm604_vm9, %v9310_v1, %v9311_v59  ;;  %v3108_v0 = vld [vmem:[#allocation8 + $0x48] sm:$0xff] }
 0xa90   :  { %3048 = vmatpush.msrb.mxu0 %v3019_v13 }
 0xa94   :  { %v9329_v20 = vpop.permute.xlu2 %9328 }
 0xa95   :  { %v9331_v26 = vunpack.i.h.bf16 %v9329_v20  ;;  %v9330_v30 = vunpack.i.l.bf16 %v9329_v20 }
 0xa97   :  { %v9294_v46 = vpop.permute.xlu1 %9293  ;;  %v3201_v35 = vsel %vm604_vm9, %v9330_v30, %v9331_v26 }
 0xa98   :  { %v9296_v55 = vunpack.i.h.bf16 %v9294_v46  ;;  %v9295_v42 = vunpack.i.l.bf16 %v9294_v46 }
 0xa9a   :  { %v3016_v3 = vsel %vm406_vm7, %v9295_v42, %v9296_v55  ;;  %v3183_v55 = vld [vmem:[#allocation8 + $0x70] sm:$0xff]  ;;  %v3256_v42 = vld [vmem:[#allocation8 + $0x88] sm:$0xff] }
 0xa9c   :  { %v9284_v52 = vpop.permute.xlu0 %9283  ;;  %v9339_v36 = vpop.permute.xlu2 %9338 }
 0xa9d   :  { %v9286_v41 = vunpack.i.h.bf16 %v9284_v52  ;;  %v9285_v54 = vunpack.i.l.bf16 %v9284_v52  ;;  %v9341_v12 = vunpack.i.h.bf16 %v9339_v36  ;;  %v9340_v13 = vunpack.i.l.bf16 %v9339_v36  ;;  %v3182_v52 = vld [vmem:[#allocation8 + $0x68] sm:$0xff] }
 0xa9f   :  { %v9314_v57 = vpop.permute.xlu1 %9313  ;;  %v3018_v60 = vsel %vm406_vm7, %v9285_v54, %v9286_v41  ;;  %v3276_v53 = vsel %vm676_vm10, %v9340_v13, %v9341_v12  ;;  %v3109_v54 = vld [vmem:[#allocation8 + $0x50] sm:$0xff] }
 0xaa0   :  { %3049 = vmatpush.msrb.mxu0 %v3018_v60  ;;  %v9316_v40 = vunpack.i.h.bf16 %v9314_v57  ;;  %v9315_v43 = vunpack.i.l.bf16 %v9314_v57  ;;  %v3110_v57 = vld [vmem:[#allocation8 + $0x58] sm:$0xff] }
 0xaa1   :  { %v3184_v60 = vld [vmem:[#allocation8 + $0x78] sm:$0xff] }
 0xaa2   :  { %3050 = vmatpush.msrb.mxu0 %v3017_v62  ;;  %v3127_v61 = vsel %vm532_vm8, %v9315_v43, %v9316_v40  ;;  %v3258_v62 = vld [vmem:[#allocation8 + $0x98] sm:$0xff] }
 0xaa4   :  { %v9304_v4 = vpop.permute.xlu0 %9303  ;;  %3051 = vmatpush.msrb.mxu0 %v3016_v3 }
 0xaa5   :  { %8540 = vmatmul.msk.f32.vlgmr.msrb.gmra.mxu0 %vm2221_vm6, %v2984_v63  ;;  %v9306_v38 = vunpack.i.h.bf16 %v9304_v4  ;;  %v9305_v16 = vunpack.i.l.bf16 %v9304_v4 }
 0xaa7   :  { %v9344_v58 = vpop.permute.xlu1 %9343  ;;  %v3128_v25 = vsel %vm532_vm8, %v9305_v16, %v9306_v38 }
 0xaa8   :  { %v9346_v2 = vunpack.i.h.bf16 %v9344_v58  ;;  %v9345_v6 = vunpack.i.l.bf16 %v9344_v58 }
 0xaa9   :  { %v3094_v5 = vpop.f32.mrf.mxu1 }
 0xaaa   :  { %v3204_v7 = vsel %vm604_vm9, %v9345_v6, %v9346_v2 }
 0xaab   :  { %3233 = vmatpush.msrb.mxu3 %v3204_v7 }
 0xaac   :  { %v9319_v10 = vpop.permute.xlu0 %9318 }
 0xaad   :  { %3234 = vmatpush.msrb.mxu3 %v3203_v9  ;;  %v9321_v29 = vunpack.i.h.bf16 %v9319_v10  ;;  %v9320_v56 = vunpack.i.l.bf16 %v9319_v10  ;;  %8541 = vmatmul.msk.f32.gmra.mxu0 %vm2221_vm6, %v2985_v8 }
 0xaaf   :  { %v9349_v18 = vpop.permute.xlu1 %9348  ;;  %v3130_v19 = vsel %vm532_vm8, %v9320_v56, %v9321_v29 }
 0xab0   :  { %v9351_v21 = vunpack.i.h.bf16 %v9349_v18  ;;  %v9350_v23 = vunpack.i.l.bf16 %v9349_v18  ;;  %3159 = vmatpush.msrb.mxu2 %v3130_v19 }
 0xab1   :  { %v3097_v1 = vpop.f32.mrf.mxu1 }
 0xab2   :  { %v3278_v15 = vsel %vm676_vm10, %v9350_v23, %v9351_v21  ;;  %3160 = vmatpush.msrb.mxu2 %v3129_v14 }
 0xab3   :  { %3307 = vmatpush.msra.mxu0 %v3278_v15 }
 0xab4   :  { %v9324_v27 = vpop.permute.xlu0 %9323  ;;  %3161 = vmatpush.msrb.mxu2 %v3128_v25 }
 0xab5   :  { %v9326_v31 = vunpack.i.h.bf16 %v9324_v27  ;;  %v9325_v48 = vunpack.i.l.bf16 %v9324_v27  ;;  %8542 = vmatmul.msk.f32.gmra.mxu0 %vm2221_vm6, %v2986_v24  ;;  %v3345_v24 = vpop.permute.xlu2 %3344 }
 0xab6   :  { %3162 = vmatpush.msrb.mxu2 %v3127_v61 }
 0xab7   :  { %8548 = vmatmul.msk.f32.vlgmr.msrb.gmra.mxu2 %vm2221_vm6, %v3107_v28  ;;  %v3202_v32 = vsel %vm604_vm9, %v9325_v48, %v9326_v31  ;;  %v9354_v39 = vpop.permute.xlu1 %9353 }
 0xab8   :  { %3235 = vmatpush.msrb.mxu3 %v3202_v32  ;;  %v9356_v46 = vunpack.i.h.bf16 %v9354_v39  ;;  %v9355_v45 = vunpack.i.l.bf16 %v9354_v39 }
 0xab9   :  { %v3100_v11 = vpop.f32.mrf.mxu1 }
 0xaba   :  { %3236 = vmatpush.msrb.mxu3 %v3201_v35  ;;  %v3275_v41 = vsel %vm676_vm10, %v9355_v45, %v9356_v46 }
 0xabb   :  { %8552 = vmatmul.msk.f32.vlgmr.msrb.gmra.mxu3 %vm2221_vm6, %v3181_v34 }
 0xabc   :  { %v9334_v44 = vpop.permute.xlu0 %9333 }
 0xabd   :  { %v9336_v47 = vunpack.i.h.bf16 %v9334_v44  ;;  %v9335_v50 = vunpack.i.l.bf16 %v9334_v44  ;;  %8543 = vmatmul.msk.f32.gmra.mxu0 %vm2221_vm6, %v2987_v33 }
 0xabf   :  { %8549 = vmatmul.msk.f32.gmra.mxu2 %vm2221_vm6, %v3108_v0  ;;  %v3277_v51 = vsel %vm676_vm10, %v9335_v50, %v9336_v47  ;;  %v3340_v16 = vpop.permute.xlu1 %3339 }
 0xac0   :  { %3308 = vmatpush.msra.mxu0 %v3277_v51 }
 0xac1   :  { %v3103_v43 = vpop.f32.mrf.mxu1 }
 0xac2   :  { %3309 = vmatpush.msra.mxu0 %v3276_v53 }
 0xac3   :  { %8553 = vmatmul.msk.f32.gmra.mxu3 %vm2221_vm6, %v3182_v52 }
 0xac4   :  { %3310 = vmatpush.msra.mxu0 %v3275_v41  ;;  %v3350_v48 = vpop.permute.xlu0 %3349 }
 0xac5   :  { %8556 = vmatmul.msk.f32.vlgmr.msra.gmra.mxu0 %vm2221_vm6, %v3255_v37 }
 0xac7   :  { %8550 = vmatmul.msk.f32.gmra.mxu2 %vm2221_vm6, %v3109_v54 }
 0xacb   :  { %8554 = vmatmul.msk.f32.gmra.mxu3 %vm2221_vm6, %v3183_v55 }
 0xacc   :  { %v3335_v12 = vpop.permute.xlu0 %3334 }
 0xacd   :  { %8557 = vmatmul.msk.f32.gmra.mxu0 %vm2221_vm6, %v3256_v42 }
 0xacf   :  { %8551 = vmatmul.msk.f32.gmra.mxu2 %vm2221_vm6, %v3110_v57 }
 0xad3   :  { %8555 = vmatmul.msk.f32.gmra.mxu3 %vm2221_vm6, %v3184_v60 }
 0xad5   :  { %8558 = vmatmul.msk.f32.gmra.mxu0 %vm2221_vm6, %v3257_v49 }
 0xadd   :  { %8559 = vmatmul.msk.f32.gmra.mxu0 %vm2221_vm6, %v3258_v62 }
 0xb22   :  { %v3053_v63 = vpop.f32.mrf.mxu0 }
 0xb23   :  { %v3095_v61 = vadd.f32 %v3094_v5, %v3053_v63  ;;  %v3835_v5 = vld [vmem:[%s12186_s0] sm:$0xff] }
 0xb2a   :  { %v3056_v3 = vpop.f32.mrf.mxu0 }
 0xb2b   :  { %v3098_v8 = vadd.f32 %v3097_v1, %v3056_v3  ;;  %v3836_v3 = vld [vmem:[%s12186_s0 + $0x8] sm:$0xff] }
 0xb32   :  { %v3059_v4 = vpop.f32.mrf.mxu0 }
 0xb33   :  { %v3101_v18 = vadd.f32 %v3100_v11, %v3059_v4  ;;  %v3838_v4 = vld [vmem:[%s12186_s0 + $0x18] sm:$0xff] }
 0xb34   :  { %v3390_v11 = vld [vmem:[#allocation9 + $0x10] sm:$0xff] }
 0xb3a   :  { %v3062_v58 = vpop.f32.mrf.mxu0  ;;  %v3164_v59 = vpop.f32.mrf.mxu2 }
 0xb3b   :  { %v3104_v26 = vadd.f32 %v3103_v43, %v3062_v58  ;;  %v3176_v35 = vadd.f32 %v3164_v59, %v3095_v61  ;;  %v3388_v59 = vld [vmem:[#allocation9] sm:$0xff] }
 0xb3e   :  { %v3238_v2 = vpop.f32.mrf.mxu3 }
 0xb3f   :  { %v3250_v33 = vadd.f32 %v3238_v2, %v3176_v35  ;;  %v3389_v2 = vld [vmem:[#allocation9 + $0x8] sm:$0xff] }
 0xb40   :  { %v3398_v35 = vld [vmem:[#allocation9 + $0x28] sm:$0xff] }
 0xb42   :  { %v3167_v6 = vpop.f32.mrf.mxu2  ;;  %v3312_v7 = vpop.f32.mrf.mxu0 }
 0xb43   :  { %v3177_v10 = vadd.f32 %v3167_v6, %v3098_v8  ;;  %v3324_v44 = vadd.f32 %v3312_v7, %v3250_v33 }
 0xb45   :  { %v3352_v13 = vadd.f32 %v3335_v12, %v3324_v44 }
 0xb46   :  { %v3241_v9 = vpop.f32.mrf.mxu3 }
 0xb47   :  { %v3251_v17 = vadd.f32 %v3241_v9, %v3177_v10  ;;  %v3356_v47 = vmax.f32 %v3352_v13, 0.0 }
 0xb4a   :  { %v3170_v29 = vpop.f32.mrf.mxu2  ;;  %v3315_v56 = vpop.f32.mrf.mxu0 }
 0xb4b   :  { %v3325_v38 = vadd.f32 %v3315_v56, %v3251_v17  ;;  %v3178_v21 = vadd.f32 %v3170_v29, %v3101_v18  ;;  %v3391_v18 = vld [vmem:[#allocation9 + $0x18] sm:$0xff] }
 0xb4d   :  { %v3353_v19 = vadd.f32 %v3340_v16, %v3325_v38 }
 0xb4e   :  { %v3244_v20 = vpop.f32.mrf.mxu3 }
 0xb4f   :  { %v3357_v23 = vmax.f32 %v3353_v19, 0.0  ;;  %v3252_v40 = vadd.f32 %v3244_v20, %v3178_v21 }
 0xb51   :  { %3366 = vrot.lane.b32.xlu0 %v3357_v23, %s10189_s25 }
 0xb52   :  { %v3318_v14 = vpop.f32.mrf.mxu0  ;;  %v3173_v25 = vpop.f32.mrf.mxu2 }
 0xb53   :  { %v3326_v15 = vadd.f32 %v3318_v14, %v3252_v40  ;;  %v3179_v30 = vadd.f32 %v3173_v25, %v3104_v26  ;;  %v3397_v26 = vld [vmem:[#allocation9 + $0x20] sm:$0xff] }
 0xb55   :  { %v3354_v27 = vadd.f32 %v3345_v24, %v3326_v15 }
 0xb56   :  { %v3247_v28 = vpop.f32.mrf.mxu3 }
 0xb57   :  { %v3358_v31 = vmax.f32 %v3354_v27, 0.0  ;;  %v3253_v32 = vadd.f32 %v3247_v28, %v3179_v30 }
 0xb59   :  { %3368 = vrot.lane.b32.xlu1 %v3358_v31, %s10189_s25 }
 0xb5a   :  { %v3321_v34 = vpop.f32.mrf.mxu0 }
 0xb5b   :  { %v3327_v36 = vadd.f32 %v3321_v34, %v3253_v32 }
 0xb5d   :  { %v3355_v39 = vadd.f32 %v3350_v48, %v3327_v36 }
 0xb5f   :  { %v3359_v0 = vmax.f32 %v3355_v39, 0.0 }
 0xb61   :  { %3370 = vrot.lane.b32.xlu2 %v3359_v0, %s10189_s25 }
 0xb69   :  { %3364 = vrot.lane.b32.xlu2 %v3356_v47, %s10189_s25 }
 0xbbb   :  { %v3371_v50 = vpop.permute.xlu2 %3370 }
 0xbbc   :  { %3382 = vst.msk [vmem:[#allocation3 + $0x48] sm:$0xff] %vm1552_vm3, %v3371_v50 }
 0xbbd   :  { %3383 = vst.msk [vmem:[#allocation3 + $0x50] sm:$0xff] %vm1543_vm4, %v3371_v50 }
 0xbbe   :  { %3387 = vst.msk [vmem:[#allocation3 + $0x50] sm:$0xff] %vm1559_vm5, %v11013_v22 }
 0xbc3   :  { %v3367_v46 = vpop.permute.xlu0 %3366  ;;  %v3395_v45 = vld [vmem:[#allocation3 + $0x48] sm:$0xff]  ;;  %v3365_v51 = vpop.permute.xlu2 %3364 }
 0xbc4   :  { %3378 = vst.msk [vmem:[#allocation3 + $0x18] sm:$0xff] %vm1552_vm3, %v3367_v46  ;;  %3502 = vmatpush.msra.mxu2 %v3395_v45 }
 0xbc5   :  { %3379 = vst.msk [vmem:[#allocation3 + $0x20] sm:$0xff] %vm1543_vm4, %v3367_v46  ;;  %v3404_v52 = vld [vmem:[#allocation3 + $0x50] sm:$0xff] }
 0xbc6   :  { %3385 = vst.msk [vmem:[#allocation3 + $0x20] sm:$0xff] %vm1559_vm5, %v11013_v22  ;;  %v9367_v53 = vpack.i.bf16 %v3404_v52, %v3395_v45 }
 0xbc7   :  { %3376 = vst.msk [vmem:[#allocation3] sm:$0xff] %vm1552_vm3, %v3365_v51 }
 0xbc8   :  { %3377 = vst.msk [vmem:[#allocation3 + $0x8] sm:$0xff] %vm1543_vm4, %v3365_v51  ;;  %9368 = vrot.lane.b32.xlu1 %v9367_v53, %s10183_s7 }
 0xbc9   :  { %3384 = vst.msk [vmem:[#allocation3 + $0x8] sm:$0xff] %vm1559_vm5, %v11013_v22 }
 0xbcb   :  { %v3369_v37 = vpop.permute.xlu1 %3368  ;;  %v3393_v41 = vld [vmem:[#allocation3 + $0x18] sm:$0xff] }
 0xbcc   :  { %3380 = vst.msk [vmem:[#allocation3 + $0x30] sm:$0xff] %vm1552_vm3, %v3369_v37 }
 0xbcd   :  { %3381 = vst.msk [vmem:[#allocation3 + $0x38] sm:$0xff] %vm1543_vm4, %v3369_v37  ;;  %v3402_v54 = vld [vmem:[#allocation3 + $0x20] sm:$0xff] }
 0xbce   :  { %3386 = vst.msk [vmem:[#allocation3 + $0x38] sm:$0xff] %vm1559_vm5, %v11013_v22  ;;  %v9362_v55 = vpack.i.bf16 %v3402_v54, %v3393_v41  ;;  %v3392_v42 = vld [vmem:[#allocation3] sm:$0xff]  ;;  %v3837_v22 = vld [vmem:[%s12186_s0 + $0x10] sm:$0xff] }
 0xbd0   :  { %9363 = vrot.lane.b32.xlu2 %v9362_v55, %s10183_s7  ;;  %v3401_v57 = vld [vmem:[#allocation3 + $0x8] sm:$0xff] }
 0xbd1   :  { %v9372_v60 = vpack.i.bf16 %v3401_v57, %v3392_v42 }
 0xbd3   :  { %9373 = vrot.lane.b32.xlu1 %v9372_v60, %s10183_s7  ;;  %v3394_v49 = vld [vmem:[#allocation3 + $0x30] sm:$0xff] }
 0xbd4   :  { %3503 = vmatpush.msra.mxu2 %v3394_v49 }
 0xbd5   :  { %v3403_v62 = vld [vmem:[#allocation3 + $0x38] sm:$0xff] }
 0xbd6   :  { %3504 = vmatpush.msra.mxu2 %v3393_v41  ;;  %v9357_v63 = vpack.i.bf16 %v3403_v62, %v3394_v49 }
 0xbd8   :  { %9358 = vrot.lane.b32.xlu0 %v9357_v63, %s10183_s7  ;;  %9378 = vrot.lane.b32.xlu2 %v9357_v63, %s10182_s5 }
 0xbd9   :  { %3505 = vmatpush.msra.mxu2 %v3392_v42  ;;  %v3520_v42 = vld [vmem:[#allocation9 + $0x40] sm:$0xff] }
 0xbda   :  { %8564 = vmatmul.msk.f32.vlgmr.msra.gmra.mxu2 %vm2221_vm6, %v3388_v59 }
 0xbdb   :  { %9383 = vrot.lane.b32.xlu1 %v9362_v55, %s10182_s5 }
 0xbe0   :  { %9398 = vrot.lane.b32.xlu2 %v9362_v55, %s10184_s10  ;;  %9388 = vrot.lane.b32.xlu0 %v9372_v60, %s10182_s5 }
 0xbe2   :  { %8565 = vmatmul.msk.f32.gmra.mxu2 %vm2221_vm6, %v3389_v2 }
 0xbe3   :  { %9393 = vrot.lane.b32.xlu1 %v9357_v63, %s10184_s10 }
 0xbe8   :  { %9413 = vrot.lane.b32.xlu2 %v9367_v53, %s10184_s10  ;;  %9408 = vrot.lane.b32.xlu0 %v9367_v53, %s10182_s5 }
 0xbea   :  { %8566 = vmatmul.msk.f32.gmra.mxu2 %vm2221_vm6, %v3390_v11  ;;  %v3594_v11 = vld [vmem:[#allocation9 + $0x60] sm:$0xff] }
 0xbeb   :  { %9403 = vrot.lane.b32.xlu1 %v9357_v63, %s10185_s30 }
 0xbf0   :  { %9428 = vrot.lane.b32.xlu2 %v9362_v55, %s10185_s30  ;;  %9418 = vrot.lane.b32.xlu0 %v9367_v53, %s10185_s30  ;;  %v3399_v53 = vld [vmem:[#allocation9 + $0x30] sm:$0xff] }
 0xbf2   :  { %8567 = vmatmul.msk.f32.gmra.mxu2 %vm2221_vm6, %v3391_v18  ;;  %v3523_v18 = vld [vmem:[#allocation9 + $0x58] sm:$0xff] }
 0xbf3   :  { %9433 = vrot.lane.b32.xlu1 %v9372_v60, %s10185_s30 }
 0xbf8   :  { %3851 = vperm.xlu2 %9005, %v3837_v22   ;;  %9423 = vrot.lane.b32.xlu0 %v9372_v60, %s10184_s10 }
 0xbfb   :  { %3846 = vperm.xlu1 %9004, %v3836_v3  }
 0xc00   :  { %3856 = vperm.xlu0 %9096, %v3838_v4  }
 0xc08   :  { %3841 = vperm.xlu0 %9096, %v3835_v5  }
 0xc2a   :  { %v9364_v58 = vpop.permute.xlu2 %9363 }
 0xc2b   :  { %v9366_v20 = vunpack.i.h.bf16 %v9364_v58  ;;  %v9365_v21 = vunpack.i.l.bf16 %v9364_v58 }
 0xc2d   :  { %v3430_v25 = vsel %vm406_vm7, %v9365_v21, %v9366_v20  ;;  %v3670_v20 = vld [vmem:[#allocation9 + $0x90] sm:$0xff]  ;;  %v3597_v21 = vld [vmem:[#allocation9 + $0x78] sm:$0xff] }
 0xc32   :  { %v9379_v1 = vpop.permute.xlu2 %9378 }
 0xc33   :  { %v9381_v39 = vunpack.i.h.bf16 %v9379_v1  ;;  %v9380_v44 = vunpack.i.l.bf16 %v9379_v1  ;;  %v3400_v1 = vld [vmem:[#allocation9 + $0x38] sm:$0xff] }
 0xc35   :  { %v3542_v52 = vsel %vm532_vm8, %v9380_v44, %v9381_v39  ;;  %v3747_v39 = vld [vmem:[%s12184_s27 + $0x30] sm:$0xff]  ;;  %v3763_v44 = vld [vmem:[#allocation4 + $0x30] sm:$0xff] }
 0xc3a   :  { %v9369_v6 = vpop.permute.xlu1 %9368  ;;  %v9399_v7 = vpop.permute.xlu2 %9398 }
 0xc3b   :  { %v9371_v8 = vunpack.i.h.bf16 %v9369_v6  ;;  %v9370_v9 = vunpack.i.l.bf16 %v9369_v6  ;;  %v9401_v31 = vunpack.i.h.bf16 %v9399_v7  ;;  %v9400_v48 = vunpack.i.l.bf16 %v9399_v7  ;;  %v3521_v7 = vld [vmem:[#allocation9 + $0x48] sm:$0xff] }
 0xc3d   :  { %v3432_v10 = vsel %vm406_vm7, %v9370_v9, %v9371_v8  ;;  %v3615_v36 = vsel %vm604_vm9, %v9400_v48, %v9401_v31  ;;  %v3751_v31 = vld [vmem:[%s12184_s27 + $0x50] sm:$0xff]  ;;  %v3767_v48 = vld [vmem:[#allocation4 + $0x50] sm:$0xff] }
 0xc3e   :  { %3461 = vmatpush.msra.mxu1 %v3432_v10 }
 0xc42   :  { %v9414_v17 = vpop.permute.xlu2 %9413 }
 0xc43   :  { %v9416_v29 = vunpack.i.h.bf16 %v9414_v17  ;;  %v9415_v56 = vunpack.i.l.bf16 %v9414_v17 }
 0xc45   :  { %v9374_v38 = vpop.permute.xlu1 %9373  ;;  %v3617_v16 = vsel %vm604_vm9, %v9415_v56, %v9416_v29  ;;  %v3668_v29 = vld [vmem:[#allocation9 + $0x80] sm:$0xff]  ;;  %v3522_v56 = vld [vmem:[#allocation9 + $0x50] sm:$0xff] }
 0xc46   :  { %3646 = vmatpush.msrb.mxu0 %v3617_v16  ;;  %v9376_v43 = vunpack.i.h.bf16 %v9374_v38  ;;  %v9375_v14 = vunpack.i.l.bf16 %v9374_v38  ;;  %v3595_v38 = vld [vmem:[#allocation9 + $0x68] sm:$0xff] }
 0xc47   :  { %v3669_v16 = vld [vmem:[#allocation9 + $0x88] sm:$0xff] }
 0xc48   :  { %v3429_v27 = vsel %vm406_vm7, %v9375_v14, %v9376_v43  ;;  %v3772_v43 = vld [vmem:[#allocation4 + $0x78] sm:$0xff]  ;;  %v3755_v14 = vld [vmem:[%s12184_s27 + $0x70] sm:$0xff] }
 0xc4a   :  { %v9359_v19 = vpop.permute.xlu0 %9358  ;;  %v9429_v41 = vpop.permute.xlu2 %9428 }
 0xc4b   :  { %v9361_v23 = vunpack.i.h.bf16 %v9359_v19  ;;  %v9360_v40 = vunpack.i.l.bf16 %v9359_v19  ;;  %v9431_v63 = vunpack.i.h.bf16 %v9429_v41  ;;  %v9430_v22 = vunpack.i.l.bf16 %v9429_v41  ;;  %v3596_v19 = vld [vmem:[#allocation9 + $0x70] sm:$0xff]  ;;  %v3741_v41 = vld [vmem:[%s12184_s27] sm:$0xff] }
 0xc4d   :  { %v9384_v15 = vpop.permute.xlu1 %9383  ;;  %v3431_v24 = vsel %vm406_vm7, %v9360_v40, %v9361_v23  ;;  %v3689_v2 = vsel %vm676_vm10, %v9430_v22, %v9431_v63  ;;  %v3671_v23 = vld [vmem:[#allocation9 + $0x98] sm:$0xff]  ;;  %v3756_v40 = vld [vmem:[%s12184_s27 + $0x78] sm:$0xff]  ;;  %vm3883_vm7 = vcmask 539664  }
 0xc4e   :  { %3462 = vmatpush.msra.mxu1 %v3431_v24  ;;  %v9386_v13 = vunpack.i.h.bf16 %v9384_v15  ;;  %v9385_v47 = vunpack.i.l.bf16 %v9384_v15  ;;  %3773 = vmatpush.msrb.mxu2 %v3756_v40  ;;  %v3771_v15 = vld [vmem:[#allocation4 + $0x70] sm:$0xff]  ;;  %v3754_v24 = vld [vmem:[%s12184_s27 + $0x68] sm:$0xff] }
 0xc50   :  { %3463 = vmatpush.msra.mxu1 %v3430_v25  ;;  %v3541_v37 = vsel %vm532_vm8, %v9385_v47, %v9386_v13  ;;  %3774 = vmatpush.msrb.mxu2 %v3755_v14  ;;  %v3770_v25 = vld [vmem:[#allocation4 + $0x68] sm:$0xff]  ;;  %v3745_v13 = vld [vmem:[%s12184_s27 + $0x20] sm:$0xff]  ;;  %v3761_v47 = vld [vmem:[#allocation4 + $0x20] sm:$0xff] }
 0xc52   :  { %v9389_v28 = vpop.permute.xlu0 %9388  ;;  %3464 = vmatpush.msra.mxu1 %v3429_v27  ;;  %3775 = vmatpush.msrb.mxu2 %v3754_v24  ;;  %v3769_v27 = vld [vmem:[#allocation4 + $0x60] sm:$0xff] }
 0xc53   :  { %8560 = vmatmul.msk.f32.vlgmr.msra.gmra.mxu1 %vm2221_vm6, %v3397_v26  ;;  %v9391_v45 = vunpack.i.h.bf16 %v9389_v28  ;;  %v9390_v51 = vunpack.i.l.bf16 %v9389_v28  ;;  %v3753_v26 = vld [vmem:[%s12184_s27 + $0x60] sm:$0xff]  ;;  %v3752_v28 = vld [vmem:[%s12184_s27 + $0x58] sm:$0xff] }
 0xc54   :  { %3776 = vmatpush.msrb.mxu2 %v3753_v26 }
 0xc55   :  { %v9394_v30 = vpop.permute.xlu1 %9393  ;;  %v3540_v55 = vsel %vm532_vm8, %v9390_v51, %v9391_v45  ;;  %v3743_v45 = vld [vmem:[%s12184_s27 + $0x10] sm:$0xff]  ;;  %v3759_v51 = vld [vmem:[#allocation4 + $0x10] sm:$0xff] }
 0xc56   :  { %v9396_v61 = vunpack.i.h.bf16 %v9394_v30  ;;  %v9395_v32 = vunpack.i.l.bf16 %v9394_v30  ;;  %v3768_v30 = vld [vmem:[#allocation4 + $0x58] sm:$0xff]  ;;  %3777 = vmatpush.msrb.mxu2 %v3752_v28 }
 0xc58   :  { %v3616_v34 = vsel %vm604_vm9, %v9395_v32, %v9396_v61  ;;  %3778 = vmatpush.msrb.mxu2 %v3751_v31  ;;  %v3750_v61 = vld [vmem:[%s12184_s27 + $0x48] sm:$0xff]  ;;  %v3766_v32 = vld [vmem:[#allocation4 + $0x48] sm:$0xff] }
 0xc59   :  { %3647 = vmatpush.msrb.mxu0 %v3616_v34  ;;  %v3749_v34 = vld [vmem:[%s12184_s27 + $0x40] sm:$0xff] }
 0xc5a   :  { %v9409_v33 = vpop.permute.xlu0 %9408  ;;  %3779 = vmatpush.msrb.mxu2 %v3750_v61 }
 0xc5b   :  { %3648 = vmatpush.msrb.mxu0 %v3615_v36  ;;  %v9411_v0 = vunpack.i.h.bf16 %v9409_v33  ;;  %v9410_v12 = vunpack.i.l.bf16 %v9409_v33  ;;  %8561 = vmatmul.msk.f32.gmra.mxu1 %vm2221_vm6, %v3398_v35  ;;  %v3765_v35 = vld [vmem:[#allocation4 + $0x40] sm:$0xff]  ;;  %v3748_v36 = vld [vmem:[%s12184_s27 + $0x38] sm:$0xff]  ;;  %v3764_v33 = vld [vmem:[#allocation4 + $0x38] sm:$0xff] }
 0xc5c   :  { %3780 = vmatpush.msrb.mxu2 %v3749_v34 }
 0xc5d   :  { %v9404_v50 = vpop.permute.xlu1 %9403  ;;  %v3543_v46 = vsel %vm532_vm8, %v9410_v12, %v9411_v0  ;;  %v3746_v0 = vld [vmem:[%s12184_s27 + $0x28] sm:$0xff]  ;;  %v3762_v12 = vld [vmem:[#allocation4 + $0x28] sm:$0xff]  ;;  %vm3888_vm8 = vcmask 556560  }
 0xc5e   :  { %3572 = vmatpush.msra.mxu3 %v3543_v46  ;;  %v9406_v57 = vunpack.i.h.bf16 %v9404_v50  ;;  %v9405_v60 = vunpack.i.l.bf16 %v9404_v50  ;;  %3781 = vmatpush.msrb.mxu2 %v3748_v36  ;;  %v3744_v50 = vld [vmem:[%s12184_s27 + $0x18] sm:$0xff]  ;;  %v3760_v46 = vld [vmem:[#allocation4 + $0x18] sm:$0xff] }
 0xc60   :  { %3573 = vmatpush.msra.mxu3 %v3542_v52  ;;  %v3690_v59 = vsel %vm676_vm10, %v9405_v60, %v9406_v57  ;;  %3782 = vmatpush.msrb.mxu2 %v3747_v39  ;;  %v3507_v57 = vpop.f32.mrf.mxu2 }
 0xc62   :  { %v9419_v54 = vpop.permute.xlu0 %9418  ;;  %3574 = vmatpush.msra.mxu3 %v3541_v37  ;;  %3783 = vmatpush.msrb.mxu2 %v3746_v0  ;;  %v3758_v37 = vld [vmem:[#allocation4 + $0x8] sm:$0xff] }
 0xc63   :  { %v9421_v49 = vunpack.i.h.bf16 %v9419_v54  ;;  %v9420_v62 = vunpack.i.l.bf16 %v9419_v54  ;;  %8562 = vmatmul.msk.f32.gmra.mxu1 %vm2221_vm6, %v3399_v53  ;;  %v3742_v53 = vld [vmem:[%s12184_s27 + $0x8] sm:$0xff] }
 0xc64   :  { %3575 = vmatpush.msra.mxu3 %v3540_v55  ;;  %3784 = vmatpush.msrb.mxu2 %v3745_v13  ;;  %v3757_v54 = vld [vmem:[#allocation4] sm:$0xff] }
 0xc65   :  { %v9434_v3 = vpop.permute.xlu1 %9433  ;;  %8568 = vmatmul.msk.f32.vlgmr.msra.gmra.mxu3 %vm2221_vm6, %v3520_v42  ;;  %v3691_v4 = vsel %vm676_vm10, %v9420_v62, %v9421_v49 }
 0xc66   :  { %3720 = vmatpush.msrb.mxu1 %v3691_v4  ;;  %v9436_v5 = vunpack.i.h.bf16 %v9434_v3  ;;  %v9435_v58 = vunpack.i.l.bf16 %v9434_v3  ;;  %3802 = vmatpush.msrb.mxu3 %v3772_v43 }
 0xc67   :  { %3785 = vmatpush.msrb.mxu2 %v3744_v50 }
 0xc68   :  { %3721 = vmatpush.msrb.mxu1 %v3690_v59  ;;  %v3688_v10 = vsel %vm676_vm10, %v9435_v58, %v9436_v5  ;;  %3803 = vmatpush.msrb.mxu3 %v3771_v15  ;;  %v3510_v63 = vpop.f32.mrf.mxu2  ;;  %vm5186_vm10 = vcmask 269320  }
 0xc69   :  { %3786 = vmatpush.msrb.mxu2 %v3743_v45 }
 0xc6a   :  { %v9424_v6 = vpop.permute.xlu0 %9423  ;;  %3722 = vmatpush.msrb.mxu1 %v3689_v2  ;;  %3804 = vmatpush.msrb.mxu3 %v3770_v25 }
 0xc6b   :  { %v9426_v8 = vunpack.i.h.bf16 %v9424_v6  ;;  %v9425_v9 = vunpack.i.l.bf16 %v9424_v6  ;;  %8563 = vmatmul.msk.f32.gmra.mxu1 %vm2221_vm6, %v3400_v1  ;;  %3787 = vmatpush.msrb.mxu2 %v3742_v53  ;;  %v11182_v53 = vld [vmem:[#allocation2 + $0x40] sm:$0xff] }
 0xc6c   :  { %3723 = vmatpush.msrb.mxu1 %v3688_v10  ;;  %3805 = vmatpush.msrb.mxu3 %v3769_v27 }
 0xc6d   :  { %8569 = vmatmul.msk.f32.gmra.mxu3 %vm2221_vm6, %v3521_v7  ;;  %v3614_v17 = vsel %vm604_vm9, %v9425_v9, %v9426_v8  ;;  %3788 = vmatpush.msrb.mxu2 %v3741_v41  ;;  %vm4511_vm9 = vcmask 523264  }
 0xc6e   :  { %3649 = vmatpush.msrb.mxu0 %v3614_v17  ;;  %3806 = vmatpush.msrb.mxu3 %v3768_v30  ;;  %v3847_v30 = vpop.permute.xlu1 %3846 }
 0xc6f   :  { %8572 = vmatmul.msk.f32.vlgmr.msrb.gmra.mxu0 %vm2221_vm6, %v3594_v11 }
 0xc70   :  { %3807 = vmatpush.msrb.mxu3 %v3767_v48  ;;  %v3513_v7 = vpop.f32.mrf.mxu2 }
 0xc72   :  { %3808 = vmatpush.msrb.mxu3 %v3766_v32  ;;  %v3857_v39 = vpop.permute.xlu0 %3856 }
 0xc73   :  { %8576 = vmatmul.msk.f32.vlgmr.msrb.gmra.mxu1 %vm2221_vm6, %v3668_v29 }
 0xc74   :  { %3809 = vmatpush.msrb.mxu3 %v3765_v35  ;;  %v3852_v35 = vpop.permute.xlu2 %3851 }
 0xc75   :  { %8570 = vmatmul.msk.f32.gmra.mxu3 %vm2221_vm6, %v3522_v56 }
 0xc76   :  { %3810 = vmatpush.msrb.mxu3 %v3764_v33 }
 0xc77   :  { %8573 = vmatmul.msk.f32.gmra.mxu0 %vm2221_vm6, %v3595_v38 }
 0xc78   :  { %3811 = vmatpush.msrb.mxu3 %v3763_v44 }
 0xc7a   :  { %3812 = vmatpush.msrb.mxu3 %v3762_v12 }
 0xc7b   :  { %8577 = vmatmul.msk.f32.gmra.mxu1 %vm2221_vm6, %v3669_v16  ;;  %v3516_v16 = vpop.f32.mrf.mxu2 }
 0xc7c   :  { %3813 = vmatpush.msrb.mxu3 %v3761_v47 }
 0xc7d   :  { %8571 = vmatmul.msk.f32.gmra.mxu3 %vm2221_vm6, %v3523_v18 }
 0xc7e   :  { %3814 = vmatpush.msrb.mxu3 %v3760_v46  ;;  %v3842_v46 = vpop.permute.xlu0 %3841 }
 0xc7f   :  { %8574 = vmatmul.msk.f32.gmra.mxu0 %vm2221_vm6, %v3596_v19 }
 0xc80   :  { %3815 = vmatpush.msrb.mxu3 %v3759_v51 }
 0xc82   :  { %3816 = vmatpush.msrb.mxu3 %v3758_v37 }
 0xc83   :  { %8578 = vmatmul.msk.f32.gmra.mxu1 %vm2221_vm6, %v3670_v20 }
 0xc84   :  { %3817 = vmatpush.msrb.mxu3 %v3757_v54 }
 0xc87   :  { %8575 = vmatmul.msk.f32.gmra.mxu0 %vm2221_vm6, %v3597_v21 }
 0xc8b   :  { %8579 = vmatmul.msk.f32.gmra.mxu1 %vm2221_vm6, %v3671_v23 }
 0xcd0   :  { %v3466_v52 = vpop.f32.mrf.mxu1 }
 0xcd1   :  { %v3508_v62 = vadd.f32 %v3507_v57, %v3466_v52 }
 0xcd8   :  { %v3469_v55 = vpop.f32.mrf.mxu1 }
 0xcd9   :  { %v3511_v1 = vadd.f32 %v3510_v63, %v3469_v55  ;;  %v4349_v63 = vld [vmem:[%s12187_s22 + $0x38] sm:$0xff] }
 0xce0   :  { %v3472_v42 = vpop.f32.mrf.mxu1 }
 0xce1   :  { %v3514_v17 = vadd.f32 %v3513_v7, %v3472_v42 }
 0xce8   :  { %v3475_v60 = vpop.f32.mrf.mxu1  ;;  %v3577_v49 = vpop.f32.mrf.mxu3 }
 0xce9   :  { %v3589_v3 = vadd.f32 %v3577_v49, %v3508_v62  ;;  %v3517_v21 = vadd.f32 %v3516_v16, %v3475_v60 }
 0xcec   :  { %v3651_v22 = vpop.f32.mrf.mxu0 }
 0xced   :  { %v3663_v4 = vadd.f32 %v3651_v22, %v3589_v3  ;;  %v4347_v22 = vld [vmem:[%s12187_s22 + $0x28] sm:$0xff]  ;;  %v4348_v3 = vld [vmem:[%s12187_s22 + $0x30] sm:$0xff] }
 0xcf0   :  { %v3580_v5 = vpop.f32.mrf.mxu3  ;;  %v3725_v58 = vpop.f32.mrf.mxu1 }
 0xcf1   :  { %v3737_v59 = vadd.f32 %v3725_v58, %v3663_v4  ;;  %v3590_v6 = vadd.f32 %v3580_v5, %v3511_v1  ;;  %v4346_v4 = vld [vmem:[%s12187_s22 + $0x20] sm:$0xff]  ;;  %v4344_v5 = vld [vmem:[%s12187_s22 + $0x10] sm:$0xff]  ;;  %v4345_v58 = vld [vmem:[%s12187_s22 + $0x18] sm:$0xff] }
 0xcf2   :  { %v4342_v1 = vld [vmem:[%s12187_s22] sm:$0xff] }
 0xcf3   :  { %3789 = vmatmul.f32.vlgmr.msrb.gmra.mxu2 %v3737_v59  ;;  %3818 = vmatmul.f32.vlgmr.msrb.gmra.mxu3 %v3737_v59  ;;  %v4343_v59 = vld [vmem:[%s12187_s22 + $0x8] sm:$0xff] }
 0xcf4   :  { %v3654_v2 = vpop.f32.mrf.mxu0 }
 0xcf5   :  { %v3664_v8 = vadd.f32 %v3654_v2, %v3590_v6 }
 0xcf8   :  { %v3583_v9 = vpop.f32.mrf.mxu3  ;;  %v3728_v10 = vpop.f32.mrf.mxu1 }
 0xcf9   :  { %v3738_v11 = vadd.f32 %v3728_v10, %v3664_v8  ;;  %v3591_v56 = vadd.f32 %v3583_v9, %v3514_v17  ;;  %v3893_v8 = vld [vmem:[%s12188_s12] sm:$0xff]  ;;  %v3894_v9 = vld [vmem:[%s12188_s12 + $0x8] sm:$0xff] }
 0xcfb   :  { %3792 = vmatmul.f32.gmra.mxu2 %v3738_v11  ;;  %3821 = vmatmul.f32.gmra.mxu3 %v3738_v11  ;;  %v3895_v11 = vld [vmem:[%s12188_s12 + $0x10] sm:$0xff] }
 0xcfc   :  { %v3657_v29 = vpop.f32.mrf.mxu0 }
 0xcfd   :  { %v3665_v38 = vadd.f32 %v3657_v29, %v3591_v56 }
 0xd00   :  { %v3731_v18 = vpop.f32.mrf.mxu1  ;;  %v3586_v20 = vpop.f32.mrf.mxu3 }
 0xd01   :  { %v3739_v19 = vadd.f32 %v3731_v18, %v3665_v38  ;;  %v3592_v40 = vadd.f32 %v3586_v20, %v3517_v21  ;;  %v3896_v38 = vld [vmem:[%s12188_s12 + $0x18] sm:$0xff]  ;;  %v8604_v21 = vld [vmem:[%s12188_s12 + $0x80] sm:$0xff] }
 0xd03   :  { %3795 = vmatmul.f32.gmra.mxu2 %v3739_v19  ;;  %3824 = vmatmul.f32.gmra.mxu3 %v3739_v19 }
 0xd04   :  { %v3660_v23 = vpop.f32.mrf.mxu0 }
 0xd05   :  { %v3666_v43 = vadd.f32 %v3660_v23, %v3592_v40  ;;  %v8580_v40 = vld [vmem:[%s12188_s12 + $0x40] sm:$0xff] }
 0xd08   :  { %v3734_v14 = vpop.f32.mrf.mxu1 }
 0xd09   :  { %v3740_v15 = vadd.f32 %v3734_v14, %v3666_v43 }
 0xd0b   :  { %3798 = vmatmul.f32.gmra.mxu2 %v3740_v15  ;;  %3827 = vmatmul.f32.gmra.mxu3 %v3740_v15 }
 0xd76   :  { %v3790_v24 = vpop.f32.mrf.mxu2  ;;  %v3819_v25 = vpop.f32.mrf.mxu3 }
 0xd77   :  { %v3831_v47 = vmax.f32 %v3790_v24, %v3819_v25  ;;  %v3897_v25 = vld [vmem:[%s12188_s12 + $0x20] sm:$0xff] }
 0xd79   :  { %v3859_v45 = vadd.f32 %v3842_v46, %v3831_v47  ;;  %v8583_v47 = vld [vmem:[%s12188_s12 + $0x58] sm:$0xff] }
 0xd7a   :  { %v3900_v46 = vld [vmem:[%s12188_s12 + $0x38] sm:$0xff] }
 0xd7b   :  { %v3863_v51 = vmax.f32 %v3859_v45, 0.0  ;;  %v8608_v45 = vld [vmem:[%s12188_s12 + $0xa0] sm:$0xff] }
 0xd7e   :  { %v3793_v26 = vpop.f32.mrf.mxu2  ;;  %v3822_v27 = vpop.f32.mrf.mxu3 }
 0xd7f   :  { %v3832_v28 = vmax.f32 %v3793_v26, %v3822_v27 }
 0xd81   :  { %v3860_v31 = vadd.f32 %v3847_v30, %v3832_v28  ;;  %v8605_v28 = vld [vmem:[%s12188_s12 + $0x88] sm:$0xff] }
 0xd82   :  { %v8581_v30 = vld [vmem:[%s12188_s12 + $0x48] sm:$0xff] }
 0xd83   :  { %v3864_v48 = vmax.f32 %v3860_v31, 0.0  ;;  %v8620_v31 = vld [vmem:[%s12188_s12 + $0xc0] sm:$0xff] }
 0xd85   :  { %3873 = vrot.lane.b32.xlu0 %v3864_v48, %s10189_s25 }
 0xd86   :  { %v3796_v61 = vpop.f32.mrf.mxu2  ;;  %v3825_v32 = vpop.f32.mrf.mxu3 }
 0xd87   :  { %v3833_v34 = vmax.f32 %v3796_v61, %v3825_v32 }
 0xd89   :  { %v3861_v36 = vadd.f32 %v3852_v35, %v3833_v34  ;;  %v3898_v35 = vld [vmem:[%s12188_s12 + $0x28] sm:$0xff] }
 0xd8b   :  { %v3865_v33 = vmax.f32 %v3861_v36, 0.0 }
 0xd8d   :  { %3875 = vrot.lane.b32.xlu1 %v3865_v33, %s10189_s25 }
 0xd8e   :  { %v3799_v44 = vpop.f32.mrf.mxu2  ;;  %v3828_v0 = vpop.f32.mrf.mxu3 }
 0xd8f   :  { %v3834_v12 = vmax.f32 %v3799_v44, %v3828_v0  ;;  %v8582_v44 = vld [vmem:[%s12188_s12 + $0x50] sm:$0xff]  ;;  %v8621_v0 = vld [vmem:[%s12188_s12 + $0xc8] sm:$0xff] }
 0xd91   :  { %v3862_v13 = vadd.f32 %v3857_v39, %v3834_v12  ;;  %v8606_v39 = vld [vmem:[%s12188_s12 + $0x90] sm:$0xff] }
 0xd92   :  { %v3899_v12 = vld [vmem:[%s12188_s12 + $0x30] sm:$0xff] }
 0xd93   :  { %v3866_v50 = vmax.f32 %v3862_v13, 0.0  ;;  %v8607_v13 = vld [vmem:[%s12188_s12 + $0x98] sm:$0xff] }
 0xd95   :  { %3877 = vrot.lane.b32.xlu2 %v3866_v50, %s10189_s25  ;;  %v8622_v50 = vld [vmem:[%s12188_s12 + $0xd0] sm:$0xff] }
 0xd9d   :  { %3871 = vrot.lane.b32.xlu2 %v3863_v51, %s10189_s25  ;;  %v8584_v51 = vld [vmem:[%s12188_s12 + $0x60] sm:$0xff] }
 0xdef   :  { %v3878_v52 = vpop.permute.xlu2 %3877 }
 0xdf0   :  { %3887 = vst.msk [vmem:[#allocation2 + $0x48] sm:$0xff] %vm3883_vm7, %v3878_v52  ;;  %v8623_v52 = vld [vmem:[%s12188_s12 + $0xd8] sm:$0xff] }
 0xdf1   :  { %3892 = vst.msk [vmem:[#allocation2 + $0x48] sm:$0xff] %vm3888_vm8, %v11182_v53 }
 0xdf7   :  { %v3874_v37 = vpop.permute.xlu0 %3873  ;;  %v3872_v41 = vpop.permute.xlu2 %3871 }
 0xdf8   :  { %3885 = vst.msk [vmem:[#allocation2 + $0x18] sm:$0xff] %vm3883_vm7, %v3874_v37  ;;  %v3904_v54 = vld [vmem:[#allocation2 + $0x48] sm:$0xff]  ;;  %v8609_v37 = vld [vmem:[%s12188_s12 + $0xa8] sm:$0xff] }
 0xdf9   :  { %3890 = vst.msk [vmem:[#allocation2 + $0x18] sm:$0xff] %vm3888_vm8, %v11182_v53  ;;  %4031 = vmatpush.msra.mxu1 %v3904_v54 }
 0xdfa   :  { %3884 = vst.msk [vmem:[#allocation2] sm:$0xff] %vm3883_vm7, %v3872_v41  ;;  %v8585_v41 = vld [vmem:[%s12188_s12 + $0x68] sm:$0xff] }
 0xdfb   :  { %3889 = vst.msk [vmem:[#allocation2] sm:$0xff] %vm3888_vm8, %v11182_v53 }
 0xdff   :  { %v3876_v55 = vpop.permute.xlu1 %3875 }
 0xe00   :  { %3886 = vst.msk [vmem:[#allocation2 + $0x30] sm:$0xff] %vm3883_vm7, %v3876_v55  ;;  %v3902_v42 = vld [vmem:[#allocation2 + $0x18] sm:$0xff]  ;;  %v8610_v55 = vld [vmem:[%s12188_s12 + $0xb0] sm:$0xff] }
 0xe01   :  { %3891 = vst.msk [vmem:[#allocation2 + $0x30] sm:$0xff] %vm3888_vm8, %v11182_v53 }
 0xe02   :  { %v3901_v57 = vld [vmem:[#allocation2] sm:$0xff] }
 0xe03   :  { %v9442_v60 = vpack.i.bf16 %v3901_v57, %v3902_v42 }
 0xe05   :  { %9443 = vrot.lane.b32.xlu0 %v9442_v60, %s10183_s7 }
 0xe08   :  { %v3903_v49 = vld [vmem:[#allocation2 + $0x30] sm:$0xff] }
 0xe09   :  { %v9452_v62 = vpack.i.bf16 %v3903_v49, %v3904_v54  ;;  %4032 = vmatpush.msra.mxu1 %v3903_v49  ;;  %v8624_v54 = vld [vmem:[%s12188_s12 + $0xe0] sm:$0xff]  ;;  %v8587_v49 = vld [vmem:[%s12188_s12 + $0x78] sm:$0xff] }
 0xe0b   :  { %9453 = vrot.lane.b32.xlu2 %v9452_v62, %s10182_s5  ;;  %9438 = vrot.lane.b32.xlu1 %v9452_v62, %s10183_s7 }
 0xe0c   :  { %4033 = vmatpush.msra.mxu1 %v3902_v42  ;;  %v8586_v42 = vld [vmem:[%s12188_s12 + $0x70] sm:$0xff] }
 0xe0d   :  { %9448 = vrot.lane.b32.xlu0 %v9442_v60, %s10182_s5 }
 0xe0e   :  { %4034 = vmatpush.msra.mxu1 %v3901_v57  ;;  %v8625_v57 = vld [vmem:[%s12188_s12 + $0xe8] sm:$0xff] }
 0xe0f   :  { %8596 = vmatmul.msk.f32.vlgmr.msra.gmra.mxu1 %vm2221_vm6, %v3893_v8 }
 0xe13   :  { %9463 = vrot.lane.b32.xlu1 %v9452_v62, %s10184_s10  ;;  %9458 = vrot.lane.b32.xlu2 %v9442_v60, %s10184_s10 }
 0xe15   :  { %9473 = vrot.lane.b32.xlu0 %v9442_v60, %s10185_s30  ;;  %v8611_v60 = vld [vmem:[%s12188_s12 + $0xb8] sm:$0xff] }
 0xe17   :  { %8597 = vmatmul.msk.f32.gmra.mxu1 %vm2221_vm6, %v3894_v9 }
 0xe1b   :  { %9468 = vrot.lane.b32.xlu1 %v9452_v62, %s10185_s30  ;;  %4387 = vperm.xlu2 %9005, %v4349_v63   ;;  %v8626_v62 = vld [vmem:[%s12188_s12 + $0xf0] sm:$0xff]  ;;  %v8627_v63 = vld [vmem:[%s12188_s12 + $0xf8] sm:$0xff] }
 0xe1d   :  { %4377 = vperm.xlu0 %9096, %v4347_v22   ;;  %v8636_v22 = vld [vmem:[%s12188_s12 + $0x100] sm:$0xff] }
 0xe1f   :  { %8598 = vmatmul.msk.f32.gmra.mxu1 %vm2221_vm6, %v3895_v11 }
 0xe23   :  { %4382 = vperm.xlu1 %9004, %v4348_v3   ;;  %4372 = vperm.xlu2 %9005, %v4346_v4   ;;  %v8637_v3 = vld [vmem:[%s12188_s12 + $0x108] sm:$0xff]  ;;  %v8638_v4 = vld [vmem:[%s12188_s12 + $0x110] sm:$0xff] }
 0xe25   :  { %4362 = vperm.xlu0 %9096, %v4344_v5   ;;  %v8639_v5 = vld [vmem:[%s12188_s12 + $0x118] sm:$0xff] }
 0xe27   :  { %8599 = vmatmul.msk.f32.gmra.mxu1 %vm2221_vm6, %v3896_v38 }
 0xe2b   :  { %4367 = vperm.xlu1 %9004, %v4345_v58   ;;  %4357 = vperm.xlu2 %9005, %v4343_v59   ;;  %v8640_v58 = vld [vmem:[%s12188_s12 + $0x120] sm:$0xff]  ;;  %v8641_v59 = vld [vmem:[%s12188_s12 + $0x128] sm:$0xff] }
 0xe2f   :  { %8600 = vmatmul.msk.f32.gmra.mxu1 %vm2221_vm6, %v3897_v25 }
 0xe33   :  { %4352 = vperm.xlu1 %9004, %v4342_v1   ;;  %v8642_v1 = vld [vmem:[%s12188_s12 + $0x130] sm:$0xff] }
 0xe37   :  { %8601 = vmatmul.msk.f32.gmra.mxu1 %vm2221_vm6, %v3898_v35 }
 0xe3f   :  { %8602 = vmatmul.msk.f32.gmra.mxu1 %vm2221_vm6, %v3899_v12 }
 0xe47   :  { %8603 = vmatmul.msk.f32.gmra.mxu1 %vm2221_vm6, %v3900_v46 }
 0xe65   :  { %v9454_v2 = vpop.permute.xlu2 %9453 }
 0xe66   :  { %v9456_v6 = vunpack.i.h.bf16 %v9454_v2  ;;  %v9455_v7 = vunpack.i.l.bf16 %v9454_v2  ;;  %v8643_v2 = vld [vmem:[%s12188_s12 + $0x138] sm:$0xff] }
 0xe68   :  { %4117 = vmatpush.msra.mxu2 %v9455_v7 }
 0xe6a   :  { %4118 = vmatpush.msra.mxu2 %v9456_v6 }
 0xe6d   :  { %v9459_v24 = vpop.permute.xlu2 %9458 }
 0xe6e   :  { %v9460_v26 = vunpack.i.l.bf16 %v9459_v24  ;;  %v9461_v27 = vunpack.i.h.bf16 %v9459_v24 }
 0xe77   :  { %v9444_v10 = vpop.permute.xlu0 %9443 }
 0xe78   :  { %v9445_v16 = vunpack.i.l.bf16 %v9444_v10  ;;  %v9446_v23 = vunpack.i.h.bf16 %v9444_v10 }
 0xe7d   :  { %v9439_v17 = vpop.permute.xlu1 %9438 }
 0xe7e   :  { %v9440_v29 = vunpack.i.l.bf16 %v9439_v17  ;;  %v9441_v18 = vunpack.i.h.bf16 %v9439_v17 }
 0xe7f   :  { %v9449_v56 = vpop.permute.xlu0 %9448 }
 0xe80   :  { %v9451_v19 = vunpack.i.h.bf16 %v9449_v56  ;;  %v9450_v20 = vunpack.i.l.bf16 %v9449_v56  ;;  %3966 = vmatpush.msra.mxu0 %v9440_v29 }
 0xe82   :  { %4119 = vmatpush.msra.mxu2 %v9450_v20  ;;  %3967 = vmatpush.msra.mxu0 %v9441_v18 }
 0xe84   :  { %4120 = vmatpush.msra.mxu2 %v9451_v19  ;;  %3968 = vmatpush.msra.mxu0 %v9445_v16 }
 0xe85   :  { %8612 = vmatmul.msk.f32.vlgmr.msra.gmra.mxu2 %vm2221_vm6, %v8604_v21  ;;  %v9464_v43 = vpop.permute.xlu1 %9463 }
 0xe86   :  { %v9466_v14 = vunpack.i.h.bf16 %v9464_v43  ;;  %v9465_v15 = vunpack.i.l.bf16 %v9464_v43  ;;  %3969 = vmatpush.msra.mxu0 %v9446_v23 }
 0xe87   :  { %8588 = vmatmul.msk.f32.vlgmr.msra.gmra.mxu0 %vm2221_vm6, %v8580_v40  ;;  %v9474_v34 = vpop.permute.xlu0 %9473 }
 0xe88   :  { %4211 = vmatpush.msra.mxu3 %v9465_v15  ;;  %v9475_v36 = vunpack.i.l.bf16 %v9474_v34  ;;  %v9476_v33 = vunpack.i.h.bf16 %v9474_v34 }
 0xe8a   :  { %4212 = vmatpush.msra.mxu3 %v9466_v14 }
 0xe8c   :  { %4213 = vmatpush.msra.mxu3 %v9460_v26  ;;  %v4036_v11 = vpop.f32.mrf.mxu1 }
 0xe8d   :  { %8613 = vmatmul.msk.f32.gmra.mxu2 %vm2221_vm6, %v8605_v28  ;;  %v9469_v48 = vpop.permute.xlu1 %9468 }
 0xe8e   :  { %v9471_v61 = vunpack.i.h.bf16 %v9469_v48  ;;  %v9470_v32 = vunpack.i.l.bf16 %v9469_v48  ;;  %4214 = vmatpush.msra.mxu3 %v9461_v27 }
 0xe8f   :  { %8589 = vmatmul.msk.f32.gmra.mxu0 %vm2221_vm6, %v8581_v30  ;;  %8628 = vmatmul.msk.f32.vlgmr.msra.gmra.mxu3 %vm2221_vm6, %v8620_v31 }
 0xe90   :  { %4305 = vmatpush.msrb.mxu0 %v9470_v32 }
 0xe92   :  { %4306 = vmatpush.msrb.mxu0 %v9471_v61 }
 0xe94   :  { %4307 = vmatpush.msrb.mxu0 %v9475_v36  ;;  %v11299_v16 = vpop.f32.mrf.mxu1 }
 0xe95   :  { %8614 = vmatmul.msk.f32.gmra.mxu2 %vm2221_vm6, %v8606_v39 }
 0xe96   :  { %4308 = vmatpush.msrb.mxu0 %v9476_v33 }
 0xe97   :  { %8590 = vmatmul.msk.f32.gmra.mxu0 %vm2221_vm6, %v8582_v44  ;;  %8629 = vmatmul.msk.f32.gmra.mxu3 %vm2221_vm6, %v8621_v0  ;;  %v4378_v44 = vpop.permute.xlu0 %4377 }
 0xe9c   :  { %v4042_v21 = vpop.f32.mrf.mxu1 }
 0xe9d   :  { %8615 = vmatmul.msk.f32.gmra.mxu2 %vm2221_vm6, %v8607_v13 }
 0xe9f   :  { %8591 = vmatmul.msk.f32.gmra.mxu0 %vm2221_vm6, %v8583_v47  ;;  %8630 = vmatmul.msk.f32.gmra.mxu3 %vm2221_vm6, %v8622_v50 }
 0xea4   :  { %v4045_v14 = vpop.f32.mrf.mxu1 }
 0xea5   :  { %8616 = vmatmul.msk.f32.gmra.mxu2 %vm2221_vm6, %v8608_v45 }
 0xea7   :  { %8592 = vmatmul.msk.f32.gmra.mxu0 %vm2221_vm6, %v8584_v51  ;;  %8631 = vmatmul.msk.f32.gmra.mxu3 %vm2221_vm6, %v8623_v52 }
 0xeac   :  { %v4048_v26 = vpop.f32.mrf.mxu1 }
 0xead   :  { %8617 = vmatmul.msk.f32.gmra.mxu2 %vm2221_vm6, %v8609_v37  ;;  %v4383_v37 = vpop.permute.xlu1 %4382 }
 0xeaf   :  { %8593 = vmatmul.msk.f32.gmra.mxu0 %vm2221_vm6, %v8585_v41  ;;  %8632 = vmatmul.msk.f32.gmra.mxu3 %vm2221_vm6, %v8624_v54 }
 0xeb4   :  { %v4051_v48 = vpop.f32.mrf.mxu1 }
 0xeb5   :  { %8618 = vmatmul.msk.f32.gmra.mxu2 %vm2221_vm6, %v8610_v55 }
 0xeb7   :  { %8594 = vmatmul.msk.f32.gmra.mxu0 %vm2221_vm6, %v8586_v42  ;;  %8633 = vmatmul.msk.f32.gmra.mxu3 %vm2221_vm6, %v8625_v57 }
 0xebc   :  { %v4054_v36 = vpop.f32.mrf.mxu1 }
 0xebd   :  { %8619 = vmatmul.msk.f32.gmra.mxu2 %vm2221_vm6, %v8611_v60 }
 0xebf   :  { %8595 = vmatmul.msk.f32.gmra.mxu0 %vm2221_vm6, %v8587_v49  ;;  %8634 = vmatmul.msk.f32.gmra.mxu3 %vm2221_vm6, %v8626_v62  ;;  %v4363_v49 = vpop.permute.xlu0 %4362 }
 0xec4   :  { %v4057_v57 = vpop.f32.mrf.mxu1 }
 0xec7   :  { %8635 = vmatmul.msk.f32.gmra.mxu3 %vm2221_vm6, %v8627_v63  ;;  %8644 = vmatmul.msk.f32.vlgmr.msrb.gmra.mxu0 %vm2221_vm6, %v8636_v22 }
 0xecf   :  { %8645 = vmatmul.msk.f32.gmra.mxu0 %vm2221_vm6, %v8637_v3 }
 0xed7   :  { %8646 = vmatmul.msk.f32.gmra.mxu0 %vm2221_vm6, %v8638_v4 }
 0xedf   :  { %8647 = vmatmul.msk.f32.gmra.mxu0 %vm2221_vm6, %v8639_v5 }
 0xee7   :  { %8648 = vmatmul.msk.f32.gmra.mxu0 %vm2221_vm6, %v8640_v58 }
 0xeef   :  { %8649 = vmatmul.msk.f32.gmra.mxu0 %vm2221_vm6, %v8641_v59 }
 0xef7   :  { %8650 = vmatmul.msk.f32.gmra.mxu0 %vm2221_vm6, %v8642_v1  ;;  %v4388_v1 = vpop.permute.xlu2 %4387 }
 0xeff   :  { %8651 = vmatmul.msk.f32.gmra.mxu0 %vm2221_vm6, %v8643_v2 }
 0xf04   :  { %v11291_v6 = vpop.f32.mrf.mxu0 }
 0xf05   :  { %v4037_v2 = vadd.f32 %v4036_v11, %v11291_v6 }
 0xf08   :  { %v11295_v29 = vpop.f32.mrf.mxu2 }
 0xf0c   :  { %v11293_v7 = vpop.f32.mrf.mxu0 }
 0xf10   :  { %v11301_v18 = vpop.f32.mrf.mxu2 }
 0xf12   :  { %v11297_v56 = vpop.f32.mrf.mxu3 }
 0xf14   :  { %v3977_v8 = vpop.f32.mrf.mxu0 }
 0xf15   :  { %v4043_v33 = vadd.f32 %v4042_v21, %v3977_v8 }
 0xf18   :  { %v4128_v23 = vpop.f32.mrf.mxu2 }
 0xf19   :  { %v4148_v47 = vadd.f32 %v4128_v23, %v4043_v33 }
 0xf1a   :  { %v11303_v19 = vpop.f32.mrf.mxu3 }
 0xf1c   :  { %v3980_v9 = vpop.f32.mrf.mxu0 }
 0xf1d   :  { %v4046_v41 = vadd.f32 %v4045_v14, %v3980_v9 }
 0xf20   :  { %v4131_v24 = vpop.f32.mrf.mxu2 }
 0xf21   :  { %v4149_v63 = vadd.f32 %v4131_v24, %v4046_v41  ;;  %v4146_v24 = vadd.f32 %v11295_v29, %v4037_v2  ;;  %v4455_v2 = vld [vmem:[%s12190_s9 + $0x8] sm:$0xff] }
 0xf22   :  { %v4222_v43 = vpop.f32.mrf.mxu3 }
 0xf23   :  { %v4242_v51 = vadd.f32 %v4222_v43, %v4148_v47  ;;  %v4368_v43 = vpop.permute.xlu1 %4367  ;;  %v4240_v6 = vadd.f32 %v11297_v56, %v4146_v24 }
 0xf24   :  { %v3983_v10 = vpop.f32.mrf.mxu0 }
 0xf25   :  { %v4049_v8 = vadd.f32 %v4048_v26, %v3983_v10  ;;  %v4040_v26 = vadd.f32 %v11299_v16, %v11293_v7 }
 0xf28   :  { %v4134_v28 = vpop.f32.mrf.mxu2 }
 0xf2a   :  { %v4225_v25 = vpop.f32.mrf.mxu3 }
 0xf2b   :  { %v4243_v58 = vadd.f32 %v4225_v25, %v4149_v63  ;;  %v4150_v25 = vadd.f32 %v4134_v28, %v4049_v8  ;;  %v4353_v29 = vpop.permute.xlu1 %4352  ;;  %v4147_v28 = vadd.f32 %v11301_v18, %v4040_v26  ;;  %v5093_v63 = vld [vmem:[%s12189_s2 + $0x18] sm:$0xff] }
 0xf2c   :  { %v3986_v17 = vpop.f32.mrf.mxu0 }
 0xf2d   :  { %v4052_v35 = vadd.f32 %v4051_v48, %v3986_v17 }
 0xf30   :  { %v4137_v61 = vpop.f32.mrf.mxu2 }
 0xf31   :  { %v4151_v39 = vadd.f32 %v4137_v61, %v4052_v35 }
 0xf32   :  { %v4228_v30 = vpop.f32.mrf.mxu3 }
 0xf33   :  { %v4244_v10 = vadd.f32 %v4228_v30, %v4150_v25  ;;  %v4241_v30 = vadd.f32 %v11303_v19, %v4147_v28 }
 0xf34   :  { %v3989_v38 = vpop.f32.mrf.mxu0 }
 0xf35   :  { %v4055_v50 = vadd.f32 %v4054_v36, %v3989_v38  ;;  %v4373_v36 = vpop.permute.xlu2 %4372 }
 0xf38   :  { %v4140_v12 = vpop.f32.mrf.mxu2 }
 0xf39   :  { %v4152_v54 = vadd.f32 %v4140_v12, %v4055_v50 }
 0xf3a   :  { %v4231_v32 = vpop.f32.mrf.mxu3 }
 0xf3b   :  { %v4245_v0 = vadd.f32 %v4231_v32, %v4151_v39 }
 0xf3c   :  { %v3992_v20 = vpop.f32.mrf.mxu0 }
 0xf3d   :  { %v4058_v22 = vadd.f32 %v4057_v57, %v3992_v20 }
 0xf40   :  { %v4143_v5 = vpop.f32.mrf.mxu2 }
 0xf41   :  { %v4153_v17 = vadd.f32 %v4143_v5, %v4058_v22  ;;  %v5094_v22 = vld [vmem:[%s12189_s2 + $0x20] sm:$0xff]  ;;  %v5091_v5 = vld [vmem:[%s12189_s2 + $0x8] sm:$0xff] }
 0xf42   :  { %v4234_v45 = vpop.f32.mrf.mxu3 }
 0xf43   :  { %v4246_v60 = vadd.f32 %v4234_v45, %v4152_v54 }
 0xf44   :  { %v11305_v40 = vpop.f32.mrf.mxu0 }
 0xf4a   :  { %v4237_v9 = vpop.f32.mrf.mxu3 }
 0xf4b   :  { %v4247_v14 = vadd.f32 %v4237_v9, %v4153_v17 }
 0xf4c   :  { %v11307_v15 = vpop.f32.mrf.mxu0 }
 0xf4d   :  { %v4335_v7 = vadd.f32 %v11307_v15, %v4241_v30 }
 0xf54   :  { %v4316_v27 = vpop.f32.mrf.mxu0 }
 0xf55   :  { %v4336_v55 = vadd.f32 %v4316_v27, %v4242_v51 }
 0xf57   :  { %v4392_v3 = vadd.f32 %v4363_v49, %v4336_v55 }
 0xf59   :  { %v4400_v38 = vmax.f32 %v4392_v3, 0.0  ;;  %v5090_v3 = vld [vmem:[%s12189_s2] sm:$0xff] }
 0xf5c   :  { %v4319_v31 = vpop.f32.mrf.mxu0 }
 0xf5d   :  { %v4337_v21 = vadd.f32 %v4319_v31, %v4243_v58  ;;  %v4334_v31 = vadd.f32 %v11305_v40, %v4240_v6  ;;  %v4358_v40 = vpop.permute.xlu2 %4357  ;;  %v5092_v58 = vld [vmem:[%s12189_s2 + $0x10] sm:$0xff] }
 0xf5f   :  { %v4393_v27 = vadd.f32 %v4368_v43, %v4337_v21  ;;  %v4390_v33 = vadd.f32 %v4353_v29, %v4334_v31  ;;  %v4458_v31 = vld [vmem:[%s12190_s9 + $0x20] sm:$0xff] }
 0xf61   :  { %v4401_v61 = vmax.f32 %v4393_v27, 0.0  ;;  %v4398_v39 = vmax.f32 %v4390_v33, 0.0 }
 0xf64   :  { %v4322_v34 = vpop.f32.mrf.mxu0 }
 0xf65   :  { %v4338_v32 = vadd.f32 %v4322_v34, %v4244_v10  ;;  %v4391_v34 = vadd.f32 %v4358_v40, %v4335_v7  ;;  %v4459_v40 = vld [vmem:[%s12190_s9 + $0x28] sm:$0xff] }
 0xf67   :  { %v4394_v56 = vadd.f32 %v4373_v36, %v4338_v32  ;;  %v8652_v36 = vld [vmem:[%s12190_s9 + $0x40] sm:$0xff] }
 0xf69   :  { %v4402_v16 = vmax.f32 %v4394_v56, 0.0 }
 0xf6c   :  { %v4325_v13 = vpop.f32.mrf.mxu0 }
 0xf6d   :  { %v4339_v46 = vadd.f32 %v4325_v13, %v4245_v0 }
 0xf6f   :  { %v4395_v52 = vadd.f32 %v4378_v44, %v4339_v46  ;;  %v4399_v44 = vmax.f32 %v4391_v34, 0.0 }
 0xf71   :  { %v4403_v42 = vmax.f32 %v4395_v52, 0.0 }
 0xf73   :  { %4424 = vrot.lane.b32.xlu1 %v4403_v42, %s10189_s25 }
 0xf74   :  { %v4328_v62 = vpop.f32.mrf.mxu0 }
 0xf75   :  { %v4340_v4 = vadd.f32 %v4328_v62, %v4246_v60  ;;  %v5097_v62 = vld [vmem:[%s12189_s2 + $0x38] sm:$0xff] }
 0xf77   :  { %v4396_v59 = vadd.f32 %v4383_v37, %v4340_v4  ;;  %v5095_v4 = vld [vmem:[%s12189_s2 + $0x28] sm:$0xff] }
 0xf79   :  { %v4404_v23 = vmax.f32 %v4396_v59, 0.0  ;;  %v4454_v59 = vld [vmem:[%s12190_s9] sm:$0xff] }
 0xf7b   :  { %4418 = vrot.lane.b32.xlu1 %v4400_v38, %s10189_s25  ;;  %4426 = vrot.lane.b32.xlu2 %v4404_v23, %s10189_s25  ;;  %v4456_v38 = vld [vmem:[%s12190_s9 + $0x10] sm:$0xff] }
 0xf7c   :  { %v4331_v20 = vpop.f32.mrf.mxu0 }
 0xf7d   :  { %v4341_v48 = vadd.f32 %v4331_v20, %v4247_v14  ;;  %v4457_v14 = vld [vmem:[%s12190_s9 + $0x18] sm:$0xff] }
 0xf7f   :  { %v4397_v11 = vadd.f32 %v4388_v1, %v4341_v48 }
 0xf81   :  { %v4405_v35 = vmax.f32 %v4397_v11, 0.0 }
 0xf83   :  { %4420 = vrot.lane.b32.xlu2 %v4401_v61, %s10189_s25  ;;  %4428 = vrot.lane.b32.xlu0 %v4405_v35, %s10189_s25 }
 0xf8b   :  { %4414 = vrot.lane.b32.xlu2 %v4398_v39, %s10189_s25  ;;  %4422 = vrot.lane.b32.xlu0 %v4402_v16, %s10189_s25 }
 0xf93   :  { %4416 = vrot.lane.b32.xlu0 %v4399_v44, %s10189_s25 }
 0xfd5   :  { %v4427_v0 = vpop.permute.xlu2 %4426 }
 0xfd6   :  { %4444 = vst.msk [vmem:[#allocation3 + $0x90] sm:$0xff] %vm3883_vm7, %v4427_v0 }
 0xfd7   :  { %4452 = vst.msk [vmem:[#allocation3 + $0x90] sm:$0xff] %vm3888_vm8, %v11182_v53 }
 0xfdd   :  { %v4421_v18 = vpop.permute.xlu2 %4420 }
 0xfde   :  { %4441 = vst.msk [vmem:[#allocation3 + $0x48] sm:$0xff] %vm3883_vm7, %v4421_v18  ;;  %v4468_v45 = vld [vmem:[#allocation3 + $0x90] sm:$0xff]  ;;  %v8653_v18 = vld [vmem:[%s12190_s9 + $0x48] sm:$0xff] }
 0xfdf   :  { %4449 = vst.msk [vmem:[#allocation3 + $0x48] sm:$0xff] %vm3888_vm8, %v11182_v53 }
 0xfe5   :  { %v4425_v19 = vpop.permute.xlu1 %4424  ;;  %v4415_v15 = vpop.permute.xlu2 %4414 }
 0xfe6   :  { %4443 = vst.msk [vmem:[#allocation3 + $0x78] sm:$0xff] %vm3883_vm7, %v4425_v19  ;;  %v4465_v13 = vld [vmem:[#allocation3 + $0x48] sm:$0xff] }
 0xfe7   :  { %4451 = vst.msk [vmem:[#allocation3 + $0x78] sm:$0xff] %vm3888_vm8, %v11182_v53 }
 0xfe8   :  { %4438 = vst.msk [vmem:[#allocation3] sm:$0xff] %vm3883_vm7, %v4415_v15 }
 0xfe9   :  { %4446 = vst.msk [vmem:[#allocation3] sm:$0xff] %vm3888_vm8, %v11182_v53 }
 0xfed   :  { %v4419_v12 = vpop.permute.xlu1 %4418 }
 0xfee   :  { %4440 = vst.msk [vmem:[#allocation3 + $0x30] sm:$0xff] %vm3883_vm7, %v4419_v12  ;;  %v4467_v41 = vld [vmem:[#allocation3 + $0x78] sm:$0xff] }
 0xfef   :  { %4448 = vst.msk [vmem:[#allocation3 + $0x30] sm:$0xff] %vm3888_vm8, %v11182_v53 }
 0xff0   :  { %v4462_v57 = vld [vmem:[#allocation3] sm:$0xff] }
 0xff5   :  { %v4429_v47 = vpop.permute.xlu0 %4428 }
 0xff6   :  { %4445 = vst.msk [vmem:[#allocation3 + $0xa8] sm:$0xff] %vm3883_vm7, %v4429_v47  ;;  %v4464_v50 = vld [vmem:[#allocation3 + $0x30] sm:$0xff]  ;;  %v4460_v47 = vld [vmem:[%s12190_s9 + $0x30] sm:$0xff] }
 0xff7   :  { %4453 = vst.msk [vmem:[#allocation3 + $0xa8] sm:$0xff] %vm3888_vm8, %v11182_v53  ;;  %v9487_v46 = vpack.i.bf16 %v4464_v50, %v4465_v13 }
 0xff9   :  { %9488 = vrot.lane.b32.xlu2 %v9487_v46, %s10183_s7 }
 0xffd   :  { %v4423_v51 = vpop.permute.xlu0 %4422 }
 0xffe   :  { %4442 = vst.msk [vmem:[#allocation3 + $0x60] sm:$0xff] %vm3883_vm7, %v4423_v51  ;;  %v4469_v52 = vld [vmem:[#allocation3 + $0xa8] sm:$0xff]  ;;  %v8676_v51 = vld [vmem:[%s12190_s9 + $0x80] sm:$0xff] }
 0xfff   :  { %4450 = vst.msk [vmem:[#allocation3 + $0x60] sm:$0xff] %vm3888_vm8, %v11182_v53  ;;  %v9477_v37 = vpack.i.bf16 %v4468_v45, %v4469_v52  ;;  %4609 = vmatpush.msrb.mxu2 %v4469_v52 }
0x1001   :  { %9478 = vrot.lane.b32.xlu1 %v9477_v37, %s10183_s7  ;;  %4610 = vmatpush.msrb.mxu2 %v4468_v45  ;;  %v8654_v45 = vld [vmem:[%s12190_s9 + $0x50] sm:$0xff] }
0x1003   :  { %4611 = vmatpush.msrb.mxu2 %v4467_v41 }
0x1005   :  { %v4417_v54 = vpop.permute.xlu0 %4416 }
0x1006   :  { %4439 = vst.msk [vmem:[#allocation3 + $0x18] sm:$0xff] %vm3883_vm7, %v4417_v54  ;;  %v4466_v55 = vld [vmem:[#allocation3 + $0x60] sm:$0xff] }
0x1007   :  { %4447 = vst.msk [vmem:[#allocation3 + $0x18] sm:$0xff] %vm3888_vm8, %v11182_v53  ;;  %v9497_v42 = vpack.i.bf16 %v4466_v55, %v4467_v41  ;;  %4612 = vmatpush.msrb.mxu2 %v4466_v55  ;;  %v5096_v53 = vld [vmem:[%s12189_s2 + $0x30] sm:$0xff] }
0x1009   :  { %9498 = vrot.lane.b32.xlu2 %v9497_v42, %s10182_s5  ;;  %9483 = vrot.lane.b32.xlu0 %v9497_v42, %s10183_s7 }
0x100a   :  { %4613 = vmatpush.msrb.mxu2 %v4465_v13 }
0x100c   :  { %4614 = vmatpush.msrb.mxu2 %v4464_v50 }
0x100e   :  { %v4463_v60 = vld [vmem:[#allocation3 + $0x18] sm:$0xff] }
0x100f   :  { %v9492_v49 = vpack.i.bf16 %v4462_v57, %v4463_v60  ;;  %4615 = vmatpush.msrb.mxu2 %v4463_v60 }
0x1011   :  { %9528 = vrot.lane.b32.xlu2 %v9477_v37, %s10185_s30  ;;  %9513 = vrot.lane.b32.xlu0 %v9477_v37, %s10182_s5 }
0x1012   :  { %9493 = vrot.lane.b32.xlu1 %v9492_v49, %s10183_s7  ;;  %4616 = vmatpush.msrb.mxu2 %v4462_v57 }
0x1013   :  { %8668 = vmatmul.msk.f32.vlgmr.msrb.gmra.mxu2 %vm4511_vm9, %v4454_v59  ;;  %v8678_v59 = vld [vmem:[%s12190_s9 + $0x90] sm:$0xff] }
0x1019   :  { %9533 = vrot.lane.b32.xlu2 %v9497_v42, %s10185_s30  ;;  %9518 = vrot.lane.b32.xlu0 %v9477_v37, %s10184_s10  ;;  %v4461_v37 = vld [vmem:[%s12190_s9 + $0x38] sm:$0xff] }
0x101a   :  { %9503 = vrot.lane.b32.xlu1 %v9487_v46, %s10182_s5 }
0x101b   :  { %8669 = vmatmul.msk.f32.gmra.mxu2 %vm4511_vm9, %v4455_v2  ;;  %v8657_v2 = vld [vmem:[%s12190_s9 + $0x68] sm:$0xff] }
0x1021   :  { %9523 = vrot.lane.b32.xlu0 %v9497_v42, %s10184_s10  ;;  %9548 = vrot.lane.b32.xlu2 %v9492_v49, %s10184_s10 }
0x1022   :  { %9508 = vrot.lane.b32.xlu1 %v9492_v49, %s10182_s5 }
0x1023   :  { %8670 = vmatmul.msk.f32.gmra.mxu2 %vm4511_vm9, %v4456_v38  ;;  %v8680_v38 = vld [vmem:[%s12190_s9 + $0xa0] sm:$0xff] }
0x1029   :  { %9543 = vrot.lane.b32.xlu0 %v9487_v46, %s10185_s30  ;;  %5130 = vperm.xlu2 %9005, %v5096_v53   ;;  %v8655_v53 = vld [vmem:[%s12190_s9 + $0x58] sm:$0xff] }
0x102a   :  { %9538 = vrot.lane.b32.xlu1 %v9487_v46, %s10184_s10 }
0x102b   :  { %8671 = vmatmul.msk.f32.gmra.mxu2 %vm4511_vm9, %v4457_v14  ;;  %v8696_v14 = vld [vmem:[%s12190_s9 + $0xe0] sm:$0xff] }
0x1031   :  { %5135 = vperm.xlu0 %9096, %v5097_v62   ;;  %5115 = vperm.xlu2 %9005, %v5093_v63   ;;  %v8677_v62 = vld [vmem:[%s12190_s9 + $0x88] sm:$0xff] }
0x1032   :  { %9553 = vrot.lane.b32.xlu1 %v9492_v49, %s10185_s30 }
0x1033   :  { %8672 = vmatmul.msk.f32.gmra.mxu2 %vm4511_vm9, %v4458_v31  ;;  %v8712_v31 = vld [vmem:[%s12190_s9 + $0x120] sm:$0xff] }
0x1039   :  { %5120 = vperm.xlu0 %9096, %v5094_v22   ;;  %5100 = vperm.xlu2 %9005, %v5090_v3   ;;  %v8692_v22 = vld [vmem:[%s12190_s9 + $0xc0] sm:$0xff] }
0x103a   :  { %5125 = vperm.xlu1 %9004, %v5095_v4  }
0x103b   :  { %8673 = vmatmul.msk.f32.gmra.mxu2 %vm4511_vm9, %v4459_v40  ;;  %v4973_v40 = vld [vmem:[#allocation4 + $0x28] sm:$0xff] }
0x1041   :  { %5105 = vperm.xlu0 %9096, %v5091_v5  }
0x1042   :  { %5110 = vperm.xlu1 %9004, %v5092_v58   ;;  %v8656_v58 = vld [vmem:[%s12190_s9 + $0x60] sm:$0xff] }
0x1043   :  { %8674 = vmatmul.msk.f32.gmra.mxu2 %vm4511_vm9, %v4460_v47  ;;  %v11477_v47 = vld [vmem:[#allocation4 + $0x8] sm:$0xff] }
0x104b   :  { %8675 = vmatmul.msk.f32.gmra.mxu2 %vm4511_vm9, %v4461_v37 }
0x1053   :  { %v9489_v1 = vpop.permute.xlu2 %9488 }
0x1054   :  { %v9490_v20 = vunpack.i.l.bf16 %v9489_v1  ;;  %v9491_v27 = vunpack.i.h.bf16 %v9489_v1  ;;  %v8693_v1 = vld [vmem:[%s12190_s9 + $0xc8] sm:$0xff] }
0x1063   :  { %v9499_v21 = vpop.permute.xlu2 %9498 }
0x1064   :  { %v9500_v61 = vunpack.i.l.bf16 %v9499_v21  ;;  %v9501_v29 = vunpack.i.h.bf16 %v9499_v21  ;;  %v8695_v21 = vld [vmem:[%s12190_s9 + $0xd8] sm:$0xff] }
0x106b   :  { %v9529_v25 = vpop.permute.xlu2 %9528 }
0x106c   :  { %v9530_v32 = vunpack.i.l.bf16 %v9529_v25  ;;  %v9531_v28 = vunpack.i.h.bf16 %v9529_v25  ;;  %v8697_v25 = vld [vmem:[%s12190_s9 + $0xe8] sm:$0xff] }
0x1073   :  { %v9479_v8 = vpop.permute.xlu1 %9478  ;;  %v9534_v33 = vpop.permute.xlu2 %9533 }
0x1074   :  { %v9481_v9 = vunpack.i.h.bf16 %v9479_v8  ;;  %v9480_v17 = vunpack.i.l.bf16 %v9479_v8  ;;  %v9535_v56 = vunpack.i.l.bf16 %v9534_v33  ;;  %v9536_v34 = vunpack.i.h.bf16 %v9534_v33  ;;  %v8679_v8 = vld [vmem:[%s12190_s9 + $0x98] sm:$0xff] }
0x1075   :  { %v4967_v33 = vld [vmem:[%s12184_s27 + $0x38] sm:$0xff] }
0x1076   :  { %4544 = vmatpush.msrb.mxu1 %v9480_v17  ;;  %v8658_v17 = vld [vmem:[%s12190_s9 + $0x70] sm:$0xff]  ;;  %5008 = vmatpush.msra.mxu2 %v4967_v33 }
0x1078   :  { %4545 = vmatpush.msrb.mxu1 %v9481_v9  ;;  %v8694_v9 = vld [vmem:[%s12190_s9 + $0xd0] sm:$0xff] }
0x107b   :  { %v9484_v23 = vpop.permute.xlu0 %9483  ;;  %v9549_v60 = vpop.permute.xlu2 %9548 }
0x107c   :  { %v9485_v43 = vunpack.i.l.bf16 %v9484_v23  ;;  %v9486_v24 = vunpack.i.h.bf16 %v9484_v23  ;;  %v9550_v49 = vunpack.i.l.bf16 %v9549_v60  ;;  %v9551_v63 = vunpack.i.h.bf16 %v9549_v60  ;;  %v8659_v23 = vld [vmem:[%s12190_s9 + $0x78] sm:$0xff] }
0x107e   :  { %4546 = vmatpush.msrb.mxu1 %v9485_v43  ;;  %v8681_v43 = vld [vmem:[%s12190_s9 + $0xa8] sm:$0xff] }
0x1080   :  { %4547 = vmatpush.msrb.mxu1 %v9486_v24  ;;  %v8708_v24 = vld [vmem:[%s12190_s9 + $0x100] sm:$0xff] }
0x1082   :  { %4548 = vmatpush.msrb.mxu1 %v9490_v20  ;;  %v8682_v20 = vld [vmem:[%s12190_s9 + $0xb0] sm:$0xff] }
0x1083   :  { %v9514_v48 = vpop.permute.xlu0 %9513 }
0x1084   :  { %v9494_v6 = vpop.permute.xlu1 %9493  ;;  %v9516_v10 = vunpack.i.h.bf16 %v9514_v48  ;;  %v9515_v11 = vunpack.i.l.bf16 %v9514_v48  ;;  %4549 = vmatpush.msrb.mxu1 %v9491_v27  ;;  %v8683_v27 = vld [vmem:[%s12190_s9 + $0xb8] sm:$0xff]  ;;  %v8709_v48 = vld [vmem:[%s12190_s9 + $0x108] sm:$0xff] }
0x1085   :  { %v9495_v26 = vunpack.i.l.bf16 %v9494_v6  ;;  %v9496_v35 = vunpack.i.h.bf16 %v9494_v6  ;;  %v8698_v6 = vld [vmem:[%s12190_s9 + $0xf0] sm:$0xff] }
0x1086   :  { %4707 = vmatpush.msrb.mxu3 %v9515_v11  ;;  %v8699_v11 = vld [vmem:[%s12190_s9 + $0xf8] sm:$0xff] }
0x1087   :  { %4550 = vmatpush.msrb.mxu1 %v9495_v26  ;;  %v8711_v26 = vld [vmem:[%s12190_s9 + $0x118] sm:$0xff] }
0x1088   :  { %4708 = vmatpush.msrb.mxu3 %v9516_v10  ;;  %v8710_v10 = vld [vmem:[%s12190_s9 + $0x110] sm:$0xff] }
0x1089   :  { %4551 = vmatpush.msrb.mxu1 %v9496_v35  ;;  %v8715_v35 = vld [vmem:[%s12190_s9 + $0x138] sm:$0xff] }
0x108a   :  { %8660 = vmatmul.msk.f32.vlgmr.msrb.gmra.mxu1 %vm4511_vm9, %v8652_v36  ;;  %4709 = vmatpush.msrb.mxu3 %v9500_v61  ;;  %v8713_v61 = vld [vmem:[%s12190_s9 + $0x128] sm:$0xff] }
0x108b   :  { %v9519_v30 = vpop.permute.xlu0 %9518  ;;  %4919 = vmatpush.msra.mxu1 %v9530_v32  ;;  %v8714_v32 = vld [vmem:[%s12190_s9 + $0x130] sm:$0xff] }
0x108c   :  { %v9504_v39 = vpop.permute.xlu1 %9503  ;;  %v9521_v7 = vunpack.i.h.bf16 %v9519_v30  ;;  %v9520_v16 = vunpack.i.l.bf16 %v9519_v30  ;;  %4710 = vmatpush.msrb.mxu3 %v9501_v29  ;;  %v4966_v30 = vld [vmem:[%s12184_s27 + $0x30] sm:$0xff] }
0x108d   :  { %v9506_v44 = vunpack.i.h.bf16 %v9504_v39  ;;  %v9505_v0 = vunpack.i.l.bf16 %v9504_v39  ;;  %4920 = vmatpush.msra.mxu1 %v9531_v28  ;;  %v4974_v39 = vld [vmem:[#allocation4 + $0x30] sm:$0xff]  ;;  %5009 = vmatpush.msra.mxu2 %v4966_v30 }
0x108e   :  { %4813 = vmatpush.msra.mxu0 %v9520_v16  ;;  %v4965_v16 = vld [vmem:[%s12184_s27 + $0x28] sm:$0xff] }
0x108f   :  { %4711 = vmatpush.msrb.mxu3 %v9505_v0  ;;  %4921 = vmatpush.msra.mxu1 %v9535_v56  ;;  %v4975_v56 = vld [vmem:[#allocation4 + $0x38] sm:$0xff]  ;;  %v11461_v0 = vld [vmem:[%s12184_s27 + $0x18] sm:$0xff] }
0x1090   :  { %4814 = vmatpush.msra.mxu0 %v9521_v7  ;;  %5010 = vmatpush.msra.mxu2 %v4965_v16 }
0x1091   :  { %4712 = vmatpush.msrb.mxu3 %v9506_v44  ;;  %4922 = vmatpush.msra.mxu1 %v9536_v34  ;;  %v4964_v34 = vld [vmem:[%s12184_s27 + $0x20] sm:$0xff]  ;;  %v4972_v44 = vld [vmem:[#allocation4 + $0x20] sm:$0xff] }
0x1092   :  { %8661 = vmatmul.msk.f32.gmra.mxu1 %vm4511_vm9, %v8653_v18  ;;  %5011 = vmatpush.msra.mxu2 %v4964_v34  ;;  %v11463_v18 = vld [vmem:[#allocation4 + $0x18] sm:$0xff] }
0x1093   :  { %v9524_v19 = vpop.permute.xlu0 %9523 }
0x1094   :  { %v9509_v15 = vpop.permute.xlu1 %9508  ;;  %v9526_v12 = vunpack.i.h.bf16 %v9524_v19  ;;  %v9525_v13 = vunpack.i.l.bf16 %v9524_v19  ;;  %5012 = vmatpush.msra.mxu2 %v11461_v0  ;;  %v11468_v19 = vld [vmem:[%s12184_s27 + $0x10] sm:$0xff] }
0x1095   :  { %v9511_v50 = vunpack.i.h.bf16 %v9509_v15  ;;  %v9510_v46 = vunpack.i.l.bf16 %v9509_v15  ;;  %v11470_v15 = vld [vmem:[#allocation4 + $0x10] sm:$0xff] }
0x1096   :  { %4815 = vmatpush.msra.mxu0 %v9525_v13  ;;  %5013 = vmatpush.msra.mxu2 %v11468_v19  ;;  %v11475_v13 = vld [vmem:[%s12184_s27 + $0x8] sm:$0xff] }
0x1097   :  { %4713 = vmatpush.msrb.mxu3 %v9510_v46  ;;  %v11484_v46 = vld [vmem:[#allocation4] sm:$0xff] }
0x1098   :  { %4816 = vmatpush.msra.mxu0 %v9526_v12  ;;  %5014 = vmatpush.msra.mxu2 %v11475_v13 }
0x1099   :  { %4714 = vmatpush.msrb.mxu3 %v9511_v50  ;;  %v11480_v50 = vld [vmem:[%s12184_s27] sm:$0xff] }
0x109a   :  { %8662 = vmatmul.msk.f32.gmra.mxu1 %vm4511_vm9, %v8654_v45  ;;  %8684 = vmatmul.msk.f32.vlgmr.msrb.gmra.mxu3 %vm4511_vm9, %v8676_v51  ;;  %v4618_v51 = vpop.f32.mrf.mxu2 }
0x109b   :  { %v9544_v52 = vpop.permute.xlu0 %9543  ;;  %5049 = vmatpush.msra.mxu3 %v4975_v56  ;;  %5015 = vmatpush.msra.mxu2 %v11480_v50 }
0x109c   :  { %v9539_v41 = vpop.permute.xlu1 %9538  ;;  %v9546_v54 = vunpack.i.h.bf16 %v9544_v52  ;;  %v9545_v55 = vunpack.i.l.bf16 %v9544_v52 }
0x109d   :  { %v9541_v42 = vunpack.i.h.bf16 %v9539_v41  ;;  %v9540_v57 = vunpack.i.l.bf16 %v9539_v41  ;;  %5050 = vmatpush.msra.mxu3 %v4974_v39 }
0x109e   :  { %4923 = vmatpush.msra.mxu1 %v9545_v55 }
0x109f   :  { %4817 = vmatpush.msra.mxu0 %v9540_v57  ;;  %5051 = vmatpush.msra.mxu3 %v4973_v40 }
0x10a0   :  { %4924 = vmatpush.msra.mxu1 %v9546_v54 }
0x10a1   :  { %4818 = vmatpush.msra.mxu0 %v9541_v42  ;;  %5052 = vmatpush.msra.mxu3 %v4972_v44 }
0x10a2   :  { %8663 = vmatmul.msk.f32.gmra.mxu1 %vm4511_vm9, %v8655_v53  ;;  %8685 = vmatmul.msk.f32.gmra.mxu3 %vm4511_vm9, %v8677_v62  ;;  %v4621_v54 = vpop.f32.mrf.mxu2 }
0x10a3   :  { %4819 = vmatpush.msra.mxu0 %v9550_v49  ;;  %5053 = vmatpush.msra.mxu3 %v11463_v18 }
0x10a4   :  { %v9554_v3 = vpop.permute.xlu1 %9553 }
0x10a5   :  { %v9556_v4 = vunpack.i.h.bf16 %v9554_v3  ;;  %v9555_v5 = vunpack.i.l.bf16 %v9554_v3  ;;  %4820 = vmatpush.msra.mxu0 %v9551_v63  ;;  %5054 = vmatpush.msra.mxu3 %v11470_v15 }
0x10a6   :  { %8700 = vmatmul.msk.f32.vlgmr.msra.gmra.mxu0 %vm4511_vm9, %v8692_v22 }
0x10a7   :  { %4925 = vmatpush.msra.mxu1 %v9555_v5  ;;  %5055 = vmatpush.msra.mxu3 %v11477_v47 }
0x10a9   :  { %4926 = vmatpush.msra.mxu1 %v9556_v4  ;;  %5056 = vmatpush.msra.mxu3 %v11484_v46 }
0x10aa   :  { %8664 = vmatmul.msk.f32.gmra.mxu1 %vm4511_vm9, %v8656_v58  ;;  %8686 = vmatmul.msk.f32.gmra.mxu3 %vm4511_vm9, %v8678_v59  ;;  %v4624_v53 = vpop.f32.mrf.mxu2 }
0x10ae   :  { %8701 = vmatmul.msk.f32.gmra.mxu0 %vm4511_vm9, %v8693_v1 }
0x10b2   :  { %8665 = vmatmul.msk.f32.gmra.mxu1 %vm4511_vm9, %v8657_v2  ;;  %8687 = vmatmul.msk.f32.gmra.mxu3 %vm4511_vm9, %v8679_v8  ;;  %v4627_v1 = vpop.f32.mrf.mxu2 }
0x10b6   :  { %8702 = vmatmul.msk.f32.gmra.mxu0 %vm4511_vm9, %v8694_v9 }
0x10ba   :  { %8666 = vmatmul.msk.f32.gmra.mxu1 %vm4511_vm9, %v8658_v17  ;;  %8688 = vmatmul.msk.f32.gmra.mxu3 %vm4511_vm9, %v8680_v38 }
0x10be   :  { %8703 = vmatmul.msk.f32.gmra.mxu0 %vm4511_vm9, %v8695_v21 }
0x10c2   :  { %8667 = vmatmul.msk.f32.gmra.mxu1 %vm4511_vm9, %v8659_v23  ;;  %8689 = vmatmul.msk.f32.gmra.mxu3 %vm4511_vm9, %v8681_v43 }
0x10c6   :  { %8704 = vmatmul.msk.f32.gmra.mxu0 %vm4511_vm9, %v8696_v14 }
0x10ca   :  { %8690 = vmatmul.msk.f32.gmra.mxu3 %vm4511_vm9, %v8682_v20  ;;  %8716 = vmatmul.msk.f32.vlgmr.msra.gmra.mxu1 %vm4511_vm9, %v8708_v24  ;;  %v4630_v20 = vpop.f32.mrf.mxu2 }
0x10ce   :  { %8705 = vmatmul.msk.f32.gmra.mxu0 %vm4511_vm9, %v8697_v25 }
0x10d2   :  { %8691 = vmatmul.msk.f32.gmra.mxu3 %vm4511_vm9, %v8683_v27  ;;  %8717 = vmatmul.msk.f32.gmra.mxu1 %vm4511_vm9, %v8709_v48 }
0x10d6   :  { %8706 = vmatmul.msk.f32.gmra.mxu0 %vm4511_vm9, %v8698_v6 }
0x10da   :  { %8718 = vmatmul.msk.f32.gmra.mxu1 %vm4511_vm9, %v8710_v10 }
0x10de   :  { %8707 = vmatmul.msk.f32.gmra.mxu0 %vm4511_vm9, %v8699_v11 }
0x10e2   :  { %8719 = vmatmul.msk.f32.gmra.mxu1 %vm4511_vm9, %v8711_v26 }
0x10ea   :  { %8720 = vmatmul.msk.f32.gmra.mxu1 %vm4511_vm9, %v8712_v31  ;;  %v4633_v31 = vpop.f32.mrf.mxu2 }
0x10f2   :  { %8721 = vmatmul.msk.f32.gmra.mxu1 %vm4511_vm9, %v8713_v61  ;;  %v4636_v30 = vpop.f32.mrf.mxu2 }
0x10fa   :  { %8722 = vmatmul.msk.f32.gmra.mxu1 %vm4511_vm9, %v8714_v32 }
0x1102   :  { %8723 = vmatmul.msk.f32.gmra.mxu1 %vm4511_vm9, %v8715_v35 }
0x1107   :  { %v4553_v36 = vpop.f32.mrf.mxu1 }
0x1108   :  { %v4619_v60 = vadd.f32 %v4618_v51, %v4553_v36 }
0x110f   :  { %v4556_v29 = vpop.f32.mrf.mxu1 }
0x1110   :  { %v4622_v5 = vadd.f32 %v4621_v54, %v4556_v29 }
0x1117   :  { %v4559_v28 = vpop.f32.mrf.mxu1 }
0x1118   :  { %v4625_v17 = vadd.f32 %v4624_v53, %v4559_v28 }
0x111d   :  { %v4716_v52 = vpop.f32.mrf.mxu3 }
0x111e   :  { %v4740_v49 = vadd.f32 %v4716_v52, %v4619_v60  ;;  %v4639_v52 = vpop.f32.mrf.mxu2 }
0x111f   :  { %v11456_v7 = vpop.f32.mrf.mxu1 }
0x1120   :  { %v4628_v24 = vadd.f32 %v4627_v1, %v11456_v7 }
0x1123   :  { %v4822_v37 = vpop.f32.mrf.mxu0 }
0x1124   :  { %v4846_v62 = vadd.f32 %v4822_v37, %v4740_v49 }
0x1125   :  { %v4719_v55 = vpop.f32.mrf.mxu3 }
0x1126   :  { %v4741_v58 = vadd.f32 %v4719_v55, %v4622_v5 }
0x1127   :  { %v4565_v12 = vpop.f32.mrf.mxu1 }
0x1128   :  { %v4631_v26 = vadd.f32 %v4630_v20, %v4565_v12 }
0x112b   :  { %v4825_v42 = vpop.f32.mrf.mxu0 }
0x112c   :  { %v4847_v59 = vadd.f32 %v4825_v42, %v4741_v58 }
0x112d   :  { %v4722_v63 = vpop.f32.mrf.mxu3 }
0x112e   :  { %v4742_v21 = vadd.f32 %v4722_v63, %v4625_v17 }
0x112f   :  { %v4568_v45 = vpop.f32.mrf.mxu1 }
0x1130   :  { %v4634_v33 = vadd.f32 %v4633_v31, %v4568_v45 }
0x1133   :  { %v4828_v4 = vpop.f32.mrf.mxu0 }
0x1134   :  { %v4848_v23 = vadd.f32 %v4828_v4, %v4742_v21  ;;  %v5131_v21 = vpop.permute.xlu2 %5130 }
0x1135   :  { %v4725_v9 = vpop.f32.mrf.mxu3 }
0x1136   :  { %v4743_v27 = vadd.f32 %v4725_v9, %v4628_v24 }
0x1137   :  { %v4571_v41 = vpop.f32.mrf.mxu1 }
0x1138   :  { %v4637_v44 = vadd.f32 %v4636_v30, %v4571_v41 }
0x113b   :  { %v4831_v38 = vpop.f32.mrf.mxu0 }
0x113c   :  { %v4849_v6 = vadd.f32 %v4831_v38, %v4743_v27  ;;  %v5116_v31 = vpop.permute.xlu2 %5115 }
0x113d   :  { %v4728_v25 = vpop.f32.mrf.mxu3 }
0x113e   :  { %v4744_v61 = vadd.f32 %v4728_v25, %v4631_v26 }
0x113f   :  { %v11488_v57 = vpop.f32.mrf.mxu1 }
0x1140   :  { %v4640_v55 = vadd.f32 %v4639_v52, %v11488_v57 }
0x1143   :  { %v4834_v48 = vpop.f32.mrf.mxu0 }
0x1144   :  { %v4850_v35 = vadd.f32 %v4834_v48, %v4744_v61 }
0x1145   :  { %v4731_v32 = vpop.f32.mrf.mxu3 }
0x1146   :  { %v4745_v56 = vadd.f32 %v4731_v32, %v4634_v33 }
0x1147   :  { %v4928_v22 = vpop.f32.mrf.mxu1 }
0x1148   :  { %v4952_v3 = vadd.f32 %v4928_v22, %v4846_v62 }
0x114a   :  { %8724 = vmatmul.msk.f32.vlgmr.msra.gmra.mxu2 %vm4511_vm9, %v4952_v3  ;;  %8732 = vmatmul.msk.f32.vlgmr.msra.gmra.mxu3 %vm4511_vm9, %v4952_v3 }
0x114b   :  { %v4837_v36 = vpop.f32.mrf.mxu0 }
0x114c   :  { %v4851_v39 = vadd.f32 %v4837_v36, %v4745_v56 }
0x114d   :  { %v4734_v7 = vpop.f32.mrf.mxu3 }
0x114e   :  { %v4746_v12 = vadd.f32 %v4734_v7, %v4637_v44  ;;  %v5101_v7 = vpop.permute.xlu2 %5100 }
0x114f   :  { %v4931_v2 = vpop.f32.mrf.mxu1 }
0x1150   :  { %v4953_v8 = vadd.f32 %v4931_v2, %v4847_v59  ;;  %v5126_v2 = vpop.permute.xlu1 %5125 }
0x1152   :  { %8725 = vmatmul.msk.f32.gmra.mxu2 %vm4511_vm9, %v4953_v8  ;;  %8733 = vmatmul.msk.f32.gmra.mxu3 %vm4511_vm9, %v4953_v8 }
0x1153   :  { %v4840_v34 = vpop.f32.mrf.mxu0 }
0x1154   :  { %v4852_v51 = vadd.f32 %v4840_v34, %v4746_v12 }
0x1155   :  { %v4737_v54 = vpop.f32.mrf.mxu3 }
0x1156   :  { %v4747_v60 = vadd.f32 %v4737_v54, %v4640_v55  ;;  %v11517_v54 = vld [vmem:[#allocation2 + $0x40] sm:$0xff] }
0x1157   :  { %v4934_v43 = vpop.f32.mrf.mxu1 }
0x1158   :  { %v4954_v14 = vadd.f32 %v4934_v43, %v4848_v23 }
0x115a   :  { %8726 = vmatmul.msk.f32.gmra.mxu2 %vm4511_vm9, %v4954_v14  ;;  %8734 = vmatmul.msk.f32.gmra.mxu3 %vm4511_vm9, %v4954_v14  ;;  %v5111_v14 = vpop.permute.xlu1 %5110 }
0x115b   :  { %v4843_v42 = vpop.f32.mrf.mxu0 }
0x115c   :  { %v4853_v49 = vadd.f32 %v4843_v42, %v4747_v60 }
0x115f   :  { %v4937_v10 = vpop.f32.mrf.mxu1 }
0x1160   :  { %v4955_v11 = vadd.f32 %v4937_v10, %v4849_v6  ;;  %v5136_v6 = vpop.permute.xlu0 %5135 }
0x1162   :  { %8727 = vmatmul.msk.f32.gmra.mxu2 %vm4511_vm9, %v4955_v11  ;;  %8735 = vmatmul.msk.f32.gmra.mxu3 %vm4511_vm9, %v4955_v11 }
0x1167   :  { %v4940_v29 = vpop.f32.mrf.mxu1 }
0x1168   :  { %v4956_v28 = vadd.f32 %v4940_v29, %v4850_v35 }
0x116a   :  { %8728 = vmatmul.msk.f32.gmra.mxu2 %vm4511_vm9, %v4956_v28  ;;  %8736 = vmatmul.msk.f32.gmra.mxu3 %vm4511_vm9, %v4956_v28 }
0x116f   :  { %v4943_v16 = vpop.f32.mrf.mxu1 }
0x1170   :  { %v4957_v40 = vadd.f32 %v4943_v16, %v4851_v39  ;;  %v5121_v39 = vpop.permute.xlu0 %5120 }
0x1172   :  { %8729 = vmatmul.msk.f32.gmra.mxu2 %vm4511_vm9, %v4957_v40  ;;  %8737 = vmatmul.msk.f32.gmra.mxu3 %vm4511_vm9, %v4957_v40 }
0x1177   :  { %v4946_v45 = vpop.f32.mrf.mxu1 }
0x1178   :  { %v4958_v37 = vadd.f32 %v4946_v45, %v4852_v51  ;;  %v5106_v51 = vpop.permute.xlu0 %5105 }
0x117a   :  { %8730 = vmatmul.msk.f32.gmra.mxu2 %vm4511_vm9, %v4958_v37  ;;  %8738 = vmatmul.msk.f32.gmra.mxu3 %vm4511_vm9, %v4958_v37 }
0x117f   :  { %v4949_v41 = vpop.f32.mrf.mxu1 }
0x1180   :  { %v4959_v53 = vadd.f32 %v4949_v41, %v4853_v49 }
0x1182   :  { %8731 = vmatmul.msk.f32.gmra.mxu2 %vm4511_vm9, %v4959_v53  ;;  %8739 = vmatmul.msk.f32.gmra.mxu3 %vm4511_vm9, %v4959_v53 }
0x11cd   :  { %v5017_v62 = vpop.f32.mrf.mxu2  ;;  %v5058_v63 = vpop.f32.mrf.mxu3 }
0x11ce   :  { %v5082_v28 = vmax.f32 %v5017_v62, %v5058_v63 }
0x11d0   :  { %v5138_v16 = vadd.f32 %v5101_v7, %v5082_v28 }
0x11d2   :  { %v5146_v34 = vmax.f32 %v5138_v16, 0.0 }
0x11d5   :  { %v5020_v22 = vpop.f32.mrf.mxu2  ;;  %v5061_v3 = vpop.f32.mrf.mxu3 }
0x11d6   :  { %v5083_v44 = vmax.f32 %v5020_v22, %v5061_v3 }
0x11d8   :  { %v5139_v52 = vadd.f32 %v5106_v51, %v5083_v44  ;;  %v5207_v44 = vld [vmem:[#allocation11 + $0x18] sm:$0xff] }
0x11da   :  { %v5147_v45 = vmax.f32 %v5139_v52, 0.0 }
0x11dd   :  { %v5023_v4 = vpop.f32.mrf.mxu2  ;;  %v5064_v5 = vpop.f32.mrf.mxu3 }
0x11de   :  { %v5084_v23 = vmax.f32 %v5023_v4, %v5064_v5 }
0x11e0   :  { %v5140_v25 = vadd.f32 %v5111_v14, %v5084_v23  ;;  %v5499_v23 = vld [vmem:[%s12191_s28 + $0x10] sm:$0xff]  ;;  %v5501_v14 = vld [vmem:[%s12191_s28 + $0x20] sm:$0xff] }
0x11e2   :  { %v5148_v10 = vmax.f32 %v5140_v25, 0.0 }
0x11e5   :  { %v5026_v57 = vpop.f32.mrf.mxu2  ;;  %v5067_v58 = vpop.f32.mrf.mxu3 }
0x11e6   :  { %v5085_v11 = vmax.f32 %v5026_v57, %v5067_v58 }
0x11e8   :  { %v5141_v35 = vadd.f32 %v5116_v31, %v5085_v11 }
0x11ea   :  { %v5149_v33 = vmax.f32 %v5141_v35, 0.0 }
0x11ed   :  { %v5029_v59 = vpop.f32.mrf.mxu2  ;;  %v5070_v1 = vpop.f32.mrf.mxu3 }
0x11ee   :  { %v5086_v56 = vmax.f32 %v5029_v59, %v5070_v1 }
0x11f0   :  { %v5142_v40 = vadd.f32 %v5121_v39, %v5086_v56 }
0x11f2   :  { %v5150_v12 = vmax.f32 %v5142_v40, 0.0 }
0x11f5   :  { %v5032_v8 = vpop.f32.mrf.mxu2  ;;  %v5073_v9 = vpop.f32.mrf.mxu3 }
0x11f6   :  { %v5087_v17 = vmax.f32 %v5032_v8, %v5073_v9 }
0x11f8   :  { %v5143_v38 = vadd.f32 %v5126_v2, %v5087_v17  ;;  %v5502_v17 = vld [vmem:[%s12191_s28 + $0x28] sm:$0xff] }
0x11fa   :  { %v5151_v43 = vmax.f32 %v5143_v38, 0.0  ;;  %v5503_v38 = vld [vmem:[%s12191_s28 + $0x30] sm:$0xff] }
0x11fc   :  { %5172 = vrot.lane.b32.xlu2 %v5151_v43, %s10190_s13  ;;  %v5500_v43 = vld [vmem:[%s12191_s28 + $0x18] sm:$0xff] }
0x11fd   :  { %v5035_v20 = vpop.f32.mrf.mxu2  ;;  %v5076_v24 = vpop.f32.mrf.mxu3 }
0x11fe   :  { %v5088_v27 = vmax.f32 %v5035_v20, %v5076_v24  ;;  %v5497_v20 = vld [vmem:[%s12191_s28] sm:$0xff]  ;;  %v5498_v24 = vld [vmem:[%s12191_s28 + $0x8] sm:$0xff] }
0x1200   :  { %v5144_v48 = vadd.f32 %v5131_v21, %v5088_v27  ;;  %v5504_v21 = vld [vmem:[%s12191_s28 + $0x38] sm:$0xff] }
0x1202   :  { %v5152_v26 = vmax.f32 %v5144_v48, 0.0 }
0x1204   :  { %5166 = vrot.lane.b32.xlu2 %v5148_v10, %s10190_s13  ;;  %5174 = vrot.lane.b32.xlu0 %v5152_v26, %s10190_s13 }
0x1205   :  { %v5038_v61 = vpop.f32.mrf.mxu2  ;;  %v5079_v32 = vpop.f32.mrf.mxu3 }
0x1206   :  { %v5089_v36 = vmax.f32 %v5038_v61, %v5079_v32  ;;  %v5205_v61 = vld [vmem:[#allocation11 + $0x8] sm:$0xff] }
0x1208   :  { %v5145_v29 = vadd.f32 %v5136_v6, %v5089_v36  ;;  %v5204_v6 = vld [vmem:[#allocation11] sm:$0xff] }
0x120a   :  { %v5153_v30 = vmax.f32 %v5145_v29, 0.0 }
0x120c   :  { %5168 = vrot.lane.b32.xlu0 %v5149_v33, %s10190_s13  ;;  %5176 = vrot.lane.b32.xlu1 %v5153_v30, %s10190_s13  ;;  %v5206_v33 = vld [vmem:[#allocation11 + $0x10] sm:$0xff] }
0x1214   :  { %5162 = vrot.lane.b32.xlu0 %v5146_v34, %s10190_s13  ;;  %5170 = vrot.lane.b32.xlu1 %v5150_v12, %s10190_s13 }
0x121c   :  { %5164 = vrot.lane.b32.xlu1 %v5147_v45, %s10190_s13 }
0x1256   :  { %v5173_v37 = vpop.permute.xlu2 %5172 }
0x1257   :  { %5192 = vst.msk [vmem:[#allocation2 + $0x78] sm:$0xff] %vm5186_vm10, %v5173_v37  ;;  %v5392_v37 = vld [vmem:[#allocation11 + $0x80] sm:$0xff] }
0x1258   :  { %5201 = vst.msk [vmem:[#allocation2 + $0x78] sm:$0xff] %vm5195_vm11, %v11517_v54 }
0x125e   :  { %v5167_v55 = vpop.permute.xlu2 %5166 }
0x125f   :  { %5189 = vst.msk [vmem:[#allocation2 + $0x30] sm:$0xff] %vm5186_vm10, %v5167_v55  ;;  %v5217_v57 = vld [vmem:[#allocation2 + $0x78] sm:$0xff] }
0x1260   :  { %5198 = vst.msk [vmem:[#allocation2 + $0x30] sm:$0xff] %vm5195_vm11, %v11517_v54 }
0x1267   :  { %v5214_v3 = vld [vmem:[#allocation2 + $0x30] sm:$0xff] }
0x1276   :  { %v5175_v42 = vpop.permute.xlu0 %5174 }
0x1277   :  { %5193 = vst.msk [vmem:[#allocation2 + $0x90] sm:$0xff] %vm5186_vm10, %v5175_v42  ;;  %v5221_v42 = vld [vmem:[#allocation11 + $0x40] sm:$0xff] }
0x1278   :  { %5202 = vst.msk [vmem:[#allocation2 + $0x90] sm:$0xff] %vm5195_vm11, %v11517_v54 }
0x127e   :  { %v5169_v60 = vpop.permute.xlu0 %5168  ;;  %v5177_v49 = vpop.permute.xlu1 %5176 }
0x127f   :  { %5190 = vst.msk [vmem:[#allocation2 + $0x48] sm:$0xff] %vm5186_vm10, %v5169_v60  ;;  %v5218_v62 = vld [vmem:[#allocation2 + $0x90] sm:$0xff]  ;;  %v5208_v60 = vld [vmem:[#allocation11 + $0x20] sm:$0xff] }
0x1280   :  { %5199 = vst.msk [vmem:[#allocation2 + $0x48] sm:$0xff] %vm5195_vm11, %v11517_v54 }
0x1281   :  { %5194 = vst.msk [vmem:[#allocation2 + $0xa8] sm:$0xff] %vm5186_vm10, %v5177_v49  ;;  %v5393_v49 = vld [vmem:[#allocation11 + $0x88] sm:$0xff] }
0x1282   :  { %5203 = vst.msk [vmem:[#allocation2 + $0xa8] sm:$0xff] %vm5195_vm11, %v11517_v54 }
0x1286   :  { %v5163_v41 = vpop.permute.xlu0 %5162  ;;  %v5171_v53 = vpop.permute.xlu1 %5170 }
0x1287   :  { %5187 = vst.msk [vmem:[#allocation2] sm:$0xff] %vm5186_vm10, %v5163_v41  ;;  %v5215_v4 = vld [vmem:[#allocation2 + $0x48] sm:$0xff] }
0x1288   :  { %5196 = vst.msk [vmem:[#allocation2] sm:$0xff] %vm5195_vm11, %v11517_v54  ;;  %v9577_v58 = vpack.i.bf16 %v5214_v3, %v5215_v4  ;;  %v5222_v41 = vld [vmem:[#allocation11 + $0x48] sm:$0xff] }
0x1289   :  { %5191 = vst.msk [vmem:[#allocation2 + $0x60] sm:$0xff] %vm5186_vm10, %v5171_v53  ;;  %v5219_v63 = vld [vmem:[#allocation2 + $0xa8] sm:$0xff] }
0x128a   :  { %5200 = vst.msk [vmem:[#allocation2 + $0x60] sm:$0xff] %vm5195_vm11, %v11517_v54  ;;  %v9572_v22 = vpack.i.bf16 %v5218_v62, %v5219_v63  ;;  %5358 = vmatpush.msrb.mxu1 %v5219_v63  ;;  %v5209_v53 = vld [vmem:[#allocation11 + $0x28] sm:$0xff]  ;;  %v5211_v63 = vld [vmem:[#allocation11 + $0x38] sm:$0xff] }
0x128c   :  { %9573 = vrot.lane.b32.xlu1 %v9572_v22, %s10183_s7  ;;  %9563 = vrot.lane.b32.xlu2 %v9572_v22, %s10182_s5  ;;  %v5396_v22 = vld [vmem:[#allocation11 + $0xa0] sm:$0xff] }
0x128d   :  { %5359 = vmatpush.msrb.mxu1 %v5218_v62  ;;  %v5210_v62 = vld [vmem:[#allocation11 + $0x30] sm:$0xff] }
0x128e   :  { %v5165_v5 = vpop.permute.xlu1 %5164 }
0x128f   :  { %5188 = vst.msk [vmem:[#allocation2 + $0x18] sm:$0xff] %vm5186_vm10, %v5165_v5  ;;  %5360 = vmatpush.msrb.mxu1 %v5217_v57  ;;  %v5212_v2 = vld [vmem:[#allocation2] sm:$0xff]  ;;  %v5226_v5 = vld [vmem:[#allocation11 + $0x68] sm:$0xff] }
0x1290   :  { %5197 = vst.msk [vmem:[#allocation2 + $0x18] sm:$0xff] %vm5195_vm11, %v11517_v54 }
0x1291   :  { %v5216_v59 = vld [vmem:[#allocation2 + $0x60] sm:$0xff] }
0x1292   :  { %v9567_v1 = vpack.i.bf16 %v5216_v59, %v5217_v57  ;;  %5361 = vmatpush.msrb.mxu1 %v5216_v59  ;;  %v5398_v57 = vld [vmem:[#allocation11 + $0xb0] sm:$0xff]  ;;  %v5399_v59 = vld [vmem:[#allocation11 + $0xb8] sm:$0xff] }
0x1294   :  { %9578 = vrot.lane.b32.xlu1 %v9577_v58, %s10182_s5  ;;  %9568 = vrot.lane.b32.xlu2 %v9567_v1, %s10183_s7 }
0x1295   :  { %9558 = vrot.lane.b32.xlu0 %v9567_v1, %s10182_s5  ;;  %5362 = vmatpush.msrb.mxu1 %v5215_v4  ;;  %v5397_v4 = vld [vmem:[#allocation11 + $0xa8] sm:$0xff]  ;;  %v5228_v1 = vld [vmem:[#allocation11 + $0x78] sm:$0xff] }
0x1297   :  { %v5213_v8 = vld [vmem:[#allocation2 + $0x18] sm:$0xff]  ;;  %5363 = vmatpush.msrb.mxu1 %v5214_v3  ;;  %v5225_v3 = vld [vmem:[#allocation11 + $0x60] sm:$0xff] }
0x1298   :  { %v9592_v9 = vpack.i.bf16 %v5212_v2, %v5213_v8 }
0x1299   :  { %5364 = vmatpush.msrb.mxu1 %v5213_v8 }
0x129b   :  { %5365 = vmatpush.msrb.mxu1 %v5212_v2 }
0x129c   :  { %9593 = vrot.lane.b32.xlu1 %v9592_v9, %s10183_s7  ;;  %9588 = vrot.lane.b32.xlu2 %v9592_v9, %s10182_s5 }
0x129d   :  { %9583 = vrot.lane.b32.xlu0 %v9577_v58, %s10183_s7  ;;  %8748 = vmatmul.msk.f32.vlgmr.msrb.gmra.mxu1 %vm4511_vm9, %v5204_v6  ;;  %v5227_v58 = vld [vmem:[#allocation11 + $0x70] sm:$0xff] }
0x12a4   :  { %5532 = vperm.xlu1 %9004, %v5502_v17   ;;  %5537 = vperm.xlu2 %9005, %v5503_v38  }
0x12a5   :  { %5542 = vperm.xlu0 %9096, %v5504_v21   ;;  %8749 = vmatmul.msk.f32.gmra.mxu1 %vm4511_vm9, %v5205_v61 }
0x12ac   :  { %5517 = vperm.xlu1 %9004, %v5499_v23   ;;  %5522 = vperm.xlu2 %9005, %v5500_v43  }
0x12ad   :  { %5527 = vperm.xlu0 %9096, %v5501_v14   ;;  %8750 = vmatmul.msk.f32.gmra.mxu1 %vm4511_vm9, %v5206_v33 }
0x12b4   :  { %5507 = vperm.xlu2 %9005, %v5497_v20  }
0x12b5   :  { %5512 = vperm.xlu0 %9096, %v5498_v24   ;;  %8751 = vmatmul.msk.f32.gmra.mxu1 %vm4511_vm9, %v5207_v44 }
0x12bd   :  { %8752 = vmatmul.msk.f32.gmra.mxu1 %vm4511_vm9, %v5208_v60 }
0x12c5   :  { %8753 = vmatmul.msk.f32.gmra.mxu1 %vm4511_vm9, %v5209_v53 }
0x12cd   :  { %8754 = vmatmul.msk.f32.gmra.mxu1 %vm4511_vm9, %v5210_v62 }
0x12d5   :  { %8755 = vmatmul.msk.f32.gmra.mxu1 %vm4511_vm9, %v5211_v63 }
0x12e6   :  { %v9564_v25 = vpop.permute.xlu2 %9563 }
0x12e7   :  { %v9566_v27 = vunpack.i.h.bf16 %v9564_v25  ;;  %v9565_v48 = vunpack.i.l.bf16 %v9564_v25 }
0x12e9   :  { %5456 = vmatpush.msrb.mxu2 %v9565_v48 }
0x12eb   :  { %5457 = vmatpush.msrb.mxu2 %v9566_v27 }
0x12ee   :  { %v9569_v31 = vpop.permute.xlu2 %9568 }
0x12ef   :  { %v9570_v32 = vunpack.i.l.bf16 %v9569_v31  ;;  %v9571_v35 = vunpack.i.h.bf16 %v9569_v31 }
0x12f6   :  { %v9589_v39 = vpop.permute.xlu2 %9588 }
0x12f7   :  { %v9590_v7 = vunpack.i.l.bf16 %v9589_v39  ;;  %v9591_v51 = vunpack.i.h.bf16 %v9589_v39 }
0x12fe   :  { %v9574_v10 = vpop.permute.xlu1 %9573 }
0x12ff   :  { %v9576_v11 = vunpack.i.h.bf16 %v9574_v10  ;;  %v9575_v26 = vunpack.i.l.bf16 %v9574_v10 }
0x1301   :  { %5293 = vmatpush.msrb.mxu0 %v9575_v26 }
0x1303   :  { %5294 = vmatpush.msrb.mxu0 %v9576_v11 }
0x1305   :  { %5295 = vmatpush.msrb.mxu0 %v9570_v32 }
0x1306   :  { %v9579_v29 = vpop.permute.xlu1 %9578 }
0x1307   :  { %v9559_v36 = vpop.permute.xlu0 %9558  ;;  %5296 = vmatpush.msrb.mxu0 %v9571_v35  ;;  %v9580_v30 = vunpack.i.l.bf16 %v9579_v29  ;;  %v9581_v16 = vunpack.i.h.bf16 %v9579_v29 }
0x1308   :  { %v9560_v28 = vunpack.i.l.bf16 %v9559_v36  ;;  %v9561_v56 = vunpack.i.h.bf16 %v9559_v36 }
0x130a   :  { %5458 = vmatpush.msrb.mxu2 %v9560_v28  ;;  %v5538_v28 = vpop.permute.xlu2 %5537 }
0x130c   :  { %5459 = vmatpush.msrb.mxu2 %v9561_v56 }
0x130e   :  { %5460 = vmatpush.msrb.mxu2 %v9580_v30  ;;  %v9594_v12 = vpop.permute.xlu1 %9593 }
0x130f   :  { %v9584_v40 = vpop.permute.xlu0 %9583  ;;  %v9595_v45 = vunpack.i.l.bf16 %v9594_v12  ;;  %v9596_v55 = vunpack.i.h.bf16 %v9594_v12 }
0x1310   :  { %v9585_v34 = vunpack.i.l.bf16 %v9584_v40  ;;  %5461 = vmatpush.msrb.mxu2 %v9581_v16  ;;  %v9586_v52 = vunpack.i.h.bf16 %v9584_v40 }
0x1312   :  { %5297 = vmatpush.msrb.mxu0 %v9585_v34  ;;  %5462 = vmatpush.msrb.mxu2 %v9590_v7 }
0x1314   :  { %5298 = vmatpush.msrb.mxu0 %v9586_v52  ;;  %5463 = vmatpush.msrb.mxu2 %v9591_v51 }
0x1315   :  { %8756 = vmatmul.msk.f32.vlgmr.msrb.gmra.mxu2 %vm4511_vm9, %v5392_v37 }
0x1316   :  { %5299 = vmatpush.msrb.mxu0 %v9595_v45  ;;  %5946 = vmatpush.msra.mxu2 %v11461_v0  ;;  %v5394_v0 = vld [vmem:[#allocation11 + $0x90] sm:$0xff]  ;;  %v5533_v11 = vpop.permute.xlu1 %5532 }
0x1317   :  { %v5543_v51 = vpop.permute.xlu0 %5542 }
0x1318   :  { %5300 = vmatpush.msrb.mxu0 %v9596_v55  ;;  %5947 = vmatpush.msra.mxu2 %v11468_v19  ;;  %v5223_v19 = vld [vmem:[#allocation11 + $0x50] sm:$0xff] }
0x1319   :  { %8740 = vmatmul.msk.f32.vlgmr.msrb.gmra.mxu0 %vm4511_vm9, %v5221_v42  ;;  %v5523_v42 = vpop.permute.xlu2 %5522 }
0x131a   :  { %5948 = vmatpush.msra.mxu2 %v11475_v13  ;;  %v5395_v13 = vld [vmem:[#allocation11 + $0x98] sm:$0xff]  ;;  %v5367_v2 = vpop.f32.mrf.mxu1 }
0x131c   :  { %5949 = vmatpush.msra.mxu2 %v11480_v50  ;;  %v5224_v50 = vld [vmem:[#allocation11 + $0x58] sm:$0xff] }
0x131d   :  { %8757 = vmatmul.msk.f32.gmra.mxu2 %vm4511_vm9, %v5393_v49 }
0x131e   :  { %v5518_v7 = vpop.permute.xlu1 %5517 }
0x1321   :  { %8741 = vmatmul.msk.f32.gmra.mxu0 %vm4511_vm9, %v5222_v41 }
0x1322   :  { %v5370_v8 = vpop.f32.mrf.mxu1 }
0x1325   :  { %8758 = vmatmul.msk.f32.gmra.mxu2 %vm4511_vm9, %v5394_v0 }
0x1329   :  { %8742 = vmatmul.msk.f32.gmra.mxu0 %vm4511_vm9, %v5223_v19 }
0x132a   :  { %v5373_v38 = vpop.f32.mrf.mxu1 }
0x132d   :  { %8759 = vmatmul.msk.f32.gmra.mxu2 %vm4511_vm9, %v5395_v13 }
0x1331   :  { %8743 = vmatmul.msk.f32.gmra.mxu0 %vm4511_vm9, %v5224_v50 }
0x1332   :  { %v5376_v43 = vpop.f32.mrf.mxu1 }
0x1335   :  { %8760 = vmatmul.msk.f32.gmra.mxu2 %vm4511_vm9, %v5396_v22 }
0x1339   :  { %8744 = vmatmul.msk.f32.gmra.mxu0 %vm4511_vm9, %v5225_v3 }
0x133a   :  { %v5379_v25 = vpop.f32.mrf.mxu1 }
0x133d   :  { %8761 = vmatmul.msk.f32.gmra.mxu2 %vm4511_vm9, %v5397_v4  ;;  %v5528_v4 = vpop.permute.xlu0 %5527 }
0x1341   :  { %8745 = vmatmul.msk.f32.gmra.mxu0 %vm4511_vm9, %v5226_v5  ;;  %v5508_v5 = vpop.permute.xlu2 %5507 }
0x1342   :  { %v5382_v10 = vpop.f32.mrf.mxu1 }
0x1345   :  { %8762 = vmatmul.msk.f32.gmra.mxu2 %vm4511_vm9, %v5398_v57 }
0x1349   :  { %8746 = vmatmul.msk.f32.gmra.mxu0 %vm4511_vm9, %v5227_v58 }
0x134a   :  { %v5385_v36 = vpop.f32.mrf.mxu1 }
0x134d   :  { %8763 = vmatmul.msk.f32.gmra.mxu2 %vm4511_vm9, %v5399_v59 }
0x1351   :  { %8747 = vmatmul.msk.f32.gmra.mxu0 %vm4511_vm9, %v5228_v1 }
0x1352   :  { %v5388_v52 = vpop.f32.mrf.mxu1 }
0x1396   :  { %v5302_v9 = vpop.f32.mrf.mxu0 }
0x1397   :  { %v5368_v53 = vadd.f32 %v5367_v2, %v5302_v9  ;;  %v5513_v9 = vpop.permute.xlu0 %5512 }
0x1398   :  { %v5465_v17 = vpop.f32.mrf.mxu2 }
0x1399   :  { %v5489_v50 = vadd.f32 %v5465_v17, %v5368_v53 }
0x139b   :  { %v5545_v57 = vadd.f32 %v5508_v5, %v5489_v50 }
0x139d   :  { %v5553_v1 = vmax.f32 %v5545_v57, 0.0  ;;  %v5612_v57 = vld [vmem:[#allocation12 + $0x18] sm:$0xff] }
0x139e   :  { %v5305_v21 = vpop.f32.mrf.mxu0 }
0x139f   :  { %v5371_v58 = vadd.f32 %v5370_v8, %v5305_v21 }
0x13a0   :  { %v5468_v23 = vpop.f32.mrf.mxu2 }
0x13a6   :  { %v5308_v14 = vpop.f32.mrf.mxu0 }
0x13a7   :  { %v5374_v32 = vadd.f32 %v5373_v38, %v5308_v14  ;;  %v5490_v38 = vadd.f32 %v5468_v23, %v5371_v58 }
0x13a8   :  { %v5471_v20 = vpop.f32.mrf.mxu2 }
0x13a9   :  { %v5491_v33 = vadd.f32 %v5471_v20, %v5374_v32  ;;  %v5546_v17 = vadd.f32 %v5513_v9, %v5490_v38 }
0x13ab   :  { %v5547_v40 = vadd.f32 %v5518_v7, %v5491_v33  ;;  %v6030_v33 = vld [vmem:[%s12192_s11 + $0x30] sm:$0xff]  ;;  %v6029_v7 = vld [vmem:[%s12192_s11 + $0x28] sm:$0xff] }
0x13ad   :  { %v5555_v45 = vmax.f32 %v5547_v40, 0.0  ;;  %v6026_v40 = vld [vmem:[%s12192_s11 + $0x10] sm:$0xff] }
0x13ae   :  { %v5311_v24 = vpop.f32.mrf.mxu0 }
0x13af   :  { %v5377_v34 = vadd.f32 %v5376_v43, %v5311_v24  ;;  %v5554_v43 = vmax.f32 %v5546_v17, 0.0  ;;  %v5627_v17 = vld [vmem:[#allocation12 + $0x48] sm:$0xff] }
0x13b0   :  { %v5474_v27 = vpop.f32.mrf.mxu2 }
0x13b1   :  { %v5492_v37 = vadd.f32 %v5474_v27, %v5377_v34 }
0x13b3   :  { %v5548_v0 = vadd.f32 %v5523_v42, %v5492_v37  ;;  %v5609_v37 = vld [vmem:[#allocation12] sm:$0xff]  ;;  %v5610_v42 = vld [vmem:[#allocation12 + $0x8] sm:$0xff] }
0x13b5   :  { %v5556_v63 = vmax.f32 %v5548_v0, 0.0 }
0x13b6   :  { %v5314_v48 = vpop.f32.mrf.mxu0 }
0x13b7   :  { %v5380_v19 = vadd.f32 %v5379_v25, %v5314_v48 }
0x13b8   :  { %v5477_v6 = vpop.f32.mrf.mxu2 }
0x13b9   :  { %v5493_v22 = vadd.f32 %v5477_v6, %v5380_v19 }
0x13bb   :  { %v5549_v59 = vadd.f32 %v5528_v4, %v5493_v22 }
0x13bd   :  { %v5557_v2 = vmax.f32 %v5549_v59, 0.0  ;;  %v5626_v59 = vld [vmem:[#allocation12 + $0x40] sm:$0xff] }
0x13be   :  { %v5317_v26 = vpop.f32.mrf.mxu0 }
0x13bf   :  { %v5383_v31 = vadd.f32 %v5382_v10, %v5317_v26 }
0x13c0   :  { %v5480_v61 = vpop.f32.mrf.mxu2 }
0x13c1   :  { %v5494_v35 = vadd.f32 %v5480_v61, %v5383_v31 }
0x13c3   :  { %v5550_v29 = vadd.f32 %v5533_v11, %v5494_v35 }
0x13c5   :  { %v5558_v56 = vmax.f32 %v5550_v29, 0.0 }
0x13c6   :  { %v5320_v30 = vpop.f32.mrf.mxu0 }
0x13c7   :  { %v5386_v39 = vadd.f32 %v5385_v36, %v5320_v30  ;;  %5579 = vrot.lane.b32.xlu2 %v5558_v56, %s10190_s13  ;;  %v6028_v56 = vld [vmem:[%s12192_s11 + $0x20] sm:$0xff]  ;;  %v6027_v30 = vld [vmem:[%s12192_s11 + $0x18] sm:$0xff] }
0x13c8   :  { %v5483_v16 = vpop.f32.mrf.mxu2 }
0x13c9   :  { %v5495_v44 = vadd.f32 %v5483_v16, %v5386_v39  ;;  %v6025_v39 = vld [vmem:[%s12192_s11 + $0x8] sm:$0xff]  ;;  %v6024_v16 = vld [vmem:[%s12192_s11] sm:$0xff] }
0x13cb   :  { %v5551_v12 = vadd.f32 %v5538_v28, %v5495_v44  ;;  %v6031_v28 = vld [vmem:[%s12192_s11 + $0x38] sm:$0xff] }
0x13cd   :  { %v5559_v55 = vmax.f32 %v5551_v12, 0.0 }
0x13ce   :  { %v5323_v60 = vpop.f32.mrf.mxu0 }
0x13cf   :  { %v5389_v49 = vadd.f32 %v5388_v52, %v5323_v60  ;;  %5573 = vrot.lane.b32.xlu2 %v5555_v45, %s10190_s13  ;;  %5581 = vrot.lane.b32.xlu0 %v5559_v55, %s10190_s13 }
0x13d0   :  { %v5486_v41 = vpop.f32.mrf.mxu2 }
0x13d1   :  { %v5496_v62 = vadd.f32 %v5486_v41, %v5389_v49 }
0x13d3   :  { %v5552_v13 = vadd.f32 %v5543_v51, %v5496_v62  ;;  %v5611_v62 = vld [vmem:[#allocation12 + $0x10] sm:$0xff] }
0x13d5   :  { %v5560_v3 = vmax.f32 %v5552_v13, 0.0 }
0x13d7   :  { %5575 = vrot.lane.b32.xlu0 %v5556_v63, %s10190_s13  ;;  %5583 = vrot.lane.b32.xlu1 %v5560_v3, %s10190_s13 }
0x13df   :  { %5569 = vrot.lane.b32.xlu0 %v5553_v1, %s10190_s13  ;;  %5577 = vrot.lane.b32.xlu1 %v5557_v2, %s10190_s13  ;;  %v5613_v2 = vld [vmem:[#allocation12 + $0x20] sm:$0xff] }
0x13e7   :  { %5571 = vrot.lane.b32.xlu1 %v5554_v43, %s10190_s13  ;;  %v5797_v43 = vld [vmem:[#allocation12 + $0x80] sm:$0xff] }
0x1421   :  { %v5580_v14 = vpop.permute.xlu2 %5579 }
0x1422   :  { %5598 = vst.msk [vmem:[#allocation3 + $0x78] sm:$0xff] %vm5186_vm10, %v5580_v14  ;;  %v5628_v14 = vld [vmem:[#allocation12 + $0x50] sm:$0xff] }
0x1423   :  { %5606 = vst.msk [vmem:[#allocation3 + $0x78] sm:$0xff] %vm5195_vm11, %v11517_v54 }
0x1429   :  { %v5574_v8 = vpop.permute.xlu2 %5573 }
0x142a   :  { %5595 = vst.msk [vmem:[#allocation3 + $0x30] sm:$0xff] %vm5186_vm10, %v5574_v8  ;;  %v5622_v31 = vld [vmem:[#allocation3 + $0x78] sm:$0xff]  ;;  %v5798_v8 = vld [vmem:[#allocation12 + $0x88] sm:$0xff] }
0x142b   :  { %5603 = vst.msk [vmem:[#allocation3 + $0x30] sm:$0xff] %vm5195_vm11, %v11517_v54 }
0x1432   :  { %v5619_v24 = vld [vmem:[#allocation3 + $0x30] sm:$0xff] }
0x1441   :  { %v5582_v21 = vpop.permute.xlu0 %5581 }
0x1442   :  { %5599 = vst.msk [vmem:[#allocation3 + $0x90] sm:$0xff] %vm5186_vm10, %v5582_v21  ;;  %v5799_v21 = vld [vmem:[#allocation12 + $0x90] sm:$0xff] }
0x1443   :  { %5607 = vst.msk [vmem:[#allocation3 + $0x90] sm:$0xff] %vm5195_vm11, %v11517_v54 }
0x1449   :  { %v5576_v23 = vpop.permute.xlu0 %5575  ;;  %v5584_v20 = vpop.permute.xlu1 %5583 }
0x144a   :  { %5596 = vst.msk [vmem:[#allocation3 + $0x48] sm:$0xff] %vm5186_vm10, %v5576_v23  ;;  %v5623_v6 = vld [vmem:[#allocation3 + $0x90] sm:$0xff]  ;;  %v5630_v23 = vld [vmem:[#allocation12 + $0x60] sm:$0xff] }
0x144b   :  { %5604 = vst.msk [vmem:[#allocation3 + $0x48] sm:$0xff] %vm5195_vm11, %v11517_v54 }
0x144c   :  { %5600 = vst.msk [vmem:[#allocation3 + $0xa8] sm:$0xff] %vm5186_vm10, %v5584_v20  ;;  %v5800_v20 = vld [vmem:[#allocation12 + $0x98] sm:$0xff] }
0x144d   :  { %5608 = vst.msk [vmem:[#allocation3 + $0xa8] sm:$0xff] %vm5195_vm11, %v11517_v54 }
0x1451   :  { %v5570_v25 = vpop.permute.xlu0 %5569  ;;  %v5578_v27 = vpop.permute.xlu1 %5577 }
0x1452   :  { %5593 = vst.msk [vmem:[#allocation3] sm:$0xff] %vm5186_vm10, %v5570_v25  ;;  %v5620_v48 = vld [vmem:[#allocation3 + $0x48] sm:$0xff]  ;;  %v5801_v25 = vld [vmem:[#allocation12 + $0xa0] sm:$0xff] }
0x1453   :  { %5601 = vst.msk [vmem:[#allocation3] sm:$0xff] %vm5195_vm11, %v11517_v54  ;;  %v9597_v10 = vpack.i.bf16 %v5619_v24, %v5620_v48 }
0x1454   :  { %5597 = vst.msk [vmem:[#allocation3 + $0x60] sm:$0xff] %vm5186_vm10, %v5578_v27  ;;  %v5624_v11 = vld [vmem:[#allocation3 + $0xa8] sm:$0xff]  ;;  %v5632_v27 = vld [vmem:[#allocation12 + $0x70] sm:$0xff] }
0x1455   :  { %5605 = vst.msk [vmem:[#allocation3 + $0x60] sm:$0xff] %vm5195_vm11, %v11517_v54  ;;  %9598 = vrot.lane.b32.xlu0 %v9597_v10, %s10183_s7  ;;  %v9617_v26 = vpack.i.bf16 %v5623_v6, %v5624_v11  ;;  %5763 = vmatpush.msra.mxu0 %v5624_v11  ;;  %v5804_v11 = vld [vmem:[#allocation12 + $0xb8] sm:$0xff] }
0x1457   :  { %9618 = vrot.lane.b32.xlu2 %v9617_v26, %s10183_s7  ;;  %5764 = vmatpush.msra.mxu0 %v5623_v6  ;;  %v5633_v6 = vld [vmem:[#allocation12 + $0x78] sm:$0xff] }
0x1459   :  { %v5572_v61 = vpop.permute.xlu1 %5571  ;;  %5765 = vmatpush.msra.mxu0 %v5622_v31 }
0x145a   :  { %5594 = vst.msk [vmem:[#allocation3 + $0x18] sm:$0xff] %vm5186_vm10, %v5572_v61  ;;  %v5617_v36 = vld [vmem:[#allocation3] sm:$0xff] }
0x145b   :  { %5602 = vst.msk [vmem:[#allocation3 + $0x18] sm:$0xff] %vm5195_vm11, %v11517_v54 }
0x145c   :  { %v5621_v32 = vld [vmem:[#allocation3 + $0x60] sm:$0xff] }
0x145d   :  { %v9612_v35 = vpack.i.bf16 %v5621_v32, %v5622_v31  ;;  %5766 = vmatpush.msra.mxu0 %v5621_v32 }
0x145f   :  { %9623 = vrot.lane.b32.xlu2 %v9617_v26, %s10182_s5  ;;  %9613 = vrot.lane.b32.xlu0 %v9612_v35, %s10182_s5 }
0x1460   :  { %9603 = vrot.lane.b32.xlu1 %v9612_v35, %s10183_s7  ;;  %5767 = vmatpush.msra.mxu0 %v5620_v48  ;;  %v5802_v48 = vld [vmem:[#allocation12 + $0xa8] sm:$0xff] }
0x1462   :  { %v5618_v29 = vld [vmem:[#allocation3 + $0x18] sm:$0xff]  ;;  %5768 = vmatpush.msra.mxu0 %v5619_v24  ;;  %v5631_v24 = vld [vmem:[#allocation12 + $0x68] sm:$0xff] }
0x1463   :  { %v9607_v54 = vpack.i.bf16 %v5617_v36, %v5618_v29 }
0x1464   :  { %5769 = vmatpush.msra.mxu0 %v5618_v29 }
0x1466   :  { %5770 = vmatpush.msra.mxu0 %v5617_v36 }
0x1467   :  { %9628 = vrot.lane.b32.xlu2 %v9597_v10, %s10182_s5  ;;  %6069 = vperm.xlu0 %9096, %v6031_v28   ;;  %v5803_v10 = vld [vmem:[#allocation12 + $0xb0] sm:$0xff] }
0x1468   :  { %9608 = vrot.lane.b32.xlu1 %v9607_v54, %s10183_s7  ;;  %8772 = vmatmul.msk.f32.vlgmr.msra.gmra.mxu0 %vm4511_vm9, %v5609_v37 }
0x146f   :  { %6064 = vperm.xlu2 %9005, %v6030_v33   ;;  %6054 = vperm.xlu0 %9096, %v6028_v56  }
0x1470   :  { %9633 = vrot.lane.b32.xlu1 %v9607_v54, %s10182_s5  ;;  %8773 = vmatmul.msk.f32.gmra.mxu0 %vm4511_vm9, %v5610_v42 }
0x1477   :  { %6049 = vperm.xlu2 %9005, %v6027_v30   ;;  %6039 = vperm.xlu0 %9096, %v6025_v39  }
0x1478   :  { %6059 = vperm.xlu1 %9004, %v6029_v7   ;;  %8774 = vmatmul.msk.f32.gmra.mxu0 %vm4511_vm9, %v5611_v62 }
0x147f   :  { %6034 = vperm.xlu2 %9005, %v6024_v16  }
0x1480   :  { %6044 = vperm.xlu1 %9004, %v6026_v40   ;;  %8775 = vmatmul.msk.f32.gmra.mxu0 %vm4511_vm9, %v5612_v57 }
0x1488   :  { %8776 = vmatmul.msk.f32.gmra.mxu0 %vm4511_vm9, %v5613_v2 }
0x14b1   :  { %v9619_v34 = vpop.permute.xlu2 %9618 }
0x14b2   :  { %v9621_v44 = vunpack.i.h.bf16 %v9619_v34  ;;  %v9620_v12 = vunpack.i.l.bf16 %v9619_v34 }
0x14b4   :  { %5698 = vmatpush.msrb.mxu3 %v9620_v12 }
0x14b6   :  { %5699 = vmatpush.msrb.mxu3 %v9621_v44 }
0x14b9   :  { %v9624_v51 = vpop.permute.xlu2 %9623 }
0x14ba   :  { %v9626_v52 = vunpack.i.h.bf16 %v9624_v51  ;;  %v9625_v45 = vunpack.i.l.bf16 %v9624_v51 }
0x14bc   :  { %5861 = vmatpush.msra.mxu1 %v9625_v45 }
0x14be   :  { %5862 = vmatpush.msra.mxu1 %v9626_v52 }
0x14c1   :  { %v9629_v0 = vpop.permute.xlu2 %9628 }
0x14c2   :  { %v9630_v13 = vunpack.i.l.bf16 %v9629_v0  ;;  %v9631_v63 = vunpack.i.h.bf16 %v9629_v0 }
0x14c7   :  { %v9599_v55 = vpop.permute.xlu0 %9598 }
0x14c8   :  { %v9600_v22 = vunpack.i.l.bf16 %v9599_v55  ;;  %v9601_v3 = vunpack.i.h.bf16 %v9599_v55 }
0x14d1   :  { %v9614_v60 = vpop.permute.xlu0 %9613 }
0x14d2   :  { %v9616_v49 = vunpack.i.h.bf16 %v9614_v60  ;;  %v9615_v41 = vunpack.i.l.bf16 %v9614_v60  ;;  %v9604_v53 = vpop.permute.xlu1 %9603 }
0x14d3   :  { %v9605_v19 = vunpack.i.l.bf16 %v9604_v53  ;;  %v9606_v50 = vunpack.i.h.bf16 %v9604_v53 }
0x14d4   :  { %5863 = vmatpush.msra.mxu1 %v9615_v41 }
0x14d5   :  { %5700 = vmatpush.msrb.mxu3 %v9605_v19 }
0x14d6   :  { %5864 = vmatpush.msra.mxu1 %v9616_v49 }
0x14d7   :  { %5701 = vmatpush.msrb.mxu3 %v9606_v50 }
0x14d8   :  { %5865 = vmatpush.msra.mxu1 %v9630_v13 }
0x14d9   :  { %5702 = vmatpush.msrb.mxu3 %v9600_v22 }
0x14da   :  { %v9609_v4 = vpop.permute.xlu1 %9608  ;;  %5866 = vmatpush.msra.mxu1 %v9631_v63 }
0x14db   :  { %v9610_v5 = vunpack.i.l.bf16 %v9609_v4  ;;  %5703 = vmatpush.msrb.mxu3 %v9601_v3  ;;  %v9611_v58 = vunpack.i.h.bf16 %v9609_v4 }
0x14dd   :  { %5704 = vmatpush.msrb.mxu3 %v9610_v5 }
0x14df   :  { %5705 = vmatpush.msrb.mxu3 %v9611_v58 }
0x14e0   :  { %8764 = vmatmul.msk.f32.vlgmr.msrb.gmra.mxu3 %vm4511_vm9, %v5626_v59 }
0x14e1   :  { %5987 = vmatpush.msra.mxu3 %v11463_v18  ;;  %v5614_v18 = vld [vmem:[#allocation12 + $0x28] sm:$0xff] }
0x14e2   :  { %v9634_v1 = vpop.permute.xlu1 %9633  ;;  %8777 = vmatmul.msk.f32.gmra.mxu0 %vm4511_vm9, %v5614_v18 }
0x14e3   :  { %v9635_v38 = vunpack.i.l.bf16 %v9634_v1  ;;  %5988 = vmatpush.msra.mxu3 %v11470_v15  ;;  %v9636_v9 = vunpack.i.h.bf16 %v9634_v1  ;;  %v5615_v15 = vld [vmem:[#allocation12 + $0x30] sm:$0xff] }
0x14e5   :  { %5867 = vmatpush.msra.mxu1 %v9635_v38  ;;  %5989 = vmatpush.msra.mxu3 %v11477_v47  ;;  %v5629_v47 = vld [vmem:[#allocation12 + $0x58] sm:$0xff]  ;;  %v5772_v26 = vpop.f32.mrf.mxu0 }
0x14e7   :  { %5868 = vmatpush.msra.mxu1 %v9636_v9  ;;  %5990 = vmatpush.msra.mxu3 %v11484_v46  ;;  %v5616_v46 = vld [vmem:[#allocation12 + $0x38] sm:$0xff] }
0x14e8   :  { %8765 = vmatmul.msk.f32.gmra.mxu3 %vm4511_vm9, %v5627_v17  ;;  %8780 = vmatmul.msk.f32.vlgmr.msra.gmra.mxu1 %vm4511_vm9, %v5797_v43 }
0x14ea   :  { %8778 = vmatmul.msk.f32.gmra.mxu0 %vm4511_vm9, %v5615_v15 }
0x14ed   :  { %v5775_v31 = vpop.f32.mrf.mxu0 }
0x14f0   :  { %8766 = vmatmul.msk.f32.gmra.mxu3 %vm4511_vm9, %v5628_v14  ;;  %8781 = vmatmul.msk.f32.gmra.mxu1 %vm4511_vm9, %v5798_v8  ;;  %v6060_v8 = vpop.permute.xlu1 %6059 }
0x14f2   :  { %8779 = vmatmul.msk.f32.gmra.mxu0 %vm4511_vm9, %v5616_v46 }
0x14f5   :  { %v5778_v29 = vpop.f32.mrf.mxu0 }
0x14f8   :  { %8767 = vmatmul.msk.f32.gmra.mxu3 %vm4511_vm9, %v5629_v47  ;;  %8782 = vmatmul.msk.f32.gmra.mxu1 %vm4511_vm9, %v5799_v21 }
0x14fd   :  { %v5781_v30 = vpop.f32.mrf.mxu0 }
0x1500   :  { %8768 = vmatmul.msk.f32.gmra.mxu3 %vm4511_vm9, %v5630_v23  ;;  %8783 = vmatmul.msk.f32.gmra.mxu1 %vm4511_vm9, %v5800_v20  ;;  %v6065_v23 = vpop.permute.xlu2 %6064 }
0x1505   :  { %v5784_v44 = vpop.f32.mrf.mxu0 }
0x1508   :  { %8769 = vmatmul.msk.f32.gmra.mxu3 %vm4511_vm9, %v5631_v24  ;;  %8784 = vmatmul.msk.f32.gmra.mxu1 %vm4511_vm9, %v5801_v25  ;;  %v6045_v25 = vpop.permute.xlu1 %6044 }
0x1510   :  { %8770 = vmatmul.msk.f32.gmra.mxu3 %vm4511_vm9, %v5632_v27  ;;  %8785 = vmatmul.msk.f32.gmra.mxu1 %vm4511_vm9, %v5802_v48 }
0x1518   :  { %8771 = vmatmul.msk.f32.gmra.mxu3 %vm4511_vm9, %v5633_v6  ;;  %8786 = vmatmul.msk.f32.gmra.mxu1 %vm4511_vm9, %v5803_v10 }
0x1520   :  { %8787 = vmatmul.msk.f32.gmra.mxu1 %vm4511_vm9, %v5804_v11 }
0x155f   :  { %v5787_v42 = vpop.f32.mrf.mxu0 }
0x1563   :  { %v5707_v61 = vpop.f32.mrf.mxu3 }
0x1564   :  { %v5773_v32 = vadd.f32 %v5772_v26, %v5707_v61  ;;  %v6070_v26 = vpop.permute.xlu0 %6069 }
0x1565   :  { %v5870_v35 = vpop.f32.mrf.mxu1 }
0x1566   :  { %v5894_v36 = vadd.f32 %v5870_v35, %v5773_v32  ;;  %v6050_v35 = vpop.permute.xlu2 %6049 }
0x1567   :  { %v5790_v19 = vpop.f32.mrf.mxu0 }
0x1568   :  { %8788 = vmatmul.msk.f32.vlgmr.msra.gmra.mxu2 %vm2221_vm6, %v5894_v36  ;;  %8796 = vmatmul.msk.f32.vlgmr.msra.gmra.mxu3 %vm2221_vm6, %v5894_v36 }
0x156b   :  { %v5710_v28 = vpop.f32.mrf.mxu3 }
0x156c   :  { %v5776_v54 = vadd.f32 %v5775_v31, %v5710_v28 }
0x156d   :  { %v5873_v33 = vpop.f32.mrf.mxu1 }
0x156e   :  { %v5895_v56 = vadd.f32 %v5873_v33, %v5776_v54 }
0x156f   :  { %v5793_v22 = vpop.f32.mrf.mxu0 }
0x1570   :  { %8789 = vmatmul.msk.f32.gmra.mxu2 %vm2221_vm6, %v5895_v56  ;;  %8797 = vmatmul.msk.f32.gmra.mxu3 %vm2221_vm6, %v5895_v56 }
0x1573   :  { %v5713_v39 = vpop.f32.mrf.mxu3 }
0x1574   :  { %v5779_v7 = vadd.f32 %v5778_v29, %v5713_v39 }
0x1575   :  { %v5876_v16 = vpop.f32.mrf.mxu1 }
0x1576   :  { %v5896_v40 = vadd.f32 %v5876_v16, %v5779_v7  ;;  %v6055_v16 = vpop.permute.xlu0 %6054 }
0x1578   :  { %8790 = vmatmul.msk.f32.gmra.mxu2 %vm2221_vm6, %v5896_v40  ;;  %8798 = vmatmul.msk.f32.gmra.mxu3 %vm2221_vm6, %v5896_v40  ;;  %v6035_v40 = vpop.permute.xlu2 %6034 }
0x157b   :  { %v5716_v34 = vpop.f32.mrf.mxu3 }
0x157c   :  { %v5782_v12 = vadd.f32 %v5781_v30, %v5716_v34 }
0x157d   :  { %v5879_v51 = vpop.f32.mrf.mxu1 }
0x157e   :  { %v5897_v52 = vadd.f32 %v5879_v51, %v5782_v12 }
0x1580   :  { %8791 = vmatmul.msk.f32.gmra.mxu2 %vm2221_vm6, %v5897_v52  ;;  %8799 = vmatmul.msk.f32.gmra.mxu3 %vm2221_vm6, %v5897_v52 }
0x1583   :  { %v5719_v45 = vpop.f32.mrf.mxu3 }
0x1584   :  { %v5785_v37 = vadd.f32 %v5784_v44, %v5719_v45  ;;  %v6040_v45 = vpop.permute.xlu0 %6039 }
0x1585   :  { %v5882_v55 = vpop.f32.mrf.mxu1 }
0x1586   :  { %v5898_v60 = vadd.f32 %v5882_v55, %v5785_v37 }
0x1588   :  { %8792 = vmatmul.msk.f32.gmra.mxu2 %vm2221_vm6, %v5898_v60  ;;  %8800 = vmatmul.msk.f32.gmra.mxu3 %vm2221_vm6, %v5898_v60  ;;  %v11687_v60 = vld [vmem:[#allocation2 + $0x40] sm:$0xff] }
0x158b   :  { %v5722_v49 = vpop.f32.mrf.mxu3 }
0x158c   :  { %v5788_v41 = vadd.f32 %v5787_v42, %v5722_v49 }
0x158d   :  { %v5885_v53 = vpop.f32.mrf.mxu1 }
0x158e   :  { %v5899_v0 = vadd.f32 %v5885_v53, %v5788_v41 }
0x1590   :  { %8793 = vmatmul.msk.f32.gmra.mxu2 %vm2221_vm6, %v5899_v0  ;;  %8801 = vmatmul.msk.f32.gmra.mxu3 %vm2221_vm6, %v5899_v0 }
0x1593   :  { %v5725_v62 = vpop.f32.mrf.mxu3 }
0x1594   :  { %v5791_v13 = vadd.f32 %v5790_v19, %v5725_v62 }
0x1595   :  { %v5888_v50 = vpop.f32.mrf.mxu1 }
0x1596   :  { %v5900_v63 = vadd.f32 %v5888_v50, %v5791_v13 }
0x1598   :  { %8794 = vmatmul.msk.f32.gmra.mxu2 %vm2221_vm6, %v5900_v63  ;;  %8802 = vmatmul.msk.f32.gmra.mxu3 %vm2221_vm6, %v5900_v63 }
0x159b   :  { %v5728_v3 = vpop.f32.mrf.mxu3 }
0x159c   :  { %v5794_v4 = vadd.f32 %v5793_v22, %v5728_v3 }
0x159d   :  { %v5891_v5 = vpop.f32.mrf.mxu1 }
0x159e   :  { %v5901_v57 = vadd.f32 %v5891_v5, %v5794_v4 }
0x15a0   :  { %8795 = vmatmul.msk.f32.gmra.mxu2 %vm2221_vm6, %v5901_v57  ;;  %8803 = vmatmul.msk.f32.gmra.mxu3 %vm2221_vm6, %v5901_v57 }
0x15eb   :  { %v5951_v58 = vpop.f32.mrf.mxu2  ;;  %v5992_v59 = vpop.f32.mrf.mxu3 }
0x15ec   :  { %v6016_v56 = vmax.f32 %v5951_v58, %v5992_v59 }
0x15ee   :  { %v6072_v34 = vadd.f32 %v6035_v40, %v6016_v56 }
0x15f0   :  { %v6080_v12 = vmax.f32 %v6072_v34, 0.0  ;;  %v6326_v34 = vld [vmem:[#allocation14 + $0x80] sm:$0xff] }
0x15f3   :  { %v5954_v1 = vpop.f32.mrf.mxu2  ;;  %v5995_v38 = vpop.f32.mrf.mxu3 }
0x15f4   :  { %v6017_v51 = vmax.f32 %v5954_v1, %v5995_v38 }
0x15f6   :  { %v6073_v37 = vadd.f32 %v6040_v45, %v6017_v51  ;;  %v6142_v51 = vld [vmem:[#allocation14 + $0x20] sm:$0xff]  ;;  %v6156_v45 = vld [vmem:[#allocation14 + $0x48] sm:$0xff] }
0x15f8   :  { %v6081_v55 = vmax.f32 %v6073_v37, 0.0  ;;  %v6143_v37 = vld [vmem:[#allocation14 + $0x28] sm:$0xff] }
0x15fb   :  { %v5957_v2 = vpop.f32.mrf.mxu2  ;;  %v5998_v9 = vpop.f32.mrf.mxu3 }
0x15fc   :  { %v6018_v20 = vmax.f32 %v5957_v2, %v5998_v9  ;;  %v6436_v9 = vld [vmem:[%s12193_s15 + $0x28] sm:$0xff] }
0x15fe   :  { %v6074_v6 = vadd.f32 %v6045_v25, %v6018_v20  ;;  %v6138_v20 = vld [vmem:[#allocation14] sm:$0xff] }
0x1600   :  { %v6082_v31 = vmax.f32 %v6074_v6, 0.0  ;;  %v6139_v6 = vld [vmem:[#allocation14 + $0x8] sm:$0xff] }
0x1603   :  { %v5960_v17 = vpop.f32.mrf.mxu2  ;;  %v6001_v43 = vpop.f32.mrf.mxu3 }
0x1604   :  { %v6019_v61 = vmax.f32 %v5960_v17, %v6001_v43  ;;  %v6437_v17 = vld [vmem:[%s12193_s15 + $0x30] sm:$0xff]  ;;  %v6438_v43 = vld [vmem:[%s12193_s15 + $0x38] sm:$0xff] }
0x1606   :  { %v6075_v28 = vadd.f32 %v6050_v35, %v6019_v61 }
0x1608   :  { %v6083_v30 = vmax.f32 %v6075_v28, 0.0 }
0x160b   :  { %v5963_v18 = vpop.f32.mrf.mxu2  ;;  %v6004_v14 = vpop.f32.mrf.mxu3 }
0x160c   :  { %v6020_v39 = vmax.f32 %v5963_v18, %v6004_v14  ;;  %v6433_v18 = vld [vmem:[%s12193_s15 + $0x10] sm:$0xff]  ;;  %v6434_v14 = vld [vmem:[%s12193_s15 + $0x18] sm:$0xff] }
0x160e   :  { %v6076_v44 = vadd.f32 %v6055_v16, %v6020_v39 }
0x1610   :  { %v6084_v52 = vmax.f32 %v6076_v44, 0.0 }
0x1613   :  { %v5966_v15 = vpop.f32.mrf.mxu2  ;;  %v6007_v47 = vpop.f32.mrf.mxu3 }
0x1614   :  { %v6021_v21 = vmax.f32 %v5966_v15, %v6007_v47  ;;  %v6431_v15 = vld [vmem:[%s12193_s15] sm:$0xff]  ;;  %v6432_v47 = vld [vmem:[%s12193_s15 + $0x8] sm:$0xff] }
0x1616   :  { %v6077_v46 = vadd.f32 %v6060_v8, %v6021_v21  ;;  %v6435_v8 = vld [vmem:[%s12193_s15 + $0x20] sm:$0xff] }
0x1618   :  { %v6085_v24 = vmax.f32 %v6077_v46, 0.0 }
0x161a   :  { %6106 = vrot.lane.b32.xlu2 %v6085_v24, %s10190_s13 }
0x161b   :  { %v5969_v27 = vpop.f32.mrf.mxu2  ;;  %v6010_v48 = vpop.f32.mrf.mxu3 }
0x161c   :  { %v6022_v10 = vmax.f32 %v5969_v27, %v6010_v48 }
0x161e   :  { %v6078_v11 = vadd.f32 %v6065_v23, %v6022_v10 }
0x1620   :  { %v6086_v32 = vmax.f32 %v6078_v11, 0.0 }
0x1622   :  { %6100 = vrot.lane.b32.xlu2 %v6082_v31, %s10190_s13  ;;  %6108 = vrot.lane.b32.xlu0 %v6086_v32, %s10190_s13  ;;  %v6140_v32 = vld [vmem:[#allocation14 + $0x10] sm:$0xff] }
0x1623   :  { %v5972_v36 = vpop.f32.mrf.mxu2  ;;  %v6013_v29 = vpop.f32.mrf.mxu3 }
0x1624   :  { %v6023_v54 = vmax.f32 %v5972_v36, %v6013_v29 }
0x1626   :  { %v6079_v33 = vadd.f32 %v6070_v26, %v6023_v54 }
0x1628   :  { %v6087_v7 = vmax.f32 %v6079_v33, 0.0 }
0x162a   :  { %6102 = vrot.lane.b32.xlu0 %v6083_v30, %s10190_s13  ;;  %6110 = vrot.lane.b32.xlu1 %v6087_v7, %s10190_s13  ;;  %v6141_v30 = vld [vmem:[#allocation14 + $0x18] sm:$0xff] }
0x1632   :  { %6096 = vrot.lane.b32.xlu0 %v6080_v12, %s10190_s13  ;;  %6104 = vrot.lane.b32.xlu1 %v6084_v52, %s10190_s13  ;;  %v6155_v12 = vld [vmem:[#allocation14 + $0x40] sm:$0xff]  ;;  %v6327_v52 = vld [vmem:[#allocation14 + $0x88] sm:$0xff] }
0x163a   :  { %6098 = vrot.lane.b32.xlu1 %v6081_v55, %s10190_s13  ;;  %v6328_v55 = vld [vmem:[#allocation14 + $0x90] sm:$0xff] }
0x1674   :  { %v6107_v42 = vpop.permute.xlu2 %6106 }
0x1675   :  { %6126 = vst.msk [vmem:[#allocation2 + $0x78] sm:$0xff] %vm6120_vm12, %v6107_v42  ;;  %v6157_v42 = vld [vmem:[#allocation14 + $0x50] sm:$0xff] }
0x1676   :  { %6135 = vst.msk [vmem:[#allocation2 + $0x78] sm:$0xff] %vm6129_vm13, %v11687_v60 }
0x167c   :  { %v6101_v49 = vpop.permute.xlu2 %6100 }
0x167d   :  { %6123 = vst.msk [vmem:[#allocation2 + $0x30] sm:$0xff] %vm6120_vm12, %v6101_v49  ;;  %v6151_v5 = vld [vmem:[#allocation2 + $0x78] sm:$0xff]  ;;  %v6144_v49 = vld [vmem:[#allocation14 + $0x30] sm:$0xff] }
0x167e   :  { %6132 = vst.msk [vmem:[#allocation2 + $0x30] sm:$0xff] %vm6129_vm13, %v11687_v60 }
0x1685   :  { %v6148_v22 = vld [vmem:[#allocation2 + $0x30] sm:$0xff] }
0x1694   :  { %v6109_v41 = vpop.permute.xlu0 %6108 }
0x1695   :  { %6127 = vst.msk [vmem:[#allocation2 + $0x90] sm:$0xff] %vm6120_vm12, %v6109_v41  ;;  %v6329_v41 = vld [vmem:[#allocation14 + $0x98] sm:$0xff] }
0x1696   :  { %6136 = vst.msk [vmem:[#allocation2 + $0x90] sm:$0xff] %vm6129_vm13, %v11687_v60 }
0x169c   :  { %v6103_v53 = vpop.permute.xlu0 %6102  ;;  %v6111_v0 = vpop.permute.xlu1 %6110 }
0x169d   :  { %6124 = vst.msk [vmem:[#allocation2 + $0x48] sm:$0xff] %vm6120_vm12, %v6103_v53  ;;  %v6152_v13 = vld [vmem:[#allocation2 + $0x90] sm:$0xff]  ;;  %v6158_v53 = vld [vmem:[#allocation14 + $0x58] sm:$0xff] }
0x169e   :  { %6133 = vst.msk [vmem:[#allocation2 + $0x48] sm:$0xff] %vm6129_vm13, %v11687_v60 }
0x169f   :  { %6128 = vst.msk [vmem:[#allocation2 + $0xa8] sm:$0xff] %vm6120_vm12, %v6111_v0  ;;  %v6145_v0 = vld [vmem:[#allocation14 + $0x38] sm:$0xff] }
0x16a0   :  { %6137 = vst.msk [vmem:[#allocation2 + $0xa8] sm:$0xff] %vm6129_vm13, %v11687_v60 }
0x16a4   :  { %v6097_v19 = vpop.permute.xlu0 %6096  ;;  %v6105_v62 = vpop.permute.xlu1 %6104 }
0x16a5   :  { %6121 = vst.msk [vmem:[#allocation2] sm:$0xff] %vm6120_vm12, %v6097_v19  ;;  %v6149_v3 = vld [vmem:[#allocation2 + $0x48] sm:$0xff]  ;;  %v6330_v19 = vld [vmem:[#allocation14 + $0xa0] sm:$0xff] }
0x16a6   :  { %6130 = vst.msk [vmem:[#allocation2] sm:$0xff] %vm6129_vm13, %v11687_v60  ;;  %v9657_v57 = vpack.i.bf16 %v6148_v22, %v6149_v3 }
0x16a7   :  { %6125 = vst.msk [vmem:[#allocation2 + $0x60] sm:$0xff] %vm6120_vm12, %v6105_v62  ;;  %v6153_v50 = vld [vmem:[#allocation2 + $0xa8] sm:$0xff]  ;;  %v6159_v62 = vld [vmem:[#allocation14 + $0x60] sm:$0xff] }
0x16a8   :  { %6134 = vst.msk [vmem:[#allocation2 + $0x60] sm:$0xff] %vm6129_vm13, %v11687_v60  ;;  %v9652_v63 = vpack.i.bf16 %v6152_v13, %v6153_v50  ;;  %6292 = vmatpush.msrb.mxu1 %v6153_v50  ;;  %v6160_v50 = vld [vmem:[#allocation14 + $0x68] sm:$0xff] }
0x16aa   :  { %9653 = vrot.lane.b32.xlu1 %v9652_v63, %s10183_s7  ;;  %9643 = vrot.lane.b32.xlu2 %v9652_v63, %s10182_s5  ;;  %v6332_v63 = vld [vmem:[#allocation14 + $0xb0] sm:$0xff] }
0x16ab   :  { %6293 = vmatpush.msrb.mxu1 %v6152_v13  ;;  %v6331_v13 = vld [vmem:[#allocation14 + $0xa8] sm:$0xff] }
0x16ac   :  { %v6099_v4 = vpop.permute.xlu1 %6098 }
0x16ad   :  { %6122 = vst.msk [vmem:[#allocation2 + $0x18] sm:$0xff] %vm6120_vm12, %v6099_v4  ;;  %6294 = vmatpush.msrb.mxu1 %v6151_v5  ;;  %v6146_v1 = vld [vmem:[#allocation2] sm:$0xff]  ;;  %v6162_v4 = vld [vmem:[#allocation14 + $0x78] sm:$0xff] }
0x16ae   :  { %6131 = vst.msk [vmem:[#allocation2 + $0x18] sm:$0xff] %vm6129_vm13, %v11687_v60 }
0x16af   :  { %v6150_v58 = vld [vmem:[#allocation2 + $0x60] sm:$0xff] }
0x16b0   :  { %v9647_v59 = vpack.i.bf16 %v6150_v58, %v6151_v5  ;;  %6295 = vmatpush.msrb.mxu1 %v6150_v58 }
0x16b2   :  { %9658 = vrot.lane.b32.xlu1 %v9657_v57, %s10182_s5  ;;  %9648 = vrot.lane.b32.xlu2 %v9647_v59, %s10183_s7 }
0x16b3   :  { %9638 = vrot.lane.b32.xlu0 %v9647_v59, %s10182_s5  ;;  %6296 = vmatpush.msrb.mxu1 %v6149_v3  ;;  %v6333_v3 = vld [vmem:[#allocation14 + $0xb8] sm:$0xff] }
0x16b5   :  { %v6147_v38 = vld [vmem:[#allocation2 + $0x18] sm:$0xff]  ;;  %6297 = vmatpush.msrb.mxu1 %v6148_v22  ;;  %v6161_v22 = vld [vmem:[#allocation14 + $0x70] sm:$0xff] }
0x16b6   :  { %v9672_v2 = vpack.i.bf16 %v6146_v1, %v6147_v38 }
0x16b7   :  { %6298 = vmatpush.msrb.mxu1 %v6147_v38 }
0x16b9   :  { %6299 = vmatpush.msrb.mxu1 %v6146_v1 }
0x16ba   :  { %9673 = vrot.lane.b32.xlu1 %v9672_v2, %s10183_s7  ;;  %9668 = vrot.lane.b32.xlu2 %v9672_v2, %s10182_s5 }
0x16bb   :  { %9663 = vrot.lane.b32.xlu0 %v9657_v57, %s10183_s7  ;;  %8812 = vmatmul.msk.f32.vlgmr.msrb.gmra.mxu1 %vm4511_vm9, %v6138_v20 }
0x16c2   :  { %6466 = vperm.xlu1 %9004, %v6436_v9   ;;  %6471 = vperm.xlu2 %9005, %v6437_v17  }
0x16c3   :  { %6476 = vperm.xlu0 %9096, %v6438_v43   ;;  %8813 = vmatmul.msk.f32.gmra.mxu1 %vm4511_vm9, %v6139_v6 }
0x16ca   :  { %6451 = vperm.xlu1 %9004, %v6433_v18   ;;  %6456 = vperm.xlu2 %9005, %v6434_v14  }
0x16cb   :  { %6461 = vperm.xlu0 %9096, %v6435_v8   ;;  %8814 = vmatmul.msk.f32.gmra.mxu1 %vm4511_vm9, %v6140_v32 }
0x16d2   :  { %6441 = vperm.xlu2 %9005, %v6431_v15  }
0x16d3   :  { %6446 = vperm.xlu0 %9096, %v6432_v47   ;;  %8815 = vmatmul.msk.f32.gmra.mxu1 %vm4511_vm9, %v6141_v30 }
0x16db   :  { %8816 = vmatmul.msk.f32.gmra.mxu1 %vm4511_vm9, %v6142_v51 }
0x16e3   :  { %8817 = vmatmul.msk.f32.gmra.mxu1 %vm4511_vm9, %v6143_v37 }
0x16eb   :  { %8818 = vmatmul.msk.f32.gmra.mxu1 %vm4511_vm9, %v6144_v49 }
0x16f3   :  { %8819 = vmatmul.msk.f32.gmra.mxu1 %vm4511_vm9, %v6145_v0 }
0x1704   :  { %v9644_v21 = vpop.permute.xlu2 %9643 }
0x1705   :  { %v9646_v46 = vunpack.i.h.bf16 %v9644_v21  ;;  %v9645_v23 = vunpack.i.l.bf16 %v9644_v21 }
0x1707   :  { %6390 = vmatpush.msrb.mxu2 %v9645_v23 }
0x1709   :  { %6391 = vmatpush.msrb.mxu2 %v9646_v46 }
0x170c   :  { %v9649_v48 = vpop.permute.xlu2 %9648 }
0x170d   :  { %v9650_v10 = vunpack.i.l.bf16 %v9649_v48  ;;  %v9651_v11 = vunpack.i.h.bf16 %v9649_v48 }
0x1714   :  { %v9669_v29 = vpop.permute.xlu2 %9668 }
0x1715   :  { %v9670_v28 = vunpack.i.l.bf16 %v9669_v29  ;;  %v9671_v7 = vunpack.i.h.bf16 %v9669_v29 }
0x171c   :  { %v9654_v24 = vpop.permute.xlu1 %9653 }
0x171d   :  { %v9656_v25 = vunpack.i.h.bf16 %v9654_v24  ;;  %v9655_v27 = vunpack.i.l.bf16 %v9654_v24 }
0x171f   :  { %6227 = vmatpush.msrb.mxu0 %v9655_v27 }
0x1721   :  { %6228 = vmatpush.msrb.mxu0 %v9656_v25 }
0x1723   :  { %6229 = vmatpush.msrb.mxu0 %v9650_v10  ;;  %v6472_v10 = vpop.permute.xlu2 %6471 }
0x1724   :  { %v9659_v31 = vpop.permute.xlu1 %9658 }
0x1725   :  { %v9639_v26 = vpop.permute.xlu0 %9638  ;;  %6230 = vmatpush.msrb.mxu0 %v9651_v11  ;;  %v9660_v36 = vunpack.i.l.bf16 %v9659_v31  ;;  %v9661_v54 = vunpack.i.h.bf16 %v9659_v31 }
0x1726   :  { %v9640_v61 = vunpack.i.l.bf16 %v9639_v26  ;;  %v9641_v35 = vunpack.i.h.bf16 %v9639_v26 }
0x1728   :  { %6392 = vmatpush.msrb.mxu2 %v9640_v61 }
0x172a   :  { %6393 = vmatpush.msrb.mxu2 %v9641_v35 }
0x172c   :  { %6394 = vmatpush.msrb.mxu2 %v9660_v36  ;;  %v9674_v39 = vpop.permute.xlu1 %9673 }
0x172d   :  { %v9664_v33 = vpop.permute.xlu0 %9663  ;;  %v9675_v40 = vunpack.i.l.bf16 %v9674_v39  ;;  %v9676_v44 = vunpack.i.h.bf16 %v9674_v39 }
0x172e   :  { %v9665_v56 = vunpack.i.l.bf16 %v9664_v33  ;;  %6395 = vmatpush.msrb.mxu2 %v9661_v54  ;;  %v9666_v16 = vunpack.i.h.bf16 %v9664_v33 }
0x1730   :  { %6231 = vmatpush.msrb.mxu0 %v9665_v56  ;;  %6396 = vmatpush.msrb.mxu2 %v9670_v28 }
0x1732   :  { %6232 = vmatpush.msrb.mxu0 %v9666_v16  ;;  %6397 = vmatpush.msrb.mxu2 %v9671_v7  ;;  %v6457_v16 = vpop.permute.xlu2 %6456 }
0x1733   :  { %8820 = vmatmul.msk.f32.vlgmr.msrb.gmra.mxu2 %vm4511_vm9, %v6326_v34 }
0x1734   :  { %6233 = vmatpush.msrb.mxu0 %v9675_v40  ;;  %v6467_v46 = vpop.permute.xlu1 %6466 }
0x1735   :  { %v6477_v33 = vpop.permute.xlu0 %6476 }
0x1736   :  { %6234 = vmatpush.msrb.mxu0 %v9676_v44 }
0x1737   :  { %8804 = vmatmul.msk.f32.vlgmr.msrb.gmra.mxu0 %vm4511_vm9, %v6155_v12 }
0x1738   :  { %v6301_v5 = vpop.f32.mrf.mxu1 }
0x173a   :  { %v6442_v0 = vpop.permute.xlu2 %6441 }
0x173b   :  { %8821 = vmatmul.msk.f32.gmra.mxu2 %vm4511_vm9, %v6327_v52 }
0x173c   :  { %v6452_v32 = vpop.permute.xlu1 %6451 }
0x173f   :  { %8805 = vmatmul.msk.f32.gmra.mxu0 %vm4511_vm9, %v6156_v45 }
0x1740   :  { %v6304_v57 = vpop.f32.mrf.mxu1 }
0x1743   :  { %8822 = vmatmul.msk.f32.gmra.mxu2 %vm4511_vm9, %v6328_v55 }
0x1747   :  { %8806 = vmatmul.msk.f32.gmra.mxu0 %vm4511_vm9, %v6157_v42 }
0x1748   :  { %v6307_v1 = vpop.f32.mrf.mxu1 }
0x174b   :  { %8823 = vmatmul.msk.f32.gmra.mxu2 %vm4511_vm9, %v6329_v41 }
0x174f   :  { %8807 = vmatmul.msk.f32.gmra.mxu0 %vm4511_vm9, %v6158_v53  ;;  %v6462_v53 = vpop.permute.xlu0 %6461 }
0x1750   :  { %v6310_v9 = vpop.f32.mrf.mxu1 }
0x1753   :  { %8824 = vmatmul.msk.f32.gmra.mxu2 %vm4511_vm9, %v6330_v19 }
0x1757   :  { %8808 = vmatmul.msk.f32.gmra.mxu0 %vm4511_vm9, %v6159_v62 }
0x1758   :  { %v6313_v14 = vpop.f32.mrf.mxu1 }
0x175b   :  { %8825 = vmatmul.msk.f32.gmra.mxu2 %vm4511_vm9, %v6331_v13 }
0x175f   :  { %8809 = vmatmul.msk.f32.gmra.mxu0 %vm4511_vm9, %v6160_v50 }
0x1760   :  { %v6316_v21 = vpop.f32.mrf.mxu1 }
0x1763   :  { %8826 = vmatmul.msk.f32.gmra.mxu2 %vm4511_vm9, %v6332_v63 }
0x1767   :  { %8810 = vmatmul.msk.f32.gmra.mxu0 %vm4511_vm9, %v6161_v22 }
0x1768   :  { %v6319_v48 = vpop.f32.mrf.mxu1 }
0x176b   :  { %8827 = vmatmul.msk.f32.gmra.mxu2 %vm4511_vm9, %v6333_v3  ;;  %v6447_v3 = vpop.permute.xlu0 %6446 }
0x176f   :  { %8811 = vmatmul.msk.f32.gmra.mxu0 %vm4511_vm9, %v6162_v4 }
0x1770   :  { %v6322_v56 = vpop.f32.mrf.mxu1 }
0x17b4   :  { %v6236_v58 = vpop.f32.mrf.mxu0 }
0x17b5   :  { %v6302_v12 = vadd.f32 %v6301_v5, %v6236_v58 }
0x17b6   :  { %v6399_v59 = vpop.f32.mrf.mxu2 }
0x17b7   :  { %v6423_v55 = vadd.f32 %v6399_v59, %v6302_v12 }
0x17b9   :  { %v6479_v19 = vadd.f32 %v6442_v0, %v6423_v55 }
0x17bb   :  { %v6487_v50 = vmax.f32 %v6479_v19, 0.0 }
0x17bc   :  { %v6239_v38 = vpop.f32.mrf.mxu0 }
0x17bd   :  { %v6305_v62 = vadd.f32 %v6304_v57, %v6239_v38 }
0x17be   :  { %v6402_v2 = vpop.f32.mrf.mxu2 }
0x17bf   :  { %v6424_v63 = vadd.f32 %v6402_v2, %v6305_v62  ;;  %v6547_v62 = vld [vmem:[#allocation15 + $0x20] sm:$0xff] }
0x17c1   :  { %v6480_v4 = vadd.f32 %v6447_v3, %v6424_v63  ;;  %v6731_v63 = vld [vmem:[#allocation15 + $0x80] sm:$0xff]  ;;  %v6562_v3 = vld [vmem:[#allocation15 + $0x50] sm:$0xff] }
0x17c3   :  { %v6488_v5 = vmax.f32 %v6480_v4, 0.0  ;;  %v6732_v4 = vld [vmem:[#allocation15 + $0x88] sm:$0xff] }
0x17c4   :  { %v6242_v17 = vpop.f32.mrf.mxu0 }
0x17c5   :  { %v6308_v25 = vadd.f32 %v6307_v1, %v6242_v17 }
0x17c6   :  { %v6405_v43 = vpop.f32.mrf.mxu2 }
0x17c7   :  { %v6425_v11 = vadd.f32 %v6405_v43, %v6308_v25  ;;  %v6961_v25 = vld [vmem:[%s12194_s6 + $0x38] sm:$0xff] }
0x17c9   :  { %v6481_v36 = vadd.f32 %v6452_v32, %v6425_v11  ;;  %v6959_v11 = vld [vmem:[%s12194_s6 + $0x28] sm:$0xff] }
0x17cb   :  { %v6489_v30 = vmax.f32 %v6481_v36, 0.0 }
0x17cc   :  { %v6245_v18 = vpop.f32.mrf.mxu0 }
0x17cd   :  { %v6311_v29 = vadd.f32 %v6310_v9, %v6245_v18 }
0x17ce   :  { %v6408_v8 = vpop.f32.mrf.mxu2 }
0x17cf   :  { %v6426_v39 = vadd.f32 %v6408_v8, %v6311_v29 }
0x17d1   :  { %v6482_v51 = vadd.f32 %v6457_v16, %v6426_v39 }
0x17d3   :  { %v6490_v42 = vmax.f32 %v6482_v51, 0.0 }
0x17d4   :  { %v6248_v15 = vpop.f32.mrf.mxu0 }
0x17d5   :  { %v6314_v52 = vadd.f32 %v6313_v14, %v6248_v15 }
0x17d6   :  { %v6411_v47 = vpop.f32.mrf.mxu2 }
0x17d7   :  { %v6427_v49 = vadd.f32 %v6411_v47, %v6314_v52 }
0x17d9   :  { %v6483_v13 = vadd.f32 %v6462_v53, %v6427_v49  ;;  %v6546_v49 = vld [vmem:[#allocation15 + $0x18] sm:$0xff]  ;;  %v6560_v53 = vld [vmem:[#allocation15 + $0x40] sm:$0xff] }
0x17db   :  { %v6491_v22 = vmax.f32 %v6483_v13, 0.0 }
0x17dc   :  { %v6251_v23 = vpop.f32.mrf.mxu0 }
0x17dd   :  { %v6317_v20 = vadd.f32 %v6316_v21, %v6251_v23 }
0x17de   :  { %v6414_v24 = vpop.f32.mrf.mxu2 }
0x17df   :  { %v6428_v27 = vadd.f32 %v6414_v24, %v6317_v20 }
0x17e1   :  { %v6484_v6 = vadd.f32 %v6467_v46, %v6428_v27  ;;  %v6960_v27 = vld [vmem:[%s12194_s6 + $0x30] sm:$0xff] }
0x17e3   :  { %v6492_v26 = vmax.f32 %v6484_v6, 0.0  ;;  %v6957_v6 = vld [vmem:[%s12194_s6 + $0x18] sm:$0xff] }
0x17e4   :  { %v6254_v31 = vpop.f32.mrf.mxu0 }
0x17e5   :  { %v6320_v61 = vadd.f32 %v6319_v48, %v6254_v31  ;;  %6513 = vrot.lane.b32.xlu2 %v6492_v26, %s10190_s13  ;;  %v6958_v48 = vld [vmem:[%s12194_s6 + $0x20] sm:$0xff]  ;;  %v6956_v31 = vld [vmem:[%s12194_s6 + $0x10] sm:$0xff] }
0x17e6   :  { %v6417_v35 = vpop.f32.mrf.mxu2  ;;  %v6954_v26 = vld [vmem:[%s12194_s6] sm:$0xff] }
0x17e7   :  { %v6429_v28 = vadd.f32 %v6417_v35, %v6320_v61 }
0x17e9   :  { %v6485_v54 = vadd.f32 %v6472_v10, %v6429_v28  ;;  %v6955_v10 = vld [vmem:[%s12194_s6 + $0x8] sm:$0xff] }
0x17eb   :  { %v6493_v7 = vmax.f32 %v6485_v54, 0.0  ;;  %v6543_v54 = vld [vmem:[#allocation15] sm:$0xff] }
0x17ec   :  { %v6257_v40 = vpop.f32.mrf.mxu0 }
0x17ed   :  { %v6323_v34 = vadd.f32 %v6322_v56, %v6257_v40  ;;  %6507 = vrot.lane.b32.xlu2 %v6489_v30, %s10190_s13  ;;  %6515 = vrot.lane.b32.xlu0 %v6493_v7, %s10190_s13  ;;  %v6544_v56 = vld [vmem:[#allocation15 + $0x8] sm:$0xff] }
0x17ee   :  { %v6420_v44 = vpop.f32.mrf.mxu2 }
0x17ef   :  { %v6430_v45 = vadd.f32 %v6420_v44, %v6323_v34  ;;  %v6545_v44 = vld [vmem:[#allocation15 + $0x10] sm:$0xff] }
0x17f1   :  { %v6486_v37 = vadd.f32 %v6477_v33, %v6430_v45 }
0x17f3   :  { %v6494_v41 = vmax.f32 %v6486_v37, 0.0 }
0x17f5   :  { %6509 = vrot.lane.b32.xlu0 %v6490_v42, %s10190_s13  ;;  %6517 = vrot.lane.b32.xlu1 %v6494_v41, %s10190_s13 }
0x17fd   :  { %6503 = vrot.lane.b32.xlu0 %v6487_v50, %s10190_s13  ;;  %6511 = vrot.lane.b32.xlu1 %v6491_v22, %s10190_s13  ;;  %v6561_v50 = vld [vmem:[#allocation15 + $0x48] sm:$0xff] }
0x17fe   :  { %v6548_v22 = vld [vmem:[#allocation15 + $0x28] sm:$0xff] }
0x1805   :  { %6505 = vrot.lane.b32.xlu1 %v6488_v5, %s10190_s13  ;;  %v6549_v5 = vld [vmem:[#allocation15 + $0x30] sm:$0xff] }
0x183f   :  { %v6514_v58 = vpop.permute.xlu2 %6513 }
0x1840   :  { %6532 = vst.msk [vmem:[#allocation3 + $0x78] sm:$0xff] %vm6120_vm12, %v6514_v58  ;;  %v6563_v58 = vld [vmem:[#allocation15 + $0x58] sm:$0xff] }
0x1841   :  { %6540 = vst.msk [vmem:[#allocation3 + $0x78] sm:$0xff] %vm6129_vm13, %v11687_v60 }
0x1847   :  { %v6508_v57 = vpop.permute.xlu2 %6507 }
0x1848   :  { %6529 = vst.msk [vmem:[#allocation3 + $0x30] sm:$0xff] %vm6120_vm12, %v6508_v57  ;;  %v6556_v47 = vld [vmem:[#allocation3 + $0x78] sm:$0xff]  ;;  %v6733_v57 = vld [vmem:[#allocation15 + $0x90] sm:$0xff] }
0x1849   :  { %6537 = vst.msk [vmem:[#allocation3 + $0x30] sm:$0xff] %vm6129_vm13, %v11687_v60 }
0x1850   :  { %v6553_v2 = vld [vmem:[#allocation3 + $0x30] sm:$0xff] }
0x185f   :  { %v6516_v59 = vpop.permute.xlu0 %6515 }
0x1860   :  { %6533 = vst.msk [vmem:[#allocation3 + $0x90] sm:$0xff] %vm6120_vm12, %v6516_v59  ;;  %v6550_v59 = vld [vmem:[#allocation15 + $0x38] sm:$0xff] }
0x1861   :  { %6541 = vst.msk [vmem:[#allocation3 + $0x90] sm:$0xff] %vm6129_vm13, %v11687_v60 }
0x1867   :  { %v6510_v1 = vpop.permute.xlu0 %6509  ;;  %v6518_v38 = vpop.permute.xlu1 %6517 }
0x1868   :  { %6530 = vst.msk [vmem:[#allocation3 + $0x48] sm:$0xff] %vm6120_vm12, %v6510_v1  ;;  %v6557_v18 = vld [vmem:[#allocation3 + $0x90] sm:$0xff]  ;;  %v6564_v1 = vld [vmem:[#allocation15 + $0x60] sm:$0xff] }
0x1869   :  { %6538 = vst.msk [vmem:[#allocation3 + $0x48] sm:$0xff] %vm6129_vm13, %v11687_v60 }
0x186a   :  { %6534 = vst.msk [vmem:[#allocation3 + $0xa8] sm:$0xff] %vm6120_vm12, %v6518_v38  ;;  %v6734_v38 = vld [vmem:[#allocation15 + $0x98] sm:$0xff] }
0x186b   :  { %6542 = vst.msk [vmem:[#allocation3 + $0xa8] sm:$0xff] %vm6129_vm13, %v11687_v60 }
0x186f   :  { %v6504_v9 = vpop.permute.xlu0 %6503  ;;  %v6512_v17 = vpop.permute.xlu1 %6511 }
0x1870   :  { %6527 = vst.msk [vmem:[#allocation3] sm:$0xff] %vm6120_vm12, %v6504_v9  ;;  %v6554_v43 = vld [vmem:[#allocation3 + $0x48] sm:$0xff] }
0x1871   :  { %6535 = vst.msk [vmem:[#allocation3] sm:$0xff] %vm6129_vm13, %v11687_v60  ;;  %v9677_v14 = vpack.i.bf16 %v6553_v2, %v6554_v43  ;;  %v6839_v9 = vld [vmem:[#allocation4 + $0x8] sm:$0xff] }
0x1872   :  { %6531 = vst.msk [vmem:[#allocation3 + $0x60] sm:$0xff] %vm6120_vm12, %v6512_v17  ;;  %v6558_v8 = vld [vmem:[#allocation3 + $0xa8] sm:$0xff] }
0x1873   :  { %6539 = vst.msk [vmem:[#allocation3 + $0x60] sm:$0xff] %vm6129_vm13, %v11687_v60  ;;  %9678 = vrot.lane.b32.xlu0 %v9677_v14, %s10183_s7  ;;  %v9697_v15 = vpack.i.bf16 %v6557_v18, %v6558_v8  ;;  %6697 = vmatpush.msra.mxu0 %v6558_v8  ;;  %v6565_v17 = vld [vmem:[#allocation15 + $0x68] sm:$0xff]  ;;  %v6567_v8 = vld [vmem:[#allocation15 + $0x78] sm:$0xff] }
0x1875   :  { %9698 = vrot.lane.b32.xlu2 %v9697_v15, %s10183_s7  ;;  %6698 = vmatpush.msra.mxu0 %v6557_v18  ;;  %v6566_v18 = vld [vmem:[#allocation15 + $0x70] sm:$0xff] }
0x1877   :  { %v6506_v21 = vpop.permute.xlu1 %6505  ;;  %6699 = vmatpush.msra.mxu0 %v6556_v47 }
0x1878   :  { %6528 = vst.msk [vmem:[#allocation3 + $0x18] sm:$0xff] %vm6120_vm12, %v6506_v21  ;;  %v6551_v20 = vld [vmem:[#allocation3] sm:$0xff]  ;;  %v6836_v21 = vld [vmem:[%s12184_s27] sm:$0xff] }
0x1879   :  { %6536 = vst.msk [vmem:[#allocation3 + $0x18] sm:$0xff] %vm6129_vm13, %v11687_v60 }
0x187a   :  { %v6555_v46 = vld [vmem:[#allocation3 + $0x60] sm:$0xff] }
0x187b   :  { %v9692_v23 = vpack.i.bf16 %v6555_v46, %v6556_v47  ;;  %6700 = vmatpush.msra.mxu0 %v6555_v46  ;;  %v6738_v47 = vld [vmem:[#allocation15 + $0xb8] sm:$0xff]  ;;  %v6838_v46 = vld [vmem:[#allocation4] sm:$0xff] }
0x187d   :  { %9703 = vrot.lane.b32.xlu2 %v9697_v15, %s10182_s5  ;;  %9693 = vrot.lane.b32.xlu0 %v9692_v23, %s10182_s5  ;;  %v6737_v15 = vld [vmem:[#allocation15 + $0xb0] sm:$0xff] }
0x187e   :  { %9683 = vrot.lane.b32.xlu1 %v9692_v23, %s10183_s7  ;;  %6701 = vmatpush.msra.mxu0 %v6554_v43  ;;  %v6735_v43 = vld [vmem:[#allocation15 + $0xa0] sm:$0xff] }
0x1880   :  { %v6552_v24 = vld [vmem:[#allocation3 + $0x18] sm:$0xff]  ;;  %6702 = vmatpush.msra.mxu0 %v6553_v2  ;;  %v6837_v2 = vld [vmem:[%s12184_s27 + $0x8] sm:$0xff] }
0x1881   :  { %v9687_v60 = vpack.i.bf16 %v6551_v20, %v6552_v24  ;;  %6878 = vmatpush.msra.mxu2 %v6837_v2 }
0x1882   :  { %6703 = vmatpush.msra.mxu0 %v6552_v24 }
0x1883   :  { %6879 = vmatpush.msra.mxu2 %v6836_v21 }
0x1884   :  { %6704 = vmatpush.msra.mxu0 %v6551_v20 }
0x1885   :  { %9708 = vrot.lane.b32.xlu2 %v9677_v14, %s10182_s5  ;;  %6999 = vperm.xlu0 %9096, %v6961_v25   ;;  %v6736_v14 = vld [vmem:[#allocation15 + $0xa8] sm:$0xff] }
0x1886   :  { %9688 = vrot.lane.b32.xlu1 %v9687_v60, %s10183_s7  ;;  %8836 = vmatmul.msk.f32.vlgmr.msra.gmra.mxu0 %vm4511_vm9, %v6543_v54 }
0x188d   :  { %6994 = vperm.xlu2 %9005, %v6960_v27   ;;  %6984 = vperm.xlu0 %9096, %v6958_v48  }
0x188e   :  { %9713 = vrot.lane.b32.xlu1 %v9687_v60, %s10182_s5  ;;  %8837 = vmatmul.msk.f32.gmra.mxu0 %vm4511_vm9, %v6544_v56 }
0x1895   :  { %6979 = vperm.xlu2 %9005, %v6957_v6   ;;  %6969 = vperm.xlu0 %9096, %v6955_v10  }
0x1896   :  { %6989 = vperm.xlu1 %9004, %v6959_v11   ;;  %8838 = vmatmul.msk.f32.gmra.mxu0 %vm4511_vm9, %v6545_v44 }
0x189d   :  { %6964 = vperm.xlu2 %9005, %v6954_v26  }
0x189e   :  { %6974 = vperm.xlu1 %9004, %v6956_v31   ;;  %8839 = vmatmul.msk.f32.gmra.mxu0 %vm4511_vm9, %v6546_v49 }
0x18a6   :  { %8840 = vmatmul.msk.f32.gmra.mxu0 %vm4511_vm9, %v6547_v62 }
0x18ae   :  { %8841 = vmatmul.msk.f32.gmra.mxu0 %vm4511_vm9, %v6548_v22 }
0x18b6   :  { %8842 = vmatmul.msk.f32.gmra.mxu0 %vm4511_vm9, %v6549_v5 }
0x18be   :  { %8843 = vmatmul.msk.f32.gmra.mxu0 %vm4511_vm9, %v6550_v59 }
0x18cf   :  { %v9699_v61 = vpop.permute.xlu2 %9698 }
0x18d0   :  { %v9701_v32 = vunpack.i.h.bf16 %v9699_v61  ;;  %v9700_v35 = vunpack.i.l.bf16 %v9699_v61 }
0x18d2   :  { %6632 = vmatpush.msrb.mxu3 %v9700_v35 }
0x18d4   :  { %6633 = vmatpush.msrb.mxu3 %v9701_v32 }
0x18d7   :  { %v9704_v36 = vpop.permute.xlu2 %9703 }
0x18d8   :  { %v9706_v29 = vunpack.i.h.bf16 %v9704_v36  ;;  %v9705_v28 = vunpack.i.l.bf16 %v9704_v36 }
0x18da   :  { %6795 = vmatpush.msra.mxu1 %v9705_v28 }
0x18dc   :  { %6796 = vmatpush.msra.mxu1 %v9706_v29 }
0x18df   :  { %v9709_v40 = vpop.permute.xlu2 %9708 }
0x18e0   :  { %v9710_v12 = vunpack.i.l.bf16 %v9709_v40  ;;  %v9711_v52 = vunpack.i.h.bf16 %v9709_v40 }
0x18e5   :  { %v9679_v33 = vpop.permute.xlu0 %9678 }
0x18e6   :  { %v9680_v45 = vunpack.i.l.bf16 %v9679_v33  ;;  %v9681_v37 = vunpack.i.h.bf16 %v9679_v33 }
0x18ef   :  { %v9694_v30 = vpop.permute.xlu0 %9693 }
0x18f0   :  { %v9696_v39 = vunpack.i.h.bf16 %v9694_v30  ;;  %v9695_v7 = vunpack.i.l.bf16 %v9694_v30  ;;  %v9684_v16 = vpop.permute.xlu1 %9683 }
0x18f1   :  { %v9685_v34 = vunpack.i.l.bf16 %v9684_v16  ;;  %v9686_v51 = vunpack.i.h.bf16 %v9684_v16 }
0x18f2   :  { %6797 = vmatpush.msra.mxu1 %v9695_v7 }
0x18f3   :  { %6634 = vmatpush.msrb.mxu3 %v9685_v34 }
0x18f4   :  { %6798 = vmatpush.msra.mxu1 %v9696_v39 }
0x18f5   :  { %6635 = vmatpush.msrb.mxu3 %v9686_v51 }
0x18f6   :  { %6799 = vmatpush.msra.mxu1 %v9710_v12 }
0x18f7   :  { %6636 = vmatpush.msrb.mxu3 %v9680_v45 }
0x18f8   :  { %v9689_v55 = vpop.permute.xlu1 %9688  ;;  %6800 = vmatpush.msra.mxu1 %v9711_v52 }
0x18f9   :  { %v9690_v42 = vunpack.i.l.bf16 %v9689_v55  ;;  %6637 = vmatpush.msrb.mxu3 %v9681_v37  ;;  %v9691_v41 = vunpack.i.h.bf16 %v9689_v55 }
0x18fb   :  { %6638 = vmatpush.msrb.mxu3 %v9690_v42 }
0x18fd   :  { %6639 = vmatpush.msrb.mxu3 %v9691_v41 }
0x18fe   :  { %8828 = vmatmul.msk.f32.vlgmr.msrb.gmra.mxu3 %vm4511_vm9, %v6560_v53 }
0x18ff   :  { %6919 = vmatpush.msra.mxu3 %v6839_v9 }
0x1900   :  { %v9714_v0 = vpop.permute.xlu1 %9713 }
0x1901   :  { %v9715_v19 = vunpack.i.l.bf16 %v9714_v0  ;;  %v9716_v13 = vunpack.i.h.bf16 %v9714_v0  ;;  %6920 = vmatpush.msra.mxu3 %v6838_v46 }
0x1903   :  { %6801 = vmatpush.msra.mxu1 %v9715_v19  ;;  %v6706_v23 = vpop.f32.mrf.mxu0 }
0x1905   :  { %6802 = vmatpush.msra.mxu1 %v9716_v13 }
0x1906   :  { %8829 = vmatmul.msk.f32.gmra.mxu3 %vm4511_vm9, %v6561_v50  ;;  %8844 = vmatmul.msk.f32.vlgmr.msra.gmra.mxu1 %vm4511_vm9, %v6731_v63 }
0x190b   :  { %v6709_v20 = vpop.f32.mrf.mxu0 }
0x190e   :  { %8830 = vmatmul.msk.f32.gmra.mxu3 %vm4511_vm9, %v6562_v3  ;;  %8845 = vmatmul.msk.f32.gmra.mxu1 %vm4511_vm9, %v6732_v4 }
0x1913   :  { %v6712_v48 = vpop.f32.mrf.mxu0 }
0x1916   :  { %8831 = vmatmul.msk.f32.gmra.mxu3 %vm4511_vm9, %v6563_v58  ;;  %8846 = vmatmul.msk.f32.gmra.mxu1 %vm4511_vm9, %v6733_v57 }
0x191b   :  { %v6715_v31 = vpop.f32.mrf.mxu0 }
0x191e   :  { %8832 = vmatmul.msk.f32.gmra.mxu3 %vm4511_vm9, %v6564_v1  ;;  %8847 = vmatmul.msk.f32.gmra.mxu1 %vm4511_vm9, %v6734_v38  ;;  %v6990_v38 = vpop.permute.xlu1 %6989 }
0x1923   :  { %v6718_v28 = vpop.f32.mrf.mxu0 }
0x1926   :  { %8833 = vmatmul.msk.f32.gmra.mxu3 %vm4511_vm9, %v6565_v17  ;;  %8848 = vmatmul.msk.f32.gmra.mxu1 %vm4511_vm9, %v6735_v43 }
0x192b   :  { %v6721_v16 = vpop.f32.mrf.mxu0 }
0x192e   :  { %8834 = vmatmul.msk.f32.gmra.mxu3 %vm4511_vm9, %v6566_v18  ;;  %8849 = vmatmul.msk.f32.gmra.mxu1 %vm4511_vm9, %v6736_v14  ;;  %v6995_v18 = vpop.permute.xlu2 %6994 }
0x1933   :  { %v6724_v52 = vpop.f32.mrf.mxu0 }
0x1936   :  { %8835 = vmatmul.msk.f32.gmra.mxu3 %vm4511_vm9, %v6567_v8  ;;  %8850 = vmatmul.msk.f32.gmra.mxu1 %vm4511_vm9, %v6737_v15  ;;  %v6975_v15 = vpop.permute.xlu1 %6974 }
0x193b   :  { %v6727_v49 = vpop.f32.mrf.mxu0 }
0x193e   :  { %8851 = vmatmul.msk.f32.gmra.mxu1 %vm4511_vm9, %v6738_v47 }
0x1981   :  { %v6641_v24 = vpop.f32.mrf.mxu3 }
0x1982   :  { %v6707_v25 = vadd.f32 %v6706_v23, %v6641_v24  ;;  %v7000_v24 = vpop.permute.xlu0 %6999 }
0x1983   :  { %v6804_v60 = vpop.f32.mrf.mxu1 }
0x1984   :  { %v6828_v27 = vadd.f32 %v6804_v60, %v6707_v25 }
0x1986   :  { %8852 = vmatmul.msk.f32.vlgmr.msra.gmra.mxu2 %vm1011_vm1, %v6828_v27  ;;  %8860 = vmatmul.msk.f32.vlgmr.msra.gmra.mxu3 %vm1011_vm1, %v6828_v27 }
0x1989   :  { %v6644_v6 = vpop.f32.mrf.mxu3 }
0x198a   :  { %v6710_v10 = vadd.f32 %v6709_v20, %v6644_v6 }
0x198b   :  { %v6807_v11 = vpop.f32.mrf.mxu1 }
0x198c   :  { %v6829_v26 = vadd.f32 %v6807_v11, %v6710_v10 }
0x198e   :  { %8853 = vmatmul.msk.f32.gmra.mxu2 %vm1011_vm1, %v6829_v26  ;;  %8861 = vmatmul.msk.f32.gmra.mxu3 %vm1011_vm1, %v6829_v26 }
0x1991   :  { %v6647_v61 = vpop.f32.mrf.mxu3 }
0x1992   :  { %v6713_v32 = vadd.f32 %v6712_v48, %v6647_v61  ;;  %v6980_v48 = vpop.permute.xlu2 %6979 }
0x1993   :  { %v6810_v35 = vpop.f32.mrf.mxu1 }
0x1994   :  { %v6830_v36 = vadd.f32 %v6810_v35, %v6713_v32 }
0x1996   :  { %8854 = vmatmul.msk.f32.gmra.mxu2 %vm1011_vm1, %v6830_v36  ;;  %8862 = vmatmul.msk.f32.gmra.mxu3 %vm1011_vm1, %v6830_v36  ;;  %v6985_v36 = vpop.permute.xlu0 %6984 }
0x1999   :  { %v6650_v29 = vpop.f32.mrf.mxu3 }
0x199a   :  { %v6716_v54 = vadd.f32 %v6715_v31, %v6650_v29  ;;  %v6965_v29 = vpop.permute.xlu2 %6964 }
0x199b   :  { %v6813_v33 = vpop.f32.mrf.mxu1 }
0x199c   :  { %v6831_v56 = vadd.f32 %v6813_v33, %v6716_v54 }
0x199e   :  { %8855 = vmatmul.msk.f32.gmra.mxu2 %vm1011_vm1, %v6831_v56  ;;  %8863 = vmatmul.msk.f32.gmra.mxu3 %vm1011_vm1, %v6831_v56 }
0x19a1   :  { %v6653_v30 = vpop.f32.mrf.mxu3 }
0x19a2   :  { %v6719_v39 = vadd.f32 %v6718_v28, %v6653_v30  ;;  %v6970_v30 = vpop.permute.xlu0 %6969 }
0x19a3   :  { %v6816_v7 = vpop.f32.mrf.mxu1 }
0x19a4   :  { %v6832_v40 = vadd.f32 %v6816_v7, %v6719_v39 }
0x19a6   :  { %8856 = vmatmul.msk.f32.gmra.mxu2 %vm1011_vm1, %v6832_v40  ;;  %8864 = vmatmul.msk.f32.gmra.mxu3 %vm1011_vm1, %v6832_v40  ;;  %v11851_v40 = vld [vmem:[#allocation2 + $0x40] sm:$0xff] }
0x19a9   :  { %v6656_v34 = vpop.f32.mrf.mxu3 }
0x19aa   :  { %v6722_v44 = vadd.f32 %v6721_v16, %v6656_v34 }
0x19ab   :  { %v6819_v12 = vpop.f32.mrf.mxu1 }
0x19ac   :  { %v6833_v51 = vadd.f32 %v6819_v12, %v6722_v44 }
0x19ae   :  { %8857 = vmatmul.msk.f32.gmra.mxu2 %vm1011_vm1, %v6833_v51  ;;  %8865 = vmatmul.msk.f32.gmra.mxu3 %vm1011_vm1, %v6833_v51 }
0x19b1   :  { %v6659_v45 = vpop.f32.mrf.mxu3 }
0x19b2   :  { %v6725_v37 = vadd.f32 %v6724_v52, %v6659_v45 }
0x19b3   :  { %v6822_v55 = vpop.f32.mrf.mxu1 }
0x19b4   :  { %v6834_v42 = vadd.f32 %v6822_v55, %v6725_v37 }
0x19b6   :  { %8858 = vmatmul.msk.f32.gmra.mxu2 %vm1011_vm1, %v6834_v42  ;;  %8866 = vmatmul.msk.f32.gmra.mxu3 %vm1011_vm1, %v6834_v42 }
0x19b9   :  { %v6662_v41 = vpop.f32.mrf.mxu3 }
0x19ba   :  { %v6728_v53 = vadd.f32 %v6727_v49, %v6662_v41 }
0x19bb   :  { %v6825_v0 = vpop.f32.mrf.mxu1 }
0x19bc   :  { %v6835_v19 = vadd.f32 %v6825_v0, %v6728_v53 }
0x19be   :  { %8859 = vmatmul.msk.f32.gmra.mxu2 %vm1011_vm1, %v6835_v19  ;;  %8867 = vmatmul.msk.f32.gmra.mxu3 %vm1011_vm1, %v6835_v19 }
0x1a09   :  { %v6881_v62 = vpop.f32.mrf.mxu2  ;;  %v6922_v13 = vpop.f32.mrf.mxu3 }
0x1a0a   :  { %v6946_v50 = vmax.f32 %v6881_v62, %v6922_v13 }
0x1a0c   :  { %v7002_v28 = vadd.f32 %v6965_v29, %v6946_v50  ;;  %v7087_v29 = vld [vmem:[#allocation17 + $0x50] sm:$0xff] }
0x1a0e   :  { %v7010_v33 = vmax.f32 %v7002_v28, 0.0  ;;  %v7074_v28 = vld [vmem:[#allocation17 + $0x30] sm:$0xff] }
0x1a11   :  { %v6884_v63 = vpop.f32.mrf.mxu2  ;;  %v6925_v22 = vpop.f32.mrf.mxu3 }
0x1a12   :  { %v6947_v3 = vmax.f32 %v6884_v63, %v6925_v22 }
0x1a14   :  { %v7003_v39 = vadd.f32 %v6970_v30, %v6947_v3  ;;  %v7260_v30 = vld [vmem:[#allocation17 + $0xa0] sm:$0xff] }
0x1a16   :  { %v7011_v7 = vmax.f32 %v7003_v39, 0.0  ;;  %v7089_v39 = vld [vmem:[#allocation17 + $0x60] sm:$0xff] }
0x1a19   :  { %v6887_v4 = vpop.f32.mrf.mxu2  ;;  %v6928_v5 = vpop.f32.mrf.mxu3 }
0x1a1a   :  { %v6948_v14 = vmax.f32 %v6887_v4, %v6928_v5 }
0x1a1c   :  { %v7004_v46 = vadd.f32 %v6975_v15, %v6948_v14 }
0x1a1e   :  { %v7012_v25 = vmax.f32 %v7004_v46, 0.0 }
0x1a21   :  { %v6890_v58 = vpop.f32.mrf.mxu2  ;;  %v6931_v57 = vpop.f32.mrf.mxu3 }
0x1a22   :  { %v6949_v60 = vmax.f32 %v6890_v58, %v6931_v57  ;;  %v7068_v58 = vld [vmem:[#allocation17] sm:$0xff] }
0x1a24   :  { %v7005_v11 = vadd.f32 %v6980_v48, %v6949_v60  ;;  %v7071_v60 = vld [vmem:[#allocation17 + $0x18] sm:$0xff] }
0x1a26   :  { %v7013_v61 = vmax.f32 %v7005_v11, 0.0 }
0x1a29   :  { %v6893_v59 = vpop.f32.mrf.mxu2  ;;  %v6934_v1 = vpop.f32.mrf.mxu3 }
0x1a2a   :  { %v6950_v32 = vmax.f32 %v6893_v59, %v6934_v1 }
0x1a2c   :  { %v7006_v54 = vadd.f32 %v6985_v36, %v6950_v32  ;;  %v7086_v32 = vld [vmem:[#allocation17 + $0x48] sm:$0xff]  ;;  %v7258_v36 = vld [vmem:[#allocation17 + $0x90] sm:$0xff] }
0x1a2e   :  { %v7014_v56 = vmax.f32 %v7006_v54, 0.0  ;;  %v7259_v54 = vld [vmem:[#allocation17 + $0x98] sm:$0xff] }
0x1a31   :  { %v6896_v2 = vpop.f32.mrf.mxu2  ;;  %v6937_v9 = vpop.f32.mrf.mxu3 }
0x1a32   :  { %v6951_v17 = vmax.f32 %v6896_v2, %v6937_v9  ;;  %v7069_v2 = vld [vmem:[#allocation17 + $0x8] sm:$0xff] }
0x1a34   :  { %v7007_v43 = vadd.f32 %v6990_v38, %v6951_v17 }
0x1a36   :  { %v7015_v8 = vmax.f32 %v7007_v43, 0.0 }
0x1a38   :  { %7036 = vrot.lane.b32.xlu2 %v7015_v8, %s10190_s13  ;;  %v7070_v8 = vld [vmem:[#allocation17 + $0x10] sm:$0xff] }
0x1a39   :  { %v6899_v47 = vpop.f32.mrf.mxu2  ;;  %v6940_v21 = vpop.f32.mrf.mxu3 }
0x1a3a   :  { %v6952_v23 = vmax.f32 %v6899_v47, %v6940_v21 }
0x1a3c   :  { %v7008_v20 = vadd.f32 %v6995_v18, %v6952_v23 }
0x1a3e   :  { %v7016_v27 = vmax.f32 %v7008_v20, 0.0 }
0x1a40   :  { %7030 = vrot.lane.b32.xlu2 %v7012_v25, %s10190_s13  ;;  %7038 = vrot.lane.b32.xlu0 %v7016_v27, %s10190_s13 }
0x1a41   :  { %v6902_v6 = vpop.f32.mrf.mxu2  ;;  %v6943_v10 = vpop.f32.mrf.mxu3 }
0x1a42   :  { %v6953_v26 = vmax.f32 %v6902_v6, %v6943_v10  ;;  %v7256_v10 = vld [vmem:[#allocation17 + $0x80] sm:$0xff] }
0x1a44   :  { %v7009_v31 = vadd.f32 %v7000_v24, %v6953_v26  ;;  %v7085_v26 = vld [vmem:[#allocation17 + $0x40] sm:$0xff] }
0x1a46   :  { %v7017_v35 = vmax.f32 %v7009_v31, 0.0  ;;  %v7072_v31 = vld [vmem:[#allocation17 + $0x20] sm:$0xff] }
0x1a48   :  { %7032 = vrot.lane.b32.xlu0 %v7013_v61, %s10190_s13  ;;  %7040 = vrot.lane.b32.xlu1 %v7017_v35, %s10190_s13  ;;  %v7257_v61 = vld [vmem:[#allocation17 + $0x88] sm:$0xff] }
0x1a49   :  { %v7073_v35 = vld [vmem:[#allocation17 + $0x28] sm:$0xff] }
0x1a50   :  { %7026 = vrot.lane.b32.xlu0 %v7010_v33, %s10190_s13  ;;  %7034 = vrot.lane.b32.xlu1 %v7014_v56, %s10190_s13  ;;  %v7088_v33 = vld [vmem:[#allocation17 + $0x58] sm:$0xff] }
0x1a51   :  { %v7075_v56 = vld [vmem:[#allocation17 + $0x38] sm:$0xff] }
0x1a58   :  { %7028 = vrot.lane.b32.xlu1 %v7011_v7, %s10190_s13  ;;  %v7261_v7 = vld [vmem:[#allocation17 + $0xa8] sm:$0xff] }
0x1a92   :  { %v7037_v16 = vpop.permute.xlu2 %7036 }
0x1a93   :  { %7056 = vst.msk [vmem:[#allocation2 + $0x78] sm:$0xff] %vm7050_vm14, %v7037_v16  ;;  %v7090_v16 = vld [vmem:[#allocation17 + $0x68] sm:$0xff] }
0x1a94   :  { %7065 = vst.msk [vmem:[#allocation2 + $0x78] sm:$0xff] %vm7059_vm15, %v11851_v40 }
0x1a9a   :  { %v7031_v34 = vpop.permute.xlu2 %7030 }
0x1a9b   :  { %7053 = vst.msk [vmem:[#allocation2 + $0x30] sm:$0xff] %vm7050_vm14, %v7031_v34  ;;  %v7081_v0 = vld [vmem:[#allocation2 + $0x78] sm:$0xff]  ;;  %v7262_v34 = vld [vmem:[#allocation17 + $0xb0] sm:$0xff] }
0x1a9c   :  { %7062 = vst.msk [vmem:[#allocation2 + $0x30] sm:$0xff] %vm7059_vm15, %v11851_v40 }
0x1aa3   :  { %v7078_v49 = vld [vmem:[#allocation2 + $0x30] sm:$0xff] }
0x1ab2   :  { %v7039_v44 = vpop.permute.xlu0 %7038 }
0x1ab3   :  { %7057 = vst.msk [vmem:[#allocation2 + $0x90] sm:$0xff] %vm7050_vm14, %v7039_v44  ;;  %v7091_v44 = vld [vmem:[#allocation17 + $0x70] sm:$0xff] }
0x1ab4   :  { %7066 = vst.msk [vmem:[#allocation2 + $0x90] sm:$0xff] %vm7059_vm15, %v11851_v40 }
0x1aba   :  { %v7033_v12 = vpop.permute.xlu0 %7032  ;;  %v7041_v51 = vpop.permute.xlu1 %7040 }
0x1abb   :  { %7054 = vst.msk [vmem:[#allocation2 + $0x48] sm:$0xff] %vm7050_vm14, %v7033_v12  ;;  %v7082_v37 = vld [vmem:[#allocation2 + $0x90] sm:$0xff]  ;;  %v7263_v12 = vld [vmem:[#allocation17 + $0xb8] sm:$0xff] }
0x1abc   :  { %7063 = vst.msk [vmem:[#allocation2 + $0x48] sm:$0xff] %vm7059_vm15, %v11851_v40 }
0x1abd   :  { %7058 = vst.msk [vmem:[#allocation2 + $0xa8] sm:$0xff] %vm7050_vm14, %v7041_v51  ;;  %v7092_v51 = vld [vmem:[#allocation17 + $0x78] sm:$0xff] }
0x1abe   :  { %7067 = vst.msk [vmem:[#allocation2 + $0xa8] sm:$0xff] %vm7059_vm15, %v11851_v40 }
0x1ac2   :  { %v7027_v52 = vpop.permute.xlu0 %7026  ;;  %v7035_v45 = vpop.permute.xlu1 %7034 }
0x1ac3   :  { %7051 = vst.msk [vmem:[#allocation2] sm:$0xff] %vm7050_vm14, %v7027_v52  ;;  %v7079_v41 = vld [vmem:[#allocation2 + $0x48] sm:$0xff] }
0x1ac4   :  { %7060 = vst.msk [vmem:[#allocation2] sm:$0xff] %vm7059_vm15, %v11851_v40  ;;  %v9737_v19 = vpack.i.bf16 %v7078_v49, %v7079_v41 }
0x1ac5   :  { %7055 = vst.msk [vmem:[#allocation2 + $0x60] sm:$0xff] %vm7050_vm14, %v7035_v45  ;;  %v7083_v55 = vld [vmem:[#allocation2 + $0xa8] sm:$0xff] }
0x1ac6   :  { %7064 = vst.msk [vmem:[#allocation2 + $0x60] sm:$0xff] %vm7059_vm15, %v11851_v40  ;;  %v9732_v42 = vpack.i.bf16 %v7082_v37, %v7083_v55  ;;  %7222 = vmatpush.msrb.mxu1 %v7083_v55 }
0x1ac8   :  { %9733 = vrot.lane.b32.xlu1 %v9732_v42, %s10183_s7  ;;  %9723 = vrot.lane.b32.xlu2 %v9732_v42, %s10182_s5 }
0x1ac9   :  { %7223 = vmatpush.msrb.mxu1 %v7082_v37 }
0x1aca   :  { %v7029_v53 = vpop.permute.xlu1 %7028 }
0x1acb   :  { %7052 = vst.msk [vmem:[#allocation2 + $0x18] sm:$0xff] %vm7050_vm14, %v7029_v53  ;;  %7224 = vmatpush.msrb.mxu1 %v7081_v0  ;;  %v7076_v50 = vld [vmem:[#allocation2] sm:$0xff] }
0x1acc   :  { %7061 = vst.msk [vmem:[#allocation2 + $0x18] sm:$0xff] %vm7059_vm15, %v11851_v40 }
0x1acd   :  { %v7080_v62 = vld [vmem:[#allocation2 + $0x60] sm:$0xff] }
0x1ace   :  { %v9717_v13 = vpack.i.bf16 %v7080_v62, %v7081_v0  ;;  %7225 = vmatpush.msrb.mxu1 %v7080_v62 }
0x1ad0   :  { %9718 = vrot.lane.b32.xlu0 %v9717_v13, %s10182_s5  ;;  %9738 = vrot.lane.b32.xlu1 %v9737_v19, %s10182_s5 }
0x1ad1   :  { %9728 = vrot.lane.b32.xlu2 %v9717_v13, %s10183_s7  ;;  %7226 = vmatpush.msrb.mxu1 %v7079_v41 }
0x1ad3   :  { %v7077_v63 = vld [vmem:[#allocation2 + $0x18] sm:$0xff]  ;;  %7227 = vmatpush.msrb.mxu1 %v7078_v49 }
0x1ad4   :  { %v9752_v22 = vpack.i.bf16 %v7076_v50, %v7077_v63 }
0x1ad5   :  { %7228 = vmatpush.msrb.mxu1 %v7077_v63 }
0x1ad7   :  { %7229 = vmatpush.msrb.mxu1 %v7076_v50 }
0x1ad8   :  { %9743 = vrot.lane.b32.xlu0 %v9737_v19, %s10183_s7  ;;  %9753 = vrot.lane.b32.xlu1 %v9752_v22, %s10183_s7 }
0x1ad9   :  { %9748 = vrot.lane.b32.xlu2 %v9752_v22, %s10182_s5  ;;  %8876 = vmatmul.msk.f32.vlgmr.msrb.gmra.mxu1 %vm4511_vm9, %v7068_v58 }
0x1ae1   :  { %8877 = vmatmul.msk.f32.gmra.mxu1 %vm4511_vm9, %v7069_v2 }
0x1ae9   :  { %8878 = vmatmul.msk.f32.gmra.mxu1 %vm4511_vm9, %v7070_v8 }
0x1af1   :  { %8879 = vmatmul.msk.f32.gmra.mxu1 %vm4511_vm9, %v7071_v60 }
0x1af9   :  { %8880 = vmatmul.msk.f32.gmra.mxu1 %vm4511_vm9, %v7072_v31 }
0x1b01   :  { %8881 = vmatmul.msk.f32.gmra.mxu1 %vm4511_vm9, %v7073_v35 }
0x1b09   :  { %8882 = vmatmul.msk.f32.gmra.mxu1 %vm4511_vm9, %v7074_v28 }
0x1b11   :  { %8883 = vmatmul.msk.f32.gmra.mxu1 %vm4511_vm9, %v7075_v56 }
0x1b22   :  { %v9724_v3 = vpop.permute.xlu2 %9723 }
0x1b23   :  { %v9726_v4 = vunpack.i.h.bf16 %v9724_v3  ;;  %v9725_v5 = vunpack.i.l.bf16 %v9724_v3 }
0x1b25   :  { %7320 = vmatpush.msrb.mxu2 %v9725_v5 }
0x1b27   :  { %7321 = vmatpush.msrb.mxu2 %v9726_v4 }
0x1b2b   :  { %v9729_v59 = vpop.permute.xlu2 %9728 }
0x1b2c   :  { %v9730_v9 = vunpack.i.l.bf16 %v9729_v59  ;;  %v9731_v17 = vunpack.i.h.bf16 %v9729_v59 }
0x1b33   :  { %v9749_v21 = vpop.permute.xlu2 %9748 }
0x1b34   :  { %v9750_v23 = vunpack.i.l.bf16 %v9749_v21  ;;  %v9751_v48 = vunpack.i.h.bf16 %v9749_v21 }
0x1b3a   :  { %v9734_v57 = vpop.permute.xlu1 %9733 }
0x1b3b   :  { %v9736_v1 = vunpack.i.h.bf16 %v9734_v57  ;;  %v9735_v38 = vunpack.i.l.bf16 %v9734_v57 }
0x1b3d   :  { %7157 = vmatpush.msrb.mxu0 %v9735_v38 }
0x1b3f   :  { %7158 = vmatpush.msrb.mxu0 %v9736_v1 }
0x1b41   :  { %7159 = vmatpush.msrb.mxu0 %v9730_v9 }
0x1b42   :  { %v9719_v43 = vpop.permute.xlu0 %9718  ;;  %v9739_v18 = vpop.permute.xlu1 %9738 }
0x1b43   :  { %v9720_v14 = vunpack.i.l.bf16 %v9719_v43  ;;  %7160 = vmatpush.msrb.mxu0 %v9731_v17  ;;  %v9721_v15 = vunpack.i.h.bf16 %v9719_v43  ;;  %v9740_v47 = vunpack.i.l.bf16 %v9739_v18  ;;  %v9741_v46 = vunpack.i.h.bf16 %v9739_v18 }
0x1b45   :  { %7322 = vmatpush.msrb.mxu2 %v9720_v14 }
0x1b47   :  { %7323 = vmatpush.msrb.mxu2 %v9721_v15 }
0x1b49   :  { %7324 = vmatpush.msrb.mxu2 %v9740_v47 }
0x1b4a   :  { %v9744_v20 = vpop.permute.xlu0 %9743  ;;  %v9754_v24 = vpop.permute.xlu1 %9753 }
0x1b4b   :  { %v9745_v25 = vunpack.i.l.bf16 %v9744_v20  ;;  %7325 = vmatpush.msrb.mxu2 %v9741_v46  ;;  %v9746_v27 = vunpack.i.h.bf16 %v9744_v20  ;;  %v9755_v6 = vunpack.i.l.bf16 %v9754_v24  ;;  %v9756_v11 = vunpack.i.h.bf16 %v9754_v24 }
0x1b4d   :  { %7161 = vmatpush.msrb.mxu0 %v9745_v25  ;;  %7326 = vmatpush.msrb.mxu2 %v9750_v23 }
0x1b4f   :  { %7162 = vmatpush.msrb.mxu0 %v9746_v27  ;;  %7327 = vmatpush.msrb.mxu2 %v9751_v48 }
0x1b50   :  { %8884 = vmatmul.msk.f32.vlgmr.msrb.gmra.mxu2 %vm4511_vm9, %v7256_v10 }
0x1b51   :  { %7163 = vmatpush.msrb.mxu0 %v9755_v6 }
0x1b53   :  { %7164 = vmatpush.msrb.mxu0 %v9756_v11 }
0x1b54   :  { %8868 = vmatmul.msk.f32.vlgmr.msrb.gmra.mxu0 %vm4511_vm9, %v7085_v26 }
0x1b56   :  { %v7231_v52 = vpop.f32.mrf.mxu1 }
0x1b58   :  { %8885 = vmatmul.msk.f32.gmra.mxu2 %vm4511_vm9, %v7257_v61 }
0x1b5c   :  { %8869 = vmatmul.msk.f32.gmra.mxu0 %vm4511_vm9, %v7086_v32 }
0x1b5e   :  { %v7234_v45 = vpop.f32.mrf.mxu1 }
0x1b60   :  { %8886 = vmatmul.msk.f32.gmra.mxu2 %vm4511_vm9, %v7258_v36 }
0x1b64   :  { %8870 = vmatmul.msk.f32.gmra.mxu0 %vm4511_vm9, %v7087_v29 }
0x1b66   :  { %v7237_v41 = vpop.f32.mrf.mxu1 }
0x1b68   :  { %8887 = vmatmul.msk.f32.gmra.mxu2 %vm4511_vm9, %v7259_v54 }
0x1b6c   :  { %8871 = vmatmul.msk.f32.gmra.mxu0 %vm4511_vm9, %v7088_v33 }
0x1b6e   :  { %v7240_v63 = vpop.f32.mrf.mxu1 }
0x1b70   :  { %8888 = vmatmul.msk.f32.gmra.mxu2 %vm4511_vm9, %v7260_v30 }
0x1b74   :  { %8872 = vmatmul.msk.f32.gmra.mxu0 %vm4511_vm9, %v7089_v39 }
0x1b76   :  { %v7243_v38 = vpop.f32.mrf.mxu1 }
0x1b78   :  { %8889 = vmatmul.msk.f32.gmra.mxu2 %vm4511_vm9, %v7261_v7 }
0x1b7c   :  { %8873 = vmatmul.msk.f32.gmra.mxu0 %vm4511_vm9, %v7090_v16 }
0x1b7e   :  { %v7246_v23 = vpop.f32.mrf.mxu1 }
0x1b80   :  { %8890 = vmatmul.msk.f32.gmra.mxu2 %vm4511_vm9, %v7262_v34 }
0x1b84   :  { %8874 = vmatmul.msk.f32.gmra.mxu0 %vm4511_vm9, %v7091_v44 }
0x1b86   :  { %v7249_v6 = vpop.f32.mrf.mxu1 }
0x1b88   :  { %8891 = vmatmul.msk.f32.gmra.mxu2 %vm4511_vm9, %v7263_v12 }
0x1b8c   :  { %8875 = vmatmul.msk.f32.gmra.mxu0 %vm4511_vm9, %v7092_v51 }
0x1b8e   :  { %v7252_v35 = vpop.f32.mrf.mxu1 }
0x1bd1   :  { %v7166_v37 = vpop.f32.mrf.mxu0 }
0x1bd2   :  { %v7232_v55 = vadd.f32 %v7231_v52, %v7166_v37 }
0x1bd3   :  { %v7329_v42 = vpop.f32.mrf.mxu2 }
0x1bd4   :  { %v11908_v49 = vadd.f32 %v7329_v42, %v7232_v55 }
0x1bd6   :  { %v7362_v53 = vsel %vm7361_vm0, %v11908_v49, 0.0  ;;  %v7386_v44 = vmul.f32 %v11908_v49, %v11908_v49 }
0x1bd7   :  { %7363 = vadd.xlane.f32.xlu2 %v7362_v53 }
0x1bd8   :  { %v7394_v52 = vsel %vm7361_vm0, %v7386_v44, 0.0 }
0x1bd9   :  { %v7169_v0 = vpop.f32.mrf.mxu0 }
0x1bda   :  { %v7235_v19 = vadd.f32 %v7234_v45, %v7169_v0 }
0x1bdb   :  { %v7332_v62 = vpop.f32.mrf.mxu2 }
0x1bdc   :  { %v11912_v13 = vadd.f32 %v7332_v62, %v7235_v19 }
0x1bde   :  { %v7365_v50 = vsel %vm7361_vm0, %v11912_v13, 0.0  ;;  %v7387_v4 = vmul.f32 %v11912_v13, %v11912_v13 }
0x1bdf   :  { %7366 = vadd.xlane.f32.xlu0 %v7365_v50 }
0x1be0   :  { %v7397_v57 = vsel %vm7361_vm0, %v7387_v4, 0.0 }
0x1be1   :  { %v7172_v22 = vpop.f32.mrf.mxu0 }
0x1be2   :  { %v7238_v3 = vadd.f32 %v7237_v41, %v7172_v22 }
0x1be3   :  { %v7335_v5 = vpop.f32.mrf.mxu2 }
0x1be4   :  { %v11918_v58 = vadd.f32 %v7335_v5, %v7238_v3 }
0x1be6   :  { %v7368_v59 = vsel %vm7361_vm0, %v11918_v58, 0.0  ;;  %v7388_v9 = vmul.f32 %v11918_v58, %v11918_v58 }
0x1be7   :  { %7398 = vadd.xlane.f32.xlu0 %v7397_v57  ;;  %7369 = vadd.xlane.f32.xlu1 %v7368_v59 }
0x1be8   :  { %v7400_v18 = vsel %vm7361_vm0, %v7388_v9, 0.0 }
0x1be9   :  { %v7175_v1 = vpop.f32.mrf.mxu0 }
0x1bea   :  { %v7241_v2 = vadd.f32 %v7240_v63, %v7175_v1 }
0x1beb   :  { %v7338_v17 = vpop.f32.mrf.mxu2 }
0x1bec   :  { %v11925_v43 = vadd.f32 %v7338_v17, %v7241_v2 }
0x1bee   :  { %v7371_v14 = vsel %vm7361_vm0, %v11925_v43, 0.0  ;;  %v7389_v8 = vmul.f32 %v11925_v43, %v11925_v43 }
0x1bef   :  { %7401 = vadd.xlane.f32.xlu1 %v7400_v18  ;;  %7372 = vadd.xlane.f32.xlu0 %v7371_v14 }
0x1bf0   :  { %v7403_v15 = vsel %vm7361_vm0, %v7389_v8, 0.0 }
0x1bf1   :  { %7404 = vadd.xlane.f32.xlu2 %v7403_v15  ;;  %v7178_v47 = vpop.f32.mrf.mxu0 }
0x1bf2   :  { %v7244_v21 = vadd.f32 %v7243_v38, %v7178_v47 }
0x1bf3   :  { %v7341_v46 = vpop.f32.mrf.mxu2 }
0x1bf4   :  { %v11933_v20 = vadd.f32 %v7341_v46, %v7244_v21 }
0x1bf6   :  { %v7374_v24 = vsel %vm7361_vm0, %v11933_v20, 0.0  ;;  %v7390_v16 = vmul.f32 %v11933_v20, %v11933_v20 }
0x1bf7   :  { %7375 = vadd.xlane.f32.xlu1 %v7374_v24 }
0x1bf8   :  { %v7406_v12 = vsel %vm7361_vm0, %v7390_v16, 0.0 }
0x1bf9   :  { %v7181_v25 = vpop.f32.mrf.mxu0 }
0x1bfa   :  { %v7247_v60 = vadd.f32 %v7246_v23, %v7181_v25 }
0x1bfb   :  { %v7344_v27 = vpop.f32.mrf.mxu2 }
0x1bfc   :  { %v11937_v48 = vadd.f32 %v7344_v27, %v7247_v60 }
0x1bfe   :  { %v7377_v10 = vsel %vm7361_vm0, %v11937_v48, 0.0  ;;  %v7391_v34 = vmul.f32 %v11937_v48, %v11937_v48 }
0x1bff   :  { %7378 = vadd.xlane.f32.xlu2 %v7377_v10 }
0x1c00   :  { %v7409_v51 = vsel %vm7361_vm0, %v7391_v34, 0.0 }
0x1c01   :  { %v7184_v11 = vpop.f32.mrf.mxu0 }
0x1c02   :  { %v7250_v26 = vadd.f32 %v7249_v6, %v7184_v11 }
0x1c03   :  { %v7347_v31 = vpop.f32.mrf.mxu2 }
0x1c04   :  { %v11941_v61 = vadd.f32 %v7347_v31, %v7250_v26 }
0x1c06   :  { %v7380_v32 = vsel %vm7361_vm0, %v11941_v61, 0.0  ;;  %v7392_v28 = vmul.f32 %v11941_v61, %v11941_v61 }
0x1c07   :  { %7381 = vadd.xlane.f32.xlu0 %v7380_v32 }
0x1c08   :  { %v7412_v56 = vsel %vm7361_vm0, %v7392_v28, 0.0 }
0x1c09   :  { %v7187_v36 = vpop.f32.mrf.mxu0 }
0x1c0a   :  { %v7253_v29 = vadd.f32 %v7252_v35, %v7187_v36 }
0x1c0b   :  { %v7350_v54 = vpop.f32.mrf.mxu2 }
0x1c0c   :  { %v11947_v33 = vadd.f32 %v7350_v54, %v7253_v29 }
0x1c0e   :  { %v7383_v30 = vsel %vm7361_vm0, %v11947_v33, 0.0  ;;  %v7393_v39 = vmul.f32 %v11947_v33, %v11947_v33 }
0x1c0f   :  { %7413 = vadd.xlane.f32.xlu0 %v7412_v56  ;;  %7384 = vadd.xlane.f32.xlu2 %v7383_v30 }
0x1c10   :  { %v7415_v7 = vsel %vm7361_vm0, %v7393_v39, 0.0 }
0x1c11   :  { %7416 = vadd.xlane.f32.xlu1 %v7415_v7 }
0x1c17   :  { %7407 = vadd.xlane.f32.xlu0 %v7406_v12  ;;  %7410 = vadd.xlane.f32.xlu2 %v7409_v51 }
0x1c19   :  { %7395 = vadd.xlane.f32.xlu1 %v7394_v52 }
0x1c4a   :  { %v7364_v42 = vpop.xlane.xlu2 %7363 }
0x1c52   :  { %v7367_v45 = vpop.xlane.xlu0 %7366 }
0x1c5a   :  { %v7370_v37 = vpop.xlane.xlu1 %7369  ;;  %v7399_v55 = vpop.xlane.xlu0 %7398 }
0x1c62   :  { %v7402_v41 = vpop.xlane.xlu1 %7401  ;;  %v7373_v53 = vpop.xlane.xlu0 %7372 }
0x1c64   :  { %v7405_v0 = vpop.xlane.xlu2 %7404 }
0x1c6a   :  { %v7376_v50 = vpop.xlane.xlu1 %7375 }
0x1c6b   :  { %v7418_v15 = vadd.f32 %v7376_v50, %v7364_v42 }
0x1c6d   :  { %v11974_v27 = vmul.f32 0.0625, %v7418_v15  ;;  %v7447_v15 = vld [vmem:[%s12195_s19 + $0x8] sm:$0xff] }
0x1c6f   :  { %v7434_v36 = vmul.f32 %v11974_v27, %v11974_v27 }
0x1c72   :  { %v7379_v19 = vpop.xlane.xlu2 %7378 }
0x1c73   :  { %v7419_v59 = vadd.f32 %v7379_v19, %v7367_v45 }
0x1c75   :  { %v11972_v47 = vmul.f32 0.0625, %v7419_v59  ;;  %v7500_v59 = vld [vmem:[%s12196_s8 + $0x10] sm:$0xff] }
0x1c77   :  { %v7435_v10 = vmul.f32 %v11972_v47, %v11972_v47 }
0x1c7a   :  { %v7382_v62 = vpop.xlane.xlu0 %7381 }
0x1c7b   :  { %v7420_v63 = vadd.f32 %v7382_v62, %v7370_v37 }
0x1c7d   :  { %v11964_v22 = vmul.f32 0.0625, %v7420_v63 }
0x1c7f   :  { %v7436_v38 = vmul.f32 %v11964_v22, %v11964_v22 }
0x1c82   :  { %v7414_v3 = vpop.xlane.xlu0 %7413  ;;  %v7385_v4 = vpop.xlane.xlu2 %7384 }
0x1c83   :  { %v7424_v5 = vadd.f32 %v7414_v3, %v7402_v41  ;;  %v7421_v57 = vadd.f32 %v7385_v4, %v7373_v53  ;;  %v7448_v53 = vld [vmem:[%s12195_s19 + $0x10] sm:$0xff] }
0x1c84   :  { %v7417_v1 = vpop.xlane.xlu1 %7416 }
0x1c85   :  { %v7432_v2 = vmul.f32 0.0625, %v7424_v5  ;;  %v11968_v9 = vmul.f32 0.0625, %v7421_v57  ;;  %v7425_v17 = vadd.f32 %v7417_v1, %v7405_v0  ;;  %v7449_v1 = vld [vmem:[%s12195_s19 + $0x18] sm:$0xff] }
0x1c87   :  { %v7440_v18 = vsub.f32 %v7432_v2, %v7436_v38  ;;  %v7437_v14 = vmul.f32 %v11968_v9, %v11968_v9  ;;  %v7433_v8 = vmul.f32 0.0625, %v7425_v17 }
0x1c89   :  { %v7444_v21 = vmax.f32 %v7440_v18, 0.0  ;;  %v7441_v46 = vsub.f32 %v7433_v8, %v7437_v14 }
0x1c8a   :  { %v7411_v23 = vpop.xlane.xlu2 %7410  ;;  %v7408_v26 = vpop.xlane.xlu0 %7407 }
0x1c8b   :  { %v7452_v24 = vadd.f32 1e-05, %v7444_v21  ;;  %v7445_v25 = vmax.f32 %v7441_v46, 0.0  ;;  %v7423_v60 = vadd.f32 %v7411_v23, %v7399_v55 }
0x1c8c   :  { %v7396_v6 = vpop.xlane.xlu1 %7395 }
0x1c8d   :  { %9859 = vrsqrt.f32 %v7452_v24  ;;  %v7453_v11 = vadd.f32 1e-05, %v7445_v25  ;;  %v7431_v31 = vmul.f32 0.0625, %v7423_v60  ;;  %v7422_v32 = vadd.f32 %v7408_v26, %v7396_v6  ;;  %v7446_v25 = vld [vmem:[%s12195_s19] sm:$0xff]  ;;  %v7501_v6 = vld [vmem:[%s12196_s8 + $0x18] sm:$0xff] }
0x1c8e   :  { %vm7480_vm1 = vweird.f32 %v7452_v24 }
0x1c8f   :  { %9861 = vrsqrt.f32 %v7453_v11  ;;  %v7439_v35 = vsub.f32 %v7431_v31, %v7435_v10  ;;  %v7430_v29 = vmul.f32 0.0625, %v7422_v32  ;;  %vm7490_vm5 = vweird.f32 %v7453_v11  ;;  %v7498_v32 = vld [vmem:[%s12196_s8] sm:$0xff] }
0x1c91   :  { %v7443_v28 = vmax.f32 %v7439_v35, 0.0  ;;  %v7438_v54 = vsub.f32 %v7430_v29, %v7434_v36  ;;  %v7499_v29 = vld [vmem:[%s12196_s8 + $0x8] sm:$0xff] }
0x1c93   :  { %v9860_v56 = vpop.eup %9859  ;;  %v7451_v30 = vadd.f32 1e-05, %v7443_v28  ;;  %v7442_v7 = vmax.f32 %v7438_v54, 0.0 }
0x1c94   :  { %v7475_v39 = vmul.f32 %v9860_v56, %v7452_v24  ;;  %vm7481_vm2 = vweird.f32 %v9860_v56 }
0x1c95   :  { %v9862_v16 = vpop.eup %9861  ;;  %9863 = vrsqrt.f32 %v7451_v30  ;;  %v7450_v12 = vadd.f32 1e-05, %v7442_v7  ;;  %vm7482_vm4 = vmor %vm7480_vm1, %vm7481_vm2  ;;  %vm7470_vm8 = vweird.f32 %v7451_v30 }
0x1c96   :  { %v7476_v34 = vmul.f32 %v9860_v56, %v7475_v39  ;;  %v7485_v44 = vmul.f32 %v9862_v16, %v7453_v11  ;;  %vm7491_vm3 = vweird.f32 %v9862_v16 }
0x1c97   :  { %9865 = vrsqrt.f32 %v7450_v12  ;;  %vm7492_vm6 = vmor %vm7490_vm5, %vm7491_vm3  ;;  %vm7460_vm12 = vweird.f32 %v7450_v12 }
0x1c98   :  { %v7477_v51 = vmul.f32 0.5, %v7476_v34  ;;  %v7486_v52 = vmul.f32 %v9862_v16, %v7485_v44 }
0x1c9a   :  { %v7478_v45 = vsub.f32 1.5, %v7477_v51  ;;  %v7487_v37 = vmul.f32 0.5, %v7486_v52 }
0x1c9b   :  { %v9864_v55 = vpop.eup %9863 }
0x1c9c   :  { %v7488_v42 = vsub.f32 1.5, %v7487_v37  ;;  %v7465_v41 = vmul.f32 %v9864_v55, %v7451_v30  ;;  %v7479_v0 = vmul.f32 %v9860_v56, %v7478_v45  ;;  %vm7471_vm7 = vweird.f32 %v9864_v55 }
0x1c9d   :  { %v9866_v19 = vpop.eup %9865  ;;  %vm7472_vm10 = vmor %vm7470_vm8, %vm7471_vm7 }
0x1c9e   :  { %v7489_v62 = vmul.f32 %v9862_v16, %v7488_v42  ;;  %v7466_v50 = vmul.f32 %v9864_v55, %v7465_v41  ;;  %v7483_v63 = vsel %vm7482_vm4, %v9860_v56, %v7479_v0  ;;  %v7455_v3 = vmul.f32 %v9866_v19, %v7450_v12 }
0x1c9f   :  { %v7496_v4 = vmul.f32 %v7483_v63, %v7448_v53  ;;  %vm7461_vm11 = vweird.f32 %v9866_v19 }
0x1ca0   :  { %v7493_v5 = vsel %vm7492_vm6, %v9862_v16, %v7489_v62  ;;  %v7467_v57 = vmul.f32 0.5, %v7466_v50  ;;  %v7456_v38 = vmul.f32 %v9866_v19, %v7455_v3  ;;  %vm7462_vm13 = vmor %vm7460_vm12, %vm7461_vm11 }
0x1ca1   :  { %7522 = vperm.xlu1 %9004, %v7496_v4   ;;  %v7504_v2 = vmul.f32 %v7496_v4, %v11964_v22  ;;  %v7497_v8 = vmul.f32 %v7493_v5, %v7449_v1 }
0x1ca2   :  { %v7468_v17 = vsub.f32 1.5, %v7467_v57  ;;  %v7457_v18 = vmul.f32 0.5, %v7456_v38 }
0x1ca3   :  { %v7508_v14 = vsub.f32 %v7500_v59, %v7504_v2  ;;  %v7505_v60 = vmul.f32 %v7497_v8, %v11968_v9 }
0x1ca4   :  { %v7469_v21 = vmul.f32 %v9864_v55, %v7468_v17  ;;  %v7458_v46 = vsub.f32 1.5, %v7457_v18 }
0x1ca5   :  { %7550 = vperm.xlu0 %9096, %v7508_v14   ;;  %v7509_v26 = vsub.f32 %v7501_v6, %v7505_v60  ;;  %v7919_v6 = vld [vmem:[%s10359_s29 + $0x20] sm:$0xff] }
0x1ca6   :  { %v7473_v23 = vsel %vm7472_vm10, %v9864_v55, %v7469_v21  ;;  %v7459_v22 = vmul.f32 %v9866_v19, %v7458_v46 }
0x1ca7   :  { %v7495_v24 = vmul.f32 %v7473_v23, %v7447_v15 }
0x1ca8   :  { %v7463_v10 = vsel %vm7462_vm13, %v9866_v19, %v7459_v22  ;;  %v7922_v22 = vld [vmem:[%s10359_s29 + $0x38] sm:$0xff] }
0x1ca9   :  { %7517 = vperm.xlu2 %9005, %v7495_v24   ;;  %v7494_v11 = vmul.f32 %v7463_v10, %v7446_v25  ;;  %v7503_v36 = vmul.f32 %v7495_v24, %v11972_v47  ;;  %v7918_v10 = vld [vmem:[%s10359_s29 + $0x18] sm:$0xff] }
0x1cab   :  { %7512 = vperm.xlu1 %9004, %v7494_v11   ;;  %v7502_v31 = vmul.f32 %v7494_v11, %v11974_v27  ;;  %v7507_v28 = vsub.f32 %v7499_v29, %v7503_v36  ;;  %v7920_v11 = vld [vmem:[%s10359_s29 + $0x28] sm:$0xff] }
0x1cad   :  { %7555 = vperm.xlu0 %9096, %v7509_v26   ;;  %v7506_v35 = vsub.f32 %v7498_v32, %v7502_v31  ;;  %v7916_v26 = vld [vmem:[%s10359_s29 + $0x8] sm:$0xff]  ;;  %v7915_v31 = vld [vmem:[%s10359_s29] sm:$0xff]  ;;  %v7917_v32 = vld [vmem:[%s10359_s29 + $0x10] sm:$0xff] }
0x1cb1   :  { %7527 = vperm.xlu2 %9005, %v7497_v8  }
0x1cb5   :  { %7540 = vperm.xlu0 %9096, %v7506_v35   ;;  %v7622_v35 = vld [vmem:[#allocation18] sm:$0xff] }
0x1cb9   :  { %7545 = vperm.xlu2 %9005, %v7507_v28  }
0x1d03   :  { %v7518_v9 = vpop.permute.xlu2 %7517 }
0x1d04   :  { %v7535_v56 = vmul.f32 %v7518_v9, %v11937_v48  ;;  %v7531_v63 = vmul.f32 %v7518_v9, %v11912_v13 }
0x1d0b   :  { %v7528_v54 = vpop.permute.xlu2 %7527 }
0x1d0c   :  { %v7533_v52 = vmul.f32 %v7528_v54, %v11925_v43  ;;  %v7537_v48 = vmul.f32 %v7528_v54, %v11947_v33  ;;  %v7623_v54 = vld [vmem:[#allocation18 + $0x8] sm:$0xff] }
0x1d13   :  { %v7523_v30 = vpop.permute.xlu1 %7522  ;;  %v7546_v39 = vpop.permute.xlu2 %7545 }
0x1d14   :  { %v7563_v7 = vadd.f32 %v7546_v39, %v7535_v56  ;;  %v7536_v16 = vmul.f32 %v7523_v30, %v11941_v61  ;;  %v7532_v44 = vmul.f32 %v7523_v30, %v11918_v58  ;;  %v7559_v3 = vadd.f32 %v7546_v39, %v7531_v63  ;;  %v7641_v63 = vld [vmem:[#allocation18 + $0x50] sm:$0xff] }
0x1d16   :  { %v7571_v34 = vmax.f32 %v7563_v7, 0.0  ;;  %v7567_v4 = vmax.f32 %v7559_v3, 0.0  ;;  %v7811_v3 = vld [vmem:[#allocation18 + $0x88] sm:$0xff] }
0x1d17   :  { %v7551_v27 = vpop.permute.xlu0 %7550 }
0x1d18   :  { %v7564_v12 = vadd.f32 %v7551_v27, %v7536_v16  ;;  %7592 = vrot.lane.b32.xlu0 %v7571_v34, %s10190_s13  ;;  %v7560_v47 = vadd.f32 %v7551_v27, %v7532_v44  ;;  %v7624_v34 = vld [vmem:[#allocation18 + $0x10] sm:$0xff] }
0x1d1a   :  { %v7572_v51 = vmax.f32 %v7564_v12, 0.0  ;;  %v7568_v45 = vmax.f32 %v7560_v47, 0.0 }
0x1d1c   :  { %7594 = vrot.lane.b32.xlu2 %v7572_v51, %s10190_s13 }
0x1d1d   :  { %v7513_v58 = vpop.permute.xlu1 %7512 }
0x1d1e   :  { %v7530_v53 = vmul.f32 %v7513_v58, %v11908_v49  ;;  %v7534_v0 = vmul.f32 %v7513_v58, %v11933_v20  ;;  %v7639_v58 = vld [vmem:[#allocation18 + $0x40] sm:$0xff] }
0x1d1f   :  { %v7556_v37 = vpop.permute.xlu0 %7555 }
0x1d20   :  { %v7561_v55 = vadd.f32 %v7556_v37, %v7533_v52  ;;  %v7565_v42 = vadd.f32 %v7556_v37, %v7537_v48  ;;  %7586 = vrot.lane.b32.xlu0 %v7568_v45, %s10190_s13 }
0x1d22   :  { %v7569_v61 = vmax.f32 %v7561_v55, 0.0  ;;  %v7573_v41 = vmax.f32 %v7565_v42, 0.0 }
0x1d24   :  { %7596 = vrot.lane.b32.xlu1 %v7573_v41, %s10190_s13  ;;  %7588 = vrot.lane.b32.xlu2 %v7569_v61, %s10190_s13  ;;  %v7625_v61 = vld [vmem:[#allocation18 + $0x18] sm:$0xff] }
0x1d27   :  { %v7541_v43 = vpop.permute.xlu0 %7540 }
0x1d28   :  { %v7558_v19 = vadd.f32 %v7541_v43, %v7530_v53  ;;  %v7562_v33 = vadd.f32 %v7541_v43, %v7534_v0  ;;  %v7626_v43 = vld [vmem:[#allocation18 + $0x20] sm:$0xff] }
0x1d2a   :  { %v7566_v62 = vmax.f32 %v7558_v19, 0.0  ;;  %v7570_v50 = vmax.f32 %v7562_v33, 0.0  ;;  %v7640_v33 = vld [vmem:[#allocation18 + $0x48] sm:$0xff] }
0x1d2c   :  { %7590 = vrot.lane.b32.xlu1 %v7570_v50, %s10190_s13  ;;  %7582 = vrot.lane.b32.xlu2 %v7566_v62, %s10190_s13  ;;  %v7810_v62 = vld [vmem:[#allocation18 + $0x80] sm:$0xff]  ;;  %v7627_v50 = vld [vmem:[#allocation18 + $0x28] sm:$0xff] }
0x1d34   :  { %7584 = vrot.lane.b32.xlu1 %v7567_v4, %s10190_s13  ;;  %v7628_v4 = vld [vmem:[#allocation18 + $0x30] sm:$0xff] }
0x1d76   :  { %v7595_v5 = vpop.permute.xlu2 %7594 }
0x1d77   :  { %7612 = vst.msk [vmem:[#allocation3 + $0x90] sm:$0xff] %vm7050_vm14, %v7595_v5  ;;  %v7642_v5 = vld [vmem:[#allocation18 + $0x58] sm:$0xff] }
0x1d78   :  { %7620 = vst.msk [vmem:[#allocation3 + $0x90] sm:$0xff] %vm7059_vm15, %v11851_v40 }
0x1d7e   :  { %v7589_v49 = vpop.permute.xlu2 %7588 }
0x1d7f   :  { %7609 = vst.msk [vmem:[#allocation3 + $0x48] sm:$0xff] %vm7050_vm14, %v7589_v49  ;;  %v7636_v17 = vld [vmem:[#allocation3 + $0x90] sm:$0xff] }
0x1d80   :  { %7617 = vst.msk [vmem:[#allocation3 + $0x48] sm:$0xff] %vm7059_vm15, %v11851_v40  ;;  %v7812_v49 = vld [vmem:[#allocation18 + $0x90] sm:$0xff] }
0x1d86   :  { %v7583_v13 = vpop.permute.xlu2 %7582 }
0x1d87   :  { %7606 = vst.msk [vmem:[#allocation3] sm:$0xff] %vm7050_vm14, %v7583_v13  ;;  %v7633_v1 = vld [vmem:[#allocation3 + $0x48] sm:$0xff]  ;;  %v7629_v13 = vld [vmem:[#allocation18 + $0x38] sm:$0xff] }
0x1d88   :  { %7614 = vst.msk [vmem:[#allocation3] sm:$0xff] %vm7059_vm15, %v11851_v40 }
0x1d8a   :  { %v7593_v20 = vpop.permute.xlu0 %7592 }
0x1d8b   :  { %7611 = vst.msk [vmem:[#allocation3 + $0x78] sm:$0xff] %vm7050_vm14, %v7593_v20  ;;  %v7643_v20 = vld [vmem:[#allocation18 + $0x60] sm:$0xff] }
0x1d8c   :  { %7619 = vst.msk [vmem:[#allocation3 + $0x78] sm:$0xff] %vm7059_vm15, %v11851_v40 }
0x1d8f   :  { %v7630_v24 = vld [vmem:[#allocation3] sm:$0xff] }
0x1d92   :  { %v7587_v57 = vpop.permute.xlu0 %7586 }
0x1d93   :  { %7608 = vst.msk [vmem:[#allocation3 + $0x30] sm:$0xff] %vm7050_vm14, %v7587_v57  ;;  %v7635_v15 = vld [vmem:[#allocation3 + $0x78] sm:$0xff] }
0x1d94   :  { %7616 = vst.msk [vmem:[#allocation3 + $0x30] sm:$0xff] %vm7059_vm15, %v11851_v40  ;;  %v7813_v57 = vld [vmem:[#allocation18 + $0x98] sm:$0xff] }
0x1d96   :  { %v7597_v59 = vpop.permute.xlu1 %7596 }
0x1d97   :  { %7613 = vst.msk [vmem:[#allocation3 + $0xa8] sm:$0xff] %vm7050_vm14, %v7597_v59  ;;  %v7644_v59 = vld [vmem:[#allocation18 + $0x68] sm:$0xff] }
0x1d98   :  { %7621 = vst.msk [vmem:[#allocation3 + $0xa8] sm:$0xff] %vm7059_vm15, %v11851_v40 }
0x1d9b   :  { %v7632_v38 = vld [vmem:[#allocation3 + $0x30] sm:$0xff] }
0x1d9c   :  { %v9772_v2 = vpack.i.bf16 %v7632_v38, %v7633_v1 }
0x1d9e   :  { %v7591_v18 = vpop.permute.xlu1 %7590  ;;  %9773 = vrot.lane.b32.xlu2 %v9772_v2, %s10183_s7 }
0x1d9f   :  { %7610 = vst.msk [vmem:[#allocation3 + $0x60] sm:$0xff] %vm7050_vm14, %v7591_v18  ;;  %v7637_v14 = vld [vmem:[#allocation3 + $0xa8] sm:$0xff]  ;;  %v7816_v18 = vld [vmem:[#allocation18 + $0xb0] sm:$0xff] }
0x1da0   :  { %7618 = vst.msk [vmem:[#allocation3 + $0x60] sm:$0xff] %vm7059_vm15, %v11851_v40  ;;  %v9767_v8 = vpack.i.bf16 %v7636_v17, %v7637_v14  ;;  %7776 = vmatpush.msra.mxu0 %v7637_v14  ;;  %v7817_v14 = vld [vmem:[#allocation18 + $0xb8] sm:$0xff] }
0x1da2   :  { %9768 = vrot.lane.b32.xlu0 %v9767_v8, %s10183_s7  ;;  %7777 = vmatpush.msra.mxu0 %v7636_v17  ;;  %v7646_v17 = vld [vmem:[#allocation18 + $0x78] sm:$0xff] }
0x1da4   :  { %7778 = vmatpush.msra.mxu0 %v7635_v15 }
0x1da6   :  { %v7585_v21 = vpop.permute.xlu1 %7584 }
0x1da7   :  { %7607 = vst.msk [vmem:[#allocation3 + $0x18] sm:$0xff] %vm7050_vm14, %v7585_v21  ;;  %v7634_v46 = vld [vmem:[#allocation3 + $0x60] sm:$0xff] }
0x1da8   :  { %7615 = vst.msk [vmem:[#allocation3 + $0x18] sm:$0xff] %vm7059_vm15, %v11851_v40  ;;  %v9757_v23 = vpack.i.bf16 %v7634_v46, %v7635_v15  ;;  %7779 = vmatpush.msra.mxu0 %v7634_v46  ;;  %v7921_v40 = vld [vmem:[%s10359_s29 + $0x30] sm:$0xff] }
0x1daa   :  { %9758 = vrot.lane.b32.xlu1 %v9757_v23, %s10183_s7  ;;  %9783 = vrot.lane.b32.xlu0 %v9767_v8, %s10182_s5 }
0x1dab   :  { %9778 = vrot.lane.b32.xlu2 %v9757_v23, %s10182_s5  ;;  %7780 = vmatpush.msra.mxu0 %v7633_v1  ;;  %v7814_v1 = vld [vmem:[#allocation18 + $0xa0] sm:$0xff] }
0x1dad   :  { %7781 = vmatpush.msra.mxu0 %v7632_v38  ;;  %v7645_v38 = vld [vmem:[#allocation18 + $0x70] sm:$0xff] }
0x1daf   :  { %v7631_v25 = vld [vmem:[#allocation3 + $0x18] sm:$0xff] }
0x1db0   :  { %v9762_v60 = vpack.i.bf16 %v7630_v24, %v7631_v25  ;;  %7782 = vmatpush.msra.mxu0 %v7631_v25 }
0x1db2   :  { %9788 = vrot.lane.b32.xlu0 %v9772_v2, %s10182_s5  ;;  %9763 = vrot.lane.b32.xlu1 %v9762_v60, %s10183_s7  ;;  %v7815_v2 = vld [vmem:[#allocation18 + $0xa8] sm:$0xff] }
0x1db3   :  { %7960 = vperm.xlu2 %9005, %v7922_v22   ;;  %7783 = vmatpush.msra.mxu0 %v7630_v24 }
0x1db4   :  { %8900 = vmatmul.msk.f32.vlgmr.msra.gmra.mxu0 %vm4511_vm9, %v7622_v35 }
0x1dba   :  { %7955 = vperm.xlu0 %9096, %v7921_v40   ;;  %9793 = vrot.lane.b32.xlu1 %v9762_v60, %s10182_s5 }
0x1dbb   :  { %7945 = vperm.xlu2 %9005, %v7919_v6  }
0x1dbc   :  { %8901 = vmatmul.msk.f32.gmra.mxu0 %vm4511_vm9, %v7623_v54 }
0x1dc2   :  { %7940 = vperm.xlu0 %9096, %v7918_v10   ;;  %7950 = vperm.xlu1 %9004, %v7920_v11  }
0x1dc3   :  { %7930 = vperm.xlu2 %9005, %v7916_v26  }
0x1dc4   :  { %8902 = vmatmul.msk.f32.gmra.mxu0 %vm4511_vm9, %v7624_v34 }
0x1dca   :  { %7925 = vperm.xlu0 %9096, %v7915_v31   ;;  %7935 = vperm.xlu1 %9004, %v7917_v32  }
0x1dcc   :  { %8903 = vmatmul.msk.f32.gmra.mxu0 %vm4511_vm9, %v7625_v61 }
0x1dd4   :  { %8904 = vmatmul.msk.f32.gmra.mxu0 %vm4511_vm9, %v7626_v43 }
0x1ddc   :  { %8905 = vmatmul.msk.f32.gmra.mxu0 %vm4511_vm9, %v7627_v50 }
0x1de4   :  { %8906 = vmatmul.msk.f32.gmra.mxu0 %vm4511_vm9, %v7628_v4 }
0x1dec   :  { %8907 = vmatmul.msk.f32.gmra.mxu0 %vm4511_vm9, %v7629_v13 }
0x1df8   :  { %v9774_v36 = vpop.permute.xlu2 %9773 }
0x1df9   :  { %v9775_v47 = vunpack.i.l.bf16 %v9774_v36  ;;  %v9776_v52 = vunpack.i.h.bf16 %v9774_v36 }
0x1e05   :  { %v9779_v27 = vpop.permute.xlu2 %9778 }
0x1e06   :  { %v9780_v44 = vunpack.i.l.bf16 %v9779_v27  ;;  %v9781_v51 = vunpack.i.h.bf16 %v9779_v27 }
0x1e0d   :  { %v12074_v21 = vpop.permute.xlu2 %7960 }
0x1e14   :  { %v9769_v29 = vpop.permute.xlu0 %9768 }
0x1e15   :  { %v9771_v28 = vunpack.i.h.bf16 %v9769_v29  ;;  %v9770_v9 = vunpack.i.l.bf16 %v9769_v29  ;;  %v7946_v22 = vpop.permute.xlu2 %7945 }
0x1e17   :  { %7711 = vmatpush.msrb.mxu3 %v9770_v9 }
0x1e19   :  { %7712 = vmatpush.msrb.mxu3 %v9771_v28 }
0x1e1c   :  { %v9759_v56 = vpop.permute.xlu1 %9758  ;;  %v9784_v30 = vpop.permute.xlu0 %9783 }
0x1e1d   :  { %v9760_v39 = vunpack.i.l.bf16 %v9759_v56  ;;  %v9786_v7 = vunpack.i.h.bf16 %v9784_v30  ;;  %v9785_v16 = vunpack.i.l.bf16 %v9784_v30  ;;  %v9761_v12 = vunpack.i.h.bf16 %v9759_v56  ;;  %v7931_v28 = vpop.permute.xlu2 %7930 }
0x1e1f   :  { %7713 = vmatpush.msrb.mxu3 %v9760_v39  ;;  %7874 = vmatpush.msra.mxu1 %v9785_v16 }
0x1e21   :  { %7714 = vmatpush.msrb.mxu3 %v9761_v12  ;;  %7875 = vmatpush.msra.mxu1 %v9786_v7 }
0x1e23   :  { %7715 = vmatpush.msrb.mxu3 %v9775_v47  ;;  %7876 = vmatpush.msra.mxu1 %v9780_v44 }
0x1e24   :  { %v9789_v48 = vpop.permute.xlu0 %9788  ;;  %v9764_v45 = vpop.permute.xlu1 %9763 }
0x1e25   :  { %v9791_v37 = vunpack.i.h.bf16 %v9789_v48  ;;  %v9790_v55 = vunpack.i.l.bf16 %v9789_v48  ;;  %v9765_v42 = vunpack.i.l.bf16 %v9764_v45  ;;  %7716 = vmatpush.msrb.mxu3 %v9776_v52  ;;  %7877 = vmatpush.msra.mxu1 %v9781_v51  ;;  %v9766_v41 = vunpack.i.h.bf16 %v9764_v45 }
0x1e27   :  { %7717 = vmatpush.msrb.mxu3 %v9765_v42  ;;  %7878 = vmatpush.msra.mxu1 %v9790_v55 }
0x1e29   :  { %7718 = vmatpush.msrb.mxu3 %v9766_v41  ;;  %7879 = vmatpush.msra.mxu1 %v9791_v37 }
0x1e2a   :  { %8892 = vmatmul.msk.f32.vlgmr.msrb.gmra.mxu3 %vm4511_vm9, %v7639_v58 }
0x1e2c   :  { %v9794_v53 = vpop.permute.xlu1 %9793  ;;  %v12072_v8 = vpop.permute.xlu0 %7955 }
0x1e2d   :  { %v9795_v0 = vunpack.i.l.bf16 %v9794_v53  ;;  %v9796_v19 = vunpack.i.h.bf16 %v9794_v53 }
0x1e2f   :  { %7880 = vmatpush.msra.mxu1 %v9795_v0 }
0x1e31   :  { %7881 = vmatpush.msra.mxu1 %v9796_v19  ;;  %v7785_v15 = vpop.f32.mrf.mxu0 }
0x1e32   :  { %8893 = vmatmul.msk.f32.gmra.mxu3 %vm4511_vm9, %v7640_v33  ;;  %8908 = vmatmul.msk.f32.vlgmr.msra.gmra.mxu1 %vm4511_vm9, %v7810_v62 }
0x1e34   :  { %v7941_v46 = vpop.permute.xlu0 %7940  ;;  %v7951_v35 = vpop.permute.xlu1 %7950 }
0x1e39   :  { %v7788_v23 = vpop.f32.mrf.mxu0 }
0x1e3a   :  { %8894 = vmatmul.msk.f32.gmra.mxu3 %vm4511_vm9, %v7641_v63  ;;  %8909 = vmatmul.msk.f32.gmra.mxu1 %vm4511_vm9, %v7811_v3 }
0x1e3c   :  { %v7926_v6 = vpop.permute.xlu0 %7925  ;;  %v7936_v34 = vpop.permute.xlu1 %7935 }
0x1e41   :  { %v7791_v10 = vpop.f32.mrf.mxu0 }
0x1e42   :  { %8895 = vmatmul.msk.f32.gmra.mxu3 %vm4511_vm9, %v7642_v5  ;;  %8910 = vmatmul.msk.f32.gmra.mxu1 %vm4511_vm9, %v7812_v49 }
0x1e49   :  { %v7794_v54 = vpop.f32.mrf.mxu0 }
0x1e4a   :  { %8896 = vmatmul.msk.f32.gmra.mxu3 %vm4511_vm9, %v7643_v20  ;;  %8911 = vmatmul.msk.f32.gmra.mxu1 %vm4511_vm9, %v7813_v57 }
0x1e51   :  { %v7797_v47 = vpop.f32.mrf.mxu0 }
0x1e52   :  { %8897 = vmatmul.msk.f32.gmra.mxu3 %vm4511_vm9, %v7644_v59  ;;  %8912 = vmatmul.msk.f32.gmra.mxu1 %vm4511_vm9, %v7814_v1 }
0x1e59   :  { %v7800_v41 = vpop.f32.mrf.mxu0 }
0x1e5a   :  { %8898 = vmatmul.msk.f32.gmra.mxu3 %vm4511_vm9, %v7645_v38  ;;  %8913 = vmatmul.msk.f32.gmra.mxu1 %vm4511_vm9, %v7815_v2 }
0x1e61   :  { %v7803_v4 = vpop.f32.mrf.mxu0 }
0x1e62   :  { %8899 = vmatmul.msk.f32.gmra.mxu3 %vm4511_vm9, %v7646_v17  ;;  %8914 = vmatmul.msk.f32.gmra.mxu1 %vm4511_vm9, %v7816_v18 }
0x1e69   :  { %v7806_v38 = vpop.f32.mrf.mxu0 }
0x1e6a   :  { %8915 = vmatmul.msk.f32.gmra.mxu1 %vm4511_vm9, %v7817_v14 }
0x1ead   :  { %v7720_v24 = vpop.f32.mrf.mxu3 }
0x1eae   :  { %v7786_v25 = vadd.f32 %v7785_v15, %v7720_v24 }
0x1eaf   :  { %v7883_v60 = vpop.f32.mrf.mxu1 }
0x1eb0   :  { %v7907_v40 = vadd.f32 %v7883_v60, %v7786_v25 }
0x1eb2   :  { %v7963_v11 = vadd.f32 %v7926_v6, %v7907_v40 }
0x1eb4   :  { %v7971_v26 = vmax.f32 %v7963_v11, 0.0  ;;  %v8268_v11 = vld [vmem:[%s10369_s14 + $0x10] sm:$0xff] }
0x1eb5   :  { %v7723_v31 = vpop.f32.mrf.mxu3 }
0x1eb6   :  { %7979 = vst.msk [vmem:[#allocation2] sm:$0xff] %vm7361_vm0, %v7971_v26  ;;  %v7789_v32 = vadd.f32 %v7788_v23, %v7723_v31  ;;  %v8267_v26 = vld [vmem:[%s10369_s14 + $0x8] sm:$0xff]  ;;  %v8266_v31 = vld [vmem:[%s10369_s14] sm:$0xff] }
0x1eb7   :  { %v7886_v36 = vpop.f32.mrf.mxu1 }
0x1eb8   :  { %v7908_v29 = vadd.f32 %v7886_v36, %v7789_v32  ;;  %v8269_v32 = vld [vmem:[%s10369_s14 + $0x18] sm:$0xff]  ;;  %v7987_v36 = vld [vmem:[%s10364_s4] sm:$0xff] }
0x1eba   :  { %v7964_v9 = vadd.f32 %v7931_v28, %v7908_v29 }
0x1ebc   :  { %v7972_v56 = vmax.f32 %v7964_v9, 0.0  ;;  %v7988_v9 = vld [vmem:[%s10364_s4 + $0x8] sm:$0xff] }
0x1ebd   :  { %v7726_v30 = vpop.f32.mrf.mxu3 }
0x1ebe   :  { %7980 = vst.msk [vmem:[#allocation2 + $0x18] sm:$0xff] %vm7361_vm0, %v7972_v56  ;;  %v7792_v39 = vadd.f32 %v7791_v10, %v7726_v30 }
0x1ebf   :  { %v7889_v7 = vpop.f32.mrf.mxu1 }
0x1ec0   :  { %v7909_v16 = vadd.f32 %v7889_v7, %v7792_v39 }
0x1ec2   :  { %v7965_v27 = vadd.f32 %v7936_v34, %v7909_v16  ;;  %v7989_v34 = vld [vmem:[%s10364_s4 + $0x10] sm:$0xff] }
0x1ec4   :  { %v7973_v44 = vmax.f32 %v7965_v27, 0.0 }
0x1ec5   :  { %v7729_v12 = vpop.f32.mrf.mxu3  ;;  %v7992_v6 = vld [vmem:[#allocation2 + $0x18] sm:$0xff] }
0x1ec6   :  { %7981 = vst.msk [vmem:[#allocation2 + $0x30] sm:$0xff] %vm7361_vm0, %v7973_v44  ;;  %v7795_v51 = vadd.f32 %v7794_v54, %v7729_v12 }
0x1ec7   :  { %v7892_v52 = vpop.f32.mrf.mxu1 }
0x1ec8   :  { %v7910_v48 = vadd.f32 %v7892_v52, %v7795_v51 }
0x1eca   :  { %v7966_v45 = vadd.f32 %v7941_v46, %v7910_v48 }
0x1ecc   :  { %v7974_v37 = vmax.f32 %v7966_v45, 0.0  ;;  %v7990_v45 = vld [vmem:[%s10364_s4 + $0x18] sm:$0xff] }
0x1ecd   :  { %v7732_v55 = vpop.f32.mrf.mxu3  ;;  %v7993_v19 = vld [vmem:[#allocation2 + $0x30] sm:$0xff] }
0x1ece   :  { %7982 = vst.msk [vmem:[#allocation2 + $0x48] sm:$0xff] %vm7361_vm0, %v7974_v37  ;;  %v7798_v42 = vadd.f32 %v7797_v47, %v7732_v55 }
0x1ecf   :  { %v7895_v61 = vpop.f32.mrf.mxu1 }
0x1ed0   :  { %v7911_v58 = vadd.f32 %v7895_v61, %v7798_v42  ;;  %v8916_v61 = vld [vmem:[%s10364_s4 + $0x20] sm:$0xff] }
0x1ed2   :  { %v7967_v53 = vadd.f32 %v7946_v22, %v7911_v58 }
0x1ed4   :  { %v7975_v0 = vmax.f32 %v7967_v53, 0.0 }
0x1ed5   :  { %v7735_v43 = vpop.f32.mrf.mxu3  ;;  %v7994_v33 = vld [vmem:[#allocation2 + $0x48] sm:$0xff] }
0x1ed6   :  { %7983 = vst.msk [vmem:[#allocation2 + $0x60] sm:$0xff] %vm7361_vm0, %v7975_v0  ;;  %v7801_v62 = vadd.f32 %v7800_v41, %v7735_v43  ;;  %v9807_v50 = vpack.i.bf16 %v7993_v19, %v7994_v33 }
0x1ed7   :  { %v7898_v63 = vpop.f32.mrf.mxu1 }
0x1ed8   :  { %v7912_v3 = vadd.f32 %v7898_v63, %v7801_v62  ;;  %9808 = vrot.lane.b32.xlu0 %v9807_v50, %s10183_s7 }
0x1eda   :  { %v7968_v5 = vadd.f32 %v7951_v35, %v7912_v3 }
0x1edc   :  { %v7976_v49 = vmax.f32 %v7968_v5, 0.0 }
0x1edd   :  { %v7738_v13 = vpop.f32.mrf.mxu3  ;;  %v7995_v18 = vld [vmem:[#allocation2 + $0x60] sm:$0xff] }
0x1ede   :  { %7984 = vst.msk [vmem:[#allocation2 + $0x78] sm:$0xff] %vm7361_vm0, %v7976_v49  ;;  %v7804_v20 = vadd.f32 %v7803_v4, %v7738_v13 }
0x1edf   :  { %v7901_v57 = vpop.f32.mrf.mxu1 }
0x1ee0   :  { %v7913_v59 = vadd.f32 %v7901_v57, %v7804_v20 }
0x1ee2   :  { %v7969_v1 = vadd.f32 %v12072_v8, %v7913_v59 }
0x1ee4   :  { %v7977_v2 = vmax.f32 %v7969_v1, 0.0  ;;  %v8918_v1 = vld [vmem:[%s10364_s4 + $0x30] sm:$0xff] }
0x1ee5   :  { %v7741_v17 = vpop.f32.mrf.mxu3  ;;  %v7996_v14 = vld [vmem:[#allocation2 + $0x78] sm:$0xff] }
0x1ee6   :  { %7985 = vst.msk [vmem:[#allocation2 + $0x90] sm:$0xff] %vm7361_vm0, %v7977_v2  ;;  %v7807_v15 = vadd.f32 %v7806_v38, %v7741_v17  ;;  %v9802_v46 = vpack.i.bf16 %v7995_v18, %v7996_v14  ;;  %v8936_v38 = vld [vmem:[%s10364_s4 + $0x60] sm:$0xff]  ;;  %v8919_v2 = vld [vmem:[%s10364_s4 + $0x38] sm:$0xff]  ;;  %v8937_v17 = vld [vmem:[%s10364_s4 + $0x68] sm:$0xff] }
0x1ee7   :  { %v7904_v23 = vpop.f32.mrf.mxu1 }
0x1ee8   :  { %v7914_v24 = vadd.f32 %v7904_v23, %v7807_v15  ;;  %9803 = vrot.lane.b32.xlu2 %v9802_v46, %s10183_s7  ;;  %v8929_v15 = vld [vmem:[%s10364_s4 + $0x48] sm:$0xff]  ;;  %v8930_v23 = vld [vmem:[%s10364_s4 + $0x50] sm:$0xff] }
0x1eea   :  { %v7970_v25 = vadd.f32 %v12074_v21, %v7914_v24  ;;  %v7991_v21 = vld [vmem:[#allocation2] sm:$0xff]  ;;  %v8931_v24 = vld [vmem:[%s10364_s4 + $0x58] sm:$0xff] }
0x1eeb   :  { %v9812_v10 = vpack.i.bf16 %v7991_v21, %v7992_v6 }
0x1eec   :  { %v7978_v22 = vmax.f32 %v7970_v25, 0.0 }
0x1eed   :  { %v7997_v8 = vld [vmem:[#allocation2 + $0x90] sm:$0xff] }
0x1eee   :  { %7986 = vst.msk [vmem:[#allocation2 + $0xa8] sm:$0xff] %vm7361_vm0, %v7978_v22 }
0x1ef5   :  { %v7998_v60 = vld [vmem:[#allocation2 + $0xa8] sm:$0xff] }
0x1ef6   :  { %8097 = vmatpush.msra.mxu3 %v7998_v60  ;;  %v9832_v40 = vpack.i.bf16 %v7997_v8, %v7998_v60 }
0x1ef8   :  { %9833 = vrot.lane.b32.xlu0 %v9832_v40, %s10184_s10  ;;  %9823 = vrot.lane.b32.xlu2 %v9832_v40, %s10182_s5 }
0x1ef9   :  { %9798 = vrot.lane.b32.xlu1 %v9832_v40, %s10183_s7  ;;  %8098 = vmatpush.msra.mxu3 %v7997_v8 }
0x1efb   :  { %8099 = vmatpush.msra.mxu3 %v7996_v14  ;;  %v8938_v14 = vld [vmem:[%s10364_s4 + $0x70] sm:$0xff] }
0x1efd   :  { %8100 = vmatpush.msra.mxu3 %v7995_v18  ;;  %v8928_v18 = vld [vmem:[%s10364_s4 + $0x40] sm:$0xff] }
0x1eff   :  { %8101 = vmatpush.msra.mxu3 %v7994_v33  ;;  %v8917_v33 = vld [vmem:[%s10364_s4 + $0x28] sm:$0xff] }
0x1f00   :  { %9838 = vrot.lane.b32.xlu0 %v9807_v50, %s10182_s5  ;;  %9828 = vrot.lane.b32.xlu2 %v9802_v46, %s10184_s10 }
0x1f01   :  { %9813 = vrot.lane.b32.xlu1 %v9812_v10, %s10183_s7  ;;  %8102 = vmatpush.msra.mxu3 %v7993_v19 }
0x1f03   :  { %8103 = vmatpush.msra.mxu3 %v7992_v6 }
0x1f05   :  { %8104 = vmatpush.msra.mxu3 %v7991_v21 }
0x1f06   :  { %8924 = vmatmul.msk.f32.vlgmr.msra.gmra.mxu3 %vm4511_vm9, %v7987_v36 }
0x1f08   :  { %9853 = vrot.lane.b32.xlu0 %v9812_v10, %s10184_s10  ;;  %9848 = vrot.lane.b32.xlu2 %v9812_v10, %s10182_s5 }
0x1f09   :  { %9818 = vrot.lane.b32.xlu1 %v9802_v46, %s10182_s5  ;;  %v8939_v46 = vld [vmem:[%s10364_s4 + $0x78] sm:$0xff] }
0x1f0e   :  { %8925 = vmatmul.msk.f32.gmra.mxu3 %vm4511_vm9, %v7988_v9 }
0x1f10   :  { %8282 = vperm.xlu0 %9096, %v8268_v11   ;;  %8277 = vperm.xlu2 %9005, %v8267_v26  }
0x1f11   :  { %9843 = vrot.lane.b32.xlu1 %v9807_v50, %s10184_s10 }
0x1f16   :  { %8926 = vmatmul.msk.f32.gmra.mxu3 %vm4511_vm9, %v7989_v34 }
0x1f19   :  { %8272 = vperm.xlu1 %9004, %v8266_v31  }
0x1f1e   :  { %8927 = vmatmul.msk.f32.gmra.mxu3 %vm4511_vm9, %v7990_v45 }
0x1f21   :  { %8287 = vperm.xlu1 %9004, %v8269_v32  }
0x1f42   :  { %v9804_v35 = vpop.permute.xlu2 %9803 }
0x1f43   :  { %v9805_v12 = vunpack.i.l.bf16 %v9804_v35  ;;  %v9806_v51 = vunpack.i.h.bf16 %v9804_v35 }
0x1f4a   :  { %v9809_v29 = vpop.permute.xlu0 %9808 }
0x1f4b   :  { %v9810_v48 = vunpack.i.l.bf16 %v9809_v29  ;;  %v9811_v37 = vunpack.i.h.bf16 %v9809_v29 }
0x1f52   :  { %v9824_v28 = vpop.permute.xlu2 %9823 }
0x1f53   :  { %v9825_v53 = vunpack.i.l.bf16 %v9824_v28  ;;  %v9826_v0 = vunpack.i.h.bf16 %v9824_v28 }
0x1f5a   :  { %v9829_v39 = vpop.permute.xlu2 %9828 }
0x1f5b   :  { %v9830_v44 = vunpack.i.l.bf16 %v9829_v39  ;;  %v9831_v47 = vunpack.i.h.bf16 %v9829_v39 }
0x1f62   :  { %v9849_v3 = vpop.permute.xlu2 %9848 }
0x1f63   :  { %v9850_v13 = vunpack.i.l.bf16 %v9849_v3  ;;  %v9851_v57 = vunpack.i.h.bf16 %v9849_v3 }
0x1f6a   :  { %v9834_v54 = vpop.permute.xlu0 %9833  ;;  %v8278_v39 = vpop.permute.xlu2 %8277 }
0x1f6b   :  { %v9835_v56 = vunpack.i.l.bf16 %v9834_v54  ;;  %v9799_v30 = vpop.permute.xlu1 %9798  ;;  %v9836_v16 = vunpack.i.h.bf16 %v9834_v54 }
0x1f6c   :  { %v9800_v7 = vunpack.i.l.bf16 %v9799_v30  ;;  %v9801_v27 = vunpack.i.h.bf16 %v9799_v30 }
0x1f6d   :  { %8241 = vmatpush.msrb.mxu3 %v9835_v56 }
0x1f6e   :  { %8056 = vmatpush.msra.mxu2 %v9800_v7 }
0x1f6f   :  { %8242 = vmatpush.msrb.mxu3 %v9836_v16 }
0x1f70   :  { %8057 = vmatpush.msra.mxu2 %v9801_v27 }
0x1f71   :  { %8243 = vmatpush.msrb.mxu3 %v9830_v44 }
0x1f72   :  { %8058 = vmatpush.msra.mxu2 %v9805_v12  ;;  %v9839_v41 = vpop.permute.xlu0 %9838 }
0x1f73   :  { %v9814_v52 = vpop.permute.xlu1 %9813  ;;  %8244 = vmatpush.msrb.mxu3 %v9831_v47  ;;  %v9840_v50 = vunpack.i.l.bf16 %v9839_v41  ;;  %v9841_v5 = vunpack.i.h.bf16 %v9839_v41 }
0x1f74   :  { %8059 = vmatpush.msra.mxu2 %v9806_v51  ;;  %v9815_v55 = vunpack.i.l.bf16 %v9814_v52  ;;  %v9816_v42 = vunpack.i.h.bf16 %v9814_v52 }
0x1f76   :  { %8060 = vmatpush.msra.mxu2 %v9810_v48 }
0x1f78   :  { %8061 = vmatpush.msra.mxu2 %v9811_v37 }
0x1f7a   :  { %8062 = vmatpush.msra.mxu2 %v9815_v55  ;;  %v9854_v4 = vpop.permute.xlu0 %9853 }
0x1f7b   :  { %v9819_v58 = vpop.permute.xlu1 %9818  ;;  %v9855_v20 = vunpack.i.l.bf16 %v9854_v4  ;;  %v9856_v59 = vunpack.i.h.bf16 %v9854_v4 }
0x1f7c   :  { %8063 = vmatpush.msra.mxu2 %v9816_v42  ;;  %v9820_v43 = vunpack.i.l.bf16 %v9819_v58  ;;  %v9821_v19 = vunpack.i.h.bf16 %v9819_v58 }
0x1f7d   :  { %8920 = vmatmul.msk.f32.vlgmr.msra.gmra.mxu2 %vm4511_vm9, %v8916_v61 }
0x1f7e   :  { %8167 = vmatpush.msrb.mxu2 %v9825_v53 }
0x1f80   :  { %8168 = vmatpush.msrb.mxu2 %v9826_v0 }
0x1f82   :  { %8169 = vmatpush.msrb.mxu2 %v9820_v43  ;;  %v8283_v51 = vpop.permute.xlu0 %8282 }
0x1f83   :  { %v9844_v62 = vpop.permute.xlu1 %9843 }
0x1f84   :  { %v9845_v63 = vunpack.i.l.bf16 %v9844_v62  ;;  %8170 = vmatpush.msrb.mxu2 %v9821_v19  ;;  %v9846_v49 = vunpack.i.h.bf16 %v9844_v62 }
0x1f85   :  { %8921 = vmatmul.msk.f32.gmra.mxu2 %vm4511_vm9, %v8917_v33 }
0x1f86   :  { %8171 = vmatpush.msrb.mxu2 %v9840_v50  ;;  %8245 = vmatpush.msrb.mxu3 %v9845_v63 }
0x1f88   :  { %8172 = vmatpush.msrb.mxu2 %v9841_v5  ;;  %8246 = vmatpush.msrb.mxu3 %v9846_v49 }
0x1f89   :  { %v8106_v25 = vpop.f32.mrf.mxu3 }
0x1f8a   :  { %8173 = vmatpush.msrb.mxu2 %v9850_v13  ;;  %8247 = vmatpush.msrb.mxu3 %v9855_v20 }
0x1f8b   :  { %v8273_v36 = vpop.permute.xlu1 %8272 }
0x1f8c   :  { %8174 = vmatpush.msrb.mxu2 %v9851_v57  ;;  %8248 = vmatpush.msrb.mxu3 %v9856_v59 }
0x1f8d   :  { %8922 = vmatmul.msk.f32.gmra.mxu2 %vm4511_vm9, %v8918_v1  ;;  %8940 = vmatmul.msk.f32.vlgmr.msrb.gmra.mxu3 %vm4511_vm9, %v8936_v38 }
0x1f91   :  { %v8109_v22 = vpop.f32.mrf.mxu3 }
0x1f93   :  { %v8288_v41 = vpop.permute.xlu1 %8287 }
0x1f95   :  { %8923 = vmatmul.msk.f32.gmra.mxu2 %vm4511_vm9, %v8919_v2  ;;  %8941 = vmatmul.msk.f32.gmra.mxu3 %vm4511_vm9, %v8937_v17 }
0x1f99   :  { %v8112_v40 = vpop.f32.mrf.mxu3 }
0x1f9d   :  { %8932 = vmatmul.msk.f32.vlgmr.msrb.gmra.mxu2 %vm4511_vm9, %v8928_v18  ;;  %8942 = vmatmul.msk.f32.gmra.mxu3 %vm4511_vm9, %v8938_v14 }
0x1fa1   :  { %v8115_v21 = vpop.f32.mrf.mxu3 }
0x1fa5   :  { %8933 = vmatmul.msk.f32.gmra.mxu2 %vm4511_vm9, %v8929_v15  ;;  %8943 = vmatmul.msk.f32.gmra.mxu3 %vm4511_vm9, %v8939_v46 }
0x1fad   :  { %8934 = vmatmul.msk.f32.gmra.mxu2 %vm4511_vm9, %v8930_v23 }
0x1fb5   :  { %8935 = vmatmul.msk.f32.gmra.mxu2 %vm4511_vm9, %v8931_v24  ;;  %vm8298_vm9 = vcmask 39936  }
0x2000   :  { %v8065_v60 = vpop.f32.mrf.mxu2 }
0x2001   :  { %v8107_v26 = vadd.f32 %v8106_v25, %v8065_v60 }
0x2008   :  { %v8068_v8 = vpop.f32.mrf.mxu2 }
0x2009   :  { %v8110_v9 = vadd.f32 %v8109_v22, %v8068_v8 }
0x2010   :  { %v8071_v6 = vpop.f32.mrf.mxu2  ;;  %v8250_v11 = vpop.f32.mrf.mxu3 }
0x2011   :  { %v8113_v27 = vadd.f32 %v8112_v40, %v8071_v6 }
0x2018   :  { %v8074_v10 = vpop.f32.mrf.mxu2  ;;  %v8253_v29 = vpop.f32.mrf.mxu3 }
0x2019   :  { %v8116_v45 = vadd.f32 %v8115_v21, %v8074_v10 }
0x2020   :  { %v8176_v31 = vpop.f32.mrf.mxu2  ;;  %v8256_v34 = vpop.f32.mrf.mxu3 }
0x2021   :  { %v8188_v32 = vadd.f32 %v8176_v31, %v8107_v26 }
0x2023   :  { %v8262_v35 = vadd.f32 %v8250_v11, %v8188_v32 }
0x2025   :  { %v8290_v28 = vadd.f32 %v8273_v36, %v8262_v35 }
0x2027   :  { %9867 = vtanh.f32 %v8290_v28 }
0x2028   :  { %v8179_v54 = vpop.f32.mrf.mxu2  ;;  %v8259_v55 = vpop.f32.mrf.mxu3 }
0x2029   :  { %v8189_v56 = vadd.f32 %v8179_v54, %v8110_v9 }
0x202b   :  { %v8263_v30 = vadd.f32 %v8253_v29, %v8189_v56 }
0x202d   :  { %v9868_v7 = vpop.eup %9867  ;;  %v8291_v16 = vadd.f32 %v8278_v39, %v8263_v30 }
0x202e   :  { %8299 = vst.msk [vmem:[%s10374_s3] sm:$0xff] %vm8298_vm9, %v9868_v7 }
0x202f   :  { %9869 = vtanh.f32 %v8291_v16 }
0x2030   :  { %v8182_v44 = vpop.f32.mrf.mxu2 }
0x2031   :  { %v8190_v12 = vadd.f32 %v8182_v44, %v8113_v27 }
0x2033   :  { %v8264_v47 = vadd.f32 %v8256_v34, %v8190_v12 }
0x2035   :  { %v9870_v52 = vpop.eup %9869  ;;  %v8292_v48 = vadd.f32 %v8283_v51, %v8264_v47 }
0x2036   :  { %8300 = vst.msk [vmem:[%s10374_s3 + $0x8] sm:$0xff] %vm8298_vm9, %v9870_v52 }
0x2037   :  { %9871 = vtanh.f32 %v8292_v48 }
0x2038   :  { %v8185_v37 = vpop.f32.mrf.mxu2 }
0x2039   :  { %v8191_v42 = vadd.f32 %v8185_v37, %v8116_v45 }
0x203b   :  { %v8265_v61 = vadd.f32 %v8259_v55, %v8191_v42 }
0x203d   :  { %v9872_v58 = vpop.eup %9871  ;;  %v8293_v53 = vadd.f32 %v8288_v41, %v8265_v61 }
0x203e   :  { %8944 = vst.msk [vmem:[%s10374_s3 + $0x10] sm:$0xff] %vm8298_vm9, %v9872_v58 }
0x203f   :  { %9873 = vtanh.f32 %v8293_v53 }
0x2045   :  { %v9874_v0 = vpop.eup %9873 }
0x2046   :  { %8945 = vst.msk [vmem:[%s10374_s3 + $0x18] sm:$0xff] %vm8298_vm9, %v9874_v0 }
0x2047   :  { %8308 = vsyncpa [#allocation5], 1 }
0x2048   :  { %8309 = vsyncpa [#allocation7], 1 }
0x2049   :  { %8310 = vsyncpa [#allocation10], 1 }
0x204a   :  { %8311 = vsyncpa [#allocation13], 1 }
0x204b   :  { %8312 = vsyncpa [#allocation16], 1 }
0x204c   :  { %8313 = vsyncpa [#allocation19], 1 }

</bundles_post_ra>
